<compile_context>
chip_gen: v7x
topology: tpu7x:2x2x1
jax: 0.10.0
libtpu: 0.0.40
codegen_flags: <defaults>
</compile_context>

<pallas_src>
import functools

import jax
import jax.numpy as jnp
import numpy as np
from jax import lax
from jax.experimental import pallas as pl
from jax.experimental.pallas import tpu as pltpu


# ----------------------------------------------------------------------------
# Fused Inception_A kernel (per image, per row-band)
# ----------------------------------------------------------------------------
def _inception_a_kernel(
        x_ref, w1_ref, b1_ref, wb12_ref, bb12_ref, wb2b_ref, bb2b_ref, inv_ref,
        o_ref,
        ypad_s, y3pad_s, tpad_s, imcol_s,
        *, H, W, C_IN, bh):
    b = pl.program_id(1)
    nb = pl.num_programs(1)
    b0 = b * bh                    # first output row of this band
    erows = bh + 2                 # band rows + one halo row per side

    # ---- per-image stage (band 0 only): fused 1x1 stems into padded scratches
    @pl.when(b == 0)
    def _stems():
        ypad_s[...] = jnp.zeros((H + 4, W + 2, 128), jnp.bfloat16)
        y3pad_s[...] = jnp.zeros((H + 2, W + 2, 128), jnp.bfloat16)
        tpad_s[...] = jnp.zeros((bh + 2, W + 2, 128), jnp.bfloat16)
        x2d = x_ref[0].astype(jnp.bfloat16).reshape(H * W, C_IN)
        g = jnp.dot(x2d, w1_ref[:, 128:384],
                    preferred_element_type=jnp.float32) + b1_ref[:, 128:384]
        # a1|a2 stems (ReLU'd), zero padding built in (2-row halo for branch_2).
        ypad_s[2:H + 2, 1:W + 1, :] = (
            jnp.maximum(g[:, 0:128], 0.0).astype(jnp.bfloat16).reshape(H, W, 128))
        # branch_3 1x1 (+BN), *pre*-ReLU: pool first, ReLU afterwards.
        y3pad_s[1:H + 1, 1:W + 1, :] = (
            g[:, 128:256].astype(jnp.bfloat16).reshape(H, W, 128))

    # ---- branch_0: fused 1x1 on this band's rows (x block is VMEM-resident)
    xb = x_ref[0, pl.ds(b0, bh), :, :].astype(jnp.bfloat16).reshape(bh * W, C_IN)
    g0 = jnp.dot(xb, w1_ref[:, 0:128],
                 preferred_element_type=jnp.float32) + b1_ref[:, 0:128]
    br0 = jnp.maximum(g0, 0.0).reshape(bh, W, 128)

    # ---- branch_1 conv + branch_2 first conv: one shared im2col, one matmul.
    # Rows are extended by 1 halo row per side so branch_2's second conv gets
    # the intermediate rows it needs without any HBM traffic.
    for t in range(9):
        i, j = t // 3, t % 3
        tap = ypad_s[pl.ds(b0 + i, erows), pl.ds(j, W), :]
        imcol_s[:, t * 128:(t + 1) * 128] = tap.reshape(erows * W, 128)
    c12 = jnp.dot(imcol_s[...], wb12_ref[...],
                  preferred_element_type=jnp.float32) + bb12_ref[...]
    c12 = jnp.maximum(c12, 0.0)
    br1 = c12[:, 0:128].reshape(erows, W, 128)[1:bh + 1]
    tpad_s[:, 1:W + 1, :] = (
        c12[:, 128:256].astype(jnp.bfloat16).reshape(erows, W, 128))

    # Halo rows that fall outside the image are conv *zero padding*, not conv
    # output: zero them (only the first / last band can have such rows).
    @pl.when(b == 0)
    def _zero_top():
        tpad_s[0:1, :, :] = jnp.zeros((1, W + 2, 128), jnp.bfloat16)

    @pl.when(b == nb - 1)
    def _zero_bottom():
        tpad_s[bh + 1:bh + 2, :, :] = jnp.zeros((1, W + 2, 128), jnp.bfloat16)

    # ---- branch_2 second 3x3 conv (intermediate never leaves VMEM)
    for t in range(9):
        i, j = t // 3, t % 3
        imcol_s[0:bh * W, t * 128:(t + 1) * 128] = (
            tpad_s[i:i + bh, j:j + W, :].reshape(bh * W, 128))
    c2 = jnp.dot(imcol_s[0:bh * W, :], wb2b_ref[...],
                 preferred_element_type=jnp.float32) + bb2b_ref[...]
    br2 = jnp.maximum(c2, 0.0).reshape(bh, W, 128)

    # ---- branch_3: 3x3 stride-1 avg-pool (count_include_pad=False) + ReLU
    acc = jnp.zeros((bh, W, 128), jnp.float32)
    for i in range(3):
        for j in range(3):
            acc = acc + y3pad_s[pl.ds(b0 + i, bh), pl.ds(j, W), :].astype(jnp.float32)
    br3 = jnp.maximum(acc * inv_ref[...], 0.0)

    # ---- fused channel concat + single lane-dense 384-wide store
    o_ref[0] = jnp.concatenate(
        [br0[..., 0:96], br1[..., 0:96], br2[..., 0:96], br3[..., 0:96]],
        axis=-1).astype(o_ref.dtype)


# ----------------------------------------------------------------------------
# Forward wrapper
# ----------------------------------------------------------------------------
def inception_a_forward(prep, x, *, num_bands=None):
    N, H, W, Cin = x.shape
    assert Cin == 384, "Inception_A's branch_3 1x1 conv hardcodes 384 input channels"
    if num_bands is None:
        num_bands = 1
        for cand in (4, 2):
            if H % cand == 0 and H // cand >= 8:
                num_bands = cand
                break
    assert H % num_bands == 0
    bh = H // num_bands

    # AvgPool(3,1,1, count_include_pad=False): reciprocal of the valid-tap count.
    r = jnp.arange(H)
    c = jnp.arange(W)
    cnt_h = jnp.where((r == 0) | (r == H - 1), 2.0, 3.0)
    cnt_w = jnp.where((c == 0) | (c == W - 1), 2.0, 3.0)
    inv_cnt = (1.0 / (cnt_h[:, None] * cnt_w[None, :]))[..., None].astype(jnp.float32)

    kernel = functools.partial(_inception_a_kernel, H=H, W=W, C_IN=Cin, bh=bh)
    return pl.pallas_call(
        kernel,
        out_shape=jax.ShapeDtypeStruct((N, H, W, 384), jnp.float32),
        grid=(N, num_bands),
        in_specs=[
            pl.BlockSpec((1, H, W, Cin), lambda n, b: (n, 0, 0, 0)),   # x (f32)
            pl.BlockSpec((Cin, 384), lambda n, b: (0, 0)),             # fused 1x1 w
            pl.BlockSpec((1, 384), lambda n, b: (0, 0)),               # fused 1x1 bias
            pl.BlockSpec((1152, 256), lambda n, b: (0, 0)),            # b1c1|b2c1 3x3 w
            pl.BlockSpec((1, 256), lambda n, b: (0, 0)),
            pl.BlockSpec((1152, 128), lambda n, b: (0, 0)),            # b2c2 3x3 w
            pl.BlockSpec((1, 128), lambda n, b: (0, 0)),
            pl.BlockSpec((bh, W, 1), lambda n, b: (b, 0, 0)),          # pool 1/count
        ],
        out_specs=pl.BlockSpec((1, bh, W, 384), lambda n, b: (n, b, 0, 0)),
        scratch_shapes=[
            pltpu.VMEM((H + 4, W + 2, 128), jnp.bfloat16),    # padded a1|a2 stem
            pltpu.VMEM((H + 2, W + 2, 128), jnp.bfloat16),    # padded branch_3 1x1
            pltpu.VMEM((bh + 2, W + 2, 128), jnp.bfloat16),   # padded b2 intermediate
            pltpu.VMEM(((bh + 2) * W, 1152), jnp.bfloat16),   # shared im2col
        ],
        compiler_params=pltpu.CompilerParams(
            dimension_semantics=("parallel", "arbitrary")),
    )(x, prep["w1x1"], prep["b1x1"], prep["wb12"], prep["bb12"],
      prep["wb2c2"], prep["bb2c2"], inv_cnt)


# ----------------------------------------------------------------------------
# Parameters (deterministic, synthetic); eval-mode BN folded into conv weights
# ----------------------------------------------------------------------------
def _init_conv_bn(key, kh, kw, cin, cout, eps=1e-3):
    k1, k2, k3, k4, k5 = jax.random.split(key, 5)
    w = jax.random.normal(k1, (kh, kw, cin, cout), jnp.float32) * 0.05
    gamma = jax.random.uniform(k2, (cout,), jnp.float32, 0.5, 1.5)
    beta = jax.random.normal(k3, (cout,), jnp.float32) * 0.1
    r_mean = jax.random.normal(k4, (cout,), jnp.float32) * 0.1
    r_var = jax.random.uniform(k5, (cout,), jnp.float32, 0.5, 1.5)
    scale = gamma / jnp.sqrt(r_var + eps)
    bias = beta - r_mean * scale
    return {"w": w * scale, "bias": bias}   # BN scale folded into conv weights


def init_inception_a_params(key, in_channels):
    ks = jax.random.split(key, 7)
    return {
        "b0":   _init_conv_bn(ks[0], 1, 1, in_channels, 96),
        "b1c0": _init_conv_bn(ks[1], 1, 1, in_channels, 64),
        "b1c1": _init_conv_bn(ks[2], 3, 3, 64, 96),
        "b2c0": _init_conv_bn(ks[3], 1, 1, in_channels, 64),
        "b2c1": _init_conv_bn(ks[4], 3, 3, 64, 96),
        "b2c2": _init_conv_bn(ks[5], 3, 3, 96, 96),
        # The original module hardcodes 384 input channels for branch_3's conv.
        "b3c0": _init_conv_bn(ks[6], 1, 1, 384, 96),
    }


def prepare_params(params):
    """Build the fused / lane-padded bf16 weights consumed by the Pallas kernel."""
    def w2d(p):
        w = p["w"]
        return w.reshape(w.shape[2], w.shape[3])

    cin = params["b0"]["w"].shape[2]
    zw = jnp.zeros((cin, 32), jnp.float32)
    zb = jnp.zeros((32,), jnp.float32)
    # column layout: [b0(96) pad(32) | b1c0(64) b2c0(64) | b3c0(96) pad(32)]
    w1x1 = jnp.concatenate(
        [w2d(params["b0"]), zw, w2d(params["b1c0"]), w2d(params["b2c0"]),
         w2d(params["b3c0"]), zw], axis=1)
    b1x1 = jnp.concatenate(
        [params["b0"]["bias"], zb, params["b1c0"]["bias"], params["b2c0"]["bias"],
         params["b3c0"]["bias"], zb]).reshape(1, -1)

    def conv_w_128(p, cin_off):
        # [3,3,cin_n,cout] -> [9*128, 128]; input channels at rows tap*128+cin_off..,
        # output channels in lanes 0..cout-1, everything else zero.
        w = p["w"]
        cin_n, cout = w.shape[2], w.shape[3]
        full = jnp.zeros((9, 128, 128), jnp.float32)
        full = full.at[:, cin_off:cin_off + cin_n, 0:cout].set(w.reshape(9, cin_n, cout))
        return full.reshape(9 * 128, 128)

    def bias_128(p):
        bias = p["bias"]
        return jnp.zeros((1, 128), jnp.float32).at[0, 0:bias.shape[0]].set(bias)

    wb12 = jnp.concatenate(
        [conv_w_128(params["b1c1"], 0), conv_w_128(params["b2c1"], 64)], axis=1)
    bb12 = jnp.concatenate(
        [bias_128(params["b1c1"]), bias_128(params["b2c1"])], axis=1)

    return {
        "w1x1": w1x1.astype(jnp.bfloat16),
        "b1x1": b1x1.astype(jnp.float32),
        "wb12": wb12.astype(jnp.bfloat16),
        "bb12": bb12,
        "wb2c2": conv_w_128(params["b2c2"], 0).astype(jnp.bfloat16),
        "bb2c2": bias_128(params["b2c2"]),
    }


# ----------------------------------------------------------------------------
# Pure-JAX reference (straightforward op order, correctness check only)
# ----------------------------------------------------------------------------
def _ref_conv_bn_relu(x, w, bias, padding):
    y = lax.conv_general_dilated(
        x.astype(jnp.bfloat16), w.astype(jnp.bfloat16),
        window_strides=(1, 1),
        padding=((padding, padding), (padding, padding)),
        dimension_numbers=("NHWC", "HWIO", "NHWC"),
        preferred_element_type=jnp.float32)
    return jnp.maximum(y + bias, 0.0)


def _ref_avgpool3x3(x):
    pad = [(0, 0), (1, 1), (1, 1), (0, 0)]
    s = lax.reduce_window(x, 0.0, lax.add, (1, 3, 3, 1), (1, 1, 1, 1), pad)
    c = lax.reduce_window(jnp.ones_like(x), 0.0, lax.add, (1, 3, 3, 1), (1, 1, 1, 1), pad)
    return s / c


def _ref_forward(params, x):
    b0 = _ref_conv_bn_relu(x, params["b0"]["w"], params["b0"]["bias"], 0)
    b1 = _ref_conv_bn_relu(x, params["b1c0"]["w"], params["b1c0"]["bias"], 0)
    b1 = _ref_conv_bn_relu(b1, params["b1c1"]["w"], params["b1c1"]["bias"], 1)
    b2 = _ref_conv_bn_relu(x, params["b2c0"]["w"], params["b2c0"]["bias"], 0)
    b2 = _ref_conv_bn_relu(b2, params["b2c1"]["w"], params["b2c1"]["bias"], 1)
    b2 = _ref_conv_bn_relu(b2, params["b2c2"]["w"], params["b2c2"]["bias"], 1)
    b3 = _ref_conv_bn_relu(_ref_avgpool3x3(x), params["b3c0"]["w"], params["b3c0"]["bias"], 0)
    return jnp.concatenate([b0, b1, b2, b3], axis=-1)


if __name__ == "__main__":
    key = jax.random.PRNGKey(0)
    k_param, k_x = jax.random.split(key)

    # NHWC. The module's branch_3 conv hardcodes 384 input channels, so the
    # forward is only valid for in_channels == 384.
    N, H, W, C_in = 2, 16, 16, 384
    x = jax.random.normal(k_x, (N, H, W, C_in), jnp.float32)

    params = init_inception_a_params(k_param, C_in)
    prep = prepare_params(params)

    fwd = jax.jit(functools.partial(inception_a_forward, prep))
    out = fwd(x)
    jax.block_until_ready(out)

    # Sanity check against the pure-JAX reference (bf16 matmuls in both paths;
    # the kernel applies branch_3's 1x1 before the pool - mathematically exact).
    ref = jax.jit(functools.partial(_ref_forward, params))(x)
    jax.block_until_ready(ref)

    assert out.shape == (N, H, W, 96 * 4), out.shape
    np.testing.assert_allclose(np.asarray(out), np.asarray(ref), rtol=5e-2, atol=5e-2)

    print("KERNEL_OK")
</pallas_src>

<mosaic_0001>
module attributes {stable_mosaic.version = 11 : i64} {
  func.func @_inception_a_kernel(%arg0: i32, %arg1: i32, %arg2: memref<1x16x16x384xf32, #tpu.memory_space<vmem>>, %arg3: memref<384x384xbf16, #tpu.memory_space<vmem>>, %arg4: memref<1x384xf32, #tpu.memory_space<vmem>>, %arg5: memref<1152x256xbf16, #tpu.memory_space<vmem>>, %arg6: memref<1x256xf32, #tpu.memory_space<vmem>>, %arg7: memref<1152x128xbf16, #tpu.memory_space<vmem>>, %arg8: memref<1x128xf32, #tpu.memory_space<vmem>>, %arg9: memref<8x16x1xf32, #tpu.memory_space<vmem>>, %arg10: memref<1x8x16x384xf32, #tpu.memory_space<vmem>>, %arg11: memref<20x18x128xbf16, #tpu.memory_space<vmem>>, %arg12: memref<18x18x128xbf16, #tpu.memory_space<vmem>>, %arg13: memref<10x18x128xbf16, #tpu.memory_space<vmem>>, %arg14: memref<160x1152xbf16, #tpu.memory_space<vmem>>) attributes {dimension_semantics = [#tpu.dimension_semantics<parallel>, #tpu.dimension_semantics<arbitrary>], iteration_bounds = array<i64: 2, 2>, scalar_prefetch = 0 : i64, scratch_operands = 4 : i64, tpu.core_type = #tpu.core_type<tc>, window_params = [{transform_indices = @transform_0, window_bounds = array<i64: 1, 16, 16, 384>}, {pipeline_mode = #tpu.pipeline_mode<synchronous>, transform_indices = @transform_1, window_bounds = array<i64: 384, 384>}, {pipeline_mode = #tpu.pipeline_mode<synchronous>, transform_indices = @transform_2, window_bounds = array<i64: 1, 384>}, {pipeline_mode = #tpu.pipeline_mode<synchronous>, transform_indices = @transform_3, window_bounds = array<i64: 1152, 256>}, {pipeline_mode = #tpu.pipeline_mode<synchronous>, transform_indices = @transform_4, window_bounds = array<i64: 1, 256>}, {pipeline_mode = #tpu.pipeline_mode<synchronous>, transform_indices = @transform_5, window_bounds = array<i64: 1152, 128>}, {pipeline_mode = #tpu.pipeline_mode<synchronous>, transform_indices = @transform_6, window_bounds = array<i64: 1, 128>}, {transform_indices = @transform_7, window_bounds = array<i64: 8, 16, 1>}, {transform_indices = @transform_8, window_bounds = array<i64: 1, 8, 16, 384>}]} {
    %c8_i32 = arith.constant 8 : i32
    %0 = arith.muli %arg1, %c8_i32 : i32
    %c0_i32 = arith.constant 0 : i32
    %1 = arith.cmpi eq, %arg1, %c0_i32 : i32
    %2 = arith.extui %1 : i1 to i32
    %c0_i32_0 = arith.constant 0 : i32
    %3 = arith.cmpi ne, %2, %c0_i32_0 : i32
    scf.if %3 {
      %cst_145 = arith.constant 0.000000e+00 : bf16
      %178 = vector.broadcast %cst_145 : bf16 to vector<20x18x128xbf16>
      %c0_146 = arith.constant 0 : index
      %c0_147 = arith.constant 0 : index
      %c0_148 = arith.constant 0 : index
      %179 = vector.load %arg11[%c0_146, %c0_147, %c0_148] : memref<20x18x128xbf16, #tpu.memory_space<vmem>>, vector<20x18x128xbf16>
      tpu.vector_store %arg11[%c0_146, %c0_147, %c0_148], %178 {strides = array<i32>} : memref<20x18x128xbf16, #tpu.memory_space<vmem>>, vector<20x18x128xbf16>,
      %cst_149 = arith.constant 0.000000e+00 : bf16
      %180 = vector.broadcast %cst_149 : bf16 to vector<18x18x128xbf16>
      %c0_150 = arith.constant 0 : index
      %c0_151 = arith.constant 0 : index
      %c0_152 = arith.constant 0 : index
      %181 = vector.load %arg12[%c0_150, %c0_151, %c0_152] : memref<18x18x128xbf16, #tpu.memory_space<vmem>>, vector<18x18x128xbf16>
      tpu.vector_store %arg12[%c0_150, %c0_151, %c0_152], %180 {strides = array<i32>} : memref<18x18x128xbf16, #tpu.memory_space<vmem>>, vector<18x18x128xbf16>,
      %cst_153 = arith.constant 0.000000e+00 : bf16
      %182 = vector.broadcast %cst_153 : bf16 to vector<10x18x128xbf16>
      %c0_154 = arith.constant 0 : index
      %c0_155 = arith.constant 0 : index
      %c0_156 = arith.constant 0 : index
      %183 = vector.load %arg13[%c0_154, %c0_155, %c0_156] : memref<10x18x128xbf16, #tpu.memory_space<vmem>>, vector<10x18x128xbf16>
      tpu.vector_store %arg13[%c0_154, %c0_155, %c0_156], %182 {strides = array<i32>} : memref<10x18x128xbf16, #tpu.memory_space<vmem>>, vector<10x18x128xbf16>,
      %c0_157 = arith.constant 0 : index
      %c0_158 = arith.constant 0 : index
      %c0_159 = arith.constant 0 : index
      %c0_160 = arith.constant 0 : index
      %184 = vector.load %arg2[%c0_157, %c0_158, %c0_159, %c0_160] : memref<1x16x16x384xf32, #tpu.memory_space<vmem>>, vector<1x16x16x384xf32>
      %185 = vector.shape_cast %184 : vector<1x16x16x384xf32> to vector<16x16x384xf32>
      %186 = arith.truncf %185 : vector<16x16x384xf32> to vector<16x16x384xbf16>
      %187 = vector.shape_cast %186 : vector<16x16x384xbf16> to vector<256x384xbf16>
      %c0_161 = arith.constant 0 : index
      %c128_162 = arith.constant 128 : index
      %188 = vector.load %arg3[%c0_161, %c128_162] : memref<384x384xbf16, #tpu.memory_space<vmem>>, vector<384x256xbf16>
      %cst_163 = arith.constant dense<0.000000e+00> : vector<256x256xf32>
      %189 = tpu.matmul %187, %188, %cst_163 {dimension_numbers = #tpu.dot_dimension_numbers<[1], [0], [0], [1], [0, 0, 1, 1], [], []>} : vector<256x384xbf16>, vector<384x256xbf16>, vector<256x256xf32> -> vector<256x256xf32>
      %c0_164 = arith.constant 0 : index
      %c128_165 = arith.constant 128 : index
      %190 = vector.load %arg4[%c0_164, %c128_165] : memref<1x384xf32, #tpu.memory_space<vmem>>, vector<1x256xf32>
      %191 = vector.broadcast %190 : vector<1x256xf32> to vector<256x256xf32>
      %192 = arith.addf %189, %191 : vector<256x256xf32>
      %193 = vector.extract_strided_slice %192 {offsets = [0, 0], sizes = [256, 128], strides = [1, 1]} : vector<256x256xf32> to vector<256x128xf32>
      %cst_166 = arith.constant 0.000000e+00 : f32
      %194 = vector.broadcast %cst_166 : f32 to vector<256x128xf32>
      %195 = arith.maximumf %193, %194 : vector<256x128xf32>
      %196 = arith.truncf %195 : vector<256x128xf32> to vector<256x128xbf16>
      %197 = vector.shape_cast %196 : vector<256x128xbf16> to vector<16x16x128xbf16>
      %c2_167 = arith.constant 2 : index
      %c1_168 = arith.constant 1 : index
      %c0_169 = arith.constant 0 : index
      %198 = vector.load %arg11[%c2_167, %c1_168, %c0_169] : memref<20x18x128xbf16, #tpu.memory_space<vmem>>, vector<16x16x128xbf16>
      tpu.vector_store %arg11[%c2_167, %c1_168, %c0_169], %197 {strides = array<i32>} : memref<20x18x128xbf16, #tpu.memory_space<vmem>>, vector<16x16x128xbf16>,
      %199 = vector.extract_strided_slice %192 {offsets = [0, 128], sizes = [256, 128], strides = [1, 1]} : vector<256x256xf32> to vector<256x128xf32>
      %200 = arith.truncf %199 : vector<256x128xf32> to vector<256x128xbf16>
      %201 = vector.shape_cast %200 : vector<256x128xbf16> to vector<16x16x128xbf16>
      %c1_170 = arith.constant 1 : index
      %c1_171 = arith.constant 1 : index
      %c0_172 = arith.constant 0 : index
      %202 = vector.load %arg12[%c1_170, %c1_171, %c0_172] : memref<18x18x128xbf16, #tpu.memory_space<vmem>>, vector<16x16x128xbf16>
      tpu.vector_store %arg12[%c1_170, %c1_171, %c0_172], %201 {strides = array<i32>} : memref<18x18x128xbf16, #tpu.memory_space<vmem>>, vector<16x16x128xbf16>,
    } else {
    }
    %c0 = arith.constant 0 : index
    %4 = arith.index_cast %0 : i32 to index
    %c0_1 = arith.constant 0 : index
    %c0_2 = arith.constant 0 : index
    %5 = vector.load %arg2[%c0, %4, %c0_1, %c0_2] : memref<1x16x16x384xf32, #tpu.memory_space<vmem>>, vector<1x8x16x384xf32>
    %6 = vector.shape_cast %5 : vector<1x8x16x384xf32> to vector<8x16x384xf32>
    %7 = arith.truncf %6 : vector<8x16x384xf32> to vector<8x16x384xbf16>
    %8 = vector.shape_cast %7 : vector<8x16x384xbf16> to vector<128x384xbf16>
    %c0_3 = arith.constant 0 : index
    %c0_4 = arith.constant 0 : index
    %9 = vector.load %arg3[%c0_3, %c0_4] : memref<384x384xbf16, #tpu.memory_space<vmem>>, vector<384x128xbf16>
    %cst = arith.constant dense<0.000000e+00> : vector<128x128xf32>
    %10 = tpu.matmul %8, %9, %cst {dimension_numbers = #tpu.dot_dimension_numbers<[1], [0], [0], [1], [0, 0, 1, 1], [], []>} : vector<128x384xbf16>, vector<384x128xbf16>, vector<128x128xf32> -> vector<128x128xf32>
    %c0_5 = arith.constant 0 : index
    %c0_6 = arith.constant 0 : index
    %11 = vector.load %arg4[%c0_5, %c0_6] : memref<1x384xf32, #tpu.memory_space<vmem>>, vector<1x128xf32>
    %12 = vector.broadcast %11 : vector<1x128xf32> to vector<128x128xf32>
    %13 = arith.addf %10, %12 : vector<128x128xf32>
    %cst_7 = arith.constant 0.000000e+00 : f32
    %14 = vector.broadcast %cst_7 : f32 to vector<128x128xf32>
    %15 = arith.maximumf %13, %14 : vector<128x128xf32>
    %16 = vector.shape_cast %15 : vector<128x128xf32> to vector<8x16x128xf32>
    %c0_i32_8 = arith.constant 0 : i32
    %17 = arith.addi %0, %c0_i32_8 : i32
    %18 = arith.index_cast %17 : i32 to index
    %c0_9 = arith.constant 0 : index
    %c0_10 = arith.constant 0 : index
    %19 = vector.load %arg11[%18, %c0_9, %c0_10] : memref<20x18x128xbf16, #tpu.memory_space<vmem>>, vector<10x16x128xbf16>
    %20 = vector.shape_cast %19 : vector<10x16x128xbf16> to vector<160x128xbf16>
    %c0_11 = arith.constant 0 : index
    %c0_12 = arith.constant 0 : index
    %21 = vector.load %arg14[%c0_11, %c0_12] : memref<160x1152xbf16, #tpu.memory_space<vmem>>, vector<160x128xbf16>
    tpu.vector_store %arg14[%c0_11, %c0_12], %20 {strides = array<i32>} : memref<160x1152xbf16, #tpu.memory_space<vmem>>, vector<160x128xbf16>,
    %c0_i32_13 = arith.constant 0 : i32
    %22 = arith.addi %0, %c0_i32_13 : i32
    %23 = arith.index_cast %22 : i32 to index
    %c1 = arith.constant 1 : index
    %c0_14 = arith.constant 0 : index
    %24 = vector.load %arg11[%23, %c1, %c0_14] : memref<20x18x128xbf16, #tpu.memory_space<vmem>>, vector<10x16x128xbf16>
    %25 = vector.shape_cast %24 : vector<10x16x128xbf16> to vector<160x128xbf16>
    %c0_15 = arith.constant 0 : index
    %c128 = arith.constant 128 : index
    %26 = vector.load %arg14[%c0_15, %c128] : memref<160x1152xbf16, #tpu.memory_space<vmem>>, vector<160x128xbf16>
    tpu.vector_store %arg14[%c0_15, %c128], %25 {strides = array<i32>} : memref<160x1152xbf16, #tpu.memory_space<vmem>>, vector<160x128xbf16>,
    %c0_i32_16 = arith.constant 0 : i32
    %27 = arith.addi %0, %c0_i32_16 : i32
    %28 = arith.index_cast %27 : i32 to index
    %c2 = arith.constant 2 : index
    %c0_17 = arith.constant 0 : index
    %29 = vector.load %arg11[%28, %c2, %c0_17] : memref<20x18x128xbf16, #tpu.memory_space<vmem>>, vector<10x16x128xbf16>
    %30 = vector.shape_cast %29 : vector<10x16x128xbf16> to vector<160x128xbf16>
    %c0_18 = arith.constant 0 : index
    %c256 = arith.constant 256 : index
    %31 = vector.load %arg14[%c0_18, %c256] : memref<160x1152xbf16, #tpu.memory_space<vmem>>, vector<160x128xbf16>
    tpu.vector_store %arg14[%c0_18, %c256], %30 {strides = array<i32>} : memref<160x1152xbf16, #tpu.memory_space<vmem>>, vector<160x128xbf16>,
    %c1_i32 = arith.constant 1 : i32
    %32 = arith.addi %0, %c1_i32 : i32
    %33 = arith.index_cast %32 : i32 to index
    %c0_19 = arith.constant 0 : index
    %c0_20 = arith.constant 0 : index
    %34 = vector.load %arg11[%33, %c0_19, %c0_20] : memref<20x18x128xbf16, #tpu.memory_space<vmem>>, vector<10x16x128xbf16>
    %35 = vector.shape_cast %34 : vector<10x16x128xbf16> to vector<160x128xbf16>
    %c0_21 = arith.constant 0 : index
    %c384 = arith.constant 384 : index
    %36 = vector.load %arg14[%c0_21, %c384] : memref<160x1152xbf16, #tpu.memory_space<vmem>>, vector<160x128xbf16>
    tpu.vector_store %arg14[%c0_21, %c384], %35 {strides = array<i32>} : memref<160x1152xbf16, #tpu.memory_space<vmem>>, vector<160x128xbf16>,
    %c1_i32_22 = arith.constant 1 : i32
    %37 = arith.addi %0, %c1_i32_22 : i32
    %38 = arith.index_cast %37 : i32 to index
    %c1_23 = arith.constant 1 : index
    %c0_24 = arith.constant 0 : index
    %39 = vector.load %arg11[%38, %c1_23, %c0_24] : memref<20x18x128xbf16, #tpu.memory_space<vmem>>, vector<10x16x128xbf16>
    %40 = vector.shape_cast %39 : vector<10x16x128xbf16> to vector<160x128xbf16>
    %c0_25 = arith.constant 0 : index
    %c512 = arith.constant 512 : index
    %41 = vector.load %arg14[%c0_25, %c512] : memref<160x1152xbf16, #tpu.memory_space<vmem>>, vector<160x128xbf16>
    tpu.vector_store %arg14[%c0_25, %c512], %40 {strides = array<i32>} : memref<160x1152xbf16, #tpu.memory_space<vmem>>, vector<160x128xbf16>,
    %c1_i32_26 = arith.constant 1 : i32
    %42 = arith.addi %0, %c1_i32_26 : i32
    %43 = arith.index_cast %42 : i32 to index
    %c2_27 = arith.constant 2 : index
    %c0_28 = arith.constant 0 : index
    %44 = vector.load %arg11[%43, %c2_27, %c0_28] : memref<20x18x128xbf16, #tpu.memory_space<vmem>>, vector<10x16x128xbf16>
    %45 = vector.shape_cast %44 : vector<10x16x128xbf16> to vector<160x128xbf16>
    %c0_29 = arith.constant 0 : index
    %c640 = arith.constant 640 : index
    %46 = vector.load %arg14[%c0_29, %c640] : memref<160x1152xbf16, #tpu.memory_space<vmem>>, vector<160x128xbf16>
    tpu.vector_store %arg14[%c0_29, %c640], %45 {strides = array<i32>} : memref<160x1152xbf16, #tpu.memory_space<vmem>>, vector<160x128xbf16>,
    %c2_i32 = arith.constant 2 : i32
    %47 = arith.addi %0, %c2_i32 : i32
    %48 = arith.index_cast %47 : i32 to index
    %c0_30 = arith.constant 0 : index
    %c0_31 = arith.constant 0 : index
    %49 = vector.load %arg11[%48, %c0_30, %c0_31] : memref<20x18x128xbf16, #tpu.memory_space<vmem>>, vector<10x16x128xbf16>
    %50 = vector.shape_cast %49 : vector<10x16x128xbf16> to vector<160x128xbf16>
    %c0_32 = arith.constant 0 : index
    %c768 = arith.constant 768 : index
    %51 = vector.load %arg14[%c0_32, %c768] : memref<160x1152xbf16, #tpu.memory_space<vmem>>, vector<160x128xbf16>
    tpu.vector_store %arg14[%c0_32, %c768], %50 {strides = array<i32>} : memref<160x1152xbf16, #tpu.memory_space<vmem>>, vector<160x128xbf16>,
    %c2_i32_33 = arith.constant 2 : i32
    %52 = arith.addi %0, %c2_i32_33 : i32
    %53 = arith.index_cast %52 : i32 to index
    %c1_34 = arith.constant 1 : index
    %c0_35 = arith.constant 0 : index
    %54 = vector.load %arg11[%53, %c1_34, %c0_35] : memref<20x18x128xbf16, #tpu.memory_space<vmem>>, vector<10x16x128xbf16>
    %55 = vector.shape_cast %54 : vector<10x16x128xbf16> to vector<160x128xbf16>
    %c0_36 = arith.constant 0 : index
    %c896 = arith.constant 896 : index
    %56 = vector.load %arg14[%c0_36, %c896] : memref<160x1152xbf16, #tpu.memory_space<vmem>>, vector<160x128xbf16>
    tpu.vector_store %arg14[%c0_36, %c896], %55 {strides = array<i32>} : memref<160x1152xbf16, #tpu.memory_space<vmem>>, vector<160x128xbf16>,
    %c2_i32_37 = arith.constant 2 : i32
    %57 = arith.addi %0, %c2_i32_37 : i32
    %58 = arith.index_cast %57 : i32 to index
    %c2_38 = arith.constant 2 : index
    %c0_39 = arith.constant 0 : index
    %59 = vector.load %arg11[%58, %c2_38, %c0_39] : memref<20x18x128xbf16, #tpu.memory_space<vmem>>, vector<10x16x128xbf16>
    %60 = vector.shape_cast %59 : vector<10x16x128xbf16> to vector<160x128xbf16>
    %c0_40 = arith.constant 0 : index
    %c1024 = arith.constant 1024 : index
    %61 = vector.load %arg14[%c0_40, %c1024] : memref<160x1152xbf16, #tpu.memory_space<vmem>>, vector<160x128xbf16>
    tpu.vector_store %arg14[%c0_40, %c1024], %60 {strides = array<i32>} : memref<160x1152xbf16, #tpu.memory_space<vmem>>, vector<160x128xbf16>,
    %c0_41 = arith.constant 0 : index
    %c0_42 = arith.constant 0 : index
    %62 = vector.load %arg14[%c0_41, %c0_42] : memref<160x1152xbf16, #tpu.memory_space<vmem>>, vector<160x1152xbf16>
    %c0_43 = arith.constant 0 : index
    %c0_44 = arith.constant 0 : index
    %63 = vector.load %arg5[%c0_43, %c0_44] : memref<1152x256xbf16, #tpu.memory_space<vmem>>, vector<1152x256xbf16>
    %cst_45 = arith.constant dense<0.000000e+00> : vector<160x256xf32>
    %64 = tpu.matmul %62, %63, %cst_45 {dimension_numbers = #tpu.dot_dimension_numbers<[1], [0], [0], [1], [0, 0, 1, 1], [], []>} : vector<160x1152xbf16>, vector<1152x256xbf16>, vector<160x256xf32> -> vector<160x256xf32>
    %c0_46 = arith.constant 0 : index
    %c0_47 = arith.constant 0 : index
    %65 = vector.load %arg6[%c0_46, %c0_47] : memref<1x256xf32, #tpu.memory_space<vmem>>, vector<1x256xf32>
    %66 = vector.broadcast %65 : vector<1x256xf32> to vector<160x256xf32>
    %67 = arith.addf %64, %66 : vector<160x256xf32>
    %cst_48 = arith.constant 0.000000e+00 : f32
    %68 = vector.broadcast %cst_48 : f32 to vector<160x256xf32>
    %69 = arith.maximumf %67, %68 : vector<160x256xf32>
    %70 = vector.extract_strided_slice %69 {offsets = [0, 0], sizes = [160, 128], strides = [1, 1]} : vector<160x256xf32> to vector<160x128xf32>
    %71 = vector.shape_cast %70 : vector<160x128xf32> to vector<10x16x128xf32>
    %72 = vector.extract_strided_slice %71 {offsets = [1, 0, 0], sizes = [8, 16, 128], strides = [1, 1, 1]} : vector<10x16x128xf32> to vector<8x16x128xf32>
    %73 = vector.extract_strided_slice %69 {offsets = [0, 128], sizes = [160, 128], strides = [1, 1]} : vector<160x256xf32> to vector<160x128xf32>
    %74 = arith.truncf %73 : vector<160x128xf32> to vector<160x128xbf16>
    %75 = vector.shape_cast %74 : vector<160x128xbf16> to vector<10x16x128xbf16>
    %c0_49 = arith.constant 0 : index
    %c1_50 = arith.constant 1 : index
    %c0_51 = arith.constant 0 : index
    %76 = vector.load %arg13[%c0_49, %c1_50, %c0_51] : memref<10x18x128xbf16, #tpu.memory_space<vmem>>, vector<10x16x128xbf16>
    tpu.vector_store %arg13[%c0_49, %c1_50, %c0_51], %75 {strides = array<i32>} : memref<10x18x128xbf16, #tpu.memory_space<vmem>>, vector<10x16x128xbf16>,
    %c0_i32_52 = arith.constant 0 : i32
    %77 = arith.cmpi eq, %arg1, %c0_i32_52 : i32
    %78 = arith.extui %77 : i1 to i32
    %c0_i32_53 = arith.constant 0 : i32
    %79 = arith.cmpi ne, %78, %c0_i32_53 : i32
    scf.if %79 {
      %cst_145 = arith.constant 0.000000e+00 : bf16
      %178 = vector.broadcast %cst_145 : bf16 to vector<1x18x128xbf16>
      %c0_146 = arith.constant 0 : index
      %c0_147 = arith.constant 0 : index
      %c0_148 = arith.constant 0 : index
      %179 = vector.load %arg13[%c0_146, %c0_147, %c0_148] : memref<10x18x128xbf16, #tpu.memory_space<vmem>>, vector<1x18x128xbf16>
      tpu.vector_store %arg13[%c0_146, %c0_147, %c0_148], %178 {strides = array<i32>} : memref<10x18x128xbf16, #tpu.memory_space<vmem>>, vector<1x18x128xbf16>,
    } else {
    }
    %c1_i32_54 = arith.constant 1 : i32
    %80 = arith.cmpi eq, %arg1, %c1_i32_54 : i32
    %81 = arith.extui %80 : i1 to i32
    %c0_i32_55 = arith.constant 0 : i32
    %82 = arith.cmpi ne, %81, %c0_i32_55 : i32
    scf.if %82 {
      %cst_145 = arith.constant 0.000000e+00 : bf16
      %178 = vector.broadcast %cst_145 : bf16 to vector<1x18x128xbf16>
      %c9 = arith.constant 9 : index
      %c0_146 = arith.constant 0 : index
      %c0_147 = arith.constant 0 : index
      %179 = vector.load %arg13[%c9, %c0_146, %c0_147] : memref<10x18x128xbf16, #tpu.memory_space<vmem>>, vector<1x18x128xbf16>
      tpu.vector_store %arg13[%c9, %c0_146, %c0_147], %178 {strides = array<i32>} : memref<10x18x128xbf16, #tpu.memory_space<vmem>>, vector<1x18x128xbf16>,
    } else {
    }
    %c0_56 = arith.constant 0 : index
    %c0_57 = arith.constant 0 : index
    %c0_58 = arith.constant 0 : index
    %83 = vector.load %arg13[%c0_56, %c0_57, %c0_58] : memref<10x18x128xbf16, #tpu.memory_space<vmem>>, vector<8x16x128xbf16>
    %84 = vector.shape_cast %83 : vector<8x16x128xbf16> to vector<128x128xbf16>
    %c0_59 = arith.constant 0 : index
    %c0_60 = arith.constant 0 : index
    %85 = vector.load %arg14[%c0_59, %c0_60] : memref<160x1152xbf16, #tpu.memory_space<vmem>>, vector<128x128xbf16>
    tpu.vector_store %arg14[%c0_59, %c0_60], %84 {strides = array<i32>} : memref<160x1152xbf16, #tpu.memory_space<vmem>>, vector<128x128xbf16>,
    %c0_61 = arith.constant 0 : index
    %c1_62 = arith.constant 1 : index
    %c0_63 = arith.constant 0 : index
    %86 = vector.load %arg13[%c0_61, %c1_62, %c0_63] : memref<10x18x128xbf16, #tpu.memory_space<vmem>>, vector<8x16x128xbf16>
    %87 = vector.shape_cast %86 : vector<8x16x128xbf16> to vector<128x128xbf16>
    %c0_64 = arith.constant 0 : index
    %c128_65 = arith.constant 128 : index
    %88 = vector.load %arg14[%c0_64, %c128_65] : memref<160x1152xbf16, #tpu.memory_space<vmem>>, vector<128x128xbf16>
    tpu.vector_store %arg14[%c0_64, %c128_65], %87 {strides = array<i32>} : memref<160x1152xbf16, #tpu.memory_space<vmem>>, vector<128x128xbf16>,
    %c0_66 = arith.constant 0 : index
    %c2_67 = arith.constant 2 : index
    %c0_68 = arith.constant 0 : index
    %89 = vector.load %arg13[%c0_66, %c2_67, %c0_68] : memref<10x18x128xbf16, #tpu.memory_space<vmem>>, vector<8x16x128xbf16>
    %90 = vector.shape_cast %89 : vector<8x16x128xbf16> to vector<128x128xbf16>
    %c0_69 = arith.constant 0 : index
    %c256_70 = arith.constant 256 : index
    %91 = vector.load %arg14[%c0_69, %c256_70] : memref<160x1152xbf16, #tpu.memory_space<vmem>>, vector<128x128xbf16>
    tpu.vector_store %arg14[%c0_69, %c256_70], %90 {strides = array<i32>} : memref<160x1152xbf16, #tpu.memory_space<vmem>>, vector<128x128xbf16>,
    %c1_71 = arith.constant 1 : index
    %c0_72 = arith.constant 0 : index
    %c0_73 = arith.constant 0 : index
    %92 = vector.load %arg13[%c1_71, %c0_72, %c0_73] : memref<10x18x128xbf16, #tpu.memory_space<vmem>>, vector<8x16x128xbf16>
    %93 = vector.shape_cast %92 : vector<8x16x128xbf16> to vector<128x128xbf16>
    %c0_74 = arith.constant 0 : index
    %c384_75 = arith.constant 384 : index
    %94 = vector.load %arg14[%c0_74, %c384_75] : memref<160x1152xbf16, #tpu.memory_space<vmem>>, vector<128x128xbf16>
    tpu.vector_store %arg14[%c0_74, %c384_75], %93 {strides = array<i32>} : memref<160x1152xbf16, #tpu.memory_space<vmem>>, vector<128x128xbf16>,
    %c1_76 = arith.constant 1 : index
    %c1_77 = arith.constant 1 : index
    %c0_78 = arith.constant 0 : index
    %95 = vector.load %arg13[%c1_76, %c1_77, %c0_78] : memref<10x18x128xbf16, #tpu.memory_space<vmem>>, vector<8x16x128xbf16>
    %96 = vector.shape_cast %95 : vector<8x16x128xbf16> to vector<128x128xbf16>
    %c0_79 = arith.constant 0 : index
    %c512_80 = arith.constant 512 : index
    %97 = vector.load %arg14[%c0_79, %c512_80] : memref<160x1152xbf16, #tpu.memory_space<vmem>>, vector<128x128xbf16>
    tpu.vector_store %arg14[%c0_79, %c512_80], %96 {strides = array<i32>} : memref<160x1152xbf16, #tpu.memory_space<vmem>>, vector<128x128xbf16>,
    %c1_81 = arith.constant 1 : index
    %c2_82 = arith.constant 2 : index
    %c0_83 = arith.constant 0 : index
    %98 = vector.load %arg13[%c1_81, %c2_82, %c0_83] : memref<10x18x128xbf16, #tpu.memory_space<vmem>>, vector<8x16x128xbf16>
    %99 = vector.shape_cast %98 : vector<8x16x128xbf16> to vector<128x128xbf16>
    %c0_84 = arith.constant 0 : index
    %c640_85 = arith.constant 640 : index
    %100 = vector.load %arg14[%c0_84, %c640_85] : memref<160x1152xbf16, #tpu.memory_space<vmem>>, vector<128x128xbf16>
    tpu.vector_store %arg14[%c0_84, %c640_85], %99 {strides = array<i32>} : memref<160x1152xbf16, #tpu.memory_space<vmem>>, vector<128x128xbf16>,
    %c2_86 = arith.constant 2 : index
    %c0_87 = arith.constant 0 : index
    %c0_88 = arith.constant 0 : index
    %101 = vector.load %arg13[%c2_86, %c0_87, %c0_88] : memref<10x18x128xbf16, #tpu.memory_space<vmem>>, vector<8x16x128xbf16>
    %102 = vector.shape_cast %101 : vector<8x16x128xbf16> to vector<128x128xbf16>
    %c0_89 = arith.constant 0 : index
    %c768_90 = arith.constant 768 : index
    %103 = vector.load %arg14[%c0_89, %c768_90] : memref<160x1152xbf16, #tpu.memory_space<vmem>>, vector<128x128xbf16>
    tpu.vector_store %arg14[%c0_89, %c768_90], %102 {strides = array<i32>} : memref<160x1152xbf16, #tpu.memory_space<vmem>>, vector<128x128xbf16>,
    %c2_91 = arith.constant 2 : index
    %c1_92 = arith.constant 1 : index
    %c0_93 = arith.constant 0 : index
    %104 = vector.load %arg13[%c2_91, %c1_92, %c0_93] : memref<10x18x128xbf16, #tpu.memory_space<vmem>>, vector<8x16x128xbf16>
    %105 = vector.shape_cast %104 : vector<8x16x128xbf16> to vector<128x128xbf16>
    %c0_94 = arith.constant 0 : index
    %c896_95 = arith.constant 896 : index
    %106 = vector.load %arg14[%c0_94, %c896_95] : memref<160x1152xbf16, #tpu.memory_space<vmem>>, vector<128x128xbf16>
    tpu.vector_store %arg14[%c0_94, %c896_95], %105 {strides = array<i32>} : memref<160x1152xbf16, #tpu.memory_space<vmem>>, vector<128x128xbf16>,
    %c2_96 = arith.constant 2 : index
    %c2_97 = arith.constant 2 : index
    %c0_98 = arith.constant 0 : index
    %107 = vector.load %arg13[%c2_96, %c2_97, %c0_98] : memref<10x18x128xbf16, #tpu.memory_space<vmem>>, vector<8x16x128xbf16>
    %108 = vector.shape_cast %107 : vector<8x16x128xbf16> to vector<128x128xbf16>
    %c0_99 = arith.constant 0 : index
    %c1024_100 = arith.constant 1024 : index
    %109 = vector.load %arg14[%c0_99, %c1024_100] : memref<160x1152xbf16, #tpu.memory_space<vmem>>, vector<128x128xbf16>
    tpu.vector_store %arg14[%c0_99, %c1024_100], %108 {strides = array<i32>} : memref<160x1152xbf16, #tpu.memory_space<vmem>>, vector<128x128xbf16>,
    %c0_101 = arith.constant 0 : index
    %c0_102 = arith.constant 0 : index
    %110 = vector.load %arg14[%c0_101, %c0_102] : memref<160x1152xbf16, #tpu.memory_space<vmem>>, vector<128x1152xbf16>
    %c0_103 = arith.constant 0 : index
    %c0_104 = arith.constant 0 : index
    %111 = vector.load %arg7[%c0_103, %c0_104] : memref<1152x128xbf16, #tpu.memory_space<vmem>>, vector<1152x128xbf16>
    %cst_105 = arith.constant dense<0.000000e+00> : vector<128x128xf32>
    %112 = tpu.matmul %110, %111, %cst_105 {dimension_numbers = #tpu.dot_dimension_numbers<[1], [0], [0], [1], [0, 0, 1, 1], [], []>} : vector<128x1152xbf16>, vector<1152x128xbf16>, vector<128x128xf32> -> vector<128x128xf32>
    %c0_106 = arith.constant 0 : index
    %c0_107 = arith.constant 0 : index
    %113 = vector.load %arg8[%c0_106, %c0_107] : memref<1x128xf32, #tpu.memory_space<vmem>>, vector<1x128xf32>
    %114 = vector.broadcast %113 : vector<1x128xf32> to vector<128x128xf32>
    %115 = arith.addf %112, %114 : vector<128x128xf32>
    %cst_108 = arith.constant 0.000000e+00 : f32
    %116 = vector.broadcast %cst_108 : f32 to vector<128x128xf32>
    %117 = arith.maximumf %115, %116 : vector<128x128xf32>
    %118 = vector.shape_cast %117 : vector<128x128xf32> to vector<8x16x128xf32>
    %cst_109 = arith.constant 0.000000e+00 : f32
    %119 = vector.broadcast %cst_109 : f32 to vector<8x16x128xf32>
    %c0_i32_110 = arith.constant 0 : i32
    %120 = arith.addi %0, %c0_i32_110 : i32
    %121 = arith.index_cast %120 : i32 to index
    %c0_111 = arith.constant 0 : index
    %c0_112 = arith.constant 0 : index
    %122 = vector.load %arg12[%121, %c0_111, %c0_112] : memref<18x18x128xbf16, #tpu.memory_space<vmem>>, vector<8x16x128xbf16>
    %123 = arith.extf %122 : vector<8x16x128xbf16> to vector<8x16x128xf32>
    %124 = arith.addf %119, %123 : vector<8x16x128xf32>
    %c0_i32_113 = arith.constant 0 : i32
    %125 = arith.addi %0, %c0_i32_113 : i32
    %126 = arith.index_cast %125 : i32 to index
    %c1_114 = arith.constant 1 : index
    %c0_115 = arith.constant 0 : index
    %127 = vector.load %arg12[%126, %c1_114, %c0_115] : memref<18x18x128xbf16, #tpu.memory_space<vmem>>, vector<8x16x128xbf16>
    %128 = arith.extf %127 : vector<8x16x128xbf16> to vector<8x16x128xf32>
    %129 = arith.addf %124, %128 : vector<8x16x128xf32>
    %c0_i32_116 = arith.constant 0 : i32
    %130 = arith.addi %0, %c0_i32_116 : i32
    %131 = arith.index_cast %130 : i32 to index
    %c2_117 = arith.constant 2 : index
    %c0_118 = arith.constant 0 : index
    %132 = vector.load %arg12[%131, %c2_117, %c0_118] : memref<18x18x128xbf16, #tpu.memory_space<vmem>>, vector<8x16x128xbf16>
    %133 = arith.extf %132 : vector<8x16x128xbf16> to vector<8x16x128xf32>
    %134 = arith.addf %129, %133 : vector<8x16x128xf32>
    %c1_i32_119 = arith.constant 1 : i32
    %135 = arith.addi %0, %c1_i32_119 : i32
    %136 = arith.index_cast %135 : i32 to index
    %c0_120 = arith.constant 0 : index
    %c0_121 = arith.constant 0 : index
    %137 = vector.load %arg12[%136, %c0_120, %c0_121] : memref<18x18x128xbf16, #tpu.memory_space<vmem>>, vector<8x16x128xbf16>
    %138 = arith.extf %137 : vector<8x16x128xbf16> to vector<8x16x128xf32>
    %139 = arith.addf %134, %138 : vector<8x16x128xf32>
    %c1_i32_122 = arith.constant 1 : i32
    %140 = arith.addi %0, %c1_i32_122 : i32
    %141 = arith.index_cast %140 : i32 to index
    %c1_123 = arith.constant 1 : index
    %c0_124 = arith.constant 0 : index
    %142 = vector.load %arg12[%141, %c1_123, %c0_124] : memref<18x18x128xbf16, #tpu.memory_space<vmem>>, vector<8x16x128xbf16>
    %143 = arith.extf %142 : vector<8x16x128xbf16> to vector<8x16x128xf32>
    %144 = arith.addf %139, %143 : vector<8x16x128xf32>
    %c1_i32_125 = arith.constant 1 : i32
    %145 = arith.addi %0, %c1_i32_125 : i32
    %146 = arith.index_cast %145 : i32 to index
    %c2_126 = arith.constant 2 : index
    %c0_127 = arith.constant 0 : index
    %147 = vector.load %arg12[%146, %c2_126, %c0_127] : memref<18x18x128xbf16, #tpu.memory_space<vmem>>, vector<8x16x128xbf16>
    %148 = arith.extf %147 : vector<8x16x128xbf16> to vector<8x16x128xf32>
    %149 = arith.addf %144, %148 : vector<8x16x128xf32>
    %c2_i32_128 = arith.constant 2 : i32
    %150 = arith.addi %0, %c2_i32_128 : i32
    %151 = arith.index_cast %150 : i32 to index
    %c0_129 = arith.constant 0 : index
    %c0_130 = arith.constant 0 : index
    %152 = vector.load %arg12[%151, %c0_129, %c0_130] : memref<18x18x128xbf16, #tpu.memory_space<vmem>>, vector<8x16x128xbf16>
    %153 = arith.extf %152 : vector<8x16x128xbf16> to vector<8x16x128xf32>
    %154 = arith.addf %149, %153 : vector<8x16x128xf32>
    %c2_i32_131 = arith.constant 2 : i32
    %155 = arith.addi %0, %c2_i32_131 : i32
    %156 = arith.index_cast %155 : i32 to index
    %c1_132 = arith.constant 1 : index
    %c0_133 = arith.constant 0 : index
    %157 = vector.load %arg12[%156, %c1_132, %c0_133] : memref<18x18x128xbf16, #tpu.memory_space<vmem>>, vector<8x16x128xbf16>
    %158 = arith.extf %157 : vector<8x16x128xbf16> to vector<8x16x128xf32>
    %159 = arith.addf %154, %158 : vector<8x16x128xf32>
    %c2_i32_134 = arith.constant 2 : i32
    %160 = arith.addi %0, %c2_i32_134 : i32
    %161 = arith.index_cast %160 : i32 to index
    %c2_135 = arith.constant 2 : index
    %c0_136 = arith.constant 0 : index
    %162 = vector.load %arg12[%161, %c2_135, %c0_136] : memref<18x18x128xbf16, #tpu.memory_space<vmem>>, vector<8x16x128xbf16>
    %163 = arith.extf %162 : vector<8x16x128xbf16> to vector<8x16x128xf32>
    %164 = arith.addf %159, %163 : vector<8x16x128xf32>
    %c0_137 = arith.constant 0 : index
    %c0_138 = arith.constant 0 : index
    %c0_139 = arith.constant 0 : index
    %165 = vector.load %arg9[%c0_137, %c0_138, %c0_139] : memref<8x16x1xf32, #tpu.memory_space<vmem>>, vector<8x16x1xf32>
    %166 = vector.broadcast %165 : vector<8x16x1xf32> to vector<8x16x128xf32>
    %167 = arith.mulf %164, %166 : vector<8x16x128xf32>
    %cst_140 = arith.constant 0.000000e+00 : f32
    %168 = vector.broadcast %cst_140 : f32 to vector<8x16x128xf32>
    %169 = arith.maximumf %167, %168 : vector<8x16x128xf32>
    %170 = vector.extract_strided_slice %16 {offsets = [0, 0, 0], sizes = [8, 16, 96], strides = [1, 1, 1]} : vector<8x16x128xf32> to vector<8x16x96xf32>
    %171 = vector.extract_strided_slice %72 {offsets = [0, 0, 0], sizes = [8, 16, 96], strides = [1, 1, 1]} : vector<8x16x128xf32> to vector<8x16x96xf32>
    %172 = vector.extract_strided_slice %118 {offsets = [0, 0, 0], sizes = [8, 16, 96], strides = [1, 1, 1]} : vector<8x16x128xf32> to vector<8x16x96xf32>
    %173 = vector.extract_strided_slice %169 {offsets = [0, 0, 0], sizes = [8, 16, 96], strides = [1, 1, 1]} : vector<8x16x128xf32> to vector<8x16x96xf32>
    %174 = tpu.concatenate %170, %171, %172, %173 in 2 : vector<8x16x96xf32>, vector<8x16x96xf32>, vector<8x16x96xf32>, vector<8x16x96xf32> -> vector<8x16x384xf32>
    %c0_141 = arith.constant 0 : index
    %c0_142 = arith.constant 0 : index
    %c0_143 = arith.constant 0 : index
    %c0_144 = arith.constant 0 : index
    %175 = vector.load %arg10[%c0_141, %c0_142, %c0_143, %c0_144] : memref<1x8x16x384xf32, #tpu.memory_space<vmem>>, vector<1x8x16x384xf32>
    %176 = vector.shape_cast %175 : vector<1x8x16x384xf32> to vector<8x16x384xf32>
    %177 = vector.shape_cast %174 : vector<8x16x384xf32> to vector<1x8x16x384xf32>
    tpu.vector_store %arg10[%c0_141, %c0_142, %c0_143, %c0_144], %177 {strides = array<i32>} : memref<1x8x16x384xf32, #tpu.memory_space<vmem>>, vector<1x8x16x384xf32>,
    return
  }
  func.func @transform_0(%arg0: i32, %arg1: i32) -> (i32, i32, i32, i32) {
    %c0_i32 = arith.constant 0 : i32
    %c0_i32_0 = arith.constant 0 : i32
    %c0_i32_1 = arith.constant 0 : i32
    %c0_i32_2 = arith.constant 0 : i32
    return %arg0, %c0_i32, %c0_i32_0, %c0_i32_1 : i32, i32, i32, i32
  }
  func.func @transform_1(%arg0: i32, %arg1: i32) -> (i32, i32) {
    %c0_i32 = arith.constant 0 : i32
    %c0_i32_0 = arith.constant 0 : i32
    %c0_i32_1 = arith.constant 0 : i32
    return %c0_i32, %c0_i32_0 : i32, i32
  }
  func.func @transform_2(%arg0: i32, %arg1: i32) -> (i32, i32) {
    %c0_i32 = arith.constant 0 : i32
    %c0_i32_0 = arith.constant 0 : i32
    %c0_i32_1 = arith.constant 0 : i32
    return %c0_i32, %c0_i32_0 : i32, i32
  }
  func.func @transform_3(%arg0: i32, %arg1: i32) -> (i32, i32) {
    %c0_i32 = arith.constant 0 : i32
    %c0_i32_0 = arith.constant 0 : i32
    %c0_i32_1 = arith.constant 0 : i32
    return %c0_i32, %c0_i32_0 : i32, i32
  }
  func.func @transform_4(%arg0: i32, %arg1: i32) -> (i32, i32) {
    %c0_i32 = arith.constant 0 : i32
    %c0_i32_0 = arith.constant 0 : i32
    %c0_i32_1 = arith.constant 0 : i32
    return %c0_i32, %c0_i32_0 : i32, i32
  }
  func.func @transform_5(%arg0: i32, %arg1: i32) -> (i32, i32) {
    %c0_i32 = arith.constant 0 : i32
    %c0_i32_0 = arith.constant 0 : i32
    %c0_i32_1 = arith.constant 0 : i32
    return %c0_i32, %c0_i32_0 : i32, i32
  }
  func.func @transform_6(%arg0: i32, %arg1: i32) -> (i32, i32) {
    %c0_i32 = arith.constant 0 : i32
    %c0_i32_0 = arith.constant 0 : i32
    %c0_i32_1 = arith.constant 0 : i32
    return %c0_i32, %c0_i32_0 : i32, i32
  }
  func.func @transform_7(%arg0: i32, %arg1: i32) -> (i32, i32, i32) {
    %c0_i32 = arith.constant 0 : i32
    %c0_i32_0 = arith.constant 0 : i32
    %c0_i32_1 = arith.constant 0 : i32
    return %arg1, %c0_i32, %c0_i32_0 : i32, i32, i32
  }
  func.func @transform_8(%arg0: i32, %arg1: i32) -> (i32, i32, i32, i32) {
    %c0_i32 = arith.constant 0 : i32
    %c0_i32_0 = arith.constant 0 : i32
    %c0_i32_1 = arith.constant 0 : i32
    return %arg0, %arg1, %c0_i32, %c0_i32_0 : i32, i32, i32, i32
  }
}

</mosaic_0001>

<bundles_post_ra>
// kernel: inception_a_forward.1
= control target key start
LH: loop header
LB: loop body
LE: loop exit
PB: predicated region body
PF: predicated region fallthrough
CT: control target
= control target key end

     0   :  { %13 = vsyncpa [#allocation7], 0  ;;  %s17523_s0 = inlined_call_operand.vmem [shape: f32[2,16,16,384], index: 0, kind: input, shape index: {}]   ;;  %s17524_s1 = inlined_call_operand.vmem [shape: bf16[384,384], index: 1, kind: input, shape index: {}]   ;;  %s17525_s2 = inlined_call_operand.vmem [shape: f32[1,384], index: 2, kind: input, shape index: {}]   ;;  %s17526_s3 = inlined_call_operand.vmem [shape: bf16[1152,256], index: 3, kind: input, shape index: {}]   ;;  %s17527_s4 = inlined_call_operand.vmem [shape: f32[1,256], index: 4, kind: input, shape index: {}]   ;;  %s17528_s5 = inlined_call_operand.vmem [shape: bf16[1152,128], index: 5, kind: input, shape index: {}]   ;;  %s17529_s6 = inlined_call_operand.vmem [shape: f32[1,128], index: 6, kind: input, shape index: {}]   ;;  %s17530_s7 = inlined_call_operand.vmem [shape: f32[16,16,1], index: 7, kind: input, shape index: {}]   ;;  %s17531_s8 = inlined_call_operand.hbm [shape: f32[2,16,16,384], index: 8, kind: output, shape index: {}]  }
   0x1   :  { %15 = vsyncpa [#allocation7 + $0x1], 0  ;;  %s13056_s27 = smov 0   ;;  %s13058_s28 = smov 0  }
   0x2   :  { %s13060_s29 = smov 0   ;;  %s13062_s30 = smov 0  }
   0x3   :  { %s13064_s9 = smov 0   ;;  %s13066_s10 = smov 0  }
   0x4   :  { %s13068_s11 = smov 0   ;;  %s13070_s12 = smov 0  }
   0x5 LB: > { %17560 = sst [smem:[#allocation9_spill]] %s12991_s10  ;;  %s10588_s13 = sadd.s32 4294967295, %s12999_s12   ;;  %s12999_s12 = sphi %s13070_s12, %s21_s12   ;;  %s12995_s11 = sphi %s13068_s11, %s17674_s11   ;;  %s12991_s10 = sphi %s13066_s10, %s17673_s10   ;;  %s12987_s9 = sphi %s13064_s9, %s17672_s9   ;;  %s12983_s30 = sphi %s13062_s30, %s17671_s30   ;;  %s12979_s29 = sphi %s13060_s29, %s17677_s29   ;;  %s12975_s28 = sphi %s13058_s28, %s17676_s28   ;;  %s12971_s27 = sphi %s13056_s27, %s17675_s27  }
   0x6   : > { %17561 = sst [smem:[#allocation10_spill]] %s12995_s11  ;;  %s10589_s14 = sadd.s32 4294967294, %s12999_s12  }
   0x7   : > { %s30_s15 = sadd.s32 1, %s12991_s10  ;;  %s33_s16 = sadd.s32 1, %s12995_s11 }
   0x8   : > { %p31_p0 = scmp.ge.s32.totalorder %s30_s15, 2  ;;  %p230_p1 = scmp.ne.s32.totalorder %s12979_s29, %s12975_s28 }
   0x9   : > { %p231_p2 = scmp.eq.s32.totalorder %s10588_s13, 3  ;;  %p236_p5 = scmp.ne.s32.totalorder %s12975_s28, %s12971_s27 }
   0xa   : > { %s17679_s15 = smov (%p31_p0, %s30_s15), 0  ;;  %s17681_s16 = smov (!%p31_p0, %s33_s16), %s12995_s11 }
   0xb   : > { %17562 = sst [smem:[#allocation11_spill]] %s17679_s15  ;;  %s216_s17 = ssub.s32 %s12991_s10, %s17679_s15 }
   0xc   : > { %p13107_p3 = por %p231_p2, %p230_p1  ;;  %p35_p4 = scmp.ge.s32.totalorder %s17681_s16, 2 }
   0xd   : > { %p237_p6 = scmp.eq.s32.totalorder %s10589_s14, 3  ;;  %p10592_p7 = scmp.ge.s32.totalorder %s12999_s12, 1 }
   0xe   : > { %s17683_s16 = smov (%p35_p4, %s17681_s16), 0  ;;  %p291_p9 = scmp.lt.s32.totalorder %s12999_s12, 5 }
   0xf   : > { %17564 = sst [smem:[#allocation12_spill]] %s17683_s16  ;;  %p13116_p8 = por %p237_p6, %p236_p5 }
  0x10   : > { %s215_s20 = ssub.s32 %s12995_s11, %s17683_s16  ;;  %s220_s21 = sadd.s32 1, %s12979_s29 }
  0x11   : > { %s217_s22 = sor.u32 %s216_s17, %s215_s20  ;;  %p292_p10 = pnand %p10592_p7, %p291_p9 }
  0x12   : > { %p218_p11 = scmp.eq.s32.totalorder %s217_s22, 0 }
  0x13   : > { %295 = sbr.rel (%p292_p10) target bundleno = 1816 (0x718), region = 52 }
  0x14   : > { %s13125_s23 = scalar_select %p218_p11, %s12979_s29, %s220_s21  }
  0x1a   : > { %s17536_s24 = sand.u32 1, %s12975_s28   ;;  %p331_p12 = scmp.lt.s32.totalorder %s12987_s9, 1 }
  0x1b   : > { %s12334_s25 = smul.u32 384, %s17536_s24  ;;  %s10594_s26 = sshll.u32 %s12983_s30, 3 }
  0x1c   : > { %s332_s13 = scalar_select %p331_p12, %s12987_s9, 1 }
  0x1d   : > { %p337_p13 = scmp.lt.s32.totalorder %s10594_s26, 15  ;;  %s13143_s10 = scalar_lea.vmem [#allocation6], %s12334_s25 }
  0x1e   : > { %s12335_s14 = smul.u32 768, %s332_s13  ;;  %p10598_p0 = scmp.ne.s32.totalorder %s12983_s30, 0 }
  0x1f   : > { %s17685_s26 = smov (!%p337_p13, %s10594_s26), 15 }
  0x20   : > { %s13136_s21 = scalar_lea.vmem %s17523_s0, %s12335_s14  ;;  %s11433_s22 = sshll.u32 %s17685_s26, 4 }
  0x21   : > { %s13141_s11 = scalar_lea.vmem %s17530_s7, %s11433_s22  ;;  %349 = sbr.rel (%p10598_p0) target bundleno = 489 (0x1e9), region = 56 }
  0x28   : > { %v13151_v0 = vld [vmem:[%s17524_s1 + $0x8] ss:$12 sps:$4 sm:$0xff]   ;;  %v13156_v1 = vld [vmem:[%s17524_s1 + $0x4] ss:$12 sps:$4 sm:$0xff]   ;;  %v13001_v2 = vmov 0   ;;  %v505_v49 = vld [vmem:[%s13136_s21 + $0x58] sm:$0xff] }
  0x29   : > { %1163 = vmatprep.mubr.bf16.mxu0 %v13001_v2  ;;  %350 = vst [vmem:[#allocation2] sm:$0xf] %v13001_v2  ;;  %351 = vst [vmem:[#allocation2 + $0x4] sm:$0xf] %v13001_v2  ;;  %938 = vmatprep.subr.bf16.mxu1 %v13151_v0  ;;  %v12421_v3 = vld [vmem:[%s17524_s1 + $0x20] ss:$12 sps:$4 sm:$0xff]  }
  0x2a   : > { %352 = vst [vmem:[#allocation2 + $0x8] sm:$0x1] %v13001_v2  ;;  %353 = vst [vmem:[#allocation2 + $0xc] sm:$0xf] %v13001_v2  ;;  %939 = vmatpush1.bf16.msra.mxu1 %v13156_v1  ;;  %v12423_v4 = vld [vmem:[%s17524_s1 + $0x1c] ss:$12 sps:$4 sm:$0xff]  }
  0x2b   : > { %354 = vst [vmem:[#allocation2 + $0x10] sm:$0xf] %v13001_v2  ;;  %355 = vst [vmem:[#allocation2 + $0x14] sm:$0x1] %v13001_v2  ;;  %940 = vmatprep.subr.bf16.mxu1 %v12421_v3  ;;  %v12424_v5 = vld [vmem:[%s17524_s1 + $0x38] ss:$12 sps:$4 sm:$0xff]  }
  0x2c   : > { %356 = vst [vmem:[#allocation2 + $0x18] sm:$0xf] %v13001_v2  ;;  %357 = vst [vmem:[#allocation2 + $0x1c] sm:$0xf] %v13001_v2  ;;  %v12426_v6 = vld [vmem:[%s17524_s1 + $0x34] ss:$12 sps:$4 sm:$0xff]  }
  0x2d   : > { %358 = vst [vmem:[#allocation2 + $0x20] sm:$0x1] %v13001_v2  ;;  %359 = vst [vmem:[#allocation2 + $0x24] sm:$0xf] %v13001_v2  ;;  %v12427_v7 = vld [vmem:[%s17524_s1 + $0x50] ss:$12 sps:$4 sm:$0xff]  }
  0x2e   : > { %360 = vst [vmem:[#allocation2 + $0x28] sm:$0xf] %v13001_v2  ;;  %361 = vst [vmem:[#allocation2 + $0x2c] sm:$0x1] %v13001_v2  ;;  %941 = vmatpush1.bf16.msra.mxu1 %v12423_v4  ;;  %v12429_v8 = vld [vmem:[%s17524_s1 + $0x4c] ss:$12 sps:$4 sm:$0xff]  }
  0x2f   : > { %362 = vst [vmem:[#allocation2 + $0x30] sm:$0xf] %v13001_v2  ;;  %363 = vst [vmem:[#allocation2 + $0x34] sm:$0xf] %v13001_v2  ;;  %942 = vmatprep.subr.bf16.mxu1 %v12424_v5  ;;  %v12442_v9 = vld [vmem:[%s17524_s1 + $0x188] ss:$12 sps:$4 sm:$0xff]  }
  0x30   : > { %364 = vst [vmem:[#allocation2 + $0x38] sm:$0x1] %v13001_v2  ;;  %365 = vst [vmem:[#allocation2 + $0x3c] sm:$0xf] %v13001_v2  ;;  %v12430_v10 = vld [vmem:[%s17524_s1 + $0x68] ss:$12 sps:$4 sm:$0xff]   ;;  %1131 = vmatprep.subr.bf16.mxu0 %v12442_v9 }
  0x31   : > { %366 = vst [vmem:[#allocation2 + $0x40] sm:$0xf] %v13001_v2  ;;  %367 = vst [vmem:[#allocation2 + $0x44] sm:$0x1] %v13001_v2  ;;  %v12446_v11 = vld [vmem:[%s17524_s1 + $0x184] ss:$12 sps:$4 sm:$0xff]  }
  0x32   : > { %368 = vst [vmem:[#allocation2 + $0x48] sm:$0xf] %v13001_v2  ;;  %369 = vst [vmem:[#allocation2 + $0x4c] sm:$0xf] %v13001_v2  ;;  %943 = vmatpush1.bf16.msra.mxu1 %v12426_v6  ;;  %1132 = vmatpush1.bf16.msra.mxu0 %v12446_v11  ;;  %v12448_v12 = vld [vmem:[%s17524_s1 + $0x1a0] ss:$12 sps:$4 sm:$0xff]  }
  0x33   : > { %370 = vst [vmem:[#allocation2 + $0x50] sm:$0x1] %v13001_v2  ;;  %371 = vst [vmem:[#allocation2 + $0x54] sm:$0xf] %v13001_v2  ;;  %944 = vmatprep.subr.bf16.mxu1 %v12427_v7  ;;  %v12432_v13 = vld [vmem:[%s17524_s1 + $0x64] ss:$12 sps:$4 sm:$0xff]   ;;  %1133 = vmatprep.subr.bf16.mxu0 %v12448_v12 }
  0x34   : > { %372 = vst [vmem:[#allocation2 + $0x58] sm:$0xf] %v13001_v2  ;;  %373 = vst [vmem:[#allocation2 + $0x5c] sm:$0x1] %v13001_v2  ;;  %v12433_v14 = vld [vmem:[%s17524_s1 + $0x80] ss:$12 sps:$4 sm:$0xff]  }
  0x35   : > { %374 = vst [vmem:[#allocation2 + $0x60] sm:$0xf] %v13001_v2  ;;  %375 = vst [vmem:[#allocation2 + $0x64] sm:$0xf] %v13001_v2  ;;  %v12452_v15 = vld [vmem:[%s17524_s1 + $0x19c] ss:$12 sps:$4 sm:$0xff]  }
  0x36   : > { %376 = vst [vmem:[#allocation2 + $0x68] sm:$0x1] %v13001_v2  ;;  %377 = vst [vmem:[#allocation2 + $0x6c] sm:$0xf] %v13001_v2  ;;  %945 = vmatpush1.bf16.msra.mxu1 %v12429_v8  ;;  %v12454_v16 = vld [vmem:[%s17524_s1 + $0x1b8] ss:$12 sps:$4 sm:$0xff]   ;;  %1134 = vmatpush1.bf16.msra.mxu0 %v12452_v15 }
  0x37   : > { %378 = vst [vmem:[#allocation2 + $0x70] sm:$0xf] %v13001_v2  ;;  %379 = vst [vmem:[#allocation2 + $0x74] sm:$0x1] %v13001_v2  ;;  %946 = vmatprep.subr.bf16.mxu1 %v12430_v10  ;;  %v12435_v17 = vld [vmem:[%s17524_s1 + $0x7c] ss:$12 sps:$4 sm:$0xff]   ;;  %1135 = vmatprep.subr.bf16.mxu0 %v12454_v16 }
  0x38   : > { %380 = vst [vmem:[#allocation2 + $0x78] sm:$0xf] %v13001_v2  ;;  %381 = vst [vmem:[#allocation2 + $0x7c] sm:$0xf] %v13001_v2  ;;  %v12458_v18 = vld [vmem:[%s17524_s1 + $0x1b4] ss:$12 sps:$4 sm:$0xff]  }
  0x39   : > { %382 = vst [vmem:[#allocation2 + $0x80] sm:$0x1] %v13001_v2  ;;  %383 = vst [vmem:[#allocation2 + $0x84] sm:$0xf] %v13001_v2  ;;  %v12460_v19 = vld [vmem:[%s17524_s1 + $0x1d0] ss:$12 sps:$4 sm:$0xff]  }
  0x3a   : > { %384 = vst [vmem:[#allocation2 + $0x88] sm:$0xf] %v13001_v2  ;;  %385 = vst [vmem:[#allocation2 + $0x8c] sm:$0x1] %v13001_v2  ;;  %947 = vmatpush1.bf16.msra.mxu1 %v12432_v13  ;;  %v12436_v20 = vld [vmem:[%s17524_s1 + $0x98] ss:$12 sps:$4 sm:$0xff]   ;;  %1136 = vmatpush1.bf16.msra.mxu0 %v12458_v18 }
  0x3b   : > { %386 = vst [vmem:[#allocation2 + $0x90] sm:$0xf] %v13001_v2  ;;  %387 = vst [vmem:[#allocation2 + $0x94] sm:$0xf] %v13001_v2  ;;  %948 = vmatprep.subr.bf16.mxu1 %v12433_v14  ;;  %v12464_v21 = vld [vmem:[%s17524_s1 + $0x1cc] ss:$12 sps:$4 sm:$0xff]   ;;  %1137 = vmatprep.subr.bf16.mxu0 %v12460_v19 }
  0x3c   : > { %388 = vst [vmem:[#allocation2 + $0x98] sm:$0x1] %v13001_v2  ;;  %389 = vst [vmem:[#allocation2 + $0x9c] sm:$0xf] %v13001_v2  ;;  %v12438_v22 = vld [vmem:[%s17524_s1 + $0x94] ss:$12 sps:$4 sm:$0xff]  }
  0x3d   : > { %390 = vst [vmem:[#allocation2 + $0xa0] sm:$0xf] %v13001_v2  ;;  %391 = vst [vmem:[#allocation2 + $0xa4] sm:$0x1] %v13001_v2  ;;  %v12466_v23 = vld [vmem:[%s17524_s1 + $0x1e8] ss:$12 sps:$4 sm:$0xff]  }
  0x3e   : > { %392 = vst [vmem:[#allocation2 + $0xa8] sm:$0xf] %v13001_v2  ;;  %393 = vst [vmem:[#allocation2 + $0xac] sm:$0xf] %v13001_v2  ;;  %949 = vmatpush1.bf16.msra.mxu1 %v12435_v17  ;;  %v12439_v24 = vld [vmem:[%s17524_s1 + $0xb0] ss:$12 sps:$4 sm:$0xff]   ;;  %1138 = vmatpush1.bf16.msra.mxu0 %v12464_v21 }
  0x3f   : > { %394 = vst [vmem:[#allocation2 + $0xb0] sm:$0x1] %v13001_v2  ;;  %395 = vst [vmem:[#allocation2 + $0xb4] sm:$0xf] %v13001_v2  ;;  %950 = vmatprep.subr.bf16.mxu1 %v12436_v20  ;;  %v12441_v25 = vld [vmem:[%s17524_s1 + $0xac] ss:$12 sps:$4 sm:$0xff]   ;;  %1139 = vmatprep.subr.bf16.mxu0 %v12466_v23 }
  0x40   : > { %396 = vst [vmem:[#allocation2 + $0xb8] sm:$0xf] %v13001_v2  ;;  %397 = vst [vmem:[#allocation2 + $0xbc] sm:$0x1] %v13001_v2  ;;  %v12470_v26 = vld [vmem:[%s17524_s1 + $0x1e4] ss:$12 sps:$4 sm:$0xff]  }
  0x41   : > { %398 = vst [vmem:[#allocation2 + $0xc0] sm:$0xf] %v13001_v2  ;;  %399 = vst [vmem:[#allocation2 + $0xc4] sm:$0xf] %v13001_v2  ;;  %v12472_v27 = vld [vmem:[%s17524_s1 + $0x200] ss:$12 sps:$4 sm:$0xff]  }
  0x42   : > { %400 = vst [vmem:[#allocation2 + $0xc8] sm:$0x1] %v13001_v2  ;;  %401 = vst [vmem:[#allocation2 + $0xcc] sm:$0xf] %v13001_v2  ;;  %951 = vmatpush1.bf16.msra.mxu1 %v12438_v22  ;;  %v12444_v28 = vld [vmem:[%s17524_s1 + $0xc8] ss:$12 sps:$4 sm:$0xff]   ;;  %1140 = vmatpush1.bf16.msra.mxu0 %v12470_v26 }
  0x43   : > { %402 = vst [vmem:[#allocation2 + $0xd0] sm:$0xf] %v13001_v2  ;;  %403 = vst [vmem:[#allocation2 + $0xd4] sm:$0x1] %v13001_v2  ;;  %952 = vmatprep.subr.bf16.mxu1 %v12439_v24  ;;  %v12476_v29 = vld [vmem:[%s17524_s1 + $0x1fc] ss:$12 sps:$4 sm:$0xff]   ;;  %1141 = vmatprep.subr.bf16.mxu0 %v12472_v27 }
  0x44   : > { %404 = vst [vmem:[#allocation2 + $0xd8] sm:$0xf] %v13001_v2  ;;  %405 = vst [vmem:[#allocation2 + $0xdc] sm:$0xf] %v13001_v2  ;;  %v12447_v30 = vld [vmem:[%s17524_s1 + $0xc4] ss:$12 sps:$4 sm:$0xff]  }
  0x45   : > { %406 = vst [vmem:[#allocation2 + $0xe0] sm:$0x1] %v13001_v2  ;;  %407 = vst [vmem:[#allocation2 + $0xe4] sm:$0xf] %v13001_v2  ;;  %v12478_v31 = vld [vmem:[%s17524_s1 + $0x218] ss:$12 sps:$4 sm:$0xff]  }
  0x46   : > { %408 = vst [vmem:[#allocation2 + $0xe8] sm:$0xf] %v13001_v2  ;;  %409 = vst [vmem:[#allocation2 + $0xec] sm:$0x1] %v13001_v2  ;;  %953 = vmatpush1.bf16.msra.mxu1 %v12441_v25  ;;  %v12450_v32 = vld [vmem:[%s17524_s1 + $0xe0] ss:$12 sps:$4 sm:$0xff]   ;;  %1142 = vmatpush1.bf16.msra.mxu0 %v12476_v29 }
  0x47   : > { %410 = vst [vmem:[#allocation3] sm:$0xf] %v13001_v2  ;;  %411 = vst [vmem:[#allocation3 + $0x4] sm:$0xf] %v13001_v2  ;;  %954 = vmatprep.subr.bf16.mxu1 %v12444_v28  ;;  %v495_v33 = vld [vmem:[%s13136_s21 + $0x8] sm:$0xff]  ;;  %v498_v34 = vld [vmem:[%s13136_s21 + $0x20] sm:$0xff]  ;;  %1143 = vmatprep.subr.bf16.mxu0 %v12478_v31 }
  0x48   : > { %412 = vst [vmem:[#allocation3 + $0x8] sm:$0x1] %v13001_v2  ;;  %413 = vst [vmem:[#allocation3 + $0xc] sm:$0xf] %v13001_v2  ;;  %v591_v35 = vpack.c.bf16 %v498_v34, %v495_v33  ;;  %v12482_v36 = vld [vmem:[%s17524_s1 + $0x214] ss:$12 sps:$4 sm:$0xff]  }
  0x49   : > { %414 = vst [vmem:[#allocation3 + $0x10] sm:$0xf] %v13001_v2  ;;  %415 = vst [vmem:[#allocation3 + $0x14] sm:$0x1] %v13001_v2  ;;  %v12453_v37 = vld [vmem:[%s17524_s1 + $0xdc] ss:$12 sps:$4 sm:$0xff]  }
  0x4a   : > { %416 = vst [vmem:[#allocation3 + $0x18] sm:$0xf] %v13001_v2  ;;  %417 = vst [vmem:[#allocation3 + $0x1c] sm:$0xf] %v13001_v2  ;;  %955 = vmatpush1.bf16.msra.mxu1 %v12447_v30  ;;  %v12484_v38 = vld [vmem:[%s17524_s1 + $0x230] ss:$12 sps:$4 sm:$0xff]   ;;  %970 = vmatprep.mubr.bf16.mxu1 %v591_v35 }
  0x4b   : > { %418 = vst [vmem:[#allocation3 + $0x20] sm:$0x1] %v13001_v2  ;;  %419 = vst [vmem:[#allocation3 + $0x24] sm:$0xf] %v13001_v2  ;;  %956 = vmatprep.subr.bf16.mxu1 %v12450_v32  ;;  %v12456_v39 = vld [vmem:[%s17524_s1 + $0xf8] ss:$12 sps:$4 sm:$0xff]   ;;  %1144 = vmatpush1.bf16.msra.mxu0 %v12482_v36 }
  0x4c   : > { %420 = vst [vmem:[#allocation3 + $0x28] sm:$0xf] %v13001_v2  ;;  %421 = vst [vmem:[#allocation3 + $0x2c] sm:$0x1] %v13001_v2  ;;  %v12488_v40 = vld [vmem:[%s17524_s1 + $0x22c] ss:$12 sps:$4 sm:$0xff]   ;;  %1145 = vmatprep.subr.bf16.mxu0 %v12484_v38 }
  0x4d   : > { %422 = vst [vmem:[#allocation3 + $0x30] sm:$0xf] %v13001_v2  ;;  %423 = vst [vmem:[#allocation3 + $0x34] sm:$0xf] %v13001_v2  ;;  %v496_v41 = vld [vmem:[%s13136_s21 + $0x10] sm:$0xff]  ;;  %v499_v42 = vld [vmem:[%s13136_s21 + $0x28] sm:$0xff] }
  0x4e   : > { %424 = vst [vmem:[#allocation3 + $0x38] sm:$0x1] %v13001_v2  ;;  %425 = vst [vmem:[#allocation3 + $0x3c] sm:$0xf] %v13001_v2  ;;  %957 = vmatpush1.bf16.msra.mxu1 %v12453_v37  ;;  %v12459_v43 = vld [vmem:[%s17524_s1 + $0xf4] ss:$12 sps:$4 sm:$0xff]   ;;  %v592_v45 = vpack.c.bf16 %v499_v42, %v496_v41 }
  0x4f   : > { %426 = vst [vmem:[#allocation3 + $0x40] sm:$0xf] %v13001_v2  ;;  %427 = vst [vmem:[#allocation3 + $0x44] sm:$0x1] %v13001_v2  ;;  %958 = vmatprep.subr.bf16.mxu1 %v12456_v39  ;;  %v12462_v44 = vld [vmem:[%s17524_s1 + $0x110] ss:$12 sps:$4 sm:$0xff]   ;;  %1146 = vmatpush1.bf16.msra.mxu0 %v12488_v40 }
  0x50   : > { %428 = vst [vmem:[#allocation3 + $0x48] sm:$0xf] %v13001_v2  ;;  %429 = vst [vmem:[#allocation3 + $0x4c] sm:$0xf] %v13001_v2  ;;  %v12465_v46 = vld [vmem:[%s17524_s1 + $0x10c] ss:$12 sps:$4 sm:$0xff]  }
  0x51   : > { %430 = vst [vmem:[#allocation3 + $0x50] sm:$0x1] %v13001_v2  ;;  %431 = vst [vmem:[#allocation3 + $0x54] sm:$0xf] %v13001_v2  ;;  %v12468_v47 = vld [vmem:[%s17524_s1 + $0x128] ss:$12 sps:$4 sm:$0xff]  }
  0x52   : > { %432 = vst [vmem:[#allocation3 + $0x58] sm:$0xf] %v13001_v2  ;;  %433 = vst [vmem:[#allocation3 + $0x5c] sm:$0x1] %v13001_v2  ;;  %959 = vmatpush1.bf16.msra.mxu1 %v12459_v43  ;;  %1164 = vmatmul.mubr.bf16.vlgmr.msra.gmra.mrb[0].mxu0 %v592_v45  ;;  %v502_v48 = vld [vmem:[%s13136_s21 + $0x40] sm:$0xff]  ;;  %v508_v55 = vld [vmem:[%s13136_s21 + $0x70] sm:$0xff] }
  0x53   : > { %434 = vst [vmem:[#allocation3 + $0x60] sm:$0xf] %v13001_v2  ;;  %435 = vst [vmem:[#allocation3 + $0x64] sm:$0xf] %v13001_v2  ;;  %960 = vmatprep.subr.bf16.mxu1 %v12462_v44  ;;  %1173 = vmatprep.mubr.bf16.mxu0 %v13001_v2  ;;  %v12471_v50 = vld [vmem:[%s17524_s1 + $0x124] ss:$12 sps:$4 sm:$0xff]   ;;  %v595_v52 = vpack.c.bf16 %v505_v49, %v502_v48 }
  0x54   : > { %436 = vst [vmem:[#allocation3 + $0x68] sm:$0x1] %v13001_v2  ;;  %437 = vst [vmem:[#allocation3 + $0x6c] sm:$0xf] %v13001_v2  ;;  %v12474_v51 = vld [vmem:[%s17524_s1 + $0x140] ss:$12 sps:$4 sm:$0xff]  }
  0x55   : > { %438 = vst [vmem:[#allocation3 + $0x70] sm:$0xf] %v13001_v2  ;;  %439 = vst [vmem:[#allocation3 + $0x74] sm:$0x1] %v13001_v2  ;;  %v12477_v53 = vld [vmem:[%s17524_s1 + $0x13c] ss:$12 sps:$4 sm:$0xff]  }
  0x56   : > { %440 = vst [vmem:[#allocation3 + $0x78] sm:$0xf] %v13001_v2  ;;  %441 = vst [vmem:[#allocation3 + $0x7c] sm:$0xf] %v13001_v2  ;;  %961 = vmatpush1.bf16.msra.mxu1 %v12465_v46  ;;  %v12480_v54 = vld [vmem:[%s17524_s1 + $0x158] ss:$12 sps:$4 sm:$0xff]  }
  0x57   : > { %442 = vst [vmem:[#allocation3 + $0x80] sm:$0x1] %v13001_v2  ;;  %443 = vst [vmem:[#allocation3 + $0x84] sm:$0xf] %v13001_v2  ;;  %962 = vmatprep.subr.bf16.mxu1 %v12468_v47  ;;  %v511_v56 = vld [vmem:[%s13136_s21 + $0x88] sm:$0xff]  ;;  %v494_v61 = vld [vmem:[%s13136_s21] sm:$0xff] }
  0x58   : > { %444 = vst [vmem:[#allocation3 + $0x88] sm:$0xf] %v13001_v2  ;;  %445 = vst [vmem:[#allocation3 + $0x8c] sm:$0x1] %v13001_v2  ;;  %v12483_v57 = vld [vmem:[%s17524_s1 + $0x154] ss:$12 sps:$4 sm:$0xff]   ;;  %v598_v59 = vpack.c.bf16 %v511_v56, %v508_v55 }
  0x59   : > { %446 = vst [vmem:[#allocation3 + $0x90] sm:$0xf] %v13001_v2  ;;  %447 = vst [vmem:[#allocation3 + $0x94] sm:$0xf] %v13001_v2  ;;  %v12486_v58 = vld [vmem:[%s17524_s1 + $0x170] ss:$12 sps:$4 sm:$0xff]  }
  0x5a   : > { %448 = vst [vmem:[#allocation3 + $0x98] sm:$0x1] %v13001_v2  ;;  %449 = vst [vmem:[#allocation3 + $0x9c] sm:$0xf] %v13001_v2  ;;  %963 = vmatpush1.bf16.msra.mxu1 %v12471_v50  ;;  %1174 = vmatmul.mubr.bf16.gmra.mrb[4].mxu0 %v595_v52  ;;  %v12489_v60 = vld [vmem:[%s17524_s1 + $0x16c] ss:$12 sps:$4 sm:$0xff]  }
  0x5b   : > { %450 = vst [vmem:[#allocation3 + $0xa0] sm:$0xf] %v13001_v2  ;;  %451 = vst [vmem:[#allocation3 + $0xa4] sm:$0x1] %v13001_v2  ;;  %964 = vmatprep.subr.bf16.mxu1 %v12474_v51  ;;  %1183 = vmatprep.mubr.bf16.mxu0 %v13001_v2  ;;  %v497_v62 = vld [vmem:[%s13136_s21 + $0x18] sm:$0xff]  ;;  %v504_v0 = vld [vmem:[%s13136_s21 + $0x50] sm:$0xff] }
  0x5c   : > { %452 = vst [vmem:[#allocation3 + $0xa8] sm:$0xf] %v13001_v2  ;;  %453 = vst [vmem:[#allocation3 + $0xac] sm:$0xf] %v13001_v2  ;;  %v501_v63 = vld [vmem:[%s13136_s21 + $0x38] sm:$0xff]  ;;  %v590_v1 = vpack.c.bf16 %v497_v62, %v494_v61  ;;  %v514_v3 = vld [vmem:[%s13136_s21 + $0xa0] sm:$0xff] }
  0x5d   : > { %454 = vst [vmem:[#allocation3 + $0xb0] sm:$0x1] %v13001_v2  ;;  %455 = vst [vmem:[#allocation3 + $0xb4] sm:$0xf] %v13001_v2  ;;  %v517_v4 = vld [vmem:[%s13136_s21 + $0xb8] sm:$0xff]  ;;  %v594_v5 = vpack.c.bf16 %v504_v0, %v501_v63  ;;  %v500_v7 = vld [vmem:[%s13136_s21 + $0x30] sm:$0xff] }
  0x5e   : > { %456 = vst [vmem:[#allocation3 + $0xb8] sm:$0xf] %v13001_v2  ;;  %457 = vst [vmem:[#allocation3 + $0xbc] sm:$0x1] %v13001_v2  ;;  %965 = vmatpush1.bf16.msra.mxu1 %v12477_v53  ;;  %v601_v6 = vpack.c.bf16 %v517_v4, %v514_v3  ;;  %v503_v8 = vld [vmem:[%s13136_s21 + $0x48] sm:$0xff]  ;;  %v510_v10 = vld [vmem:[%s13136_s21 + $0x80] sm:$0xff] }
  0x5f   : > { %458 = vst [vmem:[#allocation3 + $0xc0] sm:$0xf] %v13001_v2  ;;  %459 = vst [vmem:[#allocation3 + $0xc4] sm:$0xf] %v13001_v2  ;;  %966 = vmatprep.subr.bf16.mxu1 %v12480_v54  ;;  %v507_v9 = vld [vmem:[%s13136_s21 + $0x68] sm:$0xff]  ;;  %v593_v11 = vpack.c.bf16 %v503_v8, %v500_v7  ;;  %v520_v12 = vld [vmem:[%s13136_s21 + $0xd0] sm:$0xff] }
  0x60   : > { %460 = vst [vmem:[#allocation3 + $0xc8] sm:$0x1] %v13001_v2  ;;  %461 = vst [vmem:[#allocation3 + $0xcc] sm:$0xf] %v13001_v2  ;;  %v523_v13 = vld [vmem:[%s13136_s21 + $0xe8] sm:$0xff]  ;;  %v597_v14 = vpack.c.bf16 %v510_v10, %v507_v9  ;;  %v506_v16 = vld [vmem:[%s13136_s21 + $0x60] sm:$0xff] }
  0x61   : > { %462 = vst [vmem:[#allocation3 + $0xd0] sm:$0xf] %v13001_v2  ;;  %463 = vst [vmem:[#allocation3 + $0xd4] sm:$0x1] %v13001_v2  ;;  %v604_v15 = vpack.c.bf16 %v523_v13, %v520_v12  ;;  %v509_v17 = vld [vmem:[%s13136_s21 + $0x78] sm:$0xff]  ;;  %v516_v19 = vld [vmem:[%s13136_s21 + $0xb0] sm:$0xff] }
  0x62   : > { %464 = vst [vmem:[#allocation4] sm:$0xf] %v13001_v2  ;;  %465 = vst [vmem:[#allocation4 + $0x4] sm:$0xf] %v13001_v2  ;;  %967 = vmatpush1.bf16.msra.mxu1 %v12483_v57  ;;  %1184 = vmatmul.mubr.bf16.gmra.mrb[8].mxu0 %v598_v59  ;;  %v513_v18 = vld [vmem:[%s13136_s21 + $0x98] sm:$0xff]  ;;  %v596_v20 = vpack.c.bf16 %v509_v17, %v506_v16  ;;  %v526_v21 = vld [vmem:[%s13136_s21 + $0x100] sm:$0xff] }
  0x63   : > { %466 = vst [vmem:[#allocation4 + $0x8] sm:$0x1] %v13001_v2  ;;  %467 = vst [vmem:[#allocation4 + $0xc] sm:$0xf] %v13001_v2  ;;  %968 = vmatprep.subr.bf16.mxu1 %v12486_v58  ;;  %1193 = vmatprep.mubr.bf16.mxu0 %v13001_v2  ;;  %v529_v22 = vld [vmem:[%s13136_s21 + $0x118] sm:$0xff]  ;;  %v600_v23 = vpack.c.bf16 %v516_v19, %v513_v18  ;;  %v512_v25 = vld [vmem:[%s13136_s21 + $0x90] sm:$0xff] }
  0x64   : > { %468 = vst [vmem:[#allocation4 + $0x10] sm:$0xf] %v13001_v2  ;;  %469 = vst [vmem:[#allocation4 + $0x14] sm:$0x1] %v13001_v2  ;;  %v607_v24 = vpack.c.bf16 %v529_v22, %v526_v21  ;;  %v515_v26 = vld [vmem:[%s13136_s21 + $0xa8] sm:$0xff]  ;;  %v522_v28 = vld [vmem:[%s13136_s21 + $0xe0] sm:$0xff] }
  0x65   : > { %470 = vst [vmem:[#allocation4 + $0x18] sm:$0xf] %v13001_v2  ;;  %471 = vst [vmem:[#allocation4 + $0x1c] sm:$0xf] %v13001_v2  ;;  %v519_v27 = vld [vmem:[%s13136_s21 + $0xc8] sm:$0xff]  ;;  %v599_v29 = vpack.c.bf16 %v515_v26, %v512_v25  ;;  %v532_v30 = vld [vmem:[%s13136_s21 + $0x130] sm:$0xff] }
  0x66   : > { %472 = vst [vmem:[#allocation4 + $0x20] sm:$0x1] %v13001_v2  ;;  %473 = vst [vmem:[#allocation4 + $0x24] sm:$0xf] %v13001_v2  ;;  %969 = vmatpush1.bf16.msra.mxu1 %v12489_v60  ;;  %v535_v31 = vld [vmem:[%s13136_s21 + $0x148] sm:$0xff]  ;;  %v603_v32 = vpack.c.bf16 %v522_v28, %v519_v27  ;;  %v518_v34 = vld [vmem:[%s13136_s21 + $0xc0] sm:$0xff] }
  0x67   : > { %474 = vst [vmem:[#allocation4 + $0x28] sm:$0xf] %v13001_v2  ;;  %475 = vst [vmem:[#allocation4 + $0x2c] sm:$0x1] %v13001_v2  ;;  %v610_v33 = vpack.c.bf16 %v535_v31, %v532_v30  ;;  %v521_v35 = vld [vmem:[%s13136_s21 + $0xd8] sm:$0xff]  ;;  %v528_v37 = vld [vmem:[%s13136_s21 + $0x110] sm:$0xff] }
  0x68   : > { %476 = vst [vmem:[#allocation4 + $0x30] sm:$0xf] %v13001_v2  ;;  %477 = vst [vmem:[#allocation4 + $0x34] sm:$0xf] %v13001_v2  ;;  %v525_v36 = vld [vmem:[%s13136_s21 + $0xf8] sm:$0xff]  ;;  %v602_v38 = vpack.c.bf16 %v521_v35, %v518_v34  ;;  %v538_v39 = vld [vmem:[%s13136_s21 + $0x160] sm:$0xff] }
  0x69   : > { %478 = vst [vmem:[#allocation4 + $0x38] sm:$0x1] %v13001_v2  ;;  %479 = vst [vmem:[#allocation4 + $0x3c] sm:$0xf] %v13001_v2  ;;  %971 = vmatmul.mubr.bf16.vlgmr.msra.gmra.mrb[0].mxu1 %v590_v1  ;;  %v541_v40 = vld [vmem:[%s13136_s21 + $0x178] sm:$0xff]  ;;  %v606_v41 = vpack.c.bf16 %v528_v37, %v525_v36  ;;  %v524_v43 = vld [vmem:[%s13136_s21 + $0xf0] sm:$0xff] }
  0x6a   : > { %480 = vst [vmem:[#allocation4 + $0x40] sm:$0xf] %v13001_v2  ;;  %481 = vst [vmem:[#allocation4 + $0x44] sm:$0x1] %v13001_v2  ;;  %980 = vmatprep.mubr.bf16.mxu1 %v594_v5  ;;  %1194 = vmatmul.mubr.bf16.gmra.mrb[12].mxu0 %v601_v6  ;;  %v613_v42 = vpack.c.bf16 %v541_v40, %v538_v39  ;;  %v527_v44 = vld [vmem:[%s13136_s21 + $0x108] sm:$0xff]  ;;  %v534_v46 = vld [vmem:[%s13136_s21 + $0x140] sm:$0xff] }
  0x6b   : > { %482 = vst [vmem:[#allocation4 + $0x48] sm:$0xf] %v13001_v2  ;;  %483 = vst [vmem:[#allocation4 + $0x4c] sm:$0xf] %v13001_v2  ;;  %1203 = vmatprep.mubr.bf16.mxu0 %v13001_v2  ;;  %v531_v45 = vld [vmem:[%s13136_s21 + $0x128] sm:$0xff]  ;;  %v605_v47 = vpack.c.bf16 %v527_v44, %v524_v43  ;;  %v544_v48 = vld [vmem:[%s13136_s21 + $0x190] sm:$0xff] }
  0x6c   : > { %484 = vst [vmem:[#allocation4 + $0x50] sm:$0x1] %v13001_v2  ;;  %485 = vst [vmem:[#allocation4 + $0x54] sm:$0xf] %v13001_v2  ;;  %v547_v49 = vld [vmem:[%s13136_s21 + $0x1a8] sm:$0xff]  ;;  %v609_v50 = vpack.c.bf16 %v534_v46, %v531_v45  ;;  %v530_v52 = vld [vmem:[%s13136_s21 + $0x120] sm:$0xff] }
  0x6d   : > { %486 = vst [vmem:[#allocation4 + $0x58] sm:$0xf] %v13001_v2  ;;  %487 = vst [vmem:[#allocation4 + $0x5c] sm:$0x1] %v13001_v2  ;;  %v616_v51 = vpack.c.bf16 %v547_v49, %v544_v48  ;;  %v533_v53 = vld [vmem:[%s13136_s21 + $0x138] sm:$0xff]  ;;  %v540_v55 = vld [vmem:[%s13136_s21 + $0x170] sm:$0xff] }
  0x6e   : > { %488 = vst [vmem:[#allocation4 + $0x60] sm:$0xf] %v13001_v2  ;;  %489 = vst [vmem:[#allocation4 + $0x64] sm:$0xf] %v13001_v2  ;;  %v537_v54 = vld [vmem:[%s13136_s21 + $0x158] sm:$0xff]  ;;  %v608_v56 = vpack.c.bf16 %v533_v53, %v530_v52  ;;  %v550_v57 = vld [vmem:[%s13136_s21 + $0x1c0] sm:$0xff] }
  0x6f   : > { %490 = vst [vmem:[#allocation4 + $0x68] sm:$0x1] %v13001_v2  ;;  %491 = vst [vmem:[#allocation4 + $0x6c] sm:$0xf] %v13001_v2  ;;  %v553_v58 = vld [vmem:[%s13136_s21 + $0x1d8] sm:$0xff]  ;;  %v612_v59 = vpack.c.bf16 %v540_v55, %v537_v54  ;;  %v536_v61 = vld [vmem:[%s13136_s21 + $0x150] sm:$0xff] }
  0x70   : > { %492 = vst [vmem:[#allocation4 + $0x70] sm:$0xf] %v13001_v2  ;;  %493 = vst [vmem:[#allocation4 + $0x74] sm:$0x1] %v13001_v2  ;;  %v619_v60 = vpack.c.bf16 %v553_v58, %v550_v57  ;;  %v539_v62 = vld [vmem:[%s13136_s21 + $0x168] sm:$0xff]  ;;  %v546_v0 = vld [vmem:[%s13136_s21 + $0x1a0] sm:$0xff] }
  0x71   : > { %981 = vmatmul.mubr.bf16.gmra.mrb[4].mxu1 %v593_v11  ;;  %v543_v63 = vld [vmem:[%s13136_s21 + $0x188] sm:$0xff]  ;;  %v611_v1 = vpack.c.bf16 %v539_v62, %v536_v61  ;;  %v556_v3 = vld [vmem:[%s13136_s21 + $0x1f0] sm:$0xff]  ;;  %v542_v7 = vld [vmem:[%s13136_s21 + $0x180] sm:$0xff]  ;;  %vm1776_vm0 = vcmask 1043456   ;;  %vm1777_vm1 = vsmask.f32 7938 }
  0x72   : > { %990 = vmatprep.mubr.bf16.mxu1 %v597_v14  ;;  %1204 = vmatmul.mubr.bf16.gmra.mrb[16].mxu0 %v604_v15  ;;  %v559_v4 = vld [vmem:[%s13136_s21 + $0x208] sm:$0xff]  ;;  %v615_v5 = vpack.c.bf16 %v546_v0, %v543_v63  ;;  %v545_v8 = vld [vmem:[%s13136_s21 + $0x198] sm:$0xff]  ;;  %v552_v10 = vld [vmem:[%s13136_s21 + $0x1d0] sm:$0xff]  ;;  %vm1452_vm2 = vsmask.f32 256  ;;  %vm1783_vm4 = vcmask 1040384  }
  0x73   : > { %1213 = vmatprep.mubr.bf16.mxu0 %v13001_v2  ;;  %v622_v6 = vpack.c.bf16 %v559_v4, %v556_v3  ;;  %v549_v9 = vld [vmem:[%s13136_s21 + $0x1b8] sm:$0xff]  ;;  %v614_v11 = vpack.c.bf16 %v545_v8, %v542_v7  ;;  %v562_v12 = vld [vmem:[%s13136_s21 + $0x220] sm:$0xff]  ;;  %v548_v16 = vld [vmem:[%s13136_s21 + $0x1b0] sm:$0xff]  ;;  %v688_v7 = vlaneseq  ;;  %vm1453_vm3 = vsmask.f32 4368 }
  0x74   : > { %v565_v13 = vld [vmem:[%s13136_s21 + $0x238] sm:$0xff]  ;;  %v618_v14 = vpack.c.bf16 %v552_v10, %v549_v9  ;;  %v551_v17 = vld [vmem:[%s13136_s21 + $0x1c8] sm:$0xff]  ;;  %v558_v19 = vld [vmem:[%s13136_s21 + $0x200] sm:$0xff] }
  0x75   : > { %v625_v15 = vpack.c.bf16 %v565_v13, %v562_v12  ;;  %v555_v18 = vld [vmem:[%s13136_s21 + $0x1e8] sm:$0xff]  ;;  %v568_v21 = vld [vmem:[%s13136_s21 + $0x250] sm:$0xff]  ;;  %v554_v25 = vld [vmem:[%s13136_s21 + $0x1e0] sm:$0xff]  ;;  %v689_v10 = vshrl.u32 %v688_v7, 7 }
  0x76   : > { %v571_v22 = vld [vmem:[%s13136_s21 + $0x268] sm:$0xff]  ;;  %v557_v26 = vld [vmem:[%s13136_s21 + $0x1f8] sm:$0xff]  ;;  %v564_v28 = vld [vmem:[%s13136_s21 + $0x230] sm:$0xff] }
  0x77   : > { %v561_v27 = vld [vmem:[%s13136_s21 + $0x218] sm:$0xff]  ;;  %v574_v30 = vld [vmem:[%s13136_s21 + $0x280] sm:$0xff]  ;;  %v560_v34 = vld [vmem:[%s13136_s21 + $0x210] sm:$0xff]  ;;  %v690_v13 = vsub.s32 0, %v689_v10 }
  0x78   : > { %v577_v31 = vld [vmem:[%s13136_s21 + $0x298] sm:$0xff]  ;;  %v563_v35 = vld [vmem:[%s13136_s21 + $0x228] sm:$0xff]  ;;  %v570_v37 = vld [vmem:[%s13136_s21 + $0x260] sm:$0xff] }
  0x79   : > { %991 = vmatmul.mubr.bf16.gmra.mrb[8].mxu1 %v596_v20  ;;  %v617_v20 = vpack.c.bf16 %v551_v17, %v548_v16  ;;  %v567_v36 = vld [vmem:[%s13136_s21 + $0x248] sm:$0xff]  ;;  %v580_v39 = vld [vmem:[%s13136_s21 + $0x2b0] sm:$0xff]  ;;  %v566_v43 = vld [vmem:[%s13136_s21 + $0x240] sm:$0xff] }
  0x7a   : > { %1000 = vmatprep.mubr.bf16.mxu1 %v600_v23  ;;  %1214 = vmatmul.mubr.bf16.gmra.mrb[20].mxu0 %v607_v24  ;;  %v621_v23 = vpack.c.bf16 %v558_v19, %v555_v18  ;;  %v628_v24 = vpack.c.bf16 %v571_v22, %v568_v21  ;;  %v583_v40 = vld [vmem:[%s13136_s21 + $0x2c8] sm:$0xff]  ;;  %v569_v44 = vld [vmem:[%s13136_s21 + $0x258] sm:$0xff]  ;;  %v576_v46 = vld [vmem:[%s13136_s21 + $0x290] sm:$0xff] }
  0x7b   : > { %1223 = vmatprep.mubr.bf16.mxu0 %v13001_v2  ;;  %v573_v45 = vld [vmem:[%s13136_s21 + $0x278] sm:$0xff]  ;;  %v586_v48 = vld [vmem:[%s13136_s21 + $0x2e0] sm:$0xff]  ;;  %v572_v52 = vld [vmem:[%s13136_s21 + $0x270] sm:$0xff] }
  0x7c   : > { %v589_v49 = vld [vmem:[%s13136_s21 + $0x2f8] sm:$0xff]  ;;  %v575_v53 = vld [vmem:[%s13136_s21 + $0x288] sm:$0xff]  ;;  %v582_v55 = vld [vmem:[%s13136_s21 + $0x2c0] sm:$0xff] }
  0x7d   : > { %v579_v54 = vld [vmem:[%s13136_s21 + $0x2a8] sm:$0xff]  ;;  %v581_v58 = vld [vmem:[%s13136_s21 + $0x2b8] sm:$0xff]  ;;  %v584_v63 = vld [vmem:[%s13136_s21 + $0x2d0] sm:$0xff] }
  0x7e   : > { %v633_v57 = vpack.c.bf16 %v582_v55, %v579_v54  ;;  %v587_v0 = vld [vmem:[%s13136_s21 + $0x2e8] sm:$0xff]  ;;  %vm13591_vm5 = vmand %vm1776_vm0, %vm1777_vm1 }
  0x7f   : > { %vm13599_vm6 = vmor %vm1452_vm2, %vm1453_vm3 }
  0x80   : > { %vm13608_vm7 = vmand %vm1783_vm4, %vm1452_vm2 }
  0x81   : > { %1001 = vmatmul.mubr.bf16.gmra.mrb[12].mxu1 %v599_v29  ;;  %v620_v29 = vpack.c.bf16 %v557_v26, %v554_v25 }
  0x82   : > { %1010 = vmatprep.mubr.bf16.mxu1 %v603_v32  ;;  %1224 = vmatmul.mubr.bf16.gmra.mrb[24].mxu0 %v610_v33  ;;  %v624_v32 = vpack.c.bf16 %v564_v28, %v561_v27  ;;  %v631_v33 = vpack.c.bf16 %v577_v31, %v574_v30 }
  0x83   : > { %1233 = vmatprep.mubr.bf16.mxu0 %v13001_v2 }
  0x89   : > { %1011 = vmatmul.mubr.bf16.gmra.mrb[16].mxu1 %v602_v38  ;;  %v623_v38 = vpack.c.bf16 %v563_v35, %v560_v34 }
  0x8a   : > { %1020 = vmatprep.mubr.bf16.mxu1 %v606_v41  ;;  %1234 = vmatmul.mubr.bf16.gmra.mrb[28].mxu0 %v613_v42  ;;  %v627_v41 = vpack.c.bf16 %v570_v37, %v567_v36  ;;  %v634_v42 = vpack.c.bf16 %v583_v40, %v580_v39 }
  0x8b   : > { %1243 = vmatprep.mubr.bf16.mxu0 %v13001_v2 }
  0x91   : > { %1021 = vmatmul.mubr.bf16.gmra.mrb[20].mxu1 %v605_v47  ;;  %v626_v47 = vpack.c.bf16 %v569_v44, %v566_v43 }
  0x92   : > { %1030 = vmatprep.mubr.bf16.mxu1 %v609_v50  ;;  %1244 = vmatmul.mubr.bf16.gmra.mrb[32].mxu0 %v616_v51  ;;  %v630_v50 = vpack.c.bf16 %v576_v46, %v573_v45  ;;  %v637_v51 = vpack.c.bf16 %v589_v49, %v586_v48 }
  0x93   : > { %1253 = vmatprep.mubr.bf16.mxu0 %v13001_v2 }
  0x99   : > { %1031 = vmatmul.mubr.bf16.gmra.mrb[24].mxu1 %v608_v56  ;;  %v629_v56 = vpack.c.bf16 %v575_v53, %v572_v52  ;;  %v2310_v52 = vld [vmem:[#allocation3 + $0xc] sm:$0xf] }
  0x9a   : > { %1040 = vmatprep.mubr.bf16.mxu1 %v612_v59  ;;  %1254 = vmatmul.mubr.bf16.gmra.mrb[36].mxu0 %v619_v60  ;;  %v585_v59 = vld [vmem:[%s13136_s21 + $0x2d8] sm:$0xff]  ;;  %v588_v60 = vld [vmem:[%s13136_s21 + $0x2f0] sm:$0xff] }
  0x9b   : > { %1263 = vmatprep.mubr.bf16.mxu0 %v13001_v2  ;;  %v636_v62 = vpack.c.bf16 %v588_v60, %v585_v59 }
  0xa1   : > { %1041 = vmatmul.mubr.bf16.gmra.mrb[28].mxu1 %v611_v1  ;;  %v635_v1 = vpack.c.bf16 %v587_v0, %v584_v63  ;;  %v1779_v63 = vld [vmem:[#allocation2 + $0x18] sm:$0xf] }
  0xa2   : > { %1050 = vmatprep.mubr.bf16.mxu1 %v615_v5  ;;  %1264 = vmatmul.mubr.bf16.gmra.mrb[40].mxu0 %v622_v6 }
  0xa3   : > { %1273 = vmatprep.mubr.bf16.mxu0 %v13001_v2 }
  0xa9   : > { %1051 = vmatmul.mubr.bf16.gmra.mrb[32].mxu1 %v614_v11 }
  0xaa   : > { %1060 = vmatprep.mubr.bf16.mxu1 %v618_v14  ;;  %1274 = vmatmul.mubr.bf16.gmra.mrb[44].mxu0 %v625_v15  ;;  %v686_v14 = vld [vmem:[%s17525_s2 + $0x1] sm:$0x3]  ;;  %v694_v15 = vsub.s32 1, %v689_v10 }
  0xab   : > { %1283 = vmatprep.mubr.bf16.mxu0 %v13001_v2  ;;  %v13567_v18 = vrot.slane %v686_v14, %v690_v13 }
  0xb1   : > { %1061 = vmatmul.mubr.bf16.gmra.mrb[36].mxu1 %v617_v20  ;;  %v13571_v20 = vrot.slane %v686_v14, %v694_v15  ;;  %v2314_v14 = vld [vmem:[#allocation3 + $0x14] sm:$0x1] }
  0xb2   : > { %1070 = vmatprep.mubr.bf16.mxu1 %v621_v23  ;;  %1284 = vmatmul.mubr.bf16.gmra.mrb[48].mxu0 %v628_v24 }
  0xb3   : > { %1293 = vmatprep.mubr.bf16.mxu0 %v13001_v2 }
  0xb9   : > { %1071 = vmatmul.mubr.bf16.gmra.mrb[40].mxu1 %v620_v29 }
  0xba   : > { %1080 = vmatprep.mubr.bf16.mxu1 %v624_v32  ;;  %1294 = vmatmul.mubr.bf16.gmra.mrb[52].mxu0 %v631_v33 }
  0xbb   : > { %1303 = vmatprep.mubr.bf16.mxu0 %v13001_v2 }
  0xc1   : > { %1081 = vmatmul.mubr.bf16.gmra.mrb[44].mxu1 %v623_v38 }
  0xc2   : > { %1090 = vmatprep.mubr.bf16.mxu1 %v627_v41  ;;  %1304 = vmatmul.mubr.bf16.gmra.mrb[56].mxu0 %v634_v42 }
  0xc3   : > { %1313 = vmatprep.mubr.bf16.mxu0 %v13001_v2  ;;  %v578_v2 = vld [vmem:[%s13136_s21 + $0x2a0] sm:$0xff] }
  0xc4   : > { %v632_v61 = vpack.c.bf16 %v581_v58, %v578_v2 }
  0xc9   : > { %1091 = vmatmul.mubr.bf16.gmra.mrb[48].mxu1 %v626_v47 }
  0xca   : > { %1100 = vmatprep.mubr.bf16.mxu1 %v630_v50  ;;  %1314 = vmatmul.mubr.bf16.gmra.mrb[60].mxu0 %v637_v51 }
  0xd1   : > { %1101 = vmatmul.mubr.bf16.gmra.mrb[52].mxu1 %v629_v56 }
  0xd2   : > { %1110 = vmatprep.mubr.bf16.mxu1 %v633_v57 }
  0xd9   : > { %1111 = vmatmul.mubr.bf16.gmra.mrb[56].mxu1 %v632_v61 }
  0xda   : > { %1120 = vmatprep.mubr.bf16.mxu1 %v636_v62 }
  0xe1   : > { %1121 = vmatmul.mubr.bf16.gmra.mrb[60].mxu1 %v635_v1 }
 0x125   : > { %v1165_v3 = vpop.f32.mrb[0].mxu0 }
 0x126   : > { %v1167_v4 = vpop.f32.mrb[1].mxu0 }
 0x127   : > { %v1169_v5 = vpop.f32.mrb[2].mxu0 }
 0x128   : > { %v1171_v6 = vpop.f32.mrb[3].mxu0 }
 0x12d   : > { %v1175_v8 = vpop.f32.mrb[4].mxu0 }
 0x12e   : > { %v13554_v9 = vpop.f32.mrb[5].mxu0 }
 0x12f   : > { %v13556_v11 = vpop.f32.mrb[6].mxu0 }
 0x130   : > { %v13558_v12 = vpop.f32.mrb[7].mxu0 }
 0x135   : > { %v13563_v16 = vpop.f32.mrb[8].mxu0 }
 0x136   : > { %v13565_v17 = vpop.f32.mrb[9].mxu0 }
 0x137   : > { %v13569_v19 = vpop.f32.mrb[10].mxu0 }
 0x138   : > { %v13573_v21 = vpop.f32.mrb[11].mxu0 }
 0x13c   : > { %v972_v22 = vpop.f32.mrb[0].mxu1 }
 0x13d   : > { %v973_v23 = vadd.f32 %v972_v22, %v13567_v18  ;;  %v974_v24 = vpop.f32.mrb[1].mxu1  ;;  %v13578_v30 = vpop.f32.mrb[12].mxu0 }
 0x13e   : > { %v975_v25 = vadd.f32 %v974_v24, %v13571_v20  ;;  %v976_v26 = vpop.f32.mrb[2].mxu1  ;;  %v13581_v33 = vpop.f32.mrb[13].mxu0  ;;  %v1785_v24 = vld [vmem:[#allocation2 + $0x20] sm:$0x1] }
 0x13f   : > { %v1166_v27 = vadd.f32 %v1165_v3, %v973_v23  ;;  %v977_v28 = vadd.f32 %v976_v26, %v13567_v18  ;;  %v978_v29 = vpop.f32.mrb[3].mxu1  ;;  %v13583_v36 = vpop.f32.mrb[14].mxu0 }
 0x140   : > { %v1168_v31 = vadd.f32 %v1167_v4, %v975_v25  ;;  %v979_v32 = vadd.f32 %v978_v29, %v13571_v20  ;;  %v13585_v39 = vpop.f32.mrb[15].mxu0 }
 0x141   : > { %v1324_v34 = vmax.f32 %v1166_v27, 0.0  ;;  %v1170_v35 = vadd.f32 %v1169_v5, %v977_v28 }
 0x142   : > { %v11466_v37 = vpack.c.bf16 %v1168_v31, %v1168_v31  ;;  %v1172_v38 = vadd.f32 %v1171_v6, %v979_v32 }
 0x143   : > { %v11434_v40 = vpack.c.bf16 %v1324_v34, %v1324_v34  ;;  %v1325_v41 = vmax.f32 %v1170_v35, 0.0 }
 0x144   : > { %v1990_v42 = vshrl.u32 %v11466_v37, 16  ;;  %v1993_v43 = vshll.u32 %v11466_v37, 16  ;;  %v11467_v44 = vpack.c.bf16 %v1172_v38, %v1172_v38  ;;  %v982_v45 = vpop.f32.mrb[4].mxu1 }
 0x145   : > { %v1456_v46 = vshrl.u32 %v11434_v40, 16  ;;  %v1459_v47 = vshll.u32 %v11434_v40, 16  ;;  %v11435_v48 = vpack.c.bf16 %v1325_v41, %v1325_v41  ;;  %v983_v49 = vadd.f32 %v982_v45, %v13567_v18  ;;  %v984_v50 = vpop.f32.mrb[5].mxu1  ;;  %v13595_v62 = vpop.f32.mrb[16].mxu0 }
 0x146   : > { %v1992_v51 = vrot.slane %v1990_v42, 7  ;;  %v1998_v53 = vshrl.u32 %v11467_v44, 16  ;;  %v2001_v54 = vshll.u32 %v11467_v44, 16  ;;  %v985_v55 = vadd.f32 %v984_v50, %v13571_v20  ;;  %v986_v56 = vpop.f32.mrb[6].mxu1  ;;  %v13604_v6 = vpop.f32.mrb[17].mxu0 }
 0x147   : > { %v1458_v57 = vrot.slane %v1456_v46, 7  ;;  %v1464_v58 = vshrl.u32 %v11435_v48, 16  ;;  %v1467_v59 = vshll.u32 %v11435_v48, 16  ;;  %v1176_v60 = vadd.f32 %v1175_v8, %v983_v49  ;;  %v988_v61 = vpop.f32.mrb[7].mxu1  ;;  %v13612_v22 = vpop.f32.mrb[18].mxu0 }
 0x148   : > { %v1995_v0 = vor.u32 %v1993_v43, %v1992_v51  ;;  %v1996_v1 = vrot.slane %v1992_v51, 4  ;;  %v2000_v4 = vrot.slane %v1998_v53, 7  ;;  %v1178_v5 = vadd.f32 %v13554_v9, %v985_v55  ;;  %v13616_v27 = vpop.f32.mrb[19].mxu0 }
 0x149   : > { %v1461_v7 = vor.u32 %v1459_v47, %v1458_v57  ;;  %v1462_v10 = vrot.slane %v1458_v57, 4  ;;  %v1466_v8 = vrot.slane %v1464_v58, 7  ;;  %v1326_v15 = vmax.f32 %v1176_v60, 0.0  ;;  %v1788_v58 = vld [vmem:[#allocation2 + $0x24] sm:$0xf] }
 0x14a   : > { %v2311_v23 = vsel %vm13591_vm5, %v1995_v0, %v2310_v52  ;;  %v2003_v9 = vor.u32 %v2001_v54, %v2000_v4  ;;  %v2005_v25 = vrot.slane %v2000_v4, 4  ;;  %v11468_v26 = vpack.c.bf16 %v1178_v5, %v1178_v5  ;;  %v2317_v52 = vld [vmem:[#allocation3 + $0x18] sm:$0xf] }
 0x14b   : > { %v1780_v28 = vsel %vm13591_vm5, %v1461_v7, %v1779_v63  ;;  %2312 = vst [vmem:[#allocation3 + $0xc] sm:$0xf] %v2311_v23  ;;  %v1469_v29 = vor.u32 %v1467_v59, %v1466_v8  ;;  %v1471_v31 = vrot.slane %v1466_v8, 4  ;;  %v11436_v32 = vpack.c.bf16 %v1326_v15, %v1326_v15 }
 0x14c   : > { %1781 = vst [vmem:[#allocation2 + $0x18] sm:$0xf] %v1780_v28  ;;  %v2004_v34 = vsel %vm13599_vm6, %v1996_v1, %v2003_v9  ;;  %v2315_v35 = vsel %vm13608_vm7, %v2005_v25, %v2314_v14  ;;  %v2007_v37 = vshrl.u32 %v11468_v26, 16  ;;  %v992_v38 = vpop.f32.mrb[8].mxu1  ;;  %v2010_v43 = vshll.u32 %v11468_v26, 16 }
 0x14d   : > { %v1470_v40 = vsel %vm13599_vm6, %v1462_v10, %v1469_v29  ;;  %v1786_v41 = vsel %vm13608_vm7, %v1471_v31, %v1785_v24  ;;  %2313 = vst [vmem:[#allocation3 + $0x10] sm:$0xf] %v2004_v34  ;;  %2316 = vst [vmem:[#allocation3 + $0x14] sm:$0x1] %v2315_v35  ;;  %v1473_v42 = vshrl.u32 %v11436_v32, 16  ;;  %v994_v44 = vpop.f32.mrb[9].mxu1  ;;  %v987_v46 = vadd.f32 %v986_v56, %v13567_v18 }
 0x14e   : > { %1782 = vst [vmem:[#allocation2 + $0x1c] sm:$0xf] %v1470_v40  ;;  %1787 = vst [vmem:[#allocation2 + $0x20] sm:$0x1] %v1786_v41  ;;  %v13628_v45 = vrot.slane %v2007_v37, 7  ;;  %v989_v47 = vadd.f32 %v988_v61, %v13571_v20  ;;  %v993_v48 = vadd.f32 %v992_v38, %v13567_v18  ;;  %v996_v49 = vpop.f32.mrb[10].mxu1  ;;  %v995_v53 = vadd.f32 %v994_v44, %v13571_v20 }
 0x14f   : > { %v13633_v50 = vrot.slane %v1473_v42, 7  ;;  %v1476_v51 = vshll.u32 %v11436_v32, 16  ;;  %v997_v54 = vadd.f32 %v996_v49, %v13567_v18  ;;  %v998_v55 = vpop.f32.mrb[11].mxu1  ;;  %v13637_v57 = vpop.f32.mrb[20].mxu0  ;;  %v1180_v60 = vadd.f32 %v13556_v11, %v987_v46  ;;  %v2321_v40 = vld [vmem:[#allocation3 + $0x20] sm:$0x1] }
 0x150   : > { %v2012_v59 = vor.u32 %v2010_v43, %v13628_v45  ;;  %v2013_v56 = vrot.slane %v13628_v45, 4  ;;  %v1182_v61 = vadd.f32 %v13558_v12, %v989_v47  ;;  %v13643_v63 = vpop.f32.mrb[21].mxu0  ;;  %v1186_v4 = vadd.f32 %v13563_v16, %v993_v48 }
 0x151   : > { %v1478_v0 = vor.u32 %v1476_v51, %v13633_v50  ;;  %v1479_v1 = vrot.slane %v13633_v50, 4  ;;  %v1188_v5 = vadd.f32 %v13565_v17, %v995_v53  ;;  %v13649_v7 = vpop.f32.mrb[22].mxu0  ;;  %v1327_v8 = vmax.f32 %v1180_v60, 0.0 }
 0x152   : > { %v2318_v10 = vsel %vm13591_vm5, %v2012_v59, %v2317_v52  ;;  %v11469_v14 = vpack.c.bf16 %v1182_v61, %v1182_v61  ;;  %v1190_v11 = vadd.f32 %v13569_v19, %v997_v54  ;;  %v13654_v12 = vpop.f32.mrb[23].mxu0  ;;  %v1328_v23 = vmax.f32 %v1186_v4, 0.0  ;;  %v2324_v52 = vld [vmem:[#allocation3 + $0x24] sm:$0xf]  ;;  %v1792_v54 = vld [vmem:[#allocation2 + $0x2c] sm:$0x1] }
 0x153   : > { %v1789_v15 = vsel %vm13591_vm5, %v1478_v0, %v1788_v58  ;;  %2319 = vst [vmem:[#allocation3 + $0x18] sm:$0xf] %v2318_v10  ;;  %v11470_v24 = vpack.c.bf16 %v1188_v5, %v1188_v5  ;;  %v999_v16 = vadd.f32 %v998_v55, %v13571_v20  ;;  %v11437_v17 = vpack.c.bf16 %v1327_v8, %v1327_v8  ;;  %v1795_v8 = vld [vmem:[#allocation2 + $0x30] sm:$0xf] }
 0x154   : > { %1790 = vst [vmem:[#allocation2 + $0x24] sm:$0xf] %v1789_v15  ;;  %v2015_v9 = vshrl.u32 %v11469_v14, 16  ;;  %v2018_v25 = vshll.u32 %v11469_v14, 16  ;;  %v1329_v26 = vmax.f32 %v1190_v11, 0.0  ;;  %v1002_v28 = vpop.f32.mrb[12].mxu1  ;;  %v11438_v29 = vpack.c.bf16 %v1328_v23, %v1328_v23 }
 0x155   : > { %v2024_v31 = vshrl.u32 %v11470_v24, 16  ;;  %v2027_v32 = vshll.u32 %v11470_v24, 16  ;;  %v1192_v19 = vadd.f32 %v13573_v21, %v999_v16  ;;  %v1004_v34 = vpop.f32.mrb[13].mxu1  ;;  %v1481_v35 = vshrl.u32 %v11437_v17, 16  ;;  %v13662_v48 = vpop.f32.mrb[24].mxu0 }
 0x156   : > { %v1484_v37 = vshll.u32 %v11437_v17, 16  ;;  %v2017_v38 = vrot.slane %v2015_v9, 7  ;;  %v11439_v41 = vpack.c.bf16 %v1329_v26, %v1329_v26  ;;  %v1006_v42 = vpop.f32.mrb[14].mxu1  ;;  %v1490_v43 = vshrl.u32 %v11438_v29, 16  ;;  %v13664_v53 = vpop.f32.mrb[25].mxu0 }
 0x157   : > { %v1493_v44 = vshll.u32 %v11438_v29, 16  ;;  %v13660_v45 = vrot.slane %v2024_v31, 7  ;;  %v11471_v46 = vpack.c.bf16 %v1192_v19, %v1192_v19  ;;  %v1008_v47 = vpop.f32.mrb[15].mxu1  ;;  %v1483_v49 = vrot.slane %v1481_v35, 7  ;;  %v13668_v61 = vpop.f32.mrb[26].mxu0 }
 0x158   : > { %v2020_v50 = vor.u32 %v2018_v25, %v2017_v38  ;;  %v2022_v51 = vrot.slane %v2017_v38, 4  ;;  %v1498_v21 = vshrl.u32 %v11439_v41, 16  ;;  %v1492_v55 = vrot.slane %v1490_v43, 7  ;;  %v13674_v14 = vpop.f32.mrb[27].mxu0  ;;  %v1799_v17 = vld [vmem:[#allocation2 + $0x38] sm:$0x1] }
 0x159   : > { %v2029_v58 = vor.u32 %v2027_v32, %v13660_v45  ;;  %v2030_v59 = vrot.slane %v13660_v45, 4  ;;  %v1501_v60 = vshll.u32 %v11439_v41, 16  ;;  %v1486_v0 = vor.u32 %v1484_v37, %v1483_v49  ;;  %v2328_v45 = vld [vmem:[#allocation3 + $0x2c] sm:$0x1] }
 0x15a   : > { %v1488_v4 = vrot.slane %v1483_v49, 4  ;;  %v2021_v5 = vsel %vm13599_vm6, %v2013_v56, %v2020_v50  ;;  %v2322_v10 = vsel %vm13608_vm7, %v2022_v51, %v2321_v40  ;;  %v1495_v11 = vor.u32 %v1493_v44, %v1492_v55 }
 0x15b   : > { %2320 = vst [vmem:[#allocation3 + $0x1c] sm:$0xf] %v2021_v5  ;;  %2323 = vst [vmem:[#allocation3 + $0x20] sm:$0x1] %v2322_v10  ;;  %v1496_v15 = vrot.slane %v1492_v55, 4  ;;  %v2325_v23 = vsel %vm13591_vm5, %v2029_v58, %v2324_v52  ;;  %v1500_v24 = vrot.slane %v1498_v21, 7  ;;  %v1487_v16 = vsel %vm13599_vm6, %v1479_v1, %v1486_v0 }
 0x15c   : > { %v1793_v56 = vsel %vm13608_vm7, %v1488_v4, %v1792_v54  ;;  %2326 = vst [vmem:[#allocation3 + $0x24] sm:$0xf] %v2325_v23  ;;  %v2032_v9 = vshrl.u32 %v11471_v46, 16  ;;  %v2035_v25 = vshll.u32 %v11471_v46, 16  ;;  %v1012_v26 = vpop.f32.mrb[16].mxu1  ;;  %v1796_v29 = vsel %vm13591_vm5, %v1495_v11, %v1795_v8 }
 0x15d   : > { %1791 = vst [vmem:[#allocation2 + $0x28] sm:$0xf] %v1487_v16  ;;  %1794 = vst [vmem:[#allocation2 + $0x2c] sm:$0x1] %v1793_v56  ;;  %v1503_v31 = vor.u32 %v1501_v60, %v1500_v24  ;;  %v1505_v32 = vrot.slane %v1500_v24, 4  ;;  %v1003_v19 = vadd.f32 %v1002_v28, %v13567_v18  ;;  %v1014_v35 = vpop.f32.mrb[17].mxu1  ;;  %v1005_v37 = vadd.f32 %v1004_v34, %v13571_v20 }
 0x15e   : > { %1797 = vst [vmem:[#allocation2 + $0x30] sm:$0xf] %v1796_v29  ;;  %v2034_v1 = vrot.slane %v2032_v9, 7  ;;  %v1007_v38 = vadd.f32 %v1006_v42, %v13567_v18  ;;  %v1009_v40 = vadd.f32 %v1008_v47, %v13571_v20  ;;  %v1016_v41 = vpop.f32.mrb[18].mxu1  ;;  %v1013_v28 = vadd.f32 %v1012_v26, %v13567_v18  ;;  %v13696_v50 = vpop.f32.mrb[28].mxu0 }
 0x15f   : > { %v1504_v43 = vsel %vm13599_vm6, %v1496_v15, %v1503_v31  ;;  %v1800_v44 = vsel %vm13608_vm7, %v1505_v32, %v1799_v17  ;;  %v1196_v46 = vadd.f32 %v13578_v30, %v1003_v19  ;;  %v13694_v49 = vpop.f32.mrb[19].mxu1  ;;  %v1198_v47 = vadd.f32 %v13581_v33, %v1005_v37  ;;  %v13700_v52 = vpop.f32.mrb[29].mxu0 }
 0x160   : > { %1798 = vst [vmem:[#allocation2 + $0x34] sm:$0xf] %v1504_v43  ;;  %1801 = vst [vmem:[#allocation2 + $0x38] sm:$0x1] %v1800_v44  ;;  %v2037_v34 = vor.u32 %v2035_v25, %v2034_v1  ;;  %v2039_v42 = vrot.slane %v2034_v1, 4  ;;  %v1200_v51 = vadd.f32 %v13583_v36, %v1007_v38  ;;  %v1202_v54 = vadd.f32 %v13585_v39, %v1009_v40  ;;  %v13705_v58 = vpop.f32.mrb[30].mxu0 }
 0x161   : > { %v1330_v21 = vmax.f32 %v1196_v46, 0.0  ;;  %v1206_v30 = vadd.f32 %v13595_v62, %v1013_v28  ;;  %v1015_v55 = vadd.f32 %v1014_v35, %v13571_v20  ;;  %v11472_v33 = vpack.c.bf16 %v1198_v47, %v1198_v47  ;;  %v13711_v36 = vpop.f32.mrb[31].mxu0  ;;  %v1802_v25 = vld [vmem:[#allocation2 + $0x3c] sm:$0xf]  ;;  %v2331_v1 = vld [vmem:[#allocation3 + $0x30] sm:$0xf] }
 0x162   : > { %v2038_v60 = vsel %vm13599_vm6, %v2030_v59, %v2037_v34  ;;  %v2329_v0 = vsel %vm13608_vm7, %v2039_v42, %v2328_v45  ;;  %v1331_v4 = vmax.f32 %v1200_v51, 0.0  ;;  %v11473_v39 = vpack.c.bf16 %v1202_v54, %v1202_v54  ;;  %v2335_v46 = vld [vmem:[#allocation3 + $0x38] sm:$0x1]  ;;  %v1806_v51 = vld [vmem:[#allocation2 + $0x44] sm:$0x1] }
 0x163   : > { %2327 = vst [vmem:[#allocation3 + $0x28] sm:$0xf] %v2038_v60  ;;  %2330 = vst [vmem:[#allocation3 + $0x2c] sm:$0x1] %v2329_v0  ;;  %v11440_v5 = vpack.c.bf16 %v1330_v21, %v1330_v21  ;;  %v1332_v10 = vmax.f32 %v1206_v30, 0.0  ;;  %v1208_v62 = vadd.f32 %v13604_v6, %v1015_v55  ;;  %v2041_v8 = vshrl.u32 %v11472_v33, 16 }
 0x164   : > { %v2044_v11 = vshll.u32 %v11472_v33, 16  ;;  %v11441_v15 = vpack.c.bf16 %v1331_v4, %v1331_v4  ;;  %v1017_v23 = vadd.f32 %v1016_v41, %v13567_v18  ;;  %v1022_v59 = vpop.f32.mrb[20].mxu1  ;;  %v2049_v56 = vshrl.u32 %v11473_v39, 16 }
 0x165   : > { %v1507_v24 = vshrl.u32 %v11440_v5, 16  ;;  %v1510_v16 = vshll.u32 %v11440_v5, 16  ;;  %v2052_v17 = vshll.u32 %v11473_v39, 16  ;;  %v1024_v9 = vpop.f32.mrb[21].mxu1  ;;  %v2043_v26 = vrot.slane %v2041_v8, 7  ;;  %v13716_v41 = vpop.f32.mrb[32].mxu0 }
 0x166   : > { %v1515_v29 = vshrl.u32 %v11441_v15, 16  ;;  %v1518_v31 = vshll.u32 %v11441_v15, 16  ;;  %v11442_v32 = vpack.c.bf16 %v1332_v10, %v1332_v10  ;;  %v1026_v19 = vpop.f32.mrb[22].mxu1  ;;  %v2051_v6 = vrot.slane %v2049_v56, 7  ;;  %v13718_v34 = vpop.f32.mrb[33].mxu0 }
 0x167   : > { %v1509_v35 = vrot.slane %v1507_v24, 7  ;;  %v11474_v37 = vpack.c.bf16 %v1208_v62, %v1208_v62  ;;  %v1210_v38 = vadd.f32 %v13612_v22, %v1017_v23  ;;  %v1028_v40 = vpop.f32.mrb[23].mxu1  ;;  %v2046_v43 = vor.u32 %v2044_v11, %v2043_v26  ;;  %v13720_v30 = vpop.f32.mrb[34].mxu0  ;;  %v1809_v15 = vld [vmem:[#allocation2 + $0x48] sm:$0xf] }
 0x168   : > { %v2047_v44 = vrot.slane %v2043_v26, 4  ;;  %v1517_v45 = vrot.slane %v1515_v29, 7  ;;  %v1524_v28 = vshrl.u32 %v11442_v32, 16  ;;  %v2054_v21 = vor.u32 %v2052_v17, %v2051_v6  ;;  %v13726_v33 = vpop.f32.mrb[35].mxu0 }
 0x169   : > { %v1512_v42 = vor.u32 %v1510_v16, %v1509_v35  ;;  %v1513_v47 = vrot.slane %v1509_v35, 4  ;;  %v2056_v54 = vrot.slane %v2051_v6, 4  ;;  %v2332_v22 = vsel %vm13591_vm5, %v2046_v43, %v2331_v1 }
 0x16a   : > { %v1520_v55 = vor.u32 %v1518_v31, %v1517_v45  ;;  %v1522_v60 = vrot.slane %v1517_v45, 4  ;;  %v13724_v0 = vrot.slane %v1524_v28, 7  ;;  %2333 = vst [vmem:[#allocation3 + $0x30] sm:$0xf] %v2332_v22  ;;  %v2055_v5 = vsel %vm13599_vm6, %v2047_v44, %v2054_v21 }
 0x16b   : > { %v1803_v4 = vsel %vm13591_vm5, %v1512_v42, %v1802_v25  ;;  %v2336_v39 = vsel %vm13608_vm7, %v2056_v54, %v2335_v46  ;;  %v1527_v10 = vshll.u32 %v11442_v32, 16  ;;  %2334 = vst [vmem:[#allocation3 + $0x34] sm:$0xf] %v2055_v5  ;;  %v2058_v23 = vshrl.u32 %v11474_v37, 16  ;;  %v1813_v5 = vld [vmem:[#allocation2 + $0x50] sm:$0x1] }
 0x16c   : > { %1804 = vst [vmem:[#allocation2 + $0x3c] sm:$0xf] %v1803_v4  ;;  %v1521_v62 = vsel %vm13599_vm6, %v1513_v47, %v1520_v55  ;;  %v1807_v8 = vsel %vm13608_vm7, %v1522_v60, %v1806_v51  ;;  %2337 = vst [vmem:[#allocation3 + $0x38] sm:$0x1] %v2336_v39  ;;  %v1530_v11 = vrot.slane %v13724_v0, 4  ;;  %v13739_v24 = vpop.f32.mrb[24].mxu1  ;;  %v1019_v25 = vadd.f32 %v13694_v49, %v13571_v20 }
 0x16d   : > { %1805 = vst [vmem:[#allocation2 + $0x40] sm:$0xf] %v1521_v62  ;;  %1808 = vst [vmem:[#allocation2 + $0x44] sm:$0x1] %v1807_v8  ;;  %v1529_v16 = vor.u32 %v1527_v10, %v13724_v0  ;;  %v2061_v56 = vshll.u32 %v11474_v37, 16  ;;  %v1333_v17 = vmax.f32 %v1210_v38, 0.0  ;;  %v1023_v31 = vadd.f32 %v1022_v59, %v13567_v18 }
 0x16e   : > { %v13744_v26 = vpop.f32.mrb[25].mxu1  ;;  %v13746_v29 = vrot.slane %v2058_v23, 7  ;;  %v1025_v32 = vadd.f32 %v1024_v9, %v13571_v20  ;;  %v1027_v35 = vadd.f32 %v1026_v19, %v13567_v18  ;;  %v2338_v37 = vld [vmem:[#allocation3 + $0x3c] sm:$0xf]  ;;  %v1212_v43 = vadd.f32 %v13616_v27, %v1019_v25  ;;  %v13759_v45 = vpop.f32.mrb[36].mxu0 }
 0x16f   : > { %v13751_v1 = vpop.f32.mrb[26].mxu1  ;;  %v1810_v6 = vsel %vm13591_vm5, %v1529_v16, %v1809_v15  ;;  %v11443_v38 = vpack.c.bf16 %v1333_v17, %v1333_v17  ;;  %v1029_v49 = vadd.f32 %v1028_v40, %v13571_v20  ;;  %v1216_v19 = vadd.f32 %v13637_v57, %v1023_v31  ;;  %v13765_v28 = vpop.f32.mrb[37].mxu0 }
 0x170   : > { %v13757_v44 = vpop.f32.mrb[27].mxu1  ;;  %1811 = vst [vmem:[#allocation2 + $0x48] sm:$0xf] %v1810_v6  ;;  %v2063_v59 = vor.u32 %v2061_v56, %v13746_v29  ;;  %v2064_v9 = vrot.slane %v13746_v29, 4  ;;  %v1218_v46 = vadd.f32 %v13643_v63, %v1025_v32  ;;  %v11475_v27 = vpack.c.bf16 %v1212_v43, %v1212_v43  ;;  %v13768_v51 = vpop.f32.mrb[38].mxu0 }
 0x171   : > { %v1532_v42 = vshrl.u32 %v11443_v38, 16  ;;  %v1535_v47 = vshll.u32 %v11443_v38, 16  ;;  %v1220_v40 = vadd.f32 %v13649_v7, %v1027_v35  ;;  %v1334_v54 = vmax.f32 %v1216_v19, 0.0  ;;  %v13773_v60 = vpop.f32.mrb[39].mxu0  ;;  %v2342_v56 = vld [vmem:[#allocation3 + $0x44] sm:$0x1] }
 0x172   : > { %v2339_v21 = vsel %vm13591_vm5, %v2063_v59, %v2338_v37  ;;  %v11476_v22 = vpack.c.bf16 %v1218_v46, %v1218_v46  ;;  %v1222_v55 = vadd.f32 %v13654_v12, %v1029_v49  ;;  %v2066_v63 = vshrl.u32 %v11475_v27, 16  ;;  %v2345_v49 = vld [vmem:[#allocation3 + $0x48] sm:$0xf] }
 0x173   : > { %2340 = vst [vmem:[#allocation3 + $0x3c] sm:$0xf] %v2339_v21  ;;  %v1534_v57 = vrot.slane %v1532_v42, 7  ;;  %v2069_v0 = vshll.u32 %v11475_v27, 16  ;;  %v1335_v4 = vmax.f32 %v1220_v40, 0.0  ;;  %v11444_v39 = vpack.c.bf16 %v1334_v54, %v1334_v54 }
 0x174   : > { %v2075_v10 = vshrl.u32 %v11476_v22, 16  ;;  %v2078_v7 = vshll.u32 %v11476_v22, 16  ;;  %v11477_v62 = vpack.c.bf16 %v1222_v55, %v1222_v55  ;;  %v13775_v8 = vpop.f32.mrb[28].mxu1  ;;  %v2068_v16 = vrot.slane %v2066_v63, 7  ;;  %v1816_v54 = vld [vmem:[#allocation2 + $0x54] sm:$0xf] }
 0x175   : > { %v1537_v15 = vor.u32 %v1535_v47, %v1534_v57  ;;  %v1539_v23 = vrot.slane %v1534_v57, 4  ;;  %v11445_v17 = vpack.c.bf16 %v1335_v4, %v1335_v4  ;;  %v13777_v12 = vpop.f32.mrb[29].mxu1  ;;  %v1541_v25 = vshrl.u32 %v11444_v39, 16  ;;  %v13787_v19 = vpop.f32.mrb[40].mxu0 }
 0x176   : > { %v1544_v29 = vshll.u32 %v11444_v39, 16  ;;  %v2077_v31 = vrot.slane %v2075_v10, 7  ;;  %v2083_v32 = vshrl.u32 %v11477_v62, 16  ;;  %v13779_v35 = vpop.f32.mrb[30].mxu1  ;;  %v2071_v38 = vor.u32 %v2069_v0, %v2068_v16  ;;  %v13789_v40 = vpop.f32.mrb[41].mxu0 }
 0x177   : > { %v1538_v6 = vsel %vm13599_vm6, %v1530_v11, %v1537_v15  ;;  %v1814_v37 = vsel %vm13608_vm7, %v1539_v23, %v1813_v5  ;;  %v2073_v43 = vrot.slane %v2068_v16, 4  ;;  %v13785_v59 = vpop.f32.mrb[31].mxu1  ;;  %v1543_v46 = vrot.slane %v1541_v25, 7  ;;  %v13795_v57 = vpop.f32.mrb[42].mxu0  ;;  %v2349_v39 = vld [vmem:[#allocation3 + $0x50] sm:$0x1] }
 0x178   : > { %1812 = vst [vmem:[#allocation2 + $0x4c] sm:$0xf] %v1538_v6  ;;  %1815 = vst [vmem:[#allocation2 + $0x50] sm:$0x1] %v1814_v37  ;;  %v2080_v42 = vor.u32 %v2078_v7, %v2077_v31  ;;  %v2081_v47 = vrot.slane %v2077_v31, 4  ;;  %v1549_v27 = vshrl.u32 %v11445_v17, 16  ;;  %v2072_v11 = vsel %vm13599_vm6, %v2064_v9, %v2071_v38 }
 0x179   : > { %v2343_v21 = vsel %vm13608_vm7, %v2073_v43, %v2342_v56  ;;  %v1552_v22 = vshll.u32 %v11445_v17, 16  ;;  %v2085_v55 = vrot.slane %v2083_v32, 7  ;;  %2341 = vst [vmem:[#allocation3 + $0x40] sm:$0xf] %v2072_v11  ;;  %v1546_v63 = vor.u32 %v1544_v29, %v1543_v46  ;;  %v13799_v10 = vpop.f32.mrb[43].mxu0 }
 0x17a   : > { %2344 = vst [vmem:[#allocation3 + $0x44] sm:$0x1] %v2343_v21  ;;  %v1547_v0 = vrot.slane %v1543_v46, 4  ;;  %v2346_v4 = vsel %vm13591_vm5, %v2080_v42, %v2345_v49  ;;  %v1551_v5 = vrot.slane %v1549_v27, 7  ;;  %v1820_v9 = vld [vmem:[#allocation2 + $0x5c] sm:$0x1]  ;;  %v1033_v23 = vadd.f32 %v13739_v24, %v13567_v18 }
 0x17b   : > { %2347 = vst [vmem:[#allocation3 + $0x48] sm:$0xf] %v2346_v4  ;;  %v2086_v7 = vshll.u32 %v11477_v62, 16  ;;  %v2090_v15 = vrot.slane %v2085_v55, 4  ;;  %v1035_v16 = vadd.f32 %v13744_v26, %v13571_v20  ;;  %v1817_v56 = vsel %vm13591_vm5, %v1546_v63, %v1816_v54 }
 0x17c   : > { %v1554_v17 = vor.u32 %v1552_v22, %v1551_v5  ;;  %v1556_v25 = vrot.slane %v1551_v5, 4  ;;  %v1037_v29 = vadd.f32 %v13751_v1, %v13567_v18  ;;  %v13809_v31 = vpop.f32.mrb[32].mxu1  ;;  %1818 = vst [vmem:[#allocation2 + $0x54] sm:$0xf] %v1817_v56  ;;  %v1226_v24 = vadd.f32 %v13662_v48, %v1033_v23 }
 0x17d   : > { %v2088_v32 = vor.u32 %v2086_v7, %v2085_v55  ;;  %v2350_v62 = vsel %vm13608_vm7, %v2090_v15, %v2349_v39  ;;  %v1228_v6 = vadd.f32 %v13664_v53, %v1035_v16  ;;  %v13815_v26 = vpop.f32.mrb[33].mxu1  ;;  %v1039_v43 = vadd.f32 %v13757_v44, %v13571_v20  ;;  %v13832_v11 = vpop.f32.mrb[44].mxu0  ;;  %v2352_v15 = vld [vmem:[#allocation3 + $0x54] sm:$0xf] }
 0x17e   : > { %v1555_v37 = vsel %vm13599_vm6, %v1547_v0, %v1554_v17  ;;  %v1821_v38 = vsel %vm13608_vm7, %v1556_v25, %v1820_v9  ;;  %2351 = vst [vmem:[#allocation3 + $0x50] sm:$0x1] %v2350_v62  ;;  %v1230_v1 = vadd.f32 %v13668_v61, %v1037_v29  ;;  %v13824_v49 = vpop.f32.mrb[34].mxu1  ;;  %v1336_v53 = vmax.f32 %v1226_v24, 0.0 }
 0x17f   : > { %1819 = vst [vmem:[#allocation2 + $0x58] sm:$0xf] %v1555_v37  ;;  %1822 = vst [vmem:[#allocation2 + $0x5c] sm:$0x1] %v1821_v38  ;;  %v2089_v48 = vsel %vm13599_vm6, %v2081_v47, %v2088_v32  ;;  %v11478_v46 = vpack.c.bf16 %v1228_v6, %v1228_v6  ;;  %v1043_v42 = vadd.f32 %v13775_v8, %v13567_v18  ;;  %v13830_v27 = vpop.f32.mrb[35].mxu1  ;;  %v13839_v47 = vpop.f32.mrb[45].mxu0 }
 0x180   : > { %2348 = vst [vmem:[#allocation3 + $0x4c] sm:$0xf] %v2089_v48  ;;  %v1337_v61 = vmax.f32 %v1230_v1, 0.0  ;;  %v1232_v44 = vadd.f32 %v13674_v14, %v1039_v43  ;;  %v1045_v21 = vadd.f32 %v13777_v12, %v13571_v20  ;;  %v1047_v54 = vadd.f32 %v13779_v35, %v13567_v18  ;;  %v13842_v0 = vpop.f32.mrb[46].mxu0  ;;  %v1823_v32 = vld [vmem:[#allocation2 + $0x60] sm:$0xf] }
 0x181   : > { %v11446_v22 = vpack.c.bf16 %v1336_v53, %v1336_v53  ;;  %v2092_v55 = vshrl.u32 %v11478_v46, 16  ;;  %v2095_v63 = vshll.u32 %v11478_v46, 16  ;;  %v1236_v8 = vadd.f32 %v13696_v50, %v1043_v42  ;;  %v13846_v9 = vpop.f32.mrb[47].mxu0  ;;  %v2356_v38 = vld [vmem:[#allocation3 + $0x5c] sm:$0x1] }
 0x182   : > { %v11447_v4 = vpack.c.bf16 %v1337_v61, %v1337_v61  ;;  %v11479_v5 = vpack.c.bf16 %v1232_v44, %v1232_v44  ;;  %v1238_v39 = vadd.f32 %v13700_v52, %v1045_v21  ;;  %v1240_v14 = vadd.f32 %v13705_v58, %v1047_v54  ;;  %v1827_v61 = vld [vmem:[#allocation2 + $0x68] sm:$0x1] }
 0x183   : > { %v1558_v12 = vshrl.u32 %v11446_v22, 16  ;;  %v1561_v7 = vshll.u32 %v11446_v22, 16  ;;  %v2094_v35 = vrot.slane %v2092_v55, 7  ;;  %v1338_v23 = vmax.f32 %v1236_v8, 0.0 }
 0x184   : > { %v1566_v16 = vshrl.u32 %v11447_v4, 16  ;;  %v1569_v56 = vshll.u32 %v11447_v4, 16  ;;  %v2100_v17 = vshrl.u32 %v11479_v5, 16  ;;  %v2103_v25 = vshll.u32 %v11479_v5, 16  ;;  %v13848_v50 = vpop.f32.mrb[36].mxu1 }
 0x185   : > { %v1560_v29 = vrot.slane %v1558_v12, 7  ;;  %v2097_v62 = vor.u32 %v2095_v63, %v2094_v35  ;;  %v2098_v24 = vrot.slane %v2094_v35, 4  ;;  %v11448_v52 = vpack.c.bf16 %v1338_v23, %v1338_v23  ;;  %v13850_v6 = vpop.f32.mrb[37].mxu1  ;;  %v13858_v54 = vpop.f32.mrb[48].mxu0 }
 0x186   : > { %v1568_v58 = vrot.slane %v1566_v16, 7  ;;  %v2102_v37 = vrot.slane %v2100_v17, 7  ;;  %v11480_v1 = vpack.c.bf16 %v1238_v39, %v1238_v39  ;;  %v1339_v43 = vmax.f32 %v1240_v14, 0.0  ;;  %v13852_v48 = vpop.f32.mrb[38].mxu1  ;;  %v13860_v4 = vpop.f32.mrb[49].mxu0 }
 0x187   : > { %v1563_v53 = vor.u32 %v1561_v7, %v1560_v29  ;;  %v1564_v46 = vrot.slane %v1560_v29, 4  ;;  %v2353_v42 = vsel %vm13591_vm5, %v2097_v62, %v2352_v15  ;;  %v1575_v44 = vshrl.u32 %v11448_v52, 16  ;;  %v13856_v21 = vpop.f32.mrb[39].mxu1  ;;  %v13866_v7 = vpop.f32.mrb[50].mxu0 }
 0x188   : > { %2354 = vst [vmem:[#allocation3 + $0x54] sm:$0xf] %v2353_v42  ;;  %v1571_v22 = vor.u32 %v1569_v56, %v1568_v58  ;;  %v1573_v55 = vrot.slane %v1568_v58, 4  ;;  %v2105_v63 = vor.u32 %v2103_v25, %v2102_v37  ;;  %v2107_v8 = vrot.slane %v2102_v37, 4  ;;  %v1830_v56 = vld [vmem:[#allocation2 + $0x6c] sm:$0xf] }
 0x189   : > { %v1824_v5 = vsel %vm13591_vm5, %v1563_v53, %v1823_v32  ;;  %v13864_v39 = vrot.slane %v1575_v44, 7  ;;  %v1578_v14 = vshll.u32 %v11448_v52, 16  ;;  %v2109_v12 = vshrl.u32 %v11480_v1, 16  ;;  %v13876_v17 = vpop.f32.mrb[51].mxu0  ;;  %v2359_v52 = vld [vmem:[#allocation3 + $0x60] sm:$0xf] }
 0x18a   : > { %1825 = vst [vmem:[#allocation2 + $0x60] sm:$0xf] %v1824_v5  ;;  %v1572_v35 = vsel %vm13599_vm6, %v1564_v46, %v1571_v22  ;;  %v1828_v15 = vsel %vm13608_vm7, %v1573_v55, %v1827_v61  ;;  %v2106_v23 = vsel %vm13599_vm6, %v2098_v24, %v2105_v63  ;;  %v2357_v16 = vsel %vm13608_vm7, %v2107_v8, %v2356_v38 }
 0x18b   : > { %1826 = vst [vmem:[#allocation2 + $0x64] sm:$0xf] %v1572_v35  ;;  %1829 = vst [vmem:[#allocation2 + $0x68] sm:$0x1] %v1828_v15  ;;  %v1580_v25 = vor.u32 %v1578_v14, %v13864_v39  ;;  %v1581_v29 = vrot.slane %v13864_v39, 4  ;;  %v13880_v32 = vrot.slane %v2109_v12, 7  ;;  %v11449_v58 = vpack.c.bf16 %v1339_v43, %v1339_v43 }
 0x18c   : > { %2355 = vst [vmem:[#allocation3 + $0x58] sm:$0xf] %v2106_v23  ;;  %2358 = vst [vmem:[#allocation3 + $0x5c] sm:$0x1] %v2357_v16  ;;  %v2112_v62 = vshll.u32 %v11480_v1, 16  ;;  %v1049_v24 = vadd.f32 %v13785_v59, %v13571_v20  ;;  %v1053_v37 = vadd.f32 %v13809_v31, %v13567_v18  ;;  %v1055_v38 = vadd.f32 %v13815_v26, %v13571_v20  ;;  %v13888_v53 = vpop.f32.mrb[40].mxu1 }
 0x18d   : > { %v1831_v46 = vsel %vm13591_vm5, %v1580_v25, %v1830_v56  ;;  %v2115_v1 = vrot.slane %v13880_v32, 4  ;;  %v1057_v43 = vadd.f32 %v13824_v49, %v13567_v18  ;;  %v13896_v61 = vpop.f32.mrb[41].mxu1  ;;  %v1583_v59 = vshrl.u32 %v11449_v58, 16  ;;  %v13910_v39 = vpop.f32.mrb[52].mxu0  ;;  %v1834_v15 = vld [vmem:[#allocation2 + $0x74] sm:$0x1] }
 0x18e   : > { %v2114_v42 = vor.u32 %v2112_v62, %v13880_v32  ;;  %1832 = vst [vmem:[#allocation2 + $0x6c] sm:$0xf] %v1831_v46  ;;  %v1586_v31 = vshll.u32 %v11449_v58, 16  ;;  %v1242_v44 = vadd.f32 %v13711_v36, %v1049_v24  ;;  %v1246_v26 = vadd.f32 %v13716_v41, %v1053_v37  ;;  %v13900_v22 = vpop.f32.mrb[42].mxu1  ;;  %v13914_v35 = vpop.f32.mrb[53].mxu0 }
 0x18f   : > { %v1248_v63 = vadd.f32 %v13718_v34, %v1055_v38  ;;  %v1250_v8 = vadd.f32 %v13720_v30, %v1057_v43  ;;  %v1059_v49 = vadd.f32 %v13830_v27, %v13571_v20  ;;  %v13908_v5 = vpop.f32.mrb[43].mxu1  ;;  %v1585_v36 = vrot.slane %v1583_v59, 7  ;;  %v13919_v16 = vpop.f32.mrb[54].mxu0 }
 0x190   : > { %v2360_v55 = vsel %vm13591_vm5, %v2114_v42, %v2359_v52  ;;  %v11481_v14 = vpack.c.bf16 %v1242_v44, %v1242_v44  ;;  %v1340_v41 = vmax.f32 %v1246_v26, 0.0  ;;  %v1063_v12 = vadd.f32 %v13848_v50, %v13567_v18  ;;  %v13921_v52 = vpop.f32.mrb[55].mxu0 }
 0x191   : > { %2361 = vst [vmem:[#allocation3 + $0x60] sm:$0xf] %v2360_v55  ;;  %v11482_v34 = vpack.c.bf16 %v1248_v63, %v1248_v63  ;;  %v1341_v23 = vmax.f32 %v1250_v8, 0.0  ;;  %v1252_v30 = vadd.f32 %v13726_v33, %v1059_v49  ;;  %v1065_v27 = vadd.f32 %v13850_v6, %v13571_v20  ;;  %v2363_v6 = vld [vmem:[#allocation3 + $0x68] sm:$0x1] }
 0x192   : > { %v1588_v56 = vor.u32 %v1586_v31, %v1585_v36  ;;  %v1590_v25 = vrot.slane %v1585_v36, 4  ;;  %v2117_v32 = vshrl.u32 %v11481_v14, 16  ;;  %v2120_v62 = vshll.u32 %v11481_v14, 16  ;;  %v2366_v49 = vld [vmem:[#allocation3 + $0x6c] sm:$0xf] }
 0x193   : > { %v11450_v58 = vpack.c.bf16 %v1340_v41, %v1340_v41  ;;  %v2126_v50 = vshrl.u32 %v11482_v34, 16  ;;  %v2129_v24 = vshll.u32 %v11482_v34, 16  ;;  %v11451_v37 = vpack.c.bf16 %v1341_v23, %v1341_v23 }
 0x194   : > { %v1589_v38 = vsel %vm13599_vm6, %v1581_v29, %v1588_v56  ;;  %v1835_v33 = vsel %vm13608_vm7, %v1590_v25, %v1834_v15  ;;  %v2119_v46 = vrot.slane %v2117_v32, 7  ;;  %v11483_v42 = vpack.c.bf16 %v1252_v30, %v1252_v30  ;;  %v13927_v43 = vpop.f32.mrb[44].mxu1 }
 0x195   : > { %1833 = vst [vmem:[#allocation2 + $0x70] sm:$0xf] %v1589_v38  ;;  %1836 = vst [vmem:[#allocation2 + $0x74] sm:$0x1] %v1835_v33  ;;  %v1592_v59 = vshrl.u32 %v11450_v58, 16  ;;  %v1595_v31 = vshll.u32 %v11450_v58, 16 }
 0x196   : > { %v2128_v44 = vrot.slane %v2126_v50, 7  ;;  %v1600_v26 = vshrl.u32 %v11451_v37, 16  ;;  %v13929_v55 = vpop.f32.mrb[45].mxu1  ;;  %v2122_v63 = vor.u32 %v2120_v62, %v2119_v46  ;;  %v2124_v8 = vrot.slane %v2119_v46, 4  ;;  %v13935_v56 = vpop.f32.mrb[56].mxu0 }
 0x197   : > { %v1603_v29 = vshll.u32 %v11451_v37, 16  ;;  %v2134_v36 = vshrl.u32 %v11483_v42, 16  ;;  %v13931_v14 = vpop.f32.mrb[46].mxu1  ;;  %v1594_v41 = vrot.slane %v1592_v59, 7  ;;  %v1837_v62 = vld [vmem:[#allocation2 + $0x78] sm:$0xf] }
 0x198   : > { %v2131_v15 = vor.u32 %v2129_v24, %v2128_v44  ;;  %v2132_v34 = vrot.slane %v2128_v44, 4  ;;  %v1602_v23 = vrot.slane %v1600_v26, 7  ;;  %v13933_v30 = vpop.f32.mrb[47].mxu1  ;;  %v2123_v25 = vsel %vm13599_vm6, %v2115_v1, %v2122_v63  ;;  %v13941_v37 = vpop.f32.mrb[57].mxu0  ;;  %v1841_v59 = vld [vmem:[#allocation2 + $0x80] sm:$0x1] }
 0x199   : > { %v2364_v32 = vsel %vm13608_vm7, %v2124_v8, %v2363_v6  ;;  %v2136_v58 = vrot.slane %v2134_v36, 7  ;;  %v2137_v50 = vshll.u32 %v11483_v42, 16  ;;  %2362 = vst [vmem:[#allocation3 + $0x64] sm:$0xf] %v2123_v25  ;;  %v1597_v24 = vor.u32 %v1595_v31, %v1594_v41  ;;  %v2370_v44 = vld [vmem:[#allocation3 + $0x74] sm:$0x1] }
 0x19a   : > { %2365 = vst [vmem:[#allocation3 + $0x68] sm:$0x1] %v2364_v32  ;;  %v1598_v38 = vrot.slane %v1594_v41, 4  ;;  %v2367_v33 = vsel %vm13591_vm5, %v2131_v15, %v2366_v49  ;;  %v1605_v46 = vor.u32 %v1603_v29, %v1602_v23  ;;  %v13945_v26 = vpop.f32.mrb[58].mxu0  ;;  %v1607_v1 = vrot.slane %v1602_v23, 4 }
 0x19b   : > { %2368 = vst [vmem:[#allocation3 + $0x6c] sm:$0xf] %v2367_v33  ;;  %v2139_v6 = vor.u32 %v2137_v50, %v2136_v58  ;;  %v2141_v63 = vrot.slane %v2136_v58, 4  ;;  %v1256_v42 = vadd.f32 %v13759_v45, %v1063_v12  ;;  %v13948_v8 = vpop.f32.mrb[59].mxu0  ;;  %v1838_v31 = vsel %vm13591_vm5, %v1597_v24, %v1837_v62 }
 0x19c   : > { %v1606_v36 = vsel %vm13599_vm6, %v1598_v38, %v1605_v46  ;;  %v1258_v49 = vadd.f32 %v13765_v28, %v1065_v27  ;;  %v1067_v29 = vadd.f32 %v13852_v48, %v13567_v18  ;;  %1839 = vst [vmem:[#allocation2 + $0x78] sm:$0xf] %v1838_v31  ;;  %v1842_v41 = vsel %vm13608_vm7, %v1607_v1, %v1841_v59  ;;  %v13963_v23 = vpop.f32.mrb[48].mxu1 }
 0x19d   : > { %1840 = vst [vmem:[#allocation2 + $0x7c] sm:$0xf] %v1606_v36  ;;  %v2140_v45 = vsel %vm13599_vm6, %v2132_v34, %v2139_v6  ;;  %v2371_v12 = vsel %vm13608_vm7, %v2141_v63, %v2370_v44  ;;  %v1342_v15 = vmax.f32 %v1256_v42, 0.0  ;;  %1843 = vst [vmem:[#allocation2 + $0x80] sm:$0x1] %v1842_v41  ;;  %v1069_v27 = vadd.f32 %v13856_v21, %v13571_v20  ;;  %v13970_v32 = vpop.f32.mrb[49].mxu1 }
 0x19e   : > { %2369 = vst [vmem:[#allocation3 + $0x70] sm:$0xf] %v2140_v45  ;;  %2372 = vst [vmem:[#allocation3 + $0x74] sm:$0x1] %v2371_v12  ;;  %v11484_v28 = vpack.c.bf16 %v1258_v49, %v1258_v49  ;;  %v1260_v48 = vadd.f32 %v13768_v51, %v1067_v29  ;;  %v1073_v25 = vadd.f32 %v13888_v53, %v13567_v18  ;;  %v13978_v24 = vpop.f32.mrb[50].mxu1  ;;  %v13983_v46 = vpop.f32.mrb[60].mxu0 }
 0x19f   : > { %v11452_v34 = vpack.c.bf16 %v1342_v15, %v1342_v15  ;;  %v1075_v62 = vadd.f32 %v13896_v61, %v13571_v20  ;;  %v1077_v58 = vadd.f32 %v13900_v22, %v13567_v18  ;;  %v1079_v50 = vadd.f32 %v13908_v5, %v13571_v20  ;;  %v13981_v53 = vpop.f32.mrb[51].mxu1  ;;  %v13987_v1 = vpop.f32.mrb[61].mxu0  ;;  %v2373_v36 = vld [vmem:[#allocation3 + $0x78] sm:$0xf] }
 0x1a0   : > { %v2143_v51 = vshrl.u32 %v11484_v28, 16  ;;  %v2146_v38 = vshll.u32 %v11484_v28, 16  ;;  %v1343_v21 = vmax.f32 %v1260_v48, 0.0  ;;  %v1262_v33 = vadd.f32 %v13773_v60, %v1069_v27  ;;  %v13990_v31 = vpop.f32.mrb[62].mxu0 }
 0x1a1   : > { %v1609_v59 = vshrl.u32 %v11452_v34, 16  ;;  %v1612_v44 = vshll.u32 %v11452_v34, 16  ;;  %v1266_v61 = vadd.f32 %v13787_v19, %v1073_v25  ;;  %v1268_v22 = vadd.f32 %v13789_v40, %v1075_v62  ;;  %v13993_v45 = vpop.f32.mrb[63].mxu0  ;;  %v1844_v19 = vld [vmem:[#allocation2 + $0x84] sm:$0xf] }
 0x1a2   : > { %v2145_v5 = vrot.slane %v2143_v51, 7  ;;  %v11453_v6 = vpack.c.bf16 %v1343_v21, %v1343_v21  ;;  %v11485_v63 = vpack.c.bf16 %v1262_v33, %v1262_v33  ;;  %v1270_v42 = vadd.f32 %v13795_v57, %v1077_v58  ;;  %17572 = vst [vmem:[#allocation13_spill] sm:$0xff] %v13993_v45 }
 0x1a3   : > { %v1611_v60 = vrot.slane %v1609_v59, 7  ;;  %v1344_v49 = vmax.f32 %v1266_v61, 0.0  ;;  %v11486_v29 = vpack.c.bf16 %v1268_v22, %v1268_v22  ;;  %v1272_v41 = vadd.f32 %v13799_v10, %v1079_v50 }
 0x1a4   : > { %v2148_v12 = vor.u32 %v2146_v38, %v2145_v5  ;;  %v2149_v40 = vrot.slane %v2145_v5, 4  ;;  %v1617_v15 = vshrl.u32 %v11453_v6, 16  ;;  %v1620_v28 = vshll.u32 %v11453_v6, 16  ;;  %v13995_v57 = vpop.f32.mrb[52].mxu1  ;;  %v1848_v38 = vld [vmem:[#allocation2 + $0x8c] sm:$0x1] }
 0x1a5   : > { %v1614_v48 = vor.u32 %v1612_v44, %v1611_v60  ;;  %v1615_v27 = vrot.slane %v1611_v60, 4  ;;  %v2151_v25 = vshrl.u32 %v11485_v63, 16  ;;  %v2154_v34 = vshll.u32 %v11485_v63, 16  ;;  %v13999_v10 = vpop.f32.mrb[53].mxu1  ;;  %v2377_v6 = vld [vmem:[#allocation3 + $0x80] sm:$0x1] }
 0x1a6   : > { %v2374_v62 = vsel %vm13591_vm5, %v2148_v12, %v2373_v36  ;;  %v1619_v58 = vrot.slane %v1617_v15, 7  ;;  %v11454_v51 = vpack.c.bf16 %v1344_v49, %v1344_v49  ;;  %v2160_v21 = vshrl.u32 %v11486_v29, 16  ;;  %v14003_v61 = vpop.f32.mrb[54].mxu1 }
 0x1a7   : > { %v1845_v50 = vsel %vm13591_vm5, %v1614_v48, %v1844_v19  ;;  %2375 = vst [vmem:[#allocation3 + $0x78] sm:$0xf] %v2374_v62  ;;  %v2153_v33 = vrot.slane %v2151_v25, 7  ;;  %v2163_v59 = vshll.u32 %v11486_v29, 16  ;;  %v1345_v44 = vmax.f32 %v1270_v42, 0.0  ;;  %v14005_v36 = vpop.f32.mrb[55].mxu1 }
 0x1a8   : > { %1846 = vst [vmem:[#allocation2 + $0x84] sm:$0xf] %v1845_v50  ;;  %v1622_v22 = vor.u32 %v1620_v28, %v1619_v58  ;;  %v1624_v5 = vrot.slane %v1619_v58, 4  ;;  %v1626_v63 = vshrl.u32 %v11454_v51, 16  ;;  %v1629_v60 = vshll.u32 %v11454_v51, 16 }
 0x1a9   : > { %v2156_v49 = vor.u32 %v2154_v34, %v2153_v33  ;;  %v2158_v12 = vrot.slane %v2153_v33, 4  ;;  %v2162_v15 = vrot.slane %v2160_v21, 7  ;;  %v11455_v45 = vpack.c.bf16 %v1345_v44, %v1345_v44  ;;  %v2380_v48 = vld [vmem:[#allocation3 + $0x84] sm:$0xf]  ;;  %v1851_v62 = vld [vmem:[#allocation2 + $0x90] sm:$0xf] }
 0x1aa   : > { %v1623_v19 = vsel %vm13599_vm6, %v1615_v27, %v1622_v22  ;;  %v1849_v42 = vsel %vm13608_vm7, %v1624_v5, %v1848_v38  ;;  %v1628_v29 = vrot.slane %v1626_v63, 7  ;;  %v11487_v25 = vpack.c.bf16 %v1272_v41, %v1272_v41 }
 0x1ab   : > { %1847 = vst [vmem:[#allocation2 + $0x88] sm:$0xf] %v1623_v19  ;;  %1850 = vst [vmem:[#allocation2 + $0x8c] sm:$0x1] %v1849_v42  ;;  %v2157_v28 = vsel %vm13599_vm6, %v2149_v40, %v2156_v49  ;;  %v2378_v34 = vsel %vm13608_vm7, %v2158_v12, %v2377_v6  ;;  %v2165_v58 = vor.u32 %v2163_v59, %v2162_v15  ;;  %v2166_v51 = vrot.slane %v2162_v15, 4 }
 0x1ac   : > { %2376 = vst [vmem:[#allocation3 + $0x7c] sm:$0xf] %v2157_v28  ;;  %2379 = vst [vmem:[#allocation3 + $0x80] sm:$0x1] %v2378_v34  ;;  %v1631_v27 = vor.u32 %v1629_v60, %v1628_v29  ;;  %v1632_v21 = vrot.slane %v1628_v29, 4  ;;  %v1634_v50 = vshrl.u32 %v11455_v45, 16  ;;  %v1083_v40 = vadd.f32 %v13927_v43, %v13567_v18 }
 0x1ad   : > { %v1637_v38 = vshll.u32 %v11455_v45, 16  ;;  %v2381_v41 = vsel %vm13591_vm5, %v2165_v58, %v2380_v48  ;;  %v2168_v33 = vshrl.u32 %v11487_v25, 16  ;;  %v2171_v44 = vshll.u32 %v11487_v25, 16  ;;  %v14019_v22 = vpop.f32.mrb[56].mxu1  ;;  %v1855_v60 = vld [vmem:[#allocation2 + $0x98] sm:$0x1] }
 0x1ae   : > { %v1852_v59 = vsel %vm13591_vm5, %v1631_v27, %v1851_v62  ;;  %2382 = vst [vmem:[#allocation3 + $0x84] sm:$0xf] %v2381_v41  ;;  %v1636_v5 = vrot.slane %v1634_v50, 7  ;;  %v1085_v6 = vadd.f32 %v13929_v55, %v13571_v20  ;;  %v1087_v45 = vadd.f32 %v13931_v14, %v13567_v18  ;;  %v14027_v63 = vpop.f32.mrb[57].mxu1  ;;  %v2384_v29 = vld [vmem:[#allocation3 + $0x8c] sm:$0x1] }
 0x1af   : > { %1853 = vst [vmem:[#allocation2 + $0x90] sm:$0xf] %v1852_v59  ;;  %v2170_v49 = vrot.slane %v2168_v33, 7  ;;  %v1276_v43 = vadd.f32 %v13832_v11, %v1083_v40  ;;  %v1089_v12 = vadd.f32 %v13933_v30, %v13571_v20  ;;  %v1093_v15 = vadd.f32 %v13963_v23, %v13567_v18  ;;  %v14034_v19 = vpop.f32.mrb[58].mxu1 }
 0x1b0   : > { %v1639_v42 = vor.u32 %v1637_v38, %v1636_v5  ;;  %v1641_v55 = vrot.slane %v1636_v5, 4  ;;  %v1278_v14 = vadd.f32 %v13839_v47, %v1085_v6  ;;  %v1280_v48 = vadd.f32 %v13842_v0, %v1087_v45  ;;  %v14038_v25 = vpop.f32.mrb[59].mxu1  ;;  %v1858_v45 = vld [vmem:[#allocation2 + $0x9c] sm:$0xf] }
 0x1b1   : > { %v2173_v28 = vor.u32 %v2171_v44, %v2170_v49  ;;  %v2175_v34 = vrot.slane %v2170_v49, 4  ;;  %v1346_v11 = vmax.f32 %v1276_v43, 0.0  ;;  %v1282_v62 = vadd.f32 %v13846_v9, %v1089_v12 }
 0x1b2   : > { %v1640_v30 = vsel %vm13599_vm6, %v1632_v21, %v1639_v42  ;;  %v1856_v23 = vsel %vm13608_vm7, %v1641_v55, %v1855_v60  ;;  %v11488_v58 = vpack.c.bf16 %v1278_v14, %v1278_v14  ;;  %v1347_v27 = vmax.f32 %v1280_v48, 0.0  ;;  %v2387_v55 = vld [vmem:[#allocation3 + $0x90] sm:$0xf] }
 0x1b3   : > { %1854 = vst [vmem:[#allocation2 + $0x94] sm:$0xf] %v1640_v30  ;;  %1857 = vst [vmem:[#allocation2 + $0x98] sm:$0x1] %v1856_v23  ;;  %v2174_v47 = vsel %vm13599_vm6, %v2166_v51, %v2173_v28  ;;  %v2385_v0 = vsel %vm13608_vm7, %v2175_v34, %v2384_v29  ;;  %v11456_v50 = vpack.c.bf16 %v1346_v11, %v1346_v11  ;;  %v2391_v11 = vld [vmem:[#allocation3 + $0x98] sm:$0x1] }
 0x1b4   : > { %v11489_v38 = vpack.c.bf16 %v1282_v62, %v1282_v62  ;;  %2383 = vst [vmem:[#allocation3 + $0x88] sm:$0xf] %v2174_v47  ;;  %2386 = vst [vmem:[#allocation3 + $0x8c] sm:$0x1] %v2385_v0  ;;  %v2177_v9 = vshrl.u32 %v11488_v58, 16  ;;  %v2180_v41 = vshll.u32 %v11488_v58, 16  ;;  %v11457_v21 = vpack.c.bf16 %v1347_v27, %v1347_v27 }
 0x1b5   : > { %v1286_v33 = vadd.f32 %v13858_v54, %v1093_v15  ;;  %v1643_v44 = vshrl.u32 %v11456_v50, 16  ;;  %v1646_v40 = vshll.u32 %v11456_v50, 16  ;;  %v14050_v6 = vpop.f32.mrb[60].mxu1  ;;  %v1095_v14 = vadd.f32 %v13970_v32, %v13571_v20  ;;  %v1862_v27 = vld [vmem:[#allocation2 + $0xa4] sm:$0x1] }
 0x1b6   : > { %v2185_v59 = vshrl.u32 %v11489_v38, 16  ;;  %v2188_v5 = vshll.u32 %v11489_v38, 16  ;;  %v2179_v51 = vrot.slane %v2177_v9, 7  ;;  %v1651_v60 = vshrl.u32 %v11457_v21, 16  ;;  %v14052_v12 = vpop.f32.mrb[61].mxu1 }
 0x1b7   : > { %v1654_v49 = vshll.u32 %v11457_v21, 16  ;;  %v1348_v43 = vmax.f32 %v1286_v33, 0.0  ;;  %v1645_v42 = vrot.slane %v1643_v44, 7  ;;  %v1097_v54 = vadd.f32 %v13978_v24, %v13567_v18  ;;  %v14058_v15 = vpop.f32.mrb[62].mxu1 }
 0x1b8   : > { %v2187_v29 = vrot.slane %v2185_v59, 7  ;;  %v2182_v48 = vor.u32 %v2180_v41, %v2179_v51  ;;  %v2183_v28 = vrot.slane %v2179_v51, 4  ;;  %v1653_v34 = vrot.slane %v1651_v60, 7  ;;  %v14060_v30 = vpop.f32.mrb[63].mxu1 }
 0x1b9   : > { %v11458_v62 = vpack.c.bf16 %v1348_v43, %v1348_v43  ;;  %v1648_v23 = vor.u32 %v1646_v40, %v1645_v42  ;;  %v1649_v58 = vrot.slane %v1645_v42, 4  ;;  %v1290_v51 = vadd.f32 %v13866_v7, %v1097_v54 }
 0x1ba   : > { %v2190_v47 = vor.u32 %v2188_v5, %v2187_v29  ;;  %v2192_v0 = vrot.slane %v2187_v29, 4  ;;  %v2388_v32 = vsel %vm13591_vm5, %v2182_v48, %v2387_v55  ;;  %v1656_v50 = vor.u32 %v1654_v49, %v1653_v34 }
 0x1bb   : > { %v1658_v38 = vrot.slane %v1653_v34, 4  ;;  %v1660_v24 = vshrl.u32 %v11458_v62, 16  ;;  %v1859_v9 = vsel %vm13591_vm5, %v1648_v23, %v1858_v45  ;;  %2389 = vst [vmem:[#allocation3 + $0x90] sm:$0xf] %v2388_v32  ;;  %v1663_v33 = vshll.u32 %v11458_v62, 16 }
 0x1bc   : > { %v2191_v41 = vsel %vm13599_vm6, %v2183_v28, %v2190_v47  ;;  %v2392_v21 = vsel %vm13608_vm7, %v2192_v0, %v2391_v11  ;;  %1860 = vst [vmem:[#allocation2 + $0x9c] sm:$0xf] %v1859_v9  ;;  %v1657_v44 = vsel %vm13599_vm6, %v1649_v58, %v1656_v50  ;;  %v1288_v5 = vadd.f32 %v13860_v4, %v1095_v14  ;;  %v1865_v45 = vld [vmem:[#allocation2 + $0xa8] sm:$0xf] }
 0x1bd   : > { %v1863_v40 = vsel %vm13608_vm7, %v1658_v38, %v1862_v27  ;;  %2390 = vst [vmem:[#allocation3 + $0x94] sm:$0xf] %v2191_v41  ;;  %2393 = vst [vmem:[#allocation3 + $0x98] sm:$0x1] %v2392_v21  ;;  %v1662_v59 = vrot.slane %v1660_v24, 7  ;;  %v1099_v60 = vadd.f32 %v13981_v53, %v13571_v20  ;;  %v1103_v49 = vadd.f32 %v13995_v57, %v13567_v18 }
 0x1be   : > { %1861 = vst [vmem:[#allocation2 + $0xa0] sm:$0xf] %v1657_v44  ;;  %1864 = vst [vmem:[#allocation2 + $0xa4] sm:$0x1] %v1863_v40  ;;  %v1105_v43 = vadd.f32 %v13999_v10, %v13571_v20  ;;  %v11490_v29 = vpack.c.bf16 %v1288_v5, %v1288_v5  ;;  %v1107_v4 = vadd.f32 %v14003_v61, %v13567_v18  ;;  %v1349_v14 = vmax.f32 %v1290_v51, 0.0 }
 0x1bf   : > { %v1665_v42 = vor.u32 %v1663_v33, %v1662_v59  ;;  %v1666_v55 = vrot.slane %v1662_v59, 4  ;;  %v1292_v48 = vadd.f32 %v13876_v17, %v1099_v60  ;;  %v1296_v7 = vadd.f32 %v13910_v39, %v1103_v49  ;;  %v1869_v41 = vld [vmem:[#allocation2 + $0xb0] sm:$0x1]  ;;  %v2398_v40 = vld [vmem:[#allocation3 + $0xa4] sm:$0x1] }
 0x1c0   : > { %v1298_v54 = vadd.f32 %v13914_v35, %v1105_v43  ;;  %v2194_v57 = vshrl.u32 %v11490_v29, 16  ;;  %v2197_v28 = vshll.u32 %v11490_v29, 16  ;;  %v1300_v10 = vadd.f32 %v13919_v16, %v1107_v4  ;;  %v2394_v35 = vld [vmem:[#allocation3 + $0x9c] sm:$0xf]  ;;  %v2401_v43 = vld [vmem:[#allocation3 + $0xa8] sm:$0xf] }
 0x1c1   : > { %v1866_v53 = vsel %vm13591_vm5, %v1665_v42, %v1865_v45  ;;  %v11459_v34 = vpack.c.bf16 %v1349_v14, %v1349_v14  ;;  %v11491_v11 = vpack.c.bf16 %v1292_v48, %v1292_v48  ;;  %v1350_v62 = vmax.f32 %v1296_v7, 0.0 }
 0x1c2   : > { %1867 = vst [vmem:[#allocation2 + $0xa8] sm:$0xf] %v1866_v53  ;;  %v11492_v23 = vpack.c.bf16 %v1298_v54, %v1298_v54  ;;  %v2196_v61 = vrot.slane %v2194_v57, 7  ;;  %v1351_v58 = vmax.f32 %v1300_v10, 0.0  ;;  %v1109_v17 = vadd.f32 %v14005_v36, %v13571_v20  ;;  %v1872_v57 = vld [vmem:[#allocation2 + $0xb4] sm:$0xf] }
 0x1c3   : > { %v1113_v39 = vadd.f32 %v14019_v22, %v13567_v18  ;;  %v1668_v27 = vshrl.u32 %v11459_v34, 16  ;;  %v1671_v47 = vshll.u32 %v11459_v34, 16  ;;  %v2202_v0 = vshrl.u32 %v11491_v11, 16 }
 0x1c4   : > { %v2205_v32 = vshll.u32 %v11491_v11, 16  ;;  %v2199_v50 = vor.u32 %v2197_v28, %v2196_v61  ;;  %v2200_v16 = vrot.slane %v2196_v61, 4  ;;  %v11460_v38 = vpack.c.bf16 %v1350_v62, %v1350_v62  ;;  %v1876_v62 = vld [vmem:[#allocation2 + $0xbc] sm:$0x1] }
 0x1c5   : > { %v2211_v24 = vshrl.u32 %v11492_v23, 16  ;;  %v1670_v9 = vrot.slane %v1668_v27, 7  ;;  %v2204_v21 = vrot.slane %v2202_v0, 7  ;;  %v2214_v33 = vshll.u32 %v11492_v23, 16 }
 0x1c6   : > { %v11461_v44 = vpack.c.bf16 %v1351_v58, %v1351_v58  ;;  %v2395_v36 = vsel %vm13591_vm5, %v2199_v50, %v2394_v35  ;;  %v1677_v59 = vshrl.u32 %v11460_v38, 16  ;;  %v1680_v22 = vshll.u32 %v11460_v38, 16 }
 0x1c7   : > { %v14096_v5 = vrot.slane %v2211_v24, 7  ;;  %2396 = vst [vmem:[#allocation3 + $0x9c] sm:$0xf] %v2395_v36  ;;  %v1673_v45 = vor.u32 %v1671_v47, %v1670_v9  ;;  %v1675_v51 = vrot.slane %v1670_v9, 4  ;;  %v2207_v60 = vor.u32 %v2205_v32, %v2204_v21 }
 0x1c8   : > { %v2209_v49 = vrot.slane %v2204_v21, 4  ;;  %v1679_v42 = vrot.slane %v1677_v59, 7  ;;  %v1685_v14 = vshrl.u32 %v11461_v44, 16  ;;  %v1688_v11 = vshll.u32 %v11461_v44, 16 }
 0x1c9   : > { %v2216_v29 = vor.u32 %v2214_v33, %v14096_v5  ;;  %v2217_v4 = vrot.slane %v14096_v5, 4  ;;  %v1674_v48 = vsel %vm13599_vm6, %v1666_v55, %v1673_v45  ;;  %v1870_v7 = vsel %vm13608_vm7, %v1675_v51, %v1869_v41  ;;  %v1883_v5 = vld [vmem:[#allocation2 + $0xc8] sm:$0x1] }
 0x1ca   : > { %v2208_v54 = vsel %vm13599_vm6, %v2200_v16, %v2207_v60  ;;  %v2399_v53 = vsel %vm13608_vm7, %v2209_v49, %v2398_v40  ;;  %1868 = vst [vmem:[#allocation2 + $0xac] sm:$0xf] %v1674_v48  ;;  %1871 = vst [vmem:[#allocation2 + $0xb0] sm:$0x1] %v1870_v7  ;;  %v1682_v28 = vor.u32 %v1680_v22, %v1679_v42  ;;  %v1683_v10 = vrot.slane %v1679_v42, 4 }
 0x1cb   : > { %2397 = vst [vmem:[#allocation3 + $0xa0] sm:$0xf] %v2208_v54  ;;  %2400 = vst [vmem:[#allocation3 + $0xa4] sm:$0x1] %v2399_v53  ;;  %v2402_v34 = vsel %vm13591_vm5, %v2216_v29, %v2401_v43  ;;  %v1687_v55 = vrot.slane %v1685_v14, 7  ;;  %v1302_v23 = vadd.f32 %v13921_v52, %v1109_v17  ;;  %v1306_v61 = vadd.f32 %v13935_v56, %v1113_v39 }
 0x1cc   : > { %2403 = vst [vmem:[#allocation3 + $0xa8] sm:$0xf] %v2402_v34  ;;  %v1115_v58 = vadd.f32 %v14027_v63, %v13571_v20  ;;  %v1873_v35 = vsel %vm13591_vm5, %v1682_v28, %v1872_v57  ;;  %v1117_v47 = vadd.f32 %v14034_v19, %v13567_v18  ;;  %v1119_v0 = vadd.f32 %v14038_v25, %v13571_v20  ;;  %v1879_v43 = vld [vmem:[#allocation2 + $0xc0] sm:$0xf]  ;;  %v2408_v53 = vld [vmem:[#allocation3 + $0xb4] sm:$0xf] }
 0x1cd   : > { %v1692_v27 = vrot.slane %v1687_v55, 4  ;;  %1874 = vst [vmem:[#allocation2 + $0xb4] sm:$0xf] %v1873_v35  ;;  %v1690_v32 = vor.u32 %v1688_v11, %v1687_v55  ;;  %v11493_v50 = vpack.c.bf16 %v1302_v23, %v1302_v23  ;;  %v1352_v16 = vmax.f32 %v1306_v61, 0.0  ;;  %v2412_v55 = vld [vmem:[#allocation3 + $0xbc] sm:$0x1] }
 0x1ce   : > { %v1308_v52 = vadd.f32 %v13941_v37, %v1115_v58  ;;  %v1310_v63 = vadd.f32 %v13945_v26, %v1117_v47  ;;  %v1312_v17 = vadd.f32 %v13948_v8, %v1119_v0  ;;  %v1123_v39 = vadd.f32 %v14050_v6, %v13567_v18  ;;  %v2405_v6 = vld [vmem:[#allocation3 + $0xb0] sm:$0x1] }
 0x1cf   : > { %v1877_v56 = vsel %vm13608_vm7, %v1692_v27, %v1876_v62  ;;  %v1691_v19 = vsel %vm13599_vm6, %v1683_v10, %v1690_v32  ;;  %v2219_v25 = vshrl.u32 %v11493_v50, 16  ;;  %v2222_v38 = vshll.u32 %v11493_v50, 16 }
 0x1d0   : > { %1878 = vst [vmem:[#allocation2 + $0xbc] sm:$0x1] %v1877_v56  ;;  %v11462_v24 = vpack.c.bf16 %v1352_v16, %v1352_v16  ;;  %1875 = vst [vmem:[#allocation2 + $0xb8] sm:$0xf] %v1691_v19  ;;  %v11494_v9 = vpack.c.bf16 %v1308_v52, %v1308_v52  ;;  %v1353_v37 = vmax.f32 %v1310_v63, 0.0  ;;  %v11495_v41 = vpack.c.bf16 %v1312_v17, %v1312_v17 }
 0x1d1   : > { %v1316_v21 = vadd.f32 %v13983_v46, %v1123_v39  ;;  %v2221_v33 = vrot.slane %v2219_v25, 7  ;;  %v1125_v8 = vadd.f32 %v14052_v12, %v13571_v20  ;;  %v1127_v50 = vadd.f32 %v14058_v15, %v13567_v18  ;;  %v17573_v39 = vld [vmem:[#allocation13_spill] sm:$0xff] }
 0x1d2   : > { %v1694_v26 = vshrl.u32 %v11462_v24, 16  ;;  %v1697_v44 = vshll.u32 %v11462_v24, 16  ;;  %v2228_v36 = vshrl.u32 %v11494_v9, 16  ;;  %v2231_v40 = vshll.u32 %v11494_v9, 16  ;;  %v1886_v24 = vld [vmem:[#allocation2 + $0xcc] sm:$0xf] }
 0x1d3   : > { %v11463_v59 = vpack.c.bf16 %v1353_v37, %v1353_v37  ;;  %v2236_v22 = vshrl.u32 %v11495_v41, 16  ;;  %v2224_v45 = vor.u32 %v2222_v38, %v2221_v33  ;;  %v2226_v51 = vrot.slane %v2221_v33, 4  ;;  %v2415_v9 = vld [vmem:[#allocation3 + $0xc0] sm:$0xf] }
 0x1d4   : > { %v1696_v60 = vrot.slane %v1694_v26, 7  ;;  %v2239_v49 = vshll.u32 %v11495_v41, 16  ;;  %v2230_v42 = vrot.slane %v2228_v36, 7  ;;  %v1354_v23 = vmax.f32 %v1316_v21, 0.0 }
 0x1d5   : > { %v1702_v29 = vshrl.u32 %v11463_v59, 16  ;;  %v1705_v14 = vshll.u32 %v11463_v59, 16  ;;  %v2238_v46 = vrot.slane %v2236_v22, 7  ;;  %v2225_v48 = vsel %vm13599_vm6, %v2217_v4, %v2224_v45 }
 0x1d6   : > { %v2406_v12 = vsel %vm13608_vm7, %v2226_v51, %v2405_v6  ;;  %v1699_v7 = vor.u32 %v1697_v44, %v1696_v60  ;;  %v1700_v54 = vrot.slane %v1696_v60, 4  ;;  %2404 = vst [vmem:[#allocation3 + $0xac] sm:$0xf] %v2225_v48  ;;  %v2233_v57 = vor.u32 %v2231_v40, %v2230_v42  ;;  %v2419_v40 = vld [vmem:[#allocation3 + $0xc8] sm:$0x1] }
 0x1d7   : > { %2407 = vst [vmem:[#allocation3 + $0xb0] sm:$0x1] %v2406_v12  ;;  %v2234_v28 = vrot.slane %v2230_v42, 4  ;;  %v1704_v10 = vrot.slane %v1702_v29, 7  ;;  %v2241_v34 = vor.u32 %v2239_v49, %v2238_v46  ;;  %v2243_v62 = vrot.slane %v2238_v46, 4 }
 0x1d8   : > { %v1880_v11 = vsel %vm13591_vm5, %v1699_v7, %v1879_v43  ;;  %v1318_v4 = vadd.f32 %v13987_v1, %v1125_v8  ;;  %v2409_v61 = vsel %vm13591_vm5, %v2233_v57, %v2408_v53  ;;  %v11464_v0 = vpack.c.bf16 %v1354_v23, %v1354_v23  ;;  %v1890_v49 = vld [vmem:[#allocation2 + $0xd4] sm:$0x1] }
 0x1d9   : > { %1881 = vst [vmem:[#allocation2 + $0xc0] sm:$0xf] %v1880_v11  ;;  %v1707_v58 = vor.u32 %v1705_v14, %v1704_v10  ;;  %v1709_v35 = vrot.slane %v1704_v10, 4  ;;  %v2242_v27 = vsel %vm13599_vm6, %v2234_v28, %v2241_v34  ;;  %2410 = vst [vmem:[#allocation3 + $0xb4] sm:$0xf] %v2409_v61  ;;  %v2413_v47 = vsel %vm13608_vm7, %v2243_v62, %v2412_v55 }
 0x1da   : > { %2411 = vst [vmem:[#allocation3 + $0xb8] sm:$0xf] %v2242_v27  ;;  %v11496_v32 = vpack.c.bf16 %v1318_v4, %v1318_v4  ;;  %2414 = vst [vmem:[#allocation3 + $0xbc] sm:$0x1] %v2413_v47  ;;  %v1129_v52 = vadd.f32 %v14060_v30, %v13571_v20  ;;  %v1711_v56 = vshrl.u32 %v11464_v0, 16  ;;  %v1320_v17 = vadd.f32 %v13990_v31, %v1127_v50 }
 0x1db   : > { %v1708_v1 = vsel %vm13599_vm6, %v1700_v54, %v1707_v58  ;;  %v1884_v16 = vsel %vm13608_vm7, %v1709_v35, %v1883_v5  ;;  %v1714_v18 = vshll.u32 %v11464_v0, 16 }
 0x1dc   : > { %1882 = vst [vmem:[#allocation2 + $0xc4] sm:$0xf] %v1708_v1  ;;  %1885 = vst [vmem:[#allocation2 + $0xc8] sm:$0x1] %v1884_v16  ;;  %v2245_v63 = vshrl.u32 %v11496_v32, 16  ;;  %v1322_v19 = vadd.f32 %v17573_v39, %v1129_v52  ;;  %v1713_v25 = vrot.slane %v1711_v56, 7 }
 0x1dd   : > { %v2248_v38 = vshll.u32 %v11496_v32, 16  ;;  %v1355_v37 = vmax.f32 %v1320_v17, 0.0 }
 0x1de   : > { %v2247_v15 = vrot.slane %v2245_v63, 7  ;;  %v11497_v41 = vpack.c.bf16 %v1322_v19, %v1322_v19  ;;  %v1716_v21 = vor.u32 %v1714_v18, %v1713_v25  ;;  %v1717_v60 = vrot.slane %v1713_v25, 4 }
 0x1df   : > { %v11465_v26 = vpack.c.bf16 %v1355_v37, %v1355_v37 }
 0x1e0   : > { %v2250_v33 = vor.u32 %v2248_v38, %v2247_v15  ;;  %v2253_v20 = vshrl.u32 %v11497_v41, 16  ;;  %v1887_v30 = vsel %vm13591_vm5, %v1716_v21, %v1886_v24  ;;  %v2256_v6 = vshll.u32 %v11497_v41, 16 }
 0x1e1   : > { %1888 = vst [vmem:[#allocation2 + $0xcc] sm:$0xf] %v1887_v30  ;;  %v1719_v44 = vshrl.u32 %v11465_v26, 16  ;;  %v2251_v36 = vrot.slane %v2247_v15, 4  ;;  %v1722_v22 = vshll.u32 %v11465_v26, 16 }
 0x1e2   : > { %v2416_v31 = vsel %vm13591_vm5, %v2250_v33, %v2415_v9  ;;  %v2255_v8 = vrot.slane %v2253_v20, 7 }
 0x1e3   : > { %2417 = vst [vmem:[#allocation3 + $0xc0] sm:$0xf] %v2416_v31  ;;  %v1721_v59 = vrot.slane %v1719_v44, 7 }
 0x1e4   : > { %v2258_v45 = vor.u32 %v2256_v6, %v2255_v8  ;;  %v2260_v51 = vrot.slane %v2255_v8, 4 }
 0x1e5   : > { %v1724_v43 = vor.u32 %v1722_v22, %v1721_v59  ;;  %v1726_v42 = vrot.slane %v1721_v59, 4 }
 0x1e6   : > { %v2259_v29 = vsel %vm13599_vm6, %v2251_v36, %v2258_v45  ;;  %v2420_v2 = vsel %vm13608_vm7, %v2260_v51, %v2419_v40 }
 0x1e7   : > { %2418 = vst [vmem:[#allocation3 + $0xc4] sm:$0xf] %v2259_v29  ;;  %2421 = vst [vmem:[#allocation3 + $0xc8] sm:$0x1] %v2420_v2  ;;  %v1725_v14 = vsel %vm13599_vm6, %v1717_v60, %v1724_v43  ;;  %v1891_v46 = vsel %vm13608_vm7, %v1726_v42, %v1890_v49 }
 0x1e8   : > { %1889 = vst [vmem:[#allocation2 + $0xd0] sm:$0xf] %v1725_v14  ;;  %1892 = vst [vmem:[#allocation2 + $0xd4] sm:$0x1] %v1891_v46 }
 0x1e9 PF: > { %v12490_v48 = vld [vmem:[%s17524_s1 + $0xc0] ss:$12 sps:$4 sm:$0xff]   ;;  %v12492_v3 = vld [vmem:[%s17524_s1 + $0xd8] ss:$12 sps:$4 sm:$0xff]   ;;  %v12495_v54 = vld [vmem:[%s17524_s1 + $0xf0] ss:$12 sps:$4 sm:$0xff]  }
 0x1ea   : > { %v12491_v12 = vld [vmem:[%s17524_s1] ss:$12 sps:$4 sm:$0xff]   ;;  %11580 = vmatprep.subr.bf16.mxu0 %v12490_v48  ;;  %v12494_v7 = vld [vmem:[%s17524_s1 + $0x18] ss:$12 sps:$4 sm:$0xff]   ;;  %v12497_v57 = vld [vmem:[%s17524_s1 + $0x30] ss:$12 sps:$4 sm:$0xff]  }
 0x1eb   : > { %11581 = vmatpush3.bf16.msra.mxu0 %v12491_v12  ;;  %v12493_v13 = vld [vmem:[%s17524_s1 + $0x180] ss:$12 sps:$4 sm:$0xff]   ;;  %v12496_v53 = vld [vmem:[%s17524_s1 + $0x198] ss:$12 sps:$4 sm:$0xff]   ;;  %v12498_v28 = vld [vmem:[%s17524_s1 + $0x108] ss:$12 sps:$4 sm:$0xff]  }
 0x1ec   : > { %11582 = vmatprep.subr.bf16.mxu0 %v12492_v3  ;;  %11932 = vmatprep.subr.bf16.mxu1 %v12493_v13  ;;  %v12499_v10 = vld [vmem:[%s17524_s1 + $0x1b0] ss:$12 sps:$4 sm:$0xff]   ;;  %v12500_v34 = vld [vmem:[%s17524_s1 + $0x48] ss:$12 sps:$4 sm:$0xff]   ;;  %v12501_v55 = vld [vmem:[%s17524_s1 + $0x120] ss:$12 sps:$4 sm:$0xff]  }
 0x1ed   : > { %11933 = vmatpush3.bf16.msra.mxu1 %v12493_v13  ;;  %v12502_v11 = vld [vmem:[%s17524_s1 + $0x1c8] ss:$12 sps:$4 sm:$0xff]   ;;  %v12503_v5 = vld [vmem:[%s17524_s1 + $0x60] ss:$12 sps:$4 sm:$0xff]   ;;  %v12504_v23 = vld [vmem:[%s17524_s1 + $0x138] ss:$12 sps:$4 sm:$0xff]  }
 0x1ee   : > { %11934 = vmatprep.subr.bf16.mxu1 %v12496_v53  ;;  %v12505_v62 = vld [vmem:[%s17524_s1 + $0x1e0] ss:$12 sps:$4 sm:$0xff]   ;;  %v12506_v4 = vld [vmem:[%s17524_s1 + $0x78] ss:$12 sps:$4 sm:$0xff]   ;;  %v12507_v58 = vld [vmem:[%s17524_s1 + $0x150] ss:$12 sps:$4 sm:$0xff]  }
 0x1ef   : > { %11583 = vmatpush3.bf16.msra.mxu0 %v12494_v7  ;;  %v12508_v61 = vld [vmem:[%s17524_s1 + $0x1f8] ss:$12 sps:$4 sm:$0xff]   ;;  %v12509_v35 = vld [vmem:[%s17524_s1 + $0x90] ss:$12 sps:$4 sm:$0xff]   ;;  %s11498_s22 = smul.u32 384, %s12983_s30  ;;  %vm3382_vm11 = vcmask 1042432  }
 0x1f0   : > { %11584 = vmatprep.subr.bf16.mxu0 %v12495_v54  ;;  %v12511_v27 = vld [vmem:[%s17524_s1 + $0x210] ss:$12 sps:$4 sm:$0xff]   ;;  %v12510_v47 = vld [vmem:[%s17524_s1 + $0x168] ss:$12 sps:$4 sm:$0xff]   ;;  %v12516_v39 = vld [vmem:[%s17526_s3 + $0x4] ss:$8 sps:$4 sm:$0xff]  }
 0x1f1   : > { %11935 = vmatpush3.bf16.msra.mxu1 %v12496_v53  ;;  %v12512_v0 = vld [vmem:[%s17524_s1 + $0xa8] ss:$12 sps:$4 sm:$0xff]   ;;  %s14240_s16 = scalar_lea.vmem %s13136_s21, %s11498_s22  ;;  %v12517_v33 = vld [vmem:[%s17526_s3 + $0x10] ss:$8 sps:$4 sm:$0xff]   ;;  %v12522_v30 = vld [vmem:[%s17526_s3 + $0x24] ss:$8 sps:$4 sm:$0xff]  }
 0x1f2   : > { %11936 = vmatprep.subr.bf16.mxu1 %v12499_v10  ;;  %v12513_v32 = vld [vmem:[%s17524_s1 + $0x228] ss:$12 sps:$4 sm:$0xff]   ;;  %v2429_v1 = vld [vmem:[%s14240_s16 + $0x20] sm:$0xff]  ;;  %v2428_v56 = vld [vmem:[%s14240_s16 + $0x18] sm:$0xff]  ;;  %s11499_s24 = smul.u32 96, %s12983_s30  ;;  %vm3383_vm12 = vcmask 1046532  }
 0x1f3   : > { %11585 = vmatpush3.bf16.msra.mxu0 %v12497_v57  ;;  %v2426_v50 = vld [vmem:[%s14240_s16 + $0x8] sm:$0xff]  ;;  %v2425_v16 = vld [vmem:[%s14240_s16] sm:$0xff]  ;;  %v2427_v63 = vld [vmem:[%s14240_s16 + $0x10] sm:$0xff]  ;;  %vm3029_vm8 = vsmask.f32 3328  ;;  %vm6603_vm14 = vcmask 1043456  }
 0x1f4   : > { %11586 = vmatprep.subr.bf16.mxu0 %v12498_v28  ;;  %v2474_v52 = vpack.c.bf16 %v2429_v1, %v2426_v50  ;;  %v2430_v17 = vld [vmem:[%s14240_s16 + $0x28] sm:$0xff]  ;;  %v2432_v25 = vld [vmem:[%s14240_s16 + $0x38] sm:$0xff]  ;;  %v2435_v18 = vld [vmem:[%s14240_s16 + $0x50] sm:$0xff]  ;;  %v2473_v15 = vpack.c.bf16 %v2428_v56, %v2425_v16  ;;  %vm3030_vm9 = vsmask.f32 7440  ;;  %s14340_s15 = scalar_lea.vmem [#allocation2], %s11499_s24 }
 0x1f5   : > { %11937 = vmatpush3.bf16.msra.mxu1 %v12499_v10  ;;  %v2475_v19 = vpack.c.bf16 %v2430_v17, %v2427_v63  ;;  %v2433_v38 = vld [vmem:[%s14240_s16 + $0x40] sm:$0xff]  ;;  %v2436_v24 = vld [vmem:[%s14240_s16 + $0x58] sm:$0xff]  ;;  %v2477_v37 = vpack.c.bf16 %v2435_v18, %v2432_v25  ;;  %v2431_v26 = vld [vmem:[%s14240_s16 + $0x30] sm:$0xff]  ;;  %vm6604_vm15 = vsmask.f32 7938  ;;  %vm6610_vm2 = vcmask 1040384  }
 0x1f6   : > { %11938 = vmatprep.subr.bf16.mxu1 %v12502_v11  ;;  %2728 = vmatprep.mubr.bf16.mxu0 %v2474_v52  ;;  %v12514_v9 = vld [vmem:[%s17526_s3] ss:$8 sps:$4 sm:$0xff]   ;;  %v12519_v41 = vld [vmem:[%s17526_s3 + $0x14] ss:$8 sps:$4 sm:$0xff]   ;;  %v2478_v21 = vpack.c.bf16 %v2436_v24, %v2433_v38  ;;  %v12523_v43 = vld [vmem:[%s17526_s3 + $0x30] ss:$8 sps:$4 sm:$0xff]  }
 0x1f7   : > { %11587 = vmatpush3.bf16.msra.mxu0 %v12500_v34  ;;  %11948 = vmatprep.mubr.bf16.mxu1 %v2475_v19  ;;  %v2434_v20 = vld [vmem:[%s14240_s16 + $0x48] sm:$0xff]  ;;  %v2441_v44 = vld [vmem:[%s14240_s16 + $0x80] sm:$0xff]  ;;  %v2439_v8 = vld [vmem:[%s14240_s16 + $0x70] sm:$0xff]  ;;  %vm6400_vm0 = vsmask.f32 256 }
 0x1f8   : > { %11588 = vmatprep.subr.bf16.mxu0 %v12501_v55  ;;  %v2438_v31 = vld [vmem:[%s14240_s16 + $0x68] sm:$0xff]  ;;  %v2476_v40 = vpack.c.bf16 %v2434_v20, %v2431_v26  ;;  %v2445_v59 = vld [vmem:[%s14240_s16 + $0xa0] sm:$0xff]  ;;  %v2448_v22 = vld [vmem:[%s14240_s16 + $0xb8] sm:$0xff]  ;;  %vm6401_vm1 = vsmask.f32 4368 }
 0x1f9   : > { %11939 = vmatpush3.bf16.msra.mxu1 %v12502_v11  ;;  %v2442_v6 = vld [vmem:[%s14240_s16 + $0x88] sm:$0xff]  ;;  %v2480_v51 = vpack.c.bf16 %v2441_v44, %v2438_v31  ;;  %v12525_v60 = vld [vmem:[%s17526_s3 + $0x34] ss:$8 sps:$4 sm:$0xff]   ;;  %v2484_v49 = vpack.c.bf16 %v2448_v22, %v2445_v59  ;;  %v2437_v42 = vld [vmem:[%s14240_s16 + $0x60] sm:$0xff] }
 0x1fa   : > { %11940 = vmatprep.subr.bf16.mxu1 %v12505_v62  ;;  %v2481_v36 = vpack.c.bf16 %v2442_v6, %v2439_v8  ;;  %v12520_v45 = vld [vmem:[%s17526_s3 + $0x20] ss:$8 sps:$4 sm:$0xff]   ;;  %v2440_v29 = vld [vmem:[%s14240_s16 + $0x78] sm:$0xff]  ;;  %v12528_v2 = vld [vmem:[%s17526_s3 + $0x44] ss:$8 sps:$4 sm:$0xff]  }
 0x1fb   : > { %11589 = vmatpush3.bf16.msra.mxu0 %v12503_v5  ;;  %v2444_v14 = vld [vmem:[%s14240_s16 + $0x98] sm:$0xff]  ;;  %v2447_v46 = vld [vmem:[%s14240_s16 + $0xb0] sm:$0xff]  ;;  %v2454_v12 = vld [vmem:[%s14240_s16 + $0xe8] sm:$0xff]  ;;  %v2479_v3 = vpack.c.bf16 %v2440_v29, %v2437_v42 }
 0x1fc   : > { %11590 = vmatprep.subr.bf16.mxu0 %v12504_v23  ;;  %v2451_v48 = vld [vmem:[%s14240_s16 + $0xd0] sm:$0xff]  ;;  %v2457_v7 = vld [vmem:[%s14240_s16 + $0x100] sm:$0xff]  ;;  %v2460_v54 = vld [vmem:[%s14240_s16 + $0x118] sm:$0xff]  ;;  %v2483_v57 = vpack.c.bf16 %v2447_v46, %v2444_v14 }
 0x1fd   : > { %11941 = vmatpush3.bf16.msra.mxu1 %v12505_v62  ;;  %v2487_v13 = vpack.c.bf16 %v2454_v12, %v2451_v48  ;;  %v12526_v53 = vld [vmem:[%s17526_s3 + $0x40] ss:$8 sps:$4 sm:$0xff]   ;;  %v12531_v28 = vld [vmem:[%s17526_s3 + $0x54] ss:$8 sps:$4 sm:$0xff]   ;;  %v2490_v10 = vpack.c.bf16 %v2460_v54, %v2457_v7  ;;  %v12529_v34 = vld [vmem:[%s17526_s3 + $0x50] ss:$8 sps:$4 sm:$0xff]  }
 0x1fe   : > { %11942 = vmatprep.subr.bf16.mxu1 %v12508_v61  ;;  %v2443_v55 = vld [vmem:[%s14240_s16 + $0x90] sm:$0xff]  ;;  %v2446_v11 = vld [vmem:[%s14240_s16 + $0xa8] sm:$0xff]  ;;  %v2453_v23 = vld [vmem:[%s14240_s16 + $0xe0] sm:$0xff] }
 0x1ff   : > { %11591 = vmatpush3.bf16.msra.mxu0 %v12506_v4  ;;  %v12534_v5 = vld [vmem:[%s17526_s3 + $0x64] ss:$8 sps:$4 sm:$0xff]   ;;  %v2482_v4 = vpack.c.bf16 %v2446_v11, %v2443_v55  ;;  %v12535_v1 = vld [vmem:[%s17526_s3 + $0x70] ss:$8 sps:$4 sm:$0xff]   ;;  %v12538_v25 = vld [vmem:[%s17526_s3 + $0x80] ss:$8 sps:$4 sm:$0xff]  }
 0x200   : > { %11592 = vmatprep.subr.bf16.mxu0 %v12507_v58  ;;  %v2450_v62 = vld [vmem:[%s14240_s16 + $0xc8] sm:$0xff]  ;;  %v2463_v58 = vld [vmem:[%s14240_s16 + $0x130] sm:$0xff]  ;;  %v2449_v52 = vld [vmem:[%s14240_s16 + $0xc0] sm:$0xff] }
 0x201   : > { %11943 = vmatpush3.bf16.msra.mxu1 %v12508_v61  ;;  %v12532_v61 = vld [vmem:[%s17526_s3 + $0x60] ss:$8 sps:$4 sm:$0xff]   ;;  %v2452_v56 = vld [vmem:[%s14240_s16 + $0xd8] sm:$0xff]  ;;  %v12540_v63 = vld [vmem:[%s17526_s3 + $0x84] ss:$8 sps:$4 sm:$0xff]  }
 0x202   : > { %11944 = vmatprep.subr.bf16.mxu1 %v12511_v27  ;;  %v2456_v17 = vld [vmem:[%s14240_s16 + $0xf8] sm:$0xff]  ;;  %v2485_v19 = vpack.c.bf16 %v2452_v56, %v2449_v52  ;;  %v2999_v18 = vld [vmem:[%s14340_s15] sm:$0xf]  ;;  %v14348_v24 = vld [vmem:[%s14240_s16 + $0xf0] sm:$0xff] }
 0x203   : > { %11593 = vmatpush3.bf16.msra.mxu0 %v12509_v35  ;;  %v2486_v35 = vpack.c.bf16 %v2453_v23, %v2450_v62  ;;  %v12543_v38 = vld [vmem:[%s17526_s3 + $0x94] ss:$8 sps:$4 sm:$0xff]   ;;  %v14355_v31 = vld [vmem:[%s14340_s15] sm:$0xff]   ;;  %v2462_v59 = vld [vmem:[%s14240_s16 + $0x128] sm:$0xff] }
 0x204   : > { %11594 = vmatprep.subr.bf16.mxu0 %v12510_v47  ;;  %v2469_v47 = vld [vmem:[%s14240_s16 + $0x160] sm:$0xff]  ;;  %vm14367_vm10 = vmor %vm3029_vm8, %vm3030_vm9  ;;  %v3002_v29 = vld [vmem:[%s14340_s15 + $0xc] sm:$0xf] }
 0x205   : > { %11945 = vmatpush3.bf16.msra.mxu1 %v12511_v27  ;;  %v2466_v27 = vld [vmem:[%s14240_s16 + $0x148] sm:$0xff]  ;;  %v3004_v14 = vld [vmem:[%s14340_s15 + $0x14] sm:$0x1]  ;;  %v3057_v12 = vshrl.u32 %v3002_v29, 16  ;;  %vm14555_vm13 = vmor %vm3382_vm11, %vm3383_vm12 }
 0x206   : > { %11946 = vmatprep.subr.bf16.mxu1 %v12513_v32  ;;  %v2493_v50 = vpack.c.bf16 %v2466_v27, %v2463_v58  ;;  %v12546_v22 = vld [vmem:[%s17526_s3 + $0xa4] ss:$8 sps:$4 sm:$0xff]   ;;  %v3006_v27 = vld [vmem:[%s14340_s15 + $0x1c] sm:$0xf]  ;;  %vm15675_vm3 = vmand %vm6603_vm14, %vm6604_vm15 }
 0x207   : > { %11595 = vmatpush3.bf16.msra.mxu0 %v12512_v0  ;;  %v2472_v0 = vld [vmem:[%s14240_s16 + $0x178] sm:$0xff]  ;;  %v3059_v55 = vrot.slane %v3057_v12, 4  ;;  %v3090_v56 = vshll.u32 %v3006_v27, 16  ;;  %v14423_v12 = vld [vmem:[%s14340_s15 + $0x24] sm:$0xff]   ;;  %vm15686_vm4 = vmor %vm6400_vm0, %vm6401_vm1 }
 0x208   : > { %5659 = vmatprep.subr.bf16.mxu0 %v12516_v39  ;;  %v2496_v16 = vpack.c.bf16 %v2472_v0, %v2469_v47  ;;  %v2459_v39 = vld [vmem:[%s14240_s16 + $0x110] sm:$0xff]  ;;  %v3007_v47 = vld [vmem:[%s14340_s15 + $0x20] sm:$0x1]  ;;  %vm15693_vm5 = vmand %vm6610_vm2, %vm6400_vm0 }
 0x209   : > { %11947 = vmatpush3.bf16.msra.mxu1 %v12513_v32  ;;  %v12537_v32 = vld [vmem:[%s17526_s3 + $0x74] ss:$8 sps:$4 sm:$0xff]   ;;  %v2489_v20 = vpack.c.bf16 %v2459_v39, %v2456_v17  ;;  %v12547_v0 = vld [vmem:[%s17526_s3 + $0xb0] ss:$8 sps:$4 sm:$0xff]  }
 0x20a   : > { %2729 = vmatmul.mubr.bf16.vlgmr.msra.gmra.mrb[0].mxu0 %v2473_v15  ;;  %v3000_v15 = vld [vmem:[%s14340_s15 + $0x4] sm:$0xf]  ;;  %v2468_v17 = vld [vmem:[%s14240_s16 + $0x158] sm:$0xff]  ;;  %v2471_v39 = vld [vmem:[%s14240_s16 + $0x170] sm:$0xff] }
 0x20b   : > { %5660 = vmatpush1.bf16.msra.mxu0 %v12514_v9  ;;  %2736 = vmatprep.mubr.bf16.mxu0 %v2477_v37  ;;  %v14351_v9 = vld [vmem:[%s14240_s16 + $0x108] sm:$0xff]  ;;  %v3046_v26 = vshrl.u32 %v3000_v15, 16 }
 0x20c   : > { %5661 = vmatprep.subr.bf16.mxu0 %v12519_v41  ;;  %11949 = vmatmul.mubr.bf16.vlgmr.msra.gmra.mrb[0].mxu1 %v2478_v21  ;;  %v3001_v37 = vld [vmem:[%s14340_s15 + $0x8] sm:$0x1]  ;;  %v3033_v41 = vshrl.u32 %v2999_v18, 16  ;;  %v3036_v21 = vshll.u32 %v2999_v18, 16  ;;  %v2488_v42 = vpack.c.bf16 %v14351_v9, %v14348_v24  ;;  %v3100_v18 = vshll.u32 %v3007_v47, 16 }
 0x20d   : > { %11952 = vmatprep.mubr.bf16.mxu1 %v2481_v36  ;;  %v3048_v36 = vrot.slane %v3046_v26, 4  ;;  %v12550_v26 = vld [vmem:[%s17526_s3 + $0xc0] ss:$8 sps:$4 sm:$0xff]  }
 0x20e   : > { %v3035_v44 = vrot.slane %v3033_v41, 4  ;;  %v3038_v8 = vrot.slane %v3036_v21, 5 }
 0x20f   : > { %5662 = vmatpush1.bf16.msra.mxu0 %v12517_v33  ;;  %v3042_v33 = vshll.u32 %v3000_v15, 16  ;;  %v14405_v15 = vld [vmem:[%s14340_s15 + $0x18] sm:$0xff]  }
 0x210   : > { %5663 = vmatprep.subr.bf16.mxu0 %v12522_v30  ;;  %v3052_v30 = vshll.u32 %v3001_v37, 16  ;;  %v3092_v37 = vrot.slane %v3090_v56, 5 }
 0x211   : > { %v3044_v6 = vrot.slane %v3042_v33, 5 }
 0x212   : > { %2737 = vmatmul.mubr.bf16.gmra.mrb[4].mxu0 %v2476_v40  ;;  %v12541_v40 = vld [vmem:[%s17526_s3 + $0x90] ss:$8 sps:$4 sm:$0xff]  }
 0x213   : > { %5664 = vmatpush1.bf16.msra.mxu0 %v12520_v45  ;;  %2744 = vmatprep.mubr.bf16.mxu0 %v2480_v51  ;;  %v2465_v45 = vld [vmem:[%s14240_s16 + $0x140] sm:$0xff] }
 0x214   : > { %5665 = vmatprep.subr.bf16.mxu0 %v12525_v60  ;;  %11953 = vmatmul.mubr.bf16.gmra.mrb[4].mxu1 %v2484_v49  ;;  %v3039_v60 = vor.u32 %v3038_v8, %v3035_v44  ;;  %v3049_v49 = vor.u32 %v3048_v36, %v3044_v6  ;;  %v3102_v8 = vrot.slane %v3100_v18, 5  ;;  %v12555_v36 = vld [vmem:[%s17526_s3 + $0xd4] ss:$8 sps:$4 sm:$0xff]  }
 0x215   : > { %11956 = vmatprep.mubr.bf16.mxu1 %v2487_v13  ;;  %v2492_v13 = vpack.c.bf16 %v2465_v45, %v2462_v59  ;;  %v3010_v45 = vld [vmem:[%s14340_s15 + $0x2c] sm:$0x1] }
 0x216   : > { %v3040_v46 = vrot.slane %v3039_v60, 4  ;;  %v3050_v48 = vrot.slane %v3049_v49, 4 }
 0x217   : > { %5666 = vmatpush1.bf16.msra.mxu0 %v12523_v43  ;;  %v3054_v43 = vrot.slane %v3052_v30, 5 }
 0x218   : > { %5667 = vmatprep.subr.bf16.mxu0 %v12528_v2  ;;  %v3003_v2 = vld [vmem:[%s14340_s15 + $0x10] sm:$0xf] }
 0x219   : > { %v3066_v7 = vshll.u32 %v3003_v2, 16  ;;  %v3070_v54 = vshrl.u32 %v3003_v2, 16  ;;  %v3124_v2 = vshll.u32 %v3010_v45, 16 }
 0x21a   : > { %2745 = vmatmul.mubr.bf16.gmra.mrb[8].mxu0 %v2479_v3  ;;  %v3060_v3 = vshll.u32 %v3002_v29, 16 }
 0x21b   : > { %5668 = vmatpush1.bf16.msra.mxu0 %v12526_v53  ;;  %2752 = vmatprep.mubr.bf16.mxu0 %v2483_v57  ;;  %v3076_v53 = vshll.u32 %v3004_v14, 16  ;;  %v14377_v57 = vld [vmem:[%s14340_s15 + $0xc] sm:$0xff]   ;;  %v3068_v23 = vrot.slane %v3066_v7, 5 }
 0x21c   : > { %5669 = vmatprep.subr.bf16.mxu0 %v12531_v28  ;;  %11957 = vmatmul.mubr.bf16.gmra.mrb[8].mxu1 %v2490_v10  ;;  %v12544_v28 = vld [vmem:[%s17526_s3 + $0xa0] ss:$8 sps:$4 sm:$0xff]   ;;  %v3045_v10 = vsel %vm14367_vm10, %v3040_v46, %v3044_v6  ;;  %v3062_v11 = vrot.slane %v3060_v3, 5  ;;  %v3008_v6 = vld [vmem:[%s14340_s15 + $0x24] sm:$0xf] }
 0x21d   : > { %11960 = vmatprep.mubr.bf16.mxu1 %v2493_v50  ;;  %v2464_v50 = vld [vmem:[%s14240_s16 + $0x138] sm:$0xff]  ;;  %v3105_v60 = vshrl.u32 %v3008_v6, 16  ;;  %v3108_v49 = vshll.u32 %v3008_v6, 16 }
 0x21e   : > { %v3063_v58 = vor.u32 %v3062_v11, %v3059_v55  ;;  %v12558_v55 = vld [vmem:[%s17526_s3 + $0xe4] ss:$8 sps:$4 sm:$0xff]  }
 0x21f   : > { %5670 = vmatpush1.bf16.msra.mxu0 %v12529_v34  ;;  %v3055_v34 = vsel %vm14367_vm10, %v3050_v48, %v3054_v43  ;;  %v3107_v46 = vrot.slane %v3105_v60, 4  ;;  %v3110_v48 = vrot.slane %v3108_v49, 5 }
 0x220   : > { %5671 = vmatprep.subr.bf16.mxu0 %v12534_v5  ;;  %v12549_v5 = vld [vmem:[%s17526_s3 + $0xb4] ss:$8 sps:$4 sm:$0xff]   ;;  %v14389_v62 = vcombine.low %v3045_v10, %v3055_v34  ;;  %v2470_v34 = vld [vmem:[%s14240_s16 + $0x168] sm:$0xff] }
 0x221   : > { %v3111_v10 = vor.u32 %v3110_v48, %v3107_v46  ;;  %v12568_v48 = vld [vmem:[%s17526_s3 + $0x114] ss:$8 sps:$4 sm:$0xff]  }
 0x222   : > { %2753 = vmatmul.mubr.bf16.gmra.mrb[12].mxu0 %v2482_v4  ;;  %v3072_v4 = vrot.slane %v3070_v54, 4  ;;  %v12553_v54 = vld [vmem:[%s17526_s3 + $0xd0] ss:$8 sps:$4 sm:$0xff]  }
 0x223   : > { %5672 = vmatpush1.bf16.msra.mxu0 %v12532_v61  ;;  %2760 = vmatprep.mubr.bf16.mxu0 %v2486_v35  ;;  %v3078_v61 = vrot.slane %v3076_v53, 5  ;;  %v3005_v35 = vld [vmem:[%s14340_s15 + $0x18] sm:$0xf]  ;;  %v2467_v53 = vld [vmem:[%s14240_s16 + $0x150] sm:$0xff] }
 0x224   : > { %5673 = vmatprep.subr.bf16.mxu0 %v12537_v32  ;;  %11961 = vmatmul.mubr.bf16.gmra.mrb[12].mxu1 %v2496_v16  ;;  %v2461_v32 = vld [vmem:[%s14240_s16 + $0x120] sm:$0xff]  ;;  %v3081_v16 = vshrl.u32 %v3005_v35, 16  ;;  %v3084_v52 = vshll.u32 %v3005_v35, 16  ;;  %v3013_v35 = vld [vmem:[%s14340_s15 + $0x38] sm:$0x1] }
 0x225   : > { %v2491_v41 = vpack.c.bf16 %v2464_v50, %v2461_v32  ;;  %v3148_v56 = vshll.u32 %v3013_v35, 16 }
 0x226   : > { %v3083_v24 = vrot.slane %v3081_v16, 4  ;;  %v3086_v9 = vrot.slane %v3084_v52, 5 }
 0x227   : > { %5674 = vmatpush1.bf16.msra.mxu0 %v12535_v1  ;;  %v3073_v1 = vor.u32 %v3072_v4, %v3068_v23  ;;  %v3011_v4 = vld [vmem:[%s14340_s15 + $0x30] sm:$0xf] }
 0x228   : > { %5675 = vmatprep.subr.bf16.mxu0 %v12540_v63  ;;  %v12552_v63 = vld [vmem:[%s17526_s3 + $0xc4] ss:$8 sps:$4 sm:$0xff]   ;;  %v3087_v44 = vor.u32 %v3086_v9, %v3083_v24  ;;  %v3150_v9 = vrot.slane %v3148_v56, 5  ;;  %v3020_v56 = vld [vmem:[%s14340_s15 + $0x54] sm:$0xf] }
 0x22a   : > { %2761 = vmatmul.mubr.bf16.gmra.mrb[16].mxu0 %v2485_v19  ;;  %v3064_v19 = vrot.slane %v3063_v58, 4  ;;  %v3088_v43 = vrot.slane %v3087_v44, 4  ;;  %v3012_v58 = vld [vmem:[%s14340_s15 + $0x34] sm:$0xf] }
 0x22b   : > { %5676 = vmatpush1.bf16.msra.mxu0 %v12538_v25  ;;  %2768 = vmatprep.mubr.bf16.mxu0 %v2489_v20  ;;  %v3094_v25 = vshrl.u32 %v3006_v27, 16  ;;  %v2495_v20 = vpack.c.bf16 %v2471_v39, %v2468_v17  ;;  %v3129_v27 = vshrl.u32 %v3011_v4, 16  ;;  %v3138_v32 = vshll.u32 %v3012_v58, 16  ;;  %v12556_v17 = vld [vmem:[%s17526_s3 + $0xe0] ss:$8 sps:$4 sm:$0xff]  }
 0x22c   : > { %5677 = vmatprep.subr.bf16.mxu0 %v12543_v38  ;;  %v3074_v38 = vrot.slane %v3073_v1, 4  ;;  %v3069_v21 = vsel %vm14367_vm10, %v3064_v19, %v3068_v23  ;;  %v3093_v3 = vsel %vm14367_vm10, %v3088_v43, %v3092_v37  ;;  %v3126_v23 = vrot.slane %v3124_v2, 5  ;;  %v12565_v43 = vld [vmem:[%s17526_s3 + $0x104] ss:$8 sps:$4 sm:$0xff]   ;;  %v12563_v2 = vld [vmem:[%s17526_s3 + $0x100] ss:$8 sps:$4 sm:$0xff]  }
 0x22d   : > { %v3096_v33 = vrot.slane %v3094_v25, 4  ;;  %v3142_v50 = vshrl.u32 %v3012_v58, 16  ;;  %v2494_v1 = vpack.c.bf16 %v2470_v34, %v2467_v53  ;;  %v3131_v52 = vrot.slane %v3129_v27, 4  ;;  %v14488_v27 = vld [vmem:[%s14340_s15 + $0x48] sm:$0xff]  }
 0x22e   : > { %v3079_v30 = vsel %vm14367_vm10, %v3074_v38, %v3078_v61  ;;  %v3112_v61 = vrot.slane %v3111_v10, 4  ;;  %v3140_v25 = vrot.slane %v3138_v32, 5  ;;  %v12561_v38 = vld [vmem:[%s17526_s3 + $0xf4] ss:$8 sps:$4 sm:$0xff]   ;;  %v3019_v10 = vld [vmem:[%s14340_s15 + $0x50] sm:$0x1] }
 0x22f   : > { %5678 = vmatpush1.bf16.msra.mxu0 %v12541_v40  ;;  %v14418_v40 = vcombine.low %v3069_v21, %v3079_v30  ;;  %v3097_v59 = vor.u32 %v3096_v33, %v3092_v37  ;;  %v3144_v18 = vrot.slane %v3142_v50, 4  ;;  %v3014_v37 = vld [vmem:[%s14340_s15 + $0x3c] sm:$0xf]  ;;  %v12559_v21 = vld [vmem:[%s17526_s3 + $0xf0] ss:$8 sps:$4 sm:$0xff]   ;;  %v3196_v35 = vshll.u32 %v3019_v10, 16 }
 0x230   : > { %5679 = vmatprep.subr.bf16.mxu0 %v12546_v22  ;;  %v3009_v22 = vld [vmem:[%s14340_s15 + $0x28] sm:$0xf]  ;;  %v3016_v30 = vld [vmem:[%s14340_s15 + $0x44] sm:$0x1]  ;;  %v3153_v44 = vshrl.u32 %v3014_v37, 16 }
 0x231   : > { %v3118_v29 = vshrl.u32 %v3009_v22, 16  ;;  %v3098_v14 = vrot.slane %v3097_v59, 4  ;;  %v3172_v59 = vshll.u32 %v3016_v30, 16 }
 0x232   : > { %2769 = vmatmul.mubr.bf16.gmra.mrb[20].mxu0 %v2488_v42  ;;  %v3114_v42 = vshll.u32 %v3009_v22, 16  ;;  %v3155_v60 = vrot.slane %v3153_v44, 4 }
 0x233   : > { %5680 = vmatpush1.bf16.msra.mxu0 %v12544_v28  ;;  %2776 = vmatprep.mubr.bf16.mxu0 %v2492_v13  ;;  %v3120_v7 = vrot.slane %v3118_v29, 4  ;;  %v3103_v28 = vsel %vm14367_vm10, %v3098_v14, %v3102_v8  ;;  %v3156_v8 = vshll.u32 %v3014_v37, 16 }
 0x234   : > { %5681 = vmatprep.subr.bf16.mxu0 %v12549_v5  ;;  %v3116_v13 = vrot.slane %v3114_v42, 5  ;;  %v14437_v11 = vcombine.low %v3093_v3, %v3103_v28  ;;  %v3018_v28 = vld [vmem:[%s14340_s15 + $0x4c] sm:$0xf] }
 0x235   : > { %v3158_v49 = vrot.slane %v3156_v8, 5 }
 0x236   : > { %v3121_v5 = vor.u32 %v3120_v7, %v3116_v13  ;;  %v3117_v16 = vsel %vm14367_vm10, %v3112_v61, %v3116_v13  ;;  %v3174_v7 = vrot.slane %v3172_v59, 5 }
 0x237   : > { %5682 = vmatpush1.bf16.msra.mxu0 %v12547_v0  ;;  %v3132_v0 = vshll.u32 %v3011_v4, 16  ;;  %v3159_v46 = vor.u32 %v3158_v49, %v3155_v60  ;;  %v3190_v4 = vshrl.u32 %v3018_v28, 16  ;;  %v12573_v60 = vld [vmem:[%s17526_s3 + $0x130] ss:$8 sps:$4 sm:$0xff]  }
 0x238   : > { %5683 = vmatprep.subr.bf16.mxu0 %v12552_v63  ;;  %v3122_v47 = vrot.slane %v3121_v5, 4  ;;  %v14445_v63 = vld [vmem:[%s14340_s15 + $0x30] sm:$0xff]  }
 0x239   : > { %v3134_v19 = vrot.slane %v3132_v0, 5  ;;  %v3160_v53 = vrot.slane %v3159_v46, 4  ;;  %v3025_v46 = vld [vmem:[%s14340_s15 + $0x68] sm:$0x1] }
 0x23a   : > { %2777 = vmatmul.mubr.bf16.gmra.mrb[24].mxu0 %v2491_v41  ;;  %v3127_v39 = vsel %vm14367_vm10, %v3122_v47, %v3126_v23  ;;  %v14459_v41 = vld [vmem:[%s14340_s15 + $0x3c] sm:$0xff]   ;;  %v3186_v23 = vshll.u32 %v3018_v28, 16  ;;  %v12566_v47 = vld [vmem:[%s17526_s3 + $0x110] ss:$8 sps:$4 sm:$0xff]   ;;  %v3244_v10 = vshll.u32 %v3025_v46, 16 }
 0x23b   : > { %5684 = vmatpush1.bf16.msra.mxu0 %v12550_v26  ;;  %2784 = vmatprep.mubr.bf16.mxu0 %v2495_v20  ;;  %v14455_v24 = vcombine.low %v3117_v16, %v3127_v39  ;;  %v3135_v33 = vor.u32 %v3134_v19, %v3131_v52  ;;  %v3145_v26 = vor.u32 %v3144_v18, %v3140_v25  ;;  %v3015_v20 = vld [vmem:[%s14340_s15 + $0x40] sm:$0xf]  ;;  %v12572_v16 = vld [vmem:[%s17526_s3 + $0x124] ss:$8 sps:$4 sm:$0xff]   ;;  %v3021_v19 = vld [vmem:[%s14340_s15 + $0x58] sm:$0xf] }
 0x23c   : > { %5685 = vmatprep.subr.bf16.mxu0 %v12555_v36  ;;  %v3162_v6 = vshll.u32 %v3015_v20, 16  ;;  %v3166_v36 = vshrl.u32 %v3015_v20, 16  ;;  %v3188_v50 = vrot.slane %v3186_v23, 5  ;;  %v3201_v18 = vshrl.u32 %v3020_v56, 16 }
 0x23d   : > { %v3136_v22 = vrot.slane %v3135_v33, 4  ;;  %v3146_v45 = vrot.slane %v3145_v26, 4  ;;  %v3214_v37 = vshrl.u32 %v3021_v19, 16  ;;  %v12575_v33 = vld [vmem:[%s17526_s3 + $0x134] ss:$8 sps:$4 sm:$0xff]  }
 0x23e   : > { %v3164_v42 = vrot.slane %v3162_v6, 5  ;;  %v3168_v29 = vrot.slane %v3166_v36, 4  ;;  %v3203_v30 = vrot.slane %v3201_v18, 4  ;;  %v14512_v36 = vld [vmem:[%s14340_s15 + $0x54] sm:$0xff]  }
 0x23f   : > { %5686 = vmatpush1.bf16.msra.mxu0 %v12553_v54  ;;  %v3151_v14 = vsel %vm14367_vm10, %v3146_v45, %v3150_v9  ;;  %v3017_v54 = vld [vmem:[%s14340_s15 + $0x48] sm:$0xf]  ;;  %v3210_v9 = vshll.u32 %v3021_v19, 16  ;;  %v3216_v6 = vrot.slane %v3214_v37, 4 }
 0x240   : > { %5687 = vmatprep.subr.bf16.mxu0 %v12558_v55  ;;  %v3169_v13 = vor.u32 %v3168_v29, %v3164_v42  ;;  %v3177_v34 = vshrl.u32 %v3017_v54, 16  ;;  %v3180_v5 = vshll.u32 %v3017_v54, 16  ;;  %v3165_v61 = vsel %vm14367_vm10, %v3160_v53, %v3164_v42  ;;  %v3023_v29 = vld [vmem:[%s14340_s15 + $0x60] sm:$0xf] }
 0x241   : > { %v3212_v8 = vrot.slane %v3210_v9, 5 }
 0x242   : > { %2785 = vmatmul.mubr.bf16.gmra.mrb[28].mxu0 %v2494_v1  ;;  %v3170_v55 = vrot.slane %v3169_v13, 4  ;;  %v3179_v58 = vrot.slane %v3177_v34, 4  ;;  %v3182_v32 = vrot.slane %v3180_v5, 5  ;;  %v3192_v1 = vrot.slane %v3190_v4, 4  ;;  %v14534_v34 = vld [vmem:[%s14340_s15 + $0x60] sm:$0xff]  }
 0x243   : > { %5688 = vmatpush1.bf16.msra.mxu0 %v12556_v17  ;;  %5691 = vmatprep.mubr.bf16.mxu0 %v14389_v62  ;;  %v3141_v62 = vsel %vm14367_vm10, %v3136_v22, %v3140_v25  ;;  %v3022_v25 = vld [vmem:[%s14340_s15 + $0x5c] sm:$0x1]  ;;  %v12577_v4 = vld [vmem:[%s17526_s3 + $0x140] ss:$8 sps:$4 sm:$0xff]  }
 0x244   : > { %5689 = vmatprep.subr.bf16.mxu0 %v12561_v38  ;;  %v14480_v3 = vcombine.low %v3141_v62, %v3151_v14  ;;  %v3175_v0 = vsel %vm14367_vm10, %v3170_v55, %v3174_v7  ;;  %v3183_v17 = vor.u32 %v3182_v32, %v3179_v58  ;;  %v3193_v39 = vor.u32 %v3192_v1, %v3188_v50  ;;  %v3024_v14 = vld [vmem:[%s14340_s15 + $0x64] sm:$0xf]  ;;  %v12583_v58 = vld [vmem:[%s17526_s3 + $0x154] ss:$8 sps:$4 sm:$0xff]   ;;  %v3026_v32 = vld [vmem:[%s14340_s15 + $0x6c] sm:$0xf] }
 0x245   : > { %v14500_v52 = vcombine.low %v3165_v61, %v3175_v0  ;;  %v3204_v38 = vshll.u32 %v3020_v56, 16  ;;  %v3228_v7 = vshll.u32 %v3023_v29, 16  ;;  %v3234_v54 = vshll.u32 %v3024_v14, 16  ;;  %v3028_v1 = vld [vmem:[%s14340_s15 + $0x74] sm:$0x1] }
 0x246   : > { %v3184_v26 = vrot.slane %v3183_v17, 4  ;;  %v3194_v20 = vrot.slane %v3193_v39, 4  ;;  %v3238_v53 = vshrl.u32 %v3024_v14, 16  ;;  %v3246_v0 = vrot.slane %v3244_v10, 5  ;;  %v12590_v14 = vld [vmem:[%s17526_s3 + $0x174] ss:$8 sps:$4 sm:$0xff]  }
 0x247   : > { %5690 = vmatpush1.bf16.msra.mxu0 %v12559_v21  ;;  %v3220_v21 = vshll.u32 %v3022_v25, 16  ;;  %v3206_v44 = vrot.slane %v3204_v38, 5  ;;  %v3230_v5 = vrot.slane %v3228_v7, 5  ;;  %v3268_v38 = vshll.u32 %v3028_v1, 16  ;;  %v12588_v7 = vld [vmem:[%s17526_s3 + $0x170] ss:$8 sps:$4 sm:$0xff]  }
 0x248   : > { %5788 = vmatprep.subr.bf16.mxu0 %v12565_v43  ;;  %v3189_v59 = vsel %vm14367_vm10, %v3184_v26, %v3188_v50  ;;  %v3217_v43 = vor.u32 %v3216_v6, %v3212_v8  ;;  %v3240_v23 = vrot.slane %v3238_v53, 4  ;;  %v3027_v50 = vld [vmem:[%s14340_s15 + $0x70] sm:$0xf]  ;;  %v3325_v10 = vld [vmem:[%s14340_s15 + $0xc] sm:$0xe] }
 0x249   : > { %v3207_v45 = vor.u32 %v3206_v44, %v3203_v30  ;;  %v3222_v42 = vrot.slane %v3220_v21, 5  ;;  %v3258_v39 = vshll.u32 %v3027_v50, 16  ;;  %v3262_v19 = vshrl.u32 %v3027_v50, 16  ;;  %v3328_v1 = vld [vmem:[%s14340_s15 + $0x18] sm:$0xe] }
 0x24a   : > { %5692 = vmatmul.mubr.bf16.vlgmr.msra.gmra.mrb[32].mxu0 %v14355_v31  ;;  %v3198_v31 = vrot.slane %v3196_v35, 5  ;;  %v3218_v13 = vrot.slane %v3217_v43, 4  ;;  %v3270_v44 = vrot.slane %v3268_v38, 5 }
 0x24b   : > { %5789 = vmatpush1.bf16.msra.mxu0 %v12563_v2  ;;  %5699 = vmatprep.mubr.bf16.mxu0 %v14418_v40  ;;  %v12570_v40 = vld [vmem:[%s17526_s3 + $0x120] ss:$8 sps:$4 sm:$0xff]   ;;  %v12579_v2 = vld [vmem:[%s17526_s3 + $0x144] ss:$8 sps:$4 sm:$0xff]   ;;  %v3208_v62 = vrot.slane %v3207_v45, 4  ;;  %v3264_v26 = vrot.slane %v3262_v19, 4 }
 0x24c   : > { %5790 = vmatprep.subr.bf16.mxu0 %v12568_v48  ;;  %v3199_v22 = vsel %vm14367_vm10, %v3194_v20, %v3198_v31  ;;  %v3225_v48 = vshrl.u32 %v3023_v29, 16  ;;  %v3223_v55 = vsel %vm14367_vm10, %v3218_v13, %v3222_v42  ;;  %v3252_v31 = vshll.u32 %v3026_v32, 16  ;;  %v12586_v20 = vld [vmem:[%s17526_s3 + $0x164] ss:$8 sps:$4 sm:$0xff]   ;;  %v12584_v29 = vld [vmem:[%s17526_s3 + $0x160] ss:$8 sps:$4 sm:$0xff]  }
 0x24d   : > { %v14521_v49 = vcombine.low %v3189_v59, %v3199_v22  ;;  %v3322_v59 = vld [vmem:[%s14340_s15] sm:$0xe]  ;;  %v3323_v22 = vld [vmem:[%s14340_s15 + $0x4] sm:$0xf] }
 0x24e   : > { %v3227_v28 = vrot.slane %v3225_v48, 4  ;;  %v3254_v18 = vrot.slane %v3252_v31, 5  ;;  %v10760_v43 = vrot.slane %v3322_v59, 9  ;;  %v3387_v42 = vrot.slane %v3323_v22, 5  ;;  %v3330_v31 = vld [vmem:[%s14340_s15 + $0x20] sm:$0x1] }
 0x24f   : > { %5791 = vmatpush1.bf16.msra.mxu0 %v12566_v47  ;;  %v3404_v19 = vrot.slane %v3330_v31, 5  ;;  %v12604_v59 = vld [vmem:[%s17526_s3 + $0x1b4] ss:$8 sps:$4 sm:$0xff]  }
 0x250   : > { %5792 = vmatprep.subr.bf16.mxu0 %v12572_v16  ;;  %v3231_v35 = vor.u32 %v3230_v5, %v3227_v28  ;;  %v3249_v16 = vshrl.u32 %v3026_v32, 16  ;;  %v14588_v48 = vsel %vm14555_vm13, %v10760_v43, %v3387_v42  ;;  %v3389_v13 = vrot.slane %v3387_v42, 4  ;;  %v14603_v28 = vld [vmem:[%s14340_s15 + $0x18] sm:$0xff]   ;;  %v3334_v43 = vld [vmem:[%s14340_s15 + $0x30] sm:$0xe] }
 0x251   : > { %v12597_v32 = vld [vmem:[%s17526_s3 + $0x194] ss:$8 sps:$4 sm:$0xff]  }
 0x252   : > { %5700 = vmatmul.mubr.bf16.gmra.mrb[36].mxu0 %v14377_v57  ;;  %v3213_v57 = vsel %vm14367_vm10, %v3208_v62, %v3212_v8  ;;  %v3232_v56 = vrot.slane %v3231_v35, 4  ;;  %v3251_v25 = vrot.slane %v3249_v16, 4  ;;  %v14573_v8 = vld [vmem:[%s14340_s15 + $0xc] sm:$0xff]   ;;  %v14615_v35 = vld [vmem:[%s14340_s15 + $0x24] sm:$0xff]   ;;  %v3329_v16 = vld [vmem:[%s14340_s15 + $0x1c] sm:$0xf] }
 0x253   : > { %5793 = vmatpush1.bf16.msra.mxu0 %v12570_v40  ;;  %5709 = vmatprep.mubr.bf16.mxu0 %v14437_v11  ;;  %v3236_v11 = vrot.slane %v3234_v54, 5  ;;  %v14541_v61 = vcombine.low %v3213_v57, %v3223_v55  ;;  %v14551_v40 = vld [vmem:[%s14340_s15 + $0x6c] sm:$0xff]   ;;  %v3335_v42 = vld [vmem:[%s14340_s15 + $0x34] sm:$0xf] }
 0x254   : > { %5794 = vmatprep.subr.bf16.mxu0 %v12575_v33  ;;  %v3260_v33 = vrot.slane %v3258_v39, 5  ;;  %v3326_v55 = vld [vmem:[%s14340_s15 + $0x10] sm:$0xf]  ;;  %v3401_v39 = vrot.slane %v3329_v16, 5 }
 0x255   : > { %v3241_v47 = vor.u32 %v3240_v23, %v3236_v11  ;;  %v3237_v37 = vsel %vm14367_vm10, %v3232_v56, %v3236_v11  ;;  %v10761_v11 = vrot.slane %v3325_v10, 9  ;;  %v3394_v23 = vrot.slane %v3326_v55, 5 }
 0x256   : > { %v3265_v6 = vor.u32 %v3264_v26, %v3260_v33 }
 0x257   : > { %5795 = vmatpush1.bf16.msra.mxu0 %v12573_v60  ;;  %v3242_v17 = vrot.slane %v3241_v47, 4  ;;  %v3324_v60 = vld [vmem:[%s14340_s15 + $0x8] sm:$0x1]  ;;  %v3396_v47 = vrot.slane %v3394_v23, 4 }
 0x258   : > { %5796 = vmatprep.subr.bf16.mxu0 %v12579_v2  ;;  %v3266_v2 = vrot.slane %v3265_v6, 4  ;;  %v3390_v62 = vrot.slane %v3324_v60, 5  ;;  %v14671_v60 = vld [vmem:[%s14340_s15 + $0x3c] sm:$0xff]  }
 0x259   : > { %v3247_v21 = vsel %vm14367_vm10, %v3242_v17, %v3246_v0  ;;  %v12592_v0 = vld [vmem:[%s17526_s3 + $0x180] ss:$8 sps:$4 sm:$0xff]   ;;  %v10762_v17 = vrot.slane %v3328_v1, 9  ;;  %v12612_v1 = vld [vmem:[%s17526_s3 + $0x1d4] ss:$8 sps:$4 sm:$0xff]  }
 0x25a   : > { %5710 = vmatmul.mubr.bf16.gmra.mrb[40].mxu0 %v14405_v15  ;;  %v12581_v15 = vld [vmem:[%s17526_s3 + $0x150] ss:$8 sps:$4 sm:$0xff]   ;;  %v14570_v30 = vcombine.low %v3237_v37, %v3247_v21  ;;  %v3271_v54 = vsel %vm14367_vm10, %v3266_v2, %v3270_v44  ;;  %v14600_v57 = vsel %vm14555_vm13, %v3389_v13, %v3390_v62  ;;  %v3331_v37 = vld [vmem:[%s14340_s15 + $0x24] sm:$0xe]  ;;  %v3332_v21 = vld [vmem:[%s14340_s15 + $0x28] sm:$0xf] }
 0x25b   : > { %5797 = vmatpush1.bf16.msra.mxu0 %v12577_v4  ;;  %5719 = vmatprep.mubr.bf16.mxu0 %v14455_v24  ;;  %v3255_v24 = vor.u32 %v3254_v18, %v3251_v25  ;;  %v10770_v5 = vcombine.low %v14588_v48, %v14600_v57  ;;  %v12594_v4 = vld [vmem:[%s17526_s3 + $0x184] ss:$8 sps:$4 sm:$0xff]   ;;  %v14637_v25 = vld [vmem:[%s14340_s15 + $0x30] sm:$0xff]   ;;  %v14645_v38 = vsel %vm14555_vm13, %v10762_v17, %v3401_v39  ;;  %v10763_v26 = vrot.slane %v3331_v37, 9  ;;  %v3336_v2 = vld [vmem:[%s14340_s15 + $0x38] sm:$0x1] }
 0x25c   : > { %5798 = vmatprep.subr.bf16.mxu0 %v12583_v58  ;;  %v12595_v18 = vld [vmem:[%s17526_s3 + $0x190] ss:$8 sps:$4 sm:$0xff]   ;;  %v10764_v62 = vrot.slane %v3334_v43, 9  ;;  %v3345_v43 = vld [vmem:[%s14340_s15 + $0x5c] sm:$0x1] }
 0x25d   : > { %v3256_v45 = vrot.slane %v3255_v24, 4  ;;  %v3408_v24 = vrot.slane %v3332_v21, 5  ;;  %v14717_v17 = vld [vmem:[%s14340_s15 + $0x54] sm:$0xff]  }
 0x25f   : > { %5799 = vmatpush1.bf16.msra.mxu0 %v12581_v15  ;;  %v3261_v46 = vsel %vm14367_vm10, %v3256_v45, %v3260_v33  ;;  %v3403_v15 = vrot.slane %v3401_v39, 4  ;;  %v3333_v33 = vld [vmem:[%s14340_s15 + $0x2c] sm:$0x1]  ;;  %v14668_v22 = vsel %vm14555_vm13, %v10763_v26, %v3408_v24  ;;  %v3410_v45 = vrot.slane %v3408_v24, 4  ;;  %v3340_v39 = vld [vmem:[%s14340_s15 + $0x48] sm:$0xe] }
 0x260   : > { %5800 = vmatprep.subr.bf16.mxu0 %v12586_v20  ;;  %v14596_v53 = vcombine.low %v3261_v46, %v3271_v54  ;;  %v3411_v44 = vrot.slane %v3333_v33, 5  ;;  %v12602_v46 = vld [vmem:[%s17526_s3 + $0x1b0] ss:$8 sps:$4 sm:$0xff]   ;;  %v14686_v54 = vld [vmem:[%s14340_s15 + $0x48] sm:$0xff]   ;;  %v10766_v37 = vrot.slane %v3340_v39, 9 }
 0x261   : > { %v14656_v20 = vsel %vm14555_vm13, %v3403_v15, %v3404_v19  ;;  %v3342_v15 = vld [vmem:[%s14340_s15 + $0x50] sm:$0x1] }
 0x262   : > { %5720 = vmatmul.mubr.bf16.gmra.mrb[44].mxu0 %v14423_v12  ;;  %v3327_v12 = vld [vmem:[%s14340_s15 + $0x14] sm:$0x1]  ;;  %v10772_v6 = vcombine.low %v14645_v38, %v14656_v20  ;;  %v3432_v26 = vrot.slane %v3342_v15, 5  ;;  %v12610_v24 = vld [vmem:[%s17526_s3 + $0x1d0] ss:$8 sps:$4 sm:$0xff]  }
 0x263   : > { %5729 = vmatprep.mubr.bf16.mxu0 %v14480_v3  ;;  %5801 = vmatpush1.bf16.msra.mxu0 %v12584_v29  ;;  %v3397_v58 = vrot.slane %v3327_v12, 5  ;;  %v14619_v3 = vsel %vm14555_vm13, %v10761_v11, %v3394_v23  ;;  %v14677_v29 = vsel %vm14555_vm13, %v3410_v45, %v3411_v44  ;;  %v3337_v12 = vld [vmem:[%s14340_s15 + $0x3c] sm:$0xe]  ;;  %v3338_v11 = vld [vmem:[%s14340_s15 + $0x40] sm:$0xf] }
 0x264   : > { %5802 = vmatprep.subr.bf16.mxu0 %v12590_v14  ;;  %v3415_v14 = vrot.slane %v3335_v42, 5  ;;  %v10773_v13 = vcombine.low %v14668_v22, %v14677_v29  ;;  %v3339_v23 = vld [vmem:[%s14340_s15 + $0x44] sm:$0x1]  ;;  %v3343_v45 = vld [vmem:[%s14340_s15 + $0x54] sm:$0xe] }
 0x265   : > { %v14629_v50 = vsel %vm14555_vm13, %v3396_v47, %v3397_v58  ;;  %v10765_v58 = vrot.slane %v3337_v12, 9  ;;  %v3422_v47 = vrot.slane %v3338_v11, 5  ;;  %v10767_v42 = vrot.slane %v3343_v45, 9  ;;  %v12617_v39 = vld [vmem:[%s17526_s3 + $0x1f0] ss:$8 sps:$4 sm:$0xff]  }
 0x266   : > { %v10771_v56 = vcombine.low %v14619_v3, %v14629_v50  ;;  %v14691_v10 = vsel %vm14555_vm13, %v10764_v62, %v3415_v14  ;;  %v3417_v55 = vrot.slane %v3415_v14, 4  ;;  %v12613_v62 = vld [vmem:[%s17526_s3 + $0x1e0] ss:$8 sps:$4 sm:$0xff]   ;;  %v12619_v14 = vld [vmem:[%s17526_s3 + $0x1f4] ss:$8 sps:$4 sm:$0xff]  }
 0x267   : > { %5803 = vmatpush1.bf16.msra.mxu0 %v12588_v7  ;;  %v3418_v7 = vrot.slane %v3336_v2, 5  ;;  %v14714_v16 = vsel %vm14555_vm13, %v10765_v58, %v3422_v47  ;;  %v3424_v31 = vrot.slane %v3422_v47, 4  ;;  %v3348_v58 = vld [vmem:[%s14340_s15 + $0x68] sm:$0x1]  ;;  %v10874_v29 = vld [vmem:[%s14340_s15 + $0x64] sm:$0xf] }
 0x268   : > { %5804 = vmatprep.subr.bf16.mxu0 %v12594_v4  ;;  %v12608_v4 = vld [vmem:[%s17526_s3 + $0x1c4] ss:$8 sps:$4 sm:$0xff]  }
 0x26a   : > { %5730 = vmatmul.mubr.bf16.gmra.mrb[48].mxu0 %v14445_v63  ;;  %v12601_v63 = vld [vmem:[%s17526_s3 + $0x1a4] ss:$8 sps:$4 sm:$0xff]  }
 0x26b   : > { %5739 = vmatprep.mubr.bf16.mxu0 %v14500_v52  ;;  %5805 = vmatpush1.bf16.msra.mxu0 %v12592_v0  ;;  %v12599_v52 = vld [vmem:[%s17526_s3 + $0x1a0] ss:$8 sps:$4 sm:$0xff]  }
 0x26c   : > { %5806 = vmatprep.subr.bf16.mxu0 %v12597_v32  ;;  %v12606_v32 = vld [vmem:[%s17526_s3 + $0x1c0] ss:$8 sps:$4 sm:$0xff]  }
 0x26f   : > { %5807 = vmatpush1.bf16.msra.mxu0 %v12595_v18  ;;  %v3341_v18 = vld [vmem:[%s14340_s15 + $0x4c] sm:$0xf] }
 0x270   : > { %5808 = vmatprep.subr.bf16.mxu0 %v12601_v63  ;;  %v3429_v33 = vrot.slane %v3341_v18, 5  ;;  %v14729_v63 = vld [vmem:[%s14340_s15 + $0x60] sm:$0xff]  }
 0x272   : > { %5740 = vmatmul.mubr.bf16.gmra.mrb[52].mxu0 %v14459_v41  ;;  %v14702_v41 = vsel %vm14555_vm13, %v3417_v55, %v3418_v7  ;;  %v14738_v44 = vsel %vm14555_vm13, %v10766_v37, %v3429_v33  ;;  %v3439_v7 = vrot.slane %v3345_v43, 5  ;;  %v12667_v55 = vld [vmem:[%s14340_s15 + $0x6c] sm:$0xff]   ;;  %v12674_v37 = vld [vmem:[%s14340_s15 + $0x78] sm:$0xff]  }
 0x273   : > { %5749 = vmatprep.mubr.bf16.mxu0 %v14521_v49  ;;  %5809 = vmatpush1.bf16.msra.mxu0 %v12599_v52  ;;  %v3425_v49 = vrot.slane %v3339_v23, 5  ;;  %v10774_v0 = vcombine.low %v14691_v10, %v14702_v41  ;;  %v3431_v52 = vrot.slane %v3429_v33, 4  ;;  %3597 = vst [vmem:[#allocation5 + $0x258] sm:$0xff] %v12667_v55  ;;  %v3346_v23 = vld [vmem:[%s14340_s15 + $0x60] sm:$0xe]  ;;  %3598 = vst [vmem:[#allocation5 + $0x2a0] sm:$0xff] %v12674_v37 }
 0x274   : > { %5810 = vmatprep.subr.bf16.mxu0 %v12604_v59  ;;  %v12615_v59 = vld [vmem:[%s17526_s3 + $0x1e4] ss:$8 sps:$4 sm:$0xff]   ;;  %v12720_v10 = vld [vmem:[%s17526_s3 + $0x410] ss:$8 sps:$4 sm:$0xff]   ;;  %v12722_v41 = vld [vmem:[%s17526_s3 + $0x414] ss:$8 sps:$4 sm:$0xff]  }
 0x275   : > { %v14722_v19 = vsel %vm14555_vm13, %v3424_v31, %v3425_v49  ;;  %v10768_v49 = vrot.slane %v3346_v23, 9  ;;  %v12623_v33 = vld [vmem:[%s17526_s3 + $0x204] ss:$8 sps:$4 sm:$0xff]   ;;  %v10813_v23 = vld [vmem:[%s14340_s15 + $0x10] sm:$0xf] }
 0x276   : > { %v10775_v21 = vcombine.low %v14714_v16, %v14722_v19  ;;  %v10852_v43 = vld [vmem:[%s14340_s15 + $0xc] sm:$0xe]  ;;  %v12732_v19 = vld [vmem:[%s17526_s3 + $0x430] ss:$8 sps:$4 sm:$0xff]  }
 0x277   : > { %5811 = vmatpush1.bf16.msra.mxu0 %v12602_v46 }
 0x278   : > { %5812 = vmatprep.subr.bf16.mxu0 %v12608_v4  ;;  %v3347_v4 = vld [vmem:[%s14340_s15 + $0x64] sm:$0xf] }
 0x27a   : > { %5750 = vmatmul.mubr.bf16.gmra.mrb[56].mxu0 %v14488_v27  ;;  %v3344_v27 = vld [vmem:[%s14340_s15 + $0x58] sm:$0xf] }
 0x27b   : > { %5759 = vmatprep.mubr.bf16.mxu0 %v14541_v61  ;;  %5813 = vmatpush1.bf16.msra.mxu0 %v12606_v32  ;;  %v14747_v61 = vsel %vm14555_vm13, %v3431_v52, %v3432_v26  ;;  %v3436_v2 = vrot.slane %v3344_v27, 5  ;;  %v3443_v32 = vrot.slane %v3347_v4, 5  ;;  %v3350_v26 = vld [vmem:[%s14340_s15 + $0x70] sm:$0xf] }
 0x27c   : > { %5814 = vmatprep.subr.bf16.mxu0 %v12612_v1  ;;  %v10776_v46 = vcombine.low %v14738_v44, %v14747_v61  ;;  %v3446_v1 = vrot.slane %v3348_v58, 5  ;;  %v3450_v45 = vrot.slane %v3350_v26, 5  ;;  %v10814_v58 = vld [vmem:[%s14340_s15 + $0x14] sm:$0x1] }
 0x27d   : > { %v3437_v12 = vsel %vm14555_vm13, %v10767_v42, %v3436_v2  ;;  %v3438_v11 = vrot.slane %v3436_v2, 4  ;;  %v3444_v18 = vsel %vm14555_vm13, %v10768_v49, %v3443_v32  ;;  %v3445_v15 = vrot.slane %v3443_v32, 4 }
 0x27e   : > { %v3452_v2 = vrot.slane %v3450_v45, 4  ;;  %v3639_v32 = vshll.u32 %v10813_v23, 16 }
 0x27f   : > { %5815 = vmatpush1.bf16.msra.mxu0 %v12610_v24  ;;  %v3440_v47 = vsel %vm14555_vm13, %v3438_v11, %v3439_v7  ;;  %v3351_v24 = vld [vmem:[%s14340_s15 + $0x74] sm:$0x1]  ;;  %v10882_v7 = vrot.slane %v10852_v43, 9  ;;  %v10812_v11 = vld [vmem:[%s14340_s15 + $0xc] sm:$0xf] }
 0x280   : > { %5816 = vmatprep.subr.bf16.mxu0 %v12615_v59  ;;  %v10777_v31 = vcombine.low %v3437_v12, %v3440_v47  ;;  %v3453_v27 = vrot.slane %v3351_v24, 5  ;;  %v3630_v47 = vshrl.u32 %v10812_v11, 16  ;;  %v3633_v49 = vshll.u32 %v10812_v11, 16 }
 0x281   : > { %v3641_v37 = vrot.slane %v3639_v32, 5 }
 0x282   : > { %5760 = vmatmul.mubr.bf16.gmra.mrb[60].mxu0 %v14512_v36  ;;  %3502 = vst [vmem:[#allocation5 + $0x208] sm:$0xff] %v10777_v31  ;;  %v3447_v36 = vsel %vm14555_vm13, %v3445_v15, %v3446_v1  ;;  %v3454_v4 = vsel %vm14555_vm13, %v3452_v2, %v3453_v27  ;;  %v3632_v15 = vrot.slane %v3630_v47, 4  ;;  %v10857_v27 = vld [vmem:[%s14340_s15 + $0x20] sm:$0x1]  ;;  %v10815_v2 = vld [vmem:[%s14340_s15 + $0x18] sm:$0xf] }
 0x283   : > { %5769 = vmatprep.mubr.bf16.mxu0 %v14570_v30  ;;  %5817 = vmatpush1.bf16.msra.mxu0 %v12613_v62  ;;  %v3349_v30 = vld [vmem:[%s14340_s15 + $0x6c] sm:$0xe]  ;;  %v10778_v52 = vcombine.low %v3444_v18, %v3447_v36  ;;  %v10853_v62 = vld [vmem:[%s14340_s15 + $0x10] sm:$0xf]  ;;  %v3643_v18 = vshrl.u32 %v10813_v23, 16  ;;  %v3657_v47 = vshll.u32 %v10815_v2, 16 }
 0x284   : > { %5818 = vmatprep.subr.bf16.mxu0 %v12619_v14  ;;  %v10769_v59 = vrot.slane %v3349_v30, 9  ;;  %v10854_v14 = vld [vmem:[%s14340_s15 + $0x14] sm:$0x1]  ;;  %v3981_v55 = vrot.slane %v10853_v62, 5 }
 0x285   : > { %3503 = vst [vmem:[#allocation5 + $0x250] sm:$0xff] %v10778_v52  ;;  %v3984_v12 = vrot.slane %v10854_v14, 5  ;;  %v10855_v52 = vld [vmem:[%s14340_s15 + $0x18] sm:$0xe]  ;;  %v3991_v14 = vrot.slane %v10857_v27, 5 }
 0x286   : > { %v3451_v42 = vsel %vm14555_vm13, %v10769_v59, %v3450_v45  ;;  %v3982_v31 = vsel %vm14555_vm13, %v10882_v7, %v3981_v55  ;;  %v10856_v59 = vld [vmem:[%s14340_s15 + $0x1c] sm:$0xf]  ;;  %v10883_v43 = vrot.slane %v10855_v52, 9  ;;  %v10818_v27 = vld [vmem:[%s14340_s15 + $0x24] sm:$0xf] }
 0x287   : > { %5819 = vmatpush1.bf16.msra.mxu0 %v12617_v39  ;;  %v10779_v1 = vcombine.low %v3451_v42, %v3454_v4  ;;  %v3983_v39 = vrot.slane %v3981_v55, 4  ;;  %v3988_v42 = vrot.slane %v10856_v59, 5  ;;  %v10816_v7 = vld [vmem:[%s14340_s15 + $0x1c] sm:$0xf]  ;;  %v10817_v55 = vld [vmem:[%s14340_s15 + $0x20] sm:$0x1] }
 0x288   : > { %5917 = vmatprep.subr.bf16.mxu0 %v12623_v33  ;;  %v3649_v33 = vshll.u32 %v10814_v58, 16  ;;  %v3654_v4 = vshrl.u32 %v10815_v2, 16  ;;  %v3667_v32 = vshrl.u32 %v10816_v7, 16 }
 0x289   : > { %3504 = vst [vmem:[#allocation5 + $0x298] sm:$0xff] %v10779_v1  ;;  %v3985_v36 = vsel %vm14555_vm13, %v3983_v39, %v3984_v12  ;;  %v3989_v11 = vsel %vm14555_vm13, %v10883_v43, %v3988_v42  ;;  %v3990_v23 = vrot.slane %v3988_v42, 4  ;;  %v10819_v43 = vld [vmem:[%s14340_s15 + $0x28] sm:$0xf] }
 0x28a   : > { %5770 = vmatmul.mubr.bf16.gmra.mrb[64].mxu0 %v14534_v34  ;;  %v3635_v34 = vrot.slane %v3633_v49, 5  ;;  %v10892_v30 = vcombine.low %v3982_v31, %v3985_v36  ;;  %v3651_v24 = vrot.slane %v3649_v33, 5  ;;  %v3663_v49 = vshll.u32 %v10816_v7, 16 }
 0x28b   : > { %5779 = vmatprep.mubr.bf16.mxu0 %v14596_v53  ;;  %v3645_v53 = vrot.slane %v3643_v18, 4  ;;  %v3992_v31 = vsel %vm14555_vm13, %v3990_v23, %v3991_v14  ;;  %v3656_v39 = vrot.slane %v3654_v4, 4  ;;  %v3673_v18 = vshll.u32 %v10817_v55, 16  ;;  %v10820_v14 = vld [vmem:[%s14340_s15 + $0x2c] sm:$0x1] }
 0x28c   : > { %v3636_v26 = vor.u32 %v3635_v34, %v3632_v15  ;;  %4089 = vst [vmem:[#allocation5 + $0x28] sm:$0xff] %v10892_v30  ;;  %v10858_v15 = vld [vmem:[%s14340_s15 + $0x24] sm:$0xe]  ;;  %v10893_v33 = vcombine.low %v3989_v11, %v3992_v31  ;;  %v3665_v36 = vrot.slane %v3663_v49, 5  ;;  %v3669_v30 = vrot.slane %v3667_v32, 4 }
 0x28d   : > { %v3646_v45 = vor.u32 %v3645_v53, %v3641_v37  ;;  %v10860_v53 = vld [vmem:[%s14340_s15 + $0x2c] sm:$0x1]  ;;  %v3678_v7 = vshrl.u32 %v10818_v27, 16  ;;  %v12626_v55 = vld [vmem:[%s17526_s3 + $0x214] ss:$8 sps:$4 sm:$0xff]   ;;  %v3681_v11 = vshll.u32 %v10818_v27, 16 }
 0x28e   : > { %v3637_v62 = vrot.slane %v3636_v26, 4  ;;  %v3675_v26 = vrot.slane %v3673_v18, 5  ;;  %4090 = vst [vmem:[#allocation5 + $0x70] sm:$0xff] %v10893_v33  ;;  %v3670_v42 = vor.u32 %v3669_v30, %v3665_v36  ;;  %v3687_v23 = vshll.u32 %v10819_v43, 16  ;;  %v12630_v31 = vld [vmem:[%s17526_s3 + $0x224] ss:$8 sps:$4 sm:$0xff]  }
 0x28f   : > { %v3647_v12 = vrot.slane %v3646_v45, 4  ;;  %v3998_v45 = vrot.slane %v10860_v53, 5  ;;  %v3691_v4 = vshrl.u32 %v10819_v43, 16  ;;  %v3680_v32 = vrot.slane %v3678_v7, 4  ;;  %v10862_v33 = vld [vmem:[%s14340_s15 + $0x34] sm:$0xf] }
 0x290   : > { %v3642_v58 = vsel %vm14367_vm10, %v3637_v62, %v3641_v37  ;;  %v3659_v37 = vrot.slane %v3657_v47, 5  ;;  %v3671_v47 = vrot.slane %v3670_v42, 4  ;;  %v12628_v7 = vld [vmem:[%s17526_s3 + $0x220] ss:$8 sps:$4 sm:$0xff]  }
 0x291   : > { %v3652_v1 = vsel %vm14367_vm10, %v3647_v12, %v3651_v24  ;;  %v10884_v24 = vrot.slane %v10858_v15, 9  ;;  %v3683_v15 = vrot.slane %v3681_v11, 5  ;;  %v3693_v57 = vrot.slane %v3691_v4, 4  ;;  %v12634_v4 = vld [vmem:[%s17526_s3 + $0x234] ss:$8 sps:$4 sm:$0xff]  }
 0x292   : > { %5780 = vmatmul.mubr.bf16.gmra.mrb[68].mxu0 %v14551_v40  ;;  %v10859_v40 = vld [vmem:[%s14340_s15 + $0x28] sm:$0xf]  ;;  %v10842_v34 = vcombine.low %v3642_v58, %v3652_v1  ;;  %v3660_v59 = vor.u32 %v3659_v37, %v3656_v39  ;;  %v12624_v58 = vld [vmem:[%s17526_s3 + $0x210] ss:$8 sps:$4 sm:$0xff]   ;;  %v3697_v1 = vshll.u32 %v10820_v14, 16  ;;  %v3676_v48 = vsel %vm14367_vm10, %v3671_v47, %v3675_v26 }
 0x293   : > { %5820 = vmatprep.mubr.bf16.mxu0 %v14573_v8  ;;  %v12621_v8 = vld [vmem:[%s17526_s3 + $0x200] ss:$8 sps:$4 sm:$0xff]   ;;  %v3995_v52 = vrot.slane %v10859_v40, 5  ;;  %v3689_v40 = vrot.slane %v3687_v23, 5  ;;  %v10863_v37 = vld [vmem:[%s14340_s15 + $0x38] sm:$0x1]  ;;  %v3684_v30 = vor.u32 %v3683_v15, %v3680_v32 }
 0x294   : > { %3909 = vst [vmem:[#allocation5 + $0x20] sm:$0xff] %v10842_v34  ;;  %v3661_v12 = vrot.slane %v3660_v59, 4  ;;  %v10861_v34 = vld [vmem:[%s14340_s15 + $0x30] sm:$0xe]  ;;  %v10864_v15 = vld [vmem:[%s14340_s15 + $0x3c] sm:$0xe] }
 0x295   : > { %v3996_v2 = vsel %vm14555_vm13, %v10884_v24, %v3995_v52  ;;  %v3997_v62 = vrot.slane %v3995_v52, 4  ;;  %v10885_v53 = vrot.slane %v10861_v34, 9  ;;  %v4002_v24 = vrot.slane %v10862_v33, 5  ;;  %v10821_v59 = vld [vmem:[%s14340_s15 + $0x30] sm:$0xf] }
 0x296   : > { %v3666_v39 = vsel %vm14367_vm10, %v3661_v12, %v3665_v36  ;;  %v4005_v52 = vrot.slane %v10863_v37, 5  ;;  %v3694_v27 = vor.u32 %v3693_v57, %v3689_v40  ;;  %v3702_v43 = vshrl.u32 %v10821_v59, 16  ;;  %v10865_v34 = vld [vmem:[%s14340_s15 + $0x40] sm:$0xf]  ;;  %v12637_v33 = vld [vmem:[%s17526_s3 + $0x244] ss:$8 sps:$4 sm:$0xff]  }
 0x297   : > { %v3999_v49 = vsel %vm14555_vm13, %v3997_v62, %v3998_v45  ;;  %v10843_v36 = vcombine.low %v3666_v39, %v3676_v48  ;;  %v10822_v45 = vld [vmem:[%s14340_s15 + $0x34] sm:$0xf]  ;;  %v3705_v42 = vshll.u32 %v10821_v59, 16  ;;  %v4003_v26 = vsel %vm14555_vm13, %v10885_v53, %v4002_v24  ;;  %v10826_v59 = vld [vmem:[%s14340_s15 + $0x44] sm:$0x1] }
 0x298   : > { %v10894_v18 = vcombine.low %v3996_v2, %v3999_v49  ;;  %v3685_v2 = vrot.slane %v3684_v30, 4  ;;  %v4004_v62 = vrot.slane %v4002_v24, 4  ;;  %v3715_v14 = vshrl.u32 %v10822_v45, 16 }
 0x299   : > { %3910 = vst [vmem:[#allocation5 + $0x68] sm:$0xff] %v10843_v36  ;;  %v3704_v12 = vrot.slane %v3702_v43, 4  ;;  %v3707_v11 = vrot.slane %v3705_v42, 5  ;;  %v10886_v53 = vrot.slane %v10864_v15, 9  ;;  %v10824_v36 = vld [vmem:[%s14340_s15 + $0x3c] sm:$0xf] }
 0x29a   : > { %5821 = vmatmul.mubr.bf16.vlgmr.msra.gmra.mrb[32].mxu0 %v10770_v5  ;;  %v3699_v5 = vrot.slane %v3697_v1, 5  ;;  %4091 = vst [vmem:[#allocation5 + $0xb8] sm:$0xff] %v10894_v18  ;;  %v3690_v47 = vsel %vm14367_vm10, %v3685_v2, %v3689_v40  ;;  %v3717_v49 = vrot.slane %v3715_v14, 4  ;;  %v12632_v1 = vld [vmem:[%s17526_s3 + $0x230] ss:$8 sps:$4 sm:$0xff]   ;;  %v4009_v24 = vrot.slane %v10865_v34, 5 }
 0x29b   : > { %5918 = vmatpush1.bf16.msra.mxu0 %v12621_v8  ;;  %5828 = vmatprep.mubr.bf16.mxu0 %v14603_v28  ;;  %v10823_v8 = vld [vmem:[%s14340_s15 + $0x38] sm:$0x1]  ;;  %v3711_v28 = vshll.u32 %v10822_v45, 16  ;;  %v3708_v18 = vor.u32 %v3707_v11, %v3704_v12  ;;  %v10866_v40 = vld [vmem:[%s14340_s15 + $0x44] sm:$0x1]  ;;  %v3726_v3 = vshrl.u32 %v10824_v36, 16 }
 0x29c   : > { %5919 = vmatprep.subr.bf16.mxu0 %v12626_v55  ;;  %v3695_v55 = vrot.slane %v3694_v27, 4  ;;  %v3721_v32 = vshll.u32 %v10823_v8, 16  ;;  %v12635_v8 = vld [vmem:[%s17526_s3 + $0x240] ss:$8 sps:$4 sm:$0xff]   ;;  %v4010_v43 = vsel %vm14555_vm13, %v10886_v53, %v4009_v24  ;;  %v4011_v42 = vrot.slane %v4009_v24, 4 }
 0x29d   : > { %v3713_v23 = vrot.slane %v3711_v28, 5  ;;  %v3709_v30 = vrot.slane %v3708_v18, 4  ;;  %v3728_v28 = vrot.slane %v3726_v3, 4  ;;  %v12641_v2 = vld [vmem:[%s17526_s3 + $0x254] ss:$8 sps:$4 sm:$0xff]  }
 0x29e   : > { %v3723_v37 = vrot.slane %v3721_v32, 5  ;;  %v10827_v18 = vld [vmem:[%s14340_s15 + $0x48] sm:$0xf]  ;;  %v10828_v15 = vld [vmem:[%s14340_s15 + $0x4c] sm:$0xf] }
 0x29f   : > { %5920 = vmatpush1.bf16.msra.mxu0 %v12624_v58  ;;  %v4006_v58 = vsel %vm14555_vm13, %v4004_v62, %v4005_v52  ;;  %v3718_v57 = vor.u32 %v3717_v49, %v3713_v23  ;;  %v4012_v52 = vrot.slane %v10866_v40, 5  ;;  %v3759_v38 = vshll.u32 %v10828_v15, 16 }
 0x2a0   : > { %5921 = vmatprep.subr.bf16.mxu0 %v12630_v31  ;;  %v3700_v31 = vsel %vm14367_vm10, %v3695_v55, %v3699_v5  ;;  %v10895_v39 = vcombine.low %v4003_v26, %v4006_v58  ;;  %v10825_v5 = vld [vmem:[%s14340_s15 + $0x40] sm:$0xf]  ;;  %v10867_v55 = vld [vmem:[%s14340_s15 + $0x48] sm:$0xe]  ;;  %v3763_v20 = vshrl.u32 %v10828_v15, 16 }
 0x2a1   : > { %v10844_v48 = vcombine.low %v3690_v47, %v3700_v31  ;;  %v3719_v50 = vrot.slane %v3718_v57, 4  ;;  %v3735_v45 = vshll.u32 %v10825_v5, 16  ;;  %v3739_v27 = vshrl.u32 %v10825_v5, 16  ;;  %v10869_v47 = vld [vmem:[%s14340_s15 + $0x50] sm:$0x1] }
 0x2a2   : > { %5829 = vmatmul.mubr.bf16.gmra.mrb[36].mxu0 %v10771_v56  ;;  %4092 = vst [vmem:[#allocation5 + $0x100] sm:$0xff] %v10895_v39  ;;  %v3729_v56 = vshll.u32 %v10824_v36, 16  ;;  %v4013_v11 = vsel %vm14555_vm13, %v4011_v42, %v4012_v52  ;;  %v10887_v58 = vrot.slane %v10867_v55, 9  ;;  %v4019_v40 = vrot.slane %v10869_v47, 5  ;;  %v12639_v5 = vld [vmem:[%s17526_s3 + $0x250] ss:$8 sps:$4 sm:$0xff]  }
 0x2a3   : > { %5922 = vmatpush1.bf16.msra.mxu0 %v12628_v7  ;;  %5838 = vmatprep.mubr.bf16.mxu0 %v14615_v35  ;;  %3911 = vst [vmem:[#allocation5 + $0xb0] sm:$0xff] %v10844_v48  ;;  %v3714_v35 = vsel %vm14367_vm10, %v3709_v30, %v3713_v23  ;;  %v3724_v26 = vsel %vm14367_vm10, %v3719_v50, %v3723_v37  ;;  %v3737_v14 = vrot.slane %v3735_v45, 5  ;;  %v3741_v7 = vrot.slane %v3739_v27, 4  ;;  %v12642_v50 = vld [vmem:[%s17526_s3 + $0x260] ss:$8 sps:$4 sm:$0xff]  }
 0x2a4   : > { %5923 = vmatprep.subr.bf16.mxu0 %v12634_v4  ;;  %v3731_v62 = vrot.slane %v3729_v56, 5  ;;  %v10845_v12 = vcombine.low %v3714_v35, %v3724_v26  ;;  %v3745_v23 = vshll.u32 %v10826_v59, 16  ;;  %v10868_v4 = vld [vmem:[%s14340_s15 + $0x4c] sm:$0xf]  ;;  %v10896_v49 = vcombine.low %v4010_v43, %v4013_v11  ;;  %v10870_v35 = vld [vmem:[%s14340_s15 + $0x54] sm:$0xe] }
 0x2a5   : > { %v3742_v31 = vor.u32 %v3741_v7, %v3737_v14  ;;  %v4016_v39 = vrot.slane %v10868_v4, 5  ;;  %v3750_v48 = vshrl.u32 %v10827_v18, 16  ;;  %v3753_v57 = vshll.u32 %v10827_v18, 16  ;;  %v10871_v43 = vld [vmem:[%s14340_s15 + $0x58] sm:$0xf] }
 0x2a6   : > { %v3732_v32 = vor.u32 %v3731_v62, %v3728_v28  ;;  %3912 = vst [vmem:[#allocation5 + $0xf8] sm:$0xff] %v10845_v12  ;;  %v3747_v34 = vrot.slane %v3745_v23, 5  ;;  %4093 = vst [vmem:[#allocation5 + $0x148] sm:$0xff] %v10896_v49  ;;  %v3765_v42 = vrot.slane %v3763_v20, 4  ;;  %v10888_v26 = vrot.slane %v10870_v35, 9 }
 0x2a7   : > { %5924 = vmatpush1.bf16.msra.mxu0 %v12632_v1  ;;  %v10829_v1 = vld [vmem:[%s14340_s15 + $0x50] sm:$0x1]  ;;  %v3743_v53 = vrot.slane %v3742_v31, 4  ;;  %v4018_v36 = vrot.slane %v4016_v39, 4  ;;  %v3752_v30 = vrot.slane %v3750_v48, 4  ;;  %v3755_v24 = vrot.slane %v3753_v57, 5 }
 0x2a8   : > { %5925 = vmatprep.subr.bf16.mxu0 %v12637_v33  ;;  %v3733_v37 = vrot.slane %v3732_v32, 4  ;;  %v4017_v33 = vsel %vm14555_vm13, %v10887_v58, %v4016_v39  ;;  %v3769_v3 = vshll.u32 %v10829_v1, 16  ;;  %v4023_v62 = vrot.slane %v10871_v43, 5  ;;  %v10830_v55 = vld [vmem:[%s14340_s15 + $0x54] sm:$0xf] }
 0x2a9   : > { %v4020_v59 = vsel %vm14555_vm13, %v4018_v36, %v4019_v40  ;;  %v3756_v27 = vor.u32 %v3755_v24, %v3752_v30  ;;  %v10831_v12 = vld [vmem:[%s14340_s15 + $0x58] sm:$0xf]  ;;  %v12648_v11 = vld [vmem:[%s17526_s3 + $0x274] ss:$8 sps:$4 sm:$0xff]   ;;  %v3774_v49 = vshrl.u32 %v10830_v55, 16  ;;  %v3777_v39 = vshll.u32 %v10830_v55, 16 }
 0x2aa   : > { %5839 = vmatmul.mubr.bf16.gmra.mrb[40].mxu0 %v10772_v6  ;;  %v12644_v6 = vld [vmem:[%s17526_s3 + $0x264] ss:$8 sps:$4 sm:$0xff]   ;;  %v3738_v52 = vsel %vm14367_vm10, %v3733_v37, %v3737_v14  ;;  %v10897_v45 = vcombine.low %v4017_v33, %v4020_v59  ;;  %v3771_v28 = vrot.slane %v3769_v3, 5  ;;  %v4024_v4 = vsel %vm14555_vm13, %v10888_v26, %v4023_v62  ;;  %v10832_v58 = vld [vmem:[%s14340_s15 + $0x5c] sm:$0x1] }
 0x2ab   : > { %5926 = vmatpush1.bf16.msra.mxu0 %v12635_v8  ;;  %5848 = vmatprep.mubr.bf16.mxu0 %v14637_v25  ;;  %v3748_v25 = vsel %vm14367_vm10, %v3743_v53, %v3747_v34  ;;  %v3761_v8 = vrot.slane %v3759_v38, 5  ;;  %v3757_v14 = vrot.slane %v3756_v27, 4  ;;  %v4025_v47 = vrot.slane %v4023_v62, 4  ;;  %v12646_v32 = vld [vmem:[%s17526_s3 + $0x270] ss:$8 sps:$4 sm:$0xff]  }
 0x2ac   : > { %5927 = vmatprep.subr.bf16.mxu0 %v12641_v2  ;;  %v10846_v56 = vcombine.low %v3738_v52, %v3748_v25  ;;  %v10872_v2 = vld [vmem:[%s14340_s15 + $0x5c] sm:$0x1]  ;;  %4094 = vst [vmem:[#allocation5 + $0x190] sm:$0xff] %v10897_v45  ;;  %v3783_v18 = vshll.u32 %v10831_v12, 16  ;;  %v3787_v15 = vshrl.u32 %v10831_v12, 16  ;;  %v3776_v48 = vrot.slane %v3774_v49, 4 }
 0x2ad   : > { %v4026_v7 = vrot.slane %v10872_v2, 5  ;;  %v3766_v23 = vor.u32 %v3765_v42, %v3761_v8  ;;  %v3762_v31 = vsel %vm14367_vm10, %v3757_v14, %v3761_v8  ;;  %v12652_v34 = vld [vmem:[%s17526_s3 + $0x284] ss:$8 sps:$4 sm:$0xff]   ;;  %v3793_v57 = vshll.u32 %v10832_v58, 16  ;;  %v10873_v37 = vld [vmem:[%s14340_s15 + $0x60] sm:$0xe] }
 0x2ae   : > { %3913 = vst [vmem:[#allocation5 + $0x140] sm:$0xff] %v10846_v56  ;;  %v3779_v33 = vrot.slane %v3777_v39, 5  ;;  %v3785_v36 = vrot.slane %v3783_v18, 5  ;;  %v3789_v22 = vrot.slane %v3787_v15, 4  ;;  %v10875_v30 = vld [vmem:[%s14340_s15 + $0x68] sm:$0x1] }
 0x2af   : > { %5928 = vmatpush1.bf16.msra.mxu0 %v12639_v5  ;;  %v3767_v40 = vrot.slane %v3766_v23, 4  ;;  %v4027_v1 = vsel %vm14555_vm13, %v4025_v47, %v4026_v7  ;;  %v3795_v5 = vrot.slane %v3793_v57, 5  ;;  %v10889_v24 = vrot.slane %v10873_v37, 9  ;;  %v10834_v56 = vld [vmem:[%s14340_s15 + $0x64] sm:$0xf] }
 0x2b0   : > { %5929 = vmatprep.subr.bf16.mxu0 %v12644_v6  ;;  %v10898_v53 = vcombine.low %v4024_v4, %v4027_v1  ;;  %v4030_v38 = vrot.slane %v10874_v29, 5  ;;  %v3780_v6 = vor.u32 %v3779_v33, %v3776_v48  ;;  %v3790_v52 = vor.u32 %v3789_v22, %v3785_v36  ;;  %v10835_v8 = vld [vmem:[%s14340_s15 + $0x68] sm:$0x1]  ;;  %v12655_v42 = vld [vmem:[%s17526_s3 + $0x294] ss:$8 sps:$4 sm:$0xff]  }
 0x2b1   : > { %v4033_v25 = vrot.slane %v10875_v30, 5  ;;  %v3807_v2 = vshll.u32 %v10834_v56, 16  ;;  %v3811_v26 = vshrl.u32 %v10834_v56, 16  ;;  %v3817_v62 = vshll.u32 %v10835_v8, 16  ;;  %v12653_v14 = vld [vmem:[%s17526_s3 + $0x290] ss:$8 sps:$4 sm:$0xff]  }
 0x2b2   : > { %5849 = vmatmul.mubr.bf16.gmra.mrb[44].mxu0 %v10773_v13  ;;  %v3772_v13 = vsel %vm14367_vm10, %v3767_v40, %v3771_v28  ;;  %4095 = vst [vmem:[#allocation5 + $0x1d8] sm:$0xff] %v10898_v53  ;;  %v4031_v59 = vsel %vm14555_vm13, %v10889_v24, %v4030_v38  ;;  %v4032_v3 = vrot.slane %v4030_v38, 4  ;;  %v3781_v45 = vrot.slane %v3780_v6, 4  ;;  %v12714_v23 = vld [vmem:[%s17526_s3 + $0x400] ss:$8 sps:$4 sm:$0xff]  }
 0x2b3   : > { %5858 = vmatprep.mubr.bf16.mxu0 %v14671_v60  ;;  %5930 = vmatpush1.bf16.msra.mxu0 %v12642_v50  ;;  %v12650_v60 = vld [vmem:[%s17526_s3 + $0x280] ss:$8 sps:$4 sm:$0xff]   ;;  %v10847_v20 = vcombine.low %v3762_v31, %v3772_v13  ;;  %v3791_v27 = vrot.slane %v3790_v52, 4  ;;  %v12716_v4 = vld [vmem:[%s17526_s3 + $0x404] ss:$8 sps:$4 sm:$0xff]   ;;  %v3813_v31 = vrot.slane %v3811_v26, 4 }
 0x2b4   : > { %5931 = vmatprep.subr.bf16.mxu0 %v12648_v11  ;;  %v10833_v50 = vld [vmem:[%s14340_s15 + $0x60] sm:$0xf]  ;;  %v4034_v28 = vsel %vm14555_vm13, %v4032_v3, %v4033_v25  ;;  %v3786_v7 = vsel %vm14367_vm10, %v3781_v45, %v3785_v36  ;;  %v12659_v47 = vld [vmem:[%s17526_s3 + $0x2a4] ss:$8 sps:$4 sm:$0xff]   ;;  %v3819_v39 = vrot.slane %v3817_v62, 5  ;;  %12124 = vmatprep.subr.bf16.mxu1 %v12716_v4 }
 0x2b5   : > { %3914 = vst [vmem:[#allocation5 + $0x188] sm:$0xff] %v10847_v20  ;;  %v3798_v35 = vshrl.u32 %v10833_v50, 16  ;;  %v3801_v43 = vshll.u32 %v10833_v50, 16  ;;  %v3796_v55 = vsel %vm14367_vm10, %v3791_v27, %v3795_v5  ;;  %v10899_v12 = vcombine.low %v4031_v59, %v4034_v28  ;;  %v10876_v15 = vld [vmem:[%s14340_s15 + $0x6c] sm:$0xe]  ;;  %12132 = vmatpush1.bf16.msra.mxu1 %v12714_v23 }
 0x2b6   : > { %v10848_v58 = vcombine.low %v3786_v7, %v3796_v55  ;;  %v10890_v40 = vrot.slane %v10876_v15, 9  ;;  %v10836_v57 = vld [vmem:[%s14340_s15 + $0x6c] sm:$0xf]  ;;  %v12657_v37 = vld [vmem:[%s17526_s3 + $0x2a0] ss:$8 sps:$4 sm:$0xff]   ;;  %12125 = vmatprep.subr.bf16.mxu1 %v12722_v41 }
 0x2b7   : > { %5932 = vmatpush1.bf16.msra.mxu0 %v12646_v32  ;;  %v3800_v11 = vrot.slane %v3798_v35, 4  ;;  %v3803_v49 = vrot.slane %v3801_v43, 5  ;;  %v3809_v32 = vrot.slane %v3807_v2, 5  ;;  %4096 = vst [vmem:[#allocation5 + $0x220] sm:$0xff] %v10899_v12  ;;  %v10837_v36 = vld [vmem:[%s14340_s15 + $0x70] sm:$0xf] }
 0x2b8   : > { %5933 = vmatprep.subr.bf16.mxu0 %v12652_v34  ;;  %3915 = vst [vmem:[#allocation5 + $0x1d0] sm:$0xff] %v10848_v58  ;;  %v10878_v34 = vld [vmem:[%s14340_s15 + $0x74] sm:$0x1]  ;;  %v3822_v5 = vshrl.u32 %v10836_v57, 16  ;;  %v3825_v30 = vshll.u32 %v10836_v57, 16  ;;  %v3831_v20 = vshll.u32 %v10837_v36, 16 }
 0x2b9   : > { %v3814_v18 = vor.u32 %v3813_v31, %v3809_v32  ;;  %v4040_v48 = vrot.slane %v10878_v34, 5  ;;  %v10838_v13 = vld [vmem:[%s14340_s15 + $0x74] sm:$0x1]  ;;  %v3835_v6 = vshrl.u32 %v10837_v36, 16  ;;  %v12726_v52 = vld [vmem:[%s17526_s3 + $0x420] ss:$8 sps:$4 sm:$0xff]   ;;  %12133 = vmatpush1.bf16.msra.mxu1 %v12720_v10 }
 0x2ba   : > { %5859 = vmatmul.mubr.bf16.gmra.mrb[48].mxu0 %v10774_v0  ;;  %v3804_v0 = vor.u32 %v3803_v49, %v3800_v11  ;;  %v12663_v24 = vld [vmem:[%s17526_s3 + $0x2b4] ss:$8 sps:$4 sm:$0xff]   ;;  %v3824_v3 = vrot.slane %v3822_v5, 4  ;;  %v3827_v50 = vrot.slane %v3825_v30, 5  ;;  %v12728_v56 = vld [vmem:[%s17526_s3 + $0x424] ss:$8 sps:$4 sm:$0xff]  }
 0x2bb   : > { %5868 = vmatprep.mubr.bf16.mxu0 %v14686_v54  ;;  %5934 = vmatpush1.bf16.msra.mxu0 %v12650_v60  ;;  %v10877_v54 = vld [vmem:[%s14340_s15 + $0x70] sm:$0xf]  ;;  %v3815_v33 = vrot.slane %v3814_v18, 4  ;;  %v3833_v8 = vrot.slane %v3831_v20, 5  ;;  %v3837_v35 = vrot.slane %v3835_v6, 4  ;;  %v3841_v43 = vshll.u32 %v10838_v13, 16 }
 0x2bc   : > { %5935 = vmatprep.subr.bf16.mxu0 %v12655_v42  ;;  %v4037_v1 = vrot.slane %v10877_v54, 5  ;;  %v3805_v53 = vrot.slane %v3804_v0, 4  ;;  %v12661_v45 = vld [vmem:[%s17526_s3 + $0x2b0] ss:$8 sps:$4 sm:$0xff]   ;;  %v12666_v42 = vld [vmem:[%s17526_s3 + $0x2c4] ss:$8 sps:$4 sm:$0xff]   ;;  %v3828_v16 = vor.u32 %v3827_v50, %v3824_v3  ;;  %12126 = vmatprep.subr.bf16.mxu1 %v12728_v56 }
 0x2bd   : > { %v3820_v60 = vsel %vm14367_vm10, %v3815_v33, %v3819_v39  ;;  %v3843_v28 = vrot.slane %v3841_v43, 5  ;;  %v10879_v2 = vld [vmem:[%s14340_s15 + $0x78] sm:$0xe]  ;;  %v12664_v26 = vld [vmem:[%s17526_s3 + $0x2c0] ss:$8 sps:$4 sm:$0xff]   ;;  %12134 = vmatpush1.bf16.msra.mxu1 %v12726_v52  ;;  %v17537_v12 = vmov 0  }
 0x2be   : > { %v4038_v22 = vsel %vm14555_vm13, %v10890_v40, %v4037_v1  ;;  %v4039_v29 = vrot.slane %v4037_v1, 4  ;;  %v3810_v38 = vsel %vm14367_vm10, %v3805_v53, %v3809_v32  ;;  %v3829_v62 = vrot.slane %v3828_v16, 4  ;;  %v10881_v7 = vld [vmem:[%s14340_s15 + $0x80] sm:$0x1]  ;;  %6215 = vmatprep.mubr.bf16.mxu1 %v17537_v12  ;;  %v12670_v11 = vld [vmem:[%s17526_s3 + $0x2d4] ss:$8 sps:$4 sm:$0xff]  }
 0x2bf   : > { %5936 = vmatpush1.bf16.msra.mxu0 %v12653_v14  ;;  %v10849_v25 = vcombine.low %v3810_v38, %v3820_v60  ;;  %v10880_v14 = vld [vmem:[%s14340_s15 + $0x7c] sm:$0xf]  ;;  %v10891_v55 = vrot.slane %v10879_v2, 9  ;;  %v10839_v58 = vld [vmem:[%s14340_s15 + $0x78] sm:$0xf] }
 0x2c0   : > { %5937 = vmatprep.subr.bf16.mxu0 %v12659_v47  ;;  %v4041_v59 = vsel %vm14555_vm13, %v4039_v29, %v4040_v48  ;;  %v4044_v4 = vrot.slane %v10880_v14, 5  ;;  %v4047_v47 = vrot.slane %v10881_v7, 5  ;;  %v3834_v49 = vsel %vm14367_vm10, %v3829_v62, %v3833_v8  ;;  %v10840_v32 = vld [vmem:[%s14340_s15 + $0x7c] sm:$0xf]  ;;  %v10841_v31 = vld [vmem:[%s14340_s15 + $0x80] sm:$0x1] }
 0x2c1   : > { %v10900_v27 = vcombine.low %v4038_v22, %v4041_v59  ;;  %3916 = vst [vmem:[#allocation5 + $0x218] sm:$0xff] %v10849_v25  ;;  %v3846_v39 = vshrl.u32 %v10839_v58, 16  ;;  %v3849_v10 = vshll.u32 %v10839_v58, 16  ;;  %v3855_v15 = vshll.u32 %v10840_v32, 16  ;;  %v12735_v54 = vld [vmem:[%s17526_s3 + $0x440] ss:$8 sps:$4 sm:$0xff]  }
 0x2c2   : > { %5869 = vmatmul.mubr.bf16.gmra.mrb[52].mxu0 %v10775_v21  ;;  %v3838_v21 = vor.u32 %v3837_v35, %v3833_v8  ;;  %v4045_v0 = vsel %vm14555_vm13, %v10891_v55, %v4044_v4  ;;  %v4046_v18 = vrot.slane %v4044_v4, 4  ;;  %v12737_v34 = vld [vmem:[%s17526_s3 + $0x444] ss:$8 sps:$4 sm:$0xff]   ;;  %v3859_v57 = vshrl.u32 %v10840_v32, 16  ;;  %v12741_v29 = vld [vmem:[%s17526_s3 + $0x450] ss:$8 sps:$4 sm:$0xff]  }
 0x2c3   : > { %5878 = vmatprep.mubr.bf16.mxu0 %v14717_v17  ;;  %5938 = vmatpush1.bf16.msra.mxu0 %v12657_v37  ;;  %4097 = vst [vmem:[#allocation5 + $0x268] sm:$0xff] %v10900_v27  ;;  %v12734_v17 = vld [vmem:[%s17526_s3 + $0x434] ss:$8 sps:$4 sm:$0xff]   ;;  %v3848_v1 = vrot.slane %v3846_v39, 4  ;;  %v3851_v48 = vrot.slane %v3849_v10, 5  ;;  %v3857_v36 = vrot.slane %v3855_v15, 5 }
 0x2c4   : > { %5939 = vmatprep.subr.bf16.mxu0 %v12663_v24  ;;  %v3839_v23 = vrot.slane %v3838_v21, 4  ;;  %12127 = vmatprep.subr.bf16.mxu1 %v12734_v17  ;;  %v12668_v37 = vld [vmem:[%s17526_s3 + $0x2d0] ss:$8 sps:$4 sm:$0xff]   ;;  %v12673_v53 = vld [vmem:[%s17526_s3 + $0x2e4] ss:$8 sps:$4 sm:$0xff]   ;;  %v4048_v33 = vsel %vm14555_vm13, %v4046_v18, %v4047_v47  ;;  %v3865_v22 = vshll.u32 %v10841_v31, 16 }
 0x2c5   : > { %12135 = vmatpush1.bf16.msra.mxu1 %v12732_v19  ;;  %v10901_v44 = vcombine.low %v4045_v0, %v4048_v33  ;;  %v3852_v61 = vor.u32 %v3851_v48, %v3848_v1  ;;  %v12743_v13 = vld [vmem:[%s17526_s3 + $0x454] ss:$8 sps:$4 sm:$0xff]   ;;  %v10934_v30 = vld [vmem:[%s14340_s15 + $0x18] sm:$0xf]  ;;  %v10936_v6 = vld [vmem:[%s14340_s15 + $0x20] sm:$0x1] }
 0x2c6   : > { %v3844_v41 = vsel %vm14367_vm10, %v3839_v23, %v3843_v28  ;;  %12128 = vmatprep.subr.bf16.mxu1 %v12737_v34  ;;  %v3867_v5 = vrot.slane %v3865_v22, 5  ;;  %v10935_v24 = vld [vmem:[%s14340_s15 + $0x1c] sm:$0xf]  ;;  %v4224_v52 = vshrl.u32 %v10934_v30, 16  ;;  %v4227_v25 = vshll.u32 %v10934_v30, 16  ;;  %v12760_v62 = vld [vmem:[#allocation5 + $0x208] sm:$0xff] }
 0x2c7   : > { %5940 = vmatpush1.bf16.msra.mxu0 %v12661_v45  ;;  %v10850_v40 = vcombine.low %v3834_v49, %v3844_v41  ;;  %v12744_v38 = vld [vmem:[%s14340_s15 + $0x18] sm:$0xff]   ;;  %4098 = vst [vmem:[#allocation5 + $0x2b0] sm:$0xff] %v10901_v44  ;;  %v3853_v60 = vrot.slane %v3852_v61, 4  ;;  %v4233_v59 = vshll.u32 %v10935_v24, 16  ;;  %v4237_v3 = vshrl.u32 %v10935_v24, 16  ;;  %v12751_v18 = vld [vmem:[%s14340_s15 + $0x24] sm:$0xff]  }
 0x2c8   : > { %5941 = vmatprep.subr.bf16.mxu0 %v12666_v42  ;;  %v4243_v50 = vshll.u32 %v10936_v6, 16  ;;  %4183 = vst [vmem:[#allocation5 + $0x30] sm:$0xff] %v12744_v38  ;;  %v4226_v27 = vrot.slane %v4224_v52, 4  ;;  %v4229_v8 = vrot.slane %v4227_v25, 5  ;;  %v12677_v35 = vld [vmem:[%s17526_s3 + $0x2f4] ss:$8 sps:$4 sm:$0xff]  }
 0x2c9   : > { %3917 = vst [vmem:[#allocation5 + $0x260] sm:$0xff] %v10850_v40  ;;  %12136 = vmatpush1.bf16.msra.mxu1 %v12735_v54  ;;  %v3858_v56 = vsel %vm14367_vm10, %v3853_v60, %v3857_v36  ;;  %v4235_v43 = vrot.slane %v4233_v59, 5  ;;  %v4239_v42 = vrot.slane %v4237_v3, 4  ;;  %v12675_v19 = vld [vmem:[%s17526_s3 + $0x2f0] ss:$8 sps:$4 sm:$0xff]   ;;  %4184 = vst [vmem:[#allocation5 + $0x78] sm:$0xff] %v12751_v18 }
 0x2ca   : > { %5879 = vmatmul.mubr.bf16.gmra.mrb[56].mxu0 %v10776_v46  ;;  %v3861_v46 = vrot.slane %v3859_v57, 4  ;;  %12129 = vmatprep.subr.bf16.mxu1 %v12743_v13  ;;  %v4245_v16 = vrot.slane %v4243_v50, 5  ;;  %v4230_v28 = vor.u32 %v4229_v8, %v4226_v27  ;;  %v12745_v17 = vld [vmem:[%s17526_s3 + $0x460] ss:$8 sps:$4 sm:$0xff]   ;;  %v12747_v2 = vld [vmem:[%s17526_s3 + $0x464] ss:$8 sps:$4 sm:$0xff]  }
 0x2cb   : > { %5888 = vmatprep.mubr.bf16.mxu0 %v14729_v63  ;;  %5942 = vmatpush1.bf16.msra.mxu0 %v12664_v26  ;;  %v12671_v63 = vld [vmem:[%s17526_s3 + $0x2e0] ss:$8 sps:$4 sm:$0xff]   ;;  %v12750_v26 = vld [vmem:[%s17526_s3 + $0x474] ss:$8 sps:$4 sm:$0xff]   ;;  %v12680_v14 = vld [vmem:[%s17526_s3 + $0x304] ss:$8 sps:$4 sm:$0xff]   ;;  %v4240_v55 = vor.u32 %v4239_v42, %v4235_v43 }
 0x2cc   : > { %5943 = vmatprep.subr.bf16.mxu0 %v12670_v11  ;;  %v3862_v20 = vor.u32 %v3861_v46, %v3857_v36  ;;  %v10937_v11 = vld [vmem:[%s14340_s15 + $0x24] sm:$0xf]  ;;  %v10938_v23 = vld [vmem:[%s14340_s15 + $0x28] sm:$0xf]  ;;  %v10939_v4 = vld [vmem:[%s14340_s15 + $0x2c] sm:$0x1] }
 0x2cd   : > { %12137 = vmatpush1.bf16.msra.mxu1 %v12741_v29  ;;  %v12761_v47 = vld [vmem:[#allocation5 + $0x258] sm:$0xff]  ;;  %v4231_v58 = vrot.slane %v4230_v28, 4  ;;  %v4248_v32 = vshrl.u32 %v10937_v11, 16  ;;  %v4251_v31 = vshll.u32 %v10937_v11, 16  ;;  %v4257_v39 = vshll.u32 %v10938_v23, 16  ;;  %v12752_v48 = vld [vmem:[%s14340_s15 + $0x30] sm:$0xff]  }
 0x2ce   : > { %v3863_v45 = vrot.slane %v3862_v20, 4  ;;  %v12748_v49 = vld [vmem:[%s17526_s3 + $0x470] ss:$8 sps:$4 sm:$0xff]   ;;  %v4241_v10 = vrot.slane %v4240_v55, 4  ;;  %12130 = vmatprep.subr.bf16.mxu1 %v12747_v2  ;;  %v4261_v41 = vshrl.u32 %v10938_v23, 16  ;;  %v4267_v0 = vshll.u32 %v10939_v4, 16 }
 0x2cf   : > { %5944 = vmatpush1.bf16.msra.mxu0 %v12668_v37  ;;  %v4236_v15 = vsel %vm14367_vm10, %v4231_v58, %v4235_v43  ;;  %v4250_v54 = vrot.slane %v4248_v32, 4  ;;  %v4253_v34 = vrot.slane %v4251_v31, 5  ;;  %v4259_v40 = vrot.slane %v4257_v39, 5  ;;  %v10977_v1 = vld [vmem:[%s14340_s15 + $0x24] sm:$0xe]  ;;  %4185 = vst [vmem:[#allocation5 + $0xc0] sm:$0xff] %v12752_v48 }
 0x2d0   : > { %5945 = vmatprep.subr.bf16.mxu0 %v12673_v53  ;;  %v3868_v21 = vsel %vm14367_vm10, %v3863_v45, %v3867_v5  ;;  %v4246_v57 = vsel %vm14367_vm10, %v4241_v10, %v4245_v16  ;;  %v4263_v37 = vrot.slane %v4261_v41, 4  ;;  %v4269_v53 = vrot.slane %v4267_v0, 5  ;;  %v10978_v33 = vld [vmem:[%s14340_s15 + $0x28] sm:$0xf]  ;;  %v10979_v36 = vld [vmem:[%s14340_s15 + $0x2c] sm:$0x1] }
 0x2d1   : > { %v10851_v7 = vcombine.low %v3858_v56, %v3868_v21  ;;  %12138 = vmatpush1.bf16.msra.mxu1 %v12745_v17  ;;  %v10964_v22 = vcombine.low %v4236_v15, %v4246_v57  ;;  %v4254_v44 = vor.u32 %v4253_v34, %v4250_v54  ;;  %v11005_v61 = vrot.slane %v10977_v1, 9  ;;  %v10940_v29 = vld [vmem:[%s14340_s15 + $0x30] sm:$0xf]  ;;  %v10941_v13 = vld [vmem:[%s14340_s15 + $0x34] sm:$0xf]  ;;  %v12753_v60 = vld [vmem:[%s14340_s15 + $0x3c] sm:$0xff]  }
 0x2d2   : > { %5889 = vmatmul.mubr.bf16.gmra.mrb[60].mxu0 %v12760_v62  ;;  %12131 = vmatprep.subr.bf16.mxu1 %v12750_v26  ;;  %v4582_v46 = vrot.slane %v10978_v33, 5  ;;  %v4264_v5 = vor.u32 %v4263_v37, %v4259_v40  ;;  %v4585_v30 = vrot.slane %v10979_v36, 5  ;;  %v10942_v24 = vld [vmem:[%s14340_s15 + $0x38] sm:$0x1]  ;;  %v4272_v38 = vshrl.u32 %v10940_v29, 16  ;;  %v12754_v59 = vld [vmem:[%s14340_s15 + $0x48] sm:$0xff]  }
 0x2d3   : > { %5898 = vmatprep.mubr.bf16.mxu0 %v12761_v47  ;;  %5946 = vmatpush1.bf16.msra.mxu0 %v12671_v63  ;;  %3918 = vst [vmem:[#allocation5 + $0x2a8] sm:$0xff] %v10851_v7  ;;  %v4275_v63 = vshll.u32 %v10940_v29, 16  ;;  %4503 = vst [vmem:[#allocation5 + $0x38] sm:$0xff] %v10964_v22  ;;  %v4255_v20 = vrot.slane %v4254_v44, 4  ;;  %v4281_v25 = vshll.u32 %v10941_v13, 16  ;;  %v12762_v3 = vld [vmem:[#allocation5 + $0x250] sm:$0xff] }
 0x2d4   : > { %5947 = vmatprep.subr.bf16.mxu0 %v12677_v35  ;;  %v4583_v6 = vsel %vm14555_vm13, %v11005_v61, %v4582_v46  ;;  %v4584_v52 = vrot.slane %v4582_v46, 4  ;;  %v4265_v50 = vrot.slane %v4264_v5, 4  ;;  %v4274_v56 = vrot.slane %v4272_v38, 4  ;;  %4186 = vst [vmem:[#allocation5 + $0x108] sm:$0xff] %v12753_v60  ;;  %v12763_v8 = vld [vmem:[#allocation5 + $0x2a0] sm:$0xff]  ;;  %4187 = vst [vmem:[#allocation5 + $0x150] sm:$0xff] %v12754_v59 }
 0x2d5   : > { %12139 = vmatpush1.bf16.msra.mxu1 %v12748_v49  ;;  %v4277_v45 = vrot.slane %v4275_v63, 5  ;;  %v4285_v27 = vshrl.u32 %v10941_v13, 16  ;;  %v4260_v35 = vsel %vm14367_vm10, %v4255_v20, %v4259_v40  ;;  %v4283_v42 = vrot.slane %v4281_v25, 5  ;;  %v10981_v21 = vld [vmem:[%s14340_s15 + $0x34] sm:$0xf]  ;;  %v12764_v13 = vld [vmem:[#allocation5 + $0x298] sm:$0xff] }
 0x2d6   : > { %v4586_v43 = vsel %vm14555_vm13, %v4584_v52, %v4585_v30  ;;  %v4291_v16 = vshll.u32 %v10942_v24, 16  ;;  %v4270_v28 = vsel %vm14367_vm10, %v4265_v50, %v4269_v53  ;;  %v10982_v62 = vld [vmem:[%s14340_s15 + $0x38] sm:$0x1]  ;;  %v4589_v47 = vrot.slane %v10981_v21, 5  ;;  %v10944_v58 = vld [vmem:[%s14340_s15 + $0x40] sm:$0xf] }
 0x2d7   : > { %5948 = vmatpush1.bf16.msra.mxu0 %v12675_v19  ;;  %v10980_v19 = vld [vmem:[%s14340_s15 + $0x30] sm:$0xe]  ;;  %v11015_v17 = vcombine.low %v4583_v6, %v4586_v43  ;;  %v4278_v2 = vor.u32 %v4277_v45, %v4274_v56  ;;  %v4287_v26 = vrot.slane %v4285_v27, 4  ;;  %v15137_v7 = vld [vmem:[%s14340_s15 + $0x54] sm:$0xff]   ;;  %v15139_v11 = vcombine.low %v4260_v35, %v4270_v28  ;;  %v15145_v32 = vld [vmem:[%s17525_s2] ss:$0 sm:$0xff] }
 0x2d8   : > { %6046 = vmatprep.subr.bf16.mxu0 %v12680_v14  ;;  %v10943_v14 = vld [vmem:[%s14340_s15 + $0x3c] sm:$0xf]  ;;  %v4293_v23 = vrot.slane %v4291_v16, 5  ;;  %v11006_v4 = vrot.slane %v10980_v19, 9  ;;  %v4592_v10 = vrot.slane %v10982_v62, 5  ;;  %v4591_v54 = vrot.slane %v4589_v47, 4 }
 0x2d9   : > { %6216 = vmatmul.mubr.bf16.vlgmr.msra.gmra.mrb[16].mxu1 %v11015_v17  ;;  %v4279_v31 = vrot.slane %v4278_v2, 4  ;;  %v4288_v39 = vor.u32 %v4287_v26, %v4283_v42  ;;  %v4296_v41 = vshrl.u32 %v10943_v14, 16  ;;  %v10945_v34 = vld [vmem:[%s14340_s15 + $0x44] sm:$0x1]  ;;  %v4299_v40 = vshll.u32 %v10943_v14, 16  ;;  %v12765_v25 = vld [vmem:[#allocation5 + $0x28] sm:$0xff] }
 0x2da   : > { %5899 = vmatmul.mubr.bf16.gmra.mrb[64].mxu0 %v12762_v3  ;;  %6225 = vmatprep.mubr.bf16.mxu1 %v17537_v12  ;;  %v4590_v15 = vsel %vm14555_vm13, %v11006_v4, %v4589_v47  ;;  %v4305_v33 = vshll.u32 %v10944_v58, 16  ;;  %v4593_v61 = vsel %vm14555_vm13, %v4591_v54, %v4592_v10  ;;  %v10983_v29 = vld [vmem:[%s14340_s15 + $0x3c] sm:$0xe]  ;;  %v4309_v63 = vshrl.u32 %v10944_v58, 16  ;;  %v10984_v60 = vld [vmem:[%s14340_s15 + $0x40] sm:$0xf] }
 0x2db   : > { %5908 = vmatprep.mubr.bf16.mxu0 %v12763_v8  ;;  %v4284_v57 = vsel %vm14367_vm10, %v4279_v31, %v4283_v42  ;;  %v4289_v37 = vrot.slane %v4288_v39, 4  ;;  %v4298_v53 = vrot.slane %v4296_v41, 4  ;;  %v4301_v46 = vrot.slane %v4299_v40, 5  ;;  %v10985_v50 = vld [vmem:[%s14340_s15 + $0x44] sm:$0x1] }
 0x2dc   : > { %v11016_v24 = vcombine.low %v4590_v15, %v4593_v61  ;;  %v15163_v38 = vrot.slane %v4305_v33, 5  ;;  %v15173_v56 = vld [vmem:[%s14340_s15 + $0x60] sm:$0xff]   ;;  %v4311_v45 = vrot.slane %v4309_v63, 4  ;;  %v4315_v27 = vshll.u32 %v10945_v34, 16  ;;  %v10946_v43 = vld [vmem:[%s14340_s15 + $0x48] sm:$0xf] }
 0x2dd   : > { %v11596_v55 = vpop.f32.mrb[0].mxu0  ;;  %v4294_v30 = vsel %vm14367_vm10, %v4289_v37, %v4293_v23  ;;  %v4302_v3 = vor.u32 %v4301_v46, %v4298_v53  ;;  %v11007_v8 = vrot.slane %v10983_v29, 9  ;;  %v4596_v35 = vrot.slane %v10984_v60, 5  ;;  %v12678_v21 = vld [vmem:[%s17526_s3 + $0x300] ss:$8 sps:$4 sm:$0xff]   ;;  %v12767_v60 = vld [vmem:[#allocation5 + $0x70] sm:$0xff] }
 0x2de   : > { %v11597_v49 = vpop.f32.mrb[1].mxu0  ;;  %v15169_v59 = vcombine.low %v4284_v57, %v4294_v30  ;;  %v4599_v17 = vrot.slane %v10985_v50, 5  ;;  %v10947_v2 = vld [vmem:[%s14340_s15 + $0x4c] sm:$0xf]  ;;  %v12683_v62 = vld [vmem:[%s17526_s3 + $0x314] ss:$8 sps:$4 sm:$0xff]   ;;  %v4312_v14 = vor.u32 %v4311_v45, %v15163_v38 }
 0x2df   : > { %v11598_v0 = vadd.f32 %v11597_v49, %v11596_v55  ;;  %v11599_v18 = vpop.f32.mrb[2].mxu0  ;;  %v15151_v48 = vpop.f32.mrb[0].mxu1  ;;  %v4303_v28 = vrot.slane %v4302_v3, 4  ;;  %v4317_v55 = vrot.slane %v4315_v27, 5  ;;  %v4597_v23 = vsel %vm14555_vm13, %v11007_v8, %v4596_v35  ;;  %v10948_v47 = vld [vmem:[%s14340_s15 + $0x50] sm:$0x1] }
 0x2e0   : > { %v11600_v1 = vpop.f32.mrb[3].mxu0  ;;  %v2827_v44 = vpop.f32.mrb[1].mxu1  ;;  %v4598_v4 = vrot.slane %v4596_v35, 4  ;;  %v4320_v10 = vshrl.u32 %v10946_v43, 16  ;;  %v4323_v54 = vshll.u32 %v10946_v43, 16  ;;  %v4329_v34 = vshll.u32 %v10947_v2, 16 }
 0x2e1   : > { %v11601_v36 = vadd.f32 %v11600_v1, %v11599_v18  ;;  %v2731_v22 = vadd.f32 %v11598_v0, %v15145_v32  ;;  %v15159_v5 = vpop.f32.mrb[2].mxu1  ;;  %6226 = vmatmul.mubr.bf16.gmra.mrb[20].mxu1 %v11016_v24  ;;  %v4308_v39 = vsel %vm14367_vm10, %v4303_v28, %v15163_v38  ;;  %v4313_v18 = vrot.slane %v4312_v14, 4  ;;  %v12681_v57 = vld [vmem:[%s17526_s3 + $0x310] ss:$8 sps:$4 sm:$0xff]   ;;  %v10949_v50 = vld [vmem:[%s14340_s15 + $0x54] sm:$0xf] }
 0x2e2   : > { %5909 = vmatmul.mubr.bf16.gmra.mrb[68].mxu0 %v12764_v13  ;;  %v2830_v52 = vpop.f32.mrb[3].mxu1  ;;  %6235 = vmatprep.mubr.bf16.mxu1 %v17537_v12  ;;  %v4600_v15 = vsel %vm14555_vm13, %v4598_v4, %v4599_v17  ;;  %v4322_v33 = vrot.slane %v4320_v10, 4  ;;  %v4325_v29 = vrot.slane %v4323_v54, 5  ;;  %v15211_v13 = vrot.slane %v4329_v34, 5  ;;  %v10988_v24 = vld [vmem:[%s14340_s15 + $0x50] sm:$0x1] }
 0x2e3   : > { %v15166_v20 = vadd.f32 %v2827_v44, %v2731_v22  ;;  %v2734_v6 = vadd.f32 %v11601_v36, %v15145_v32  ;;  %5949 = vmatprep.mubr.bf16.mxu0 %v12765_v25  ;;  %v11017_v53 = vcombine.low %v4597_v23, %v4600_v15  ;;  %v10986_v36 = vld [vmem:[%s14340_s15 + $0x48] sm:$0xe]  ;;  %v10987_v22 = vld [vmem:[%s14340_s15 + $0x4c] sm:$0xf]  ;;  %v12766_v44 = vld [vmem:[#allocation5 + $0x20] sm:$0xff]  ;;  %v4318_v46 = vsel %vm14367_vm10, %v4313_v18, %v4317_v55 }
 0x2e4   : > { %v4333_v30 = vshrl.u32 %v10947_v2, 16  ;;  %v15223_v25 = vcombine.low %v4308_v39, %v4318_v46  ;;  %v4339_v3 = vshll.u32 %v10948_v47, 16  ;;  %v4326_v45 = vor.u32 %v4325_v29, %v4322_v33  ;;  %v10950_v35 = vld [vmem:[%s14340_s15 + $0x58] sm:$0xf]  ;;  %v15228_v43 = vld [vmem:[%s14340_s15 + $0x6c] sm:$0xff]  }
 0x2e5   : > { %17578 = vst [vmem:[#allocation14_spill] sm:$0xff] %v15166_v20  ;;  %v15177_v16 = vadd.f32 %v2830_v52, %v2734_v6  ;;  %v11602_v19 = vpop.f32.mrb[4].mxu0  ;;  %v12686_v52 = vld [vmem:[%s17526_s3 + $0x324] ss:$8 sps:$4 sm:$0xff]   ;;  %v11008_v27 = vrot.slane %v10986_v36, 9  ;;  %v4603_v8 = vrot.slane %v10987_v22, 5 }
 0x2e6   : > { %v11603_v26 = vpop.f32.mrb[5].mxu0  ;;  %v12684_v17 = vld [vmem:[%s17526_s3 + $0x320] ss:$8 sps:$4 sm:$0xff]   ;;  %v4341_v2 = vrot.slane %v4339_v3, 5  ;;  %v4327_v14 = vrot.slane %v4326_v45, 4  ;;  %v4344_v39 = vshrl.u32 %v10949_v50, 16 }
 0x2e7   : > { %17579 = vst [vmem:[#allocation15_spill] sm:$0xff] %v15177_v16  ;;  %v11604_v49 = vadd.f32 %v11603_v26, %v11602_v19  ;;  %v11605_v31 = vpop.f32.mrb[6].mxu0  ;;  %v15195_v0 = vpop.f32.mrb[4].mxu1  ;;  %v4606_v26 = vrot.slane %v10988_v24, 5  ;;  %v4604_v23 = vsel %vm14555_vm13, %v11008_v27, %v4603_v8  ;;  %v4605_v4 = vrot.slane %v4603_v8, 4  ;;  %v12769_v27 = vld [vmem:[#allocation5 + $0xb8] sm:$0xff] }
 0x2e8   : > { %v11606_v41 = vpop.f32.mrb[7].mxu0  ;;  %v15203_v37 = vpop.f32.mrb[5].mxu1  ;;  %v4347_v10 = vshll.u32 %v10949_v50, 16  ;;  %v4332_v15 = vsel %vm14367_vm10, %v4327_v14, %v15211_v13  ;;  %v12687_v33 = vld [vmem:[%s17526_s3 + $0x330] ss:$8 sps:$4 sm:$0xff]   ;;  %v4357_v3 = vshrl.u32 %v10950_v35, 16 }
 0x2e9   : > { %v2739_v40 = vadd.f32 %v11604_v49, %v15145_v32  ;;  %v11607_v1 = vadd.f32 %v11606_v41, %v11605_v31  ;;  %v15207_v61 = vpop.f32.mrb[6].mxu1  ;;  %6236 = vmatmul.mubr.bf16.gmra.mrb[24].mxu1 %v11017_v53  ;;  %v12689_v31 = vld [vmem:[%s17526_s3 + $0x334] ss:$8 sps:$4 sm:$0xff]   ;;  %v4607_v34 = vsel %vm14555_vm13, %v4605_v4, %v4606_v26  ;;  %v10990_v29 = vld [vmem:[%s14340_s15 + $0x58] sm:$0xf] }
 0x2ea   : > { %5950 = vmatmul.mubr.bf16.vlgmr.msra.gmra.mrb[32].mxu0 %v12766_v44  ;;  %v15218_v6 = vpop.f32.mrb[7].mxu1  ;;  %6245 = vmatprep.mubr.bf16.mxu1 %v17537_v12  ;;  %v11018_v22 = vcombine.low %v4604_v23, %v4607_v34  ;;  %v4346_v44 = vrot.slane %v4344_v39, 4  ;;  %v10989_v46 = vld [vmem:[%s14340_s15 + $0x54] sm:$0xe]  ;;  %v10991_v50 = vld [vmem:[%s14340_s15 + $0x5c] sm:$0x1] }
 0x2eb   : > { %v15215_v38 = vadd.f32 %v15151_v48, %v2739_v40  ;;  %v2742_v63 = vadd.f32 %v11607_v1, %v15145_v32  ;;  %6047 = vmatpush1.bf16.msra.mxu0 %v12678_v21  ;;  %5957 = vmatprep.mubr.bf16.mxu0 %v12767_v60  ;;  %v4335_v48 = vrot.slane %v4333_v30, 4  ;;  %v10951_v40 = vld [vmem:[%s14340_s15 + $0x5c] sm:$0x1]  ;;  %v4353_v1 = vshll.u32 %v10950_v35, 16  ;;  %v12692_v30 = vld [vmem:[%s17526_s3 + $0x344] ss:$8 sps:$4 sm:$0xff]  }
 0x2ec   : > { %6048 = vmatprep.subr.bf16.mxu0 %v12683_v62  ;;  %v4349_v60 = vrot.slane %v4347_v10, 5  ;;  %v10952_v26 = vld [vmem:[%s14340_s15 + $0x60] sm:$0xf]  ;;  %v4359_v35 = vrot.slane %v4357_v3, 4  ;;  %v11009_v14 = vrot.slane %v10989_v46, 9  ;;  %v15281_v23 = vld [vmem:[%s14340_s15 + $0x78] sm:$0xff]  }
 0x2ed   : > { %17580 = vst [vmem:[#allocation16_spill] sm:$0xff] %v15215_v38  ;;  %v15232_v21 = vadd.f32 %v15159_v5, %v2742_v63  ;;  %v11608_v28 = vpop.f32.mrb[8].mxu0  ;;  %v4336_v55 = vor.u32 %v4335_v48, %v15211_v13  ;;  %v12768_v13 = vld [vmem:[#allocation5 + $0x68] sm:$0xff]  ;;  %v4613_v39 = vrot.slane %v10991_v50, 5  ;;  %v4371_v46 = vshll.u32 %v10952_v26, 16 }
 0x2ee   : > { %v11609_v62 = vpop.f32.mrb[9].mxu0  ;;  %v10992_v3 = vld [vmem:[%s14340_s15 + $0x60] sm:$0xe]  ;;  %v10976_v5 = vld [vmem:[%s14340_s15 + $0x20] sm:$0x1] }
 0x2ef   : > { %17581 = vst [vmem:[#allocation17_spill] sm:$0xff] %v15232_v21  ;;  %v11610_v47 = vadd.f32 %v11609_v62, %v11608_v28  ;;  %v11611_v49 = vpop.f32.mrb[10].mxu0  ;;  %6049 = vmatpush1.bf16.msra.mxu0 %v12681_v57  ;;  %v15245_v18 = vpop.f32.mrb[8].mxu1  ;;  %v4337_v54 = vrot.slane %v4336_v55, 4  ;;  %v4350_v62 = vor.u32 %v4349_v60, %v4346_v44  ;;  %v4610_v55 = vrot.slane %v10990_v29, 5 }
 0x2f0   : > { %v11612_v41 = vpop.f32.mrb[11].mxu0  ;;  %6050 = vmatprep.subr.bf16.mxu0 %v12686_v52  ;;  %v15257_v36 = vpop.f32.mrb[9].mxu1  ;;  %v15268_v52 = vrot.slane %v4353_v1, 5  ;;  %v4368_v44 = vshrl.u32 %v10952_v26, 16 }
 0x2f1   : > { %v11613_v57 = vadd.f32 %v11612_v41, %v11611_v49  ;;  %v2747_v53 = vadd.f32 %v11610_v47, %v15145_v32  ;;  %v15264_v24 = vpop.f32.mrb[10].mxu1  ;;  %v4342_v63 = vsel %vm14367_vm10, %v4337_v54, %v4341_v2  ;;  %v4363_v2 = vshll.u32 %v10951_v40, 16  ;;  %v12690_v47 = vld [vmem:[%s17526_s3 + $0x340] ss:$8 sps:$4 sm:$0xff]   ;;  %v12695_v41 = vld [vmem:[%s17526_s3 + $0x354] ss:$8 sps:$4 sm:$0xff]   ;;  %6246 = vmatmul.mubr.bf16.gmra.mrb[28].mxu1 %v11018_v22 }
 0x2f2   : > { %5958 = vmatmul.mubr.bf16.gmra.mrb[36].mxu0 %v12768_v13  ;;  %v15275_v8 = vpop.f32.mrb[11].mxu1  ;;  %v15277_v28 = vcombine.low %v4332_v15, %v4342_v63  ;;  %v4351_v15 = vrot.slane %v4350_v62, 4  ;;  %v4360_v54 = vor.u32 %v4359_v35, %v15268_v52  ;;  %v4612_v34 = vrot.slane %v4610_v55, 4  ;;  %6255 = vmatprep.mubr.bf16.mxu1 %v17537_v12  ;;  %v10993_v62 = vld [vmem:[%s14340_s15 + $0x64] sm:$0xf] }
 0x2f3   : > { %v15272_v45 = vadd.f32 %v15203_v37, %v2747_v53  ;;  %v2750_v48 = vadd.f32 %v11613_v57, %v15145_v32  ;;  %6051 = vmatpush1.bf16.msra.mxu0 %v12684_v17  ;;  %5967 = vmatprep.mubr.bf16.mxu0 %v12769_v27  ;;  %v4365_v49 = vrot.slane %v4363_v2, 5  ;;  %v10954_v53 = vld [vmem:[%s14340_s15 + $0x68] sm:$0x1]  ;;  %v12693_v27 = vld [vmem:[%s17526_s3 + $0x350] ss:$8 sps:$4 sm:$0xff]   ;;  %v4370_v26 = vrot.slane %v4368_v44, 4 }
 0x2f4   : > { %6052 = vmatprep.subr.bf16.mxu0 %v12689_v31  ;;  %v10953_v31 = vld [vmem:[%s14340_s15 + $0x64] sm:$0xf]  ;;  %v4356_v13 = vsel %vm14367_vm10, %v4351_v15, %v15268_v52  ;;  %v4361_v63 = vrot.slane %v4360_v54, 4  ;;  %v4614_v60 = vsel %vm14555_vm13, %v4612_v34, %v4613_v39  ;;  %v10994_v35 = vld [vmem:[%s14340_s15 + $0x68] sm:$0x1]  ;;  %v12770_v52 = vld [vmem:[#allocation5 + $0xb0] sm:$0xff] }
 0x2f5   : > { %17582 = vst [vmem:[#allocation18_spill] sm:$0xff] %v15272_v45  ;;  %v15285_v17 = vadd.f32 %v15218_v6, %v2750_v48  ;;  %v11614_v4 = vpop.f32.mrb[12].mxu0  ;;  %v4611_v6 = vsel %vm14555_vm13, %v11009_v14, %v4610_v55  ;;  %v12698_v34 = vld [vmem:[%s17526_s3 + $0x364] ss:$8 sps:$4 sm:$0xff]  }
 0x2f6   : > { %v11615_v10 = vpop.f32.mrb[13].mxu0  ;;  %v11019_v2 = vcombine.low %v4611_v6, %v4614_v60  ;;  %v4366_v55 = vsel %vm14367_vm10, %v4361_v63, %v4365_v49  ;;  %v12771_v6 = vld [vmem:[#allocation5 + $0x100] sm:$0xff] }
 0x2f7   : > { %17583 = vst [vmem:[#allocation19_spill] sm:$0xff] %v15285_v17  ;;  %v11616_v1 = vadd.f32 %v11615_v10, %v11614_v4  ;;  %v11617_v57 = vpop.f32.mrb[14].mxu0  ;;  %6053 = vmatpush1.bf16.msra.mxu0 %v12687_v33  ;;  %v15300_v29 = vpop.f32.mrb[12].mxu1  ;;  %v4377_v33 = vshll.u32 %v10953_v31, 16  ;;  %v4373_v4 = vrot.slane %v4371_v46, 5  ;;  %v4381_v10 = vshrl.u32 %v10953_v31, 16 }
 0x2f8   : > { %v11618_v22 = vpop.f32.mrb[15].mxu0  ;;  %6054 = vmatprep.subr.bf16.mxu0 %v12692_v30  ;;  %v15312_v30 = vpop.f32.mrb[13].mxu1  ;;  %v15331_v49 = vcombine.low %v4356_v13, %v4366_v55  ;;  %v4617_v46 = vrot.slane %v10993_v62, 5  ;;  %v12696_v13 = vld [vmem:[%s17526_s3 + $0x360] ss:$8 sps:$4 sm:$0xff]  }
 0x2f9   : > { %v2755_v50 = vadd.f32 %v11616_v1, %v15145_v32  ;;  %v11619_v48 = vadd.f32 %v11618_v22, %v11617_v57  ;;  %v15316_v14 = vpop.f32.mrb[14].mxu1  ;;  %v15320_v39 = vrot.slane %v4377_v33, 5  ;;  %v4387_v57 = vshll.u32 %v10954_v53, 16  ;;  %v10955_v22 = vld [vmem:[%s14340_s15 + $0x6c] sm:$0xf]  ;;  %6256 = vmatmul.mubr.bf16.gmra.mrb[32].mxu1 %v11019_v2 }
 0x2fa   : > { %5968 = vmatmul.mubr.bf16.gmra.mrb[40].mxu0 %v12770_v52  ;;  %v15329_v1 = vpop.f32.mrb[15].mxu1  ;;  %v4374_v31 = vor.u32 %v4373_v4, %v4370_v26  ;;  %v4383_v44 = vrot.slane %v4381_v10, 4  ;;  %v4619_v52 = vrot.slane %v4617_v46, 4  ;;  %v10957_v55 = vld [vmem:[%s14340_s15 + $0x74] sm:$0x1]  ;;  %6265 = vmatprep.mubr.bf16.mxu1 %v17537_v12 }
 0x2fb   : > { %v15323_v15 = vadd.f32 %v15195_v0, %v2755_v50  ;;  %v2758_v54 = vadd.f32 %v11619_v48, %v15145_v32  ;;  %6055 = vmatpush1.bf16.msra.mxu0 %v12690_v47  ;;  %5977 = vmatprep.mubr.bf16.mxu0 %v12771_v6  ;;  %v11010_v0 = vrot.slane %v10992_v3, 9  ;;  %v15335_v47 = vld [vmem:[%s14340_s15 + $0x84] sm:$0xff]   ;;  %v4389_v53 = vrot.slane %v4387_v57, 5  ;;  %v10956_v50 = vld [vmem:[%s14340_s15 + $0x70] sm:$0xf] }
 0x2fc   : > { %6056 = vmatprep.subr.bf16.mxu0 %v12695_v41  ;;  %v4620_v41 = vrot.slane %v10994_v35, 5  ;;  %v12701_v48 = vld [vmem:[%s17526_s3 + $0x374] ss:$8 sps:$4 sm:$0xff]   ;;  %v4375_v26 = vrot.slane %v4374_v31, 4  ;;  %v4384_v62 = vor.u32 %v4383_v44, %v15320_v39  ;;  %v4395_v6 = vshll.u32 %v10955_v22, 16 }
 0x2fd   : > { %17584 = vst [vmem:[#allocation20_spill] sm:$0xff] %v15323_v15  ;;  %v15339_v60 = vadd.f32 %v15207_v61, %v2758_v54  ;;  %v11620_v33 = vpop.f32.mrb[16].mxu0  ;;  %v4618_v61 = vsel %vm14555_vm13, %v11010_v0, %v4617_v46  ;;  %v4392_v54 = vshrl.u32 %v10955_v22, 16  ;;  %v10995_v57 = vld [vmem:[%s14340_s15 + $0x6c] sm:$0xe]  ;;  %v4401_v46 = vshll.u32 %v10956_v50, 16 }
 0x2fe   : > { %v11621_v3 = vpop.f32.mrb[17].mxu0  ;;  %v4380_v31 = vsel %vm14367_vm10, %v4375_v26, %v15320_v39  ;;  %v4385_v44 = vrot.slane %v4384_v62, 4  ;;  %v4621_v0 = vsel %vm14555_vm13, %v4619_v52, %v4620_v41  ;;  %v12772_v22 = vld [vmem:[#allocation5 + $0xf8] sm:$0xff]  ;;  %v4397_v40 = vrot.slane %v4395_v6, 5  ;;  %v10997_v26 = vld [vmem:[%s14340_s15 + $0x74] sm:$0x1] }
 0x2ff   : > { %17585 = vst [vmem:[#allocation21_spill] sm:$0xff] %v15339_v60  ;;  %v11622_v35 = vadd.f32 %v11621_v3, %v11620_v33  ;;  %v11623_v10 = vpop.f32.mrb[18].mxu0  ;;  %6057 = vmatpush1.bf16.msra.mxu0 %v12693_v27  ;;  %v10996_v33 = vld [vmem:[%s14340_s15 + $0x70] sm:$0xf]  ;;  %v11020_v4 = vcombine.low %v4618_v61, %v4621_v0  ;;  %v4394_v63 = vrot.slane %v4392_v54, 4  ;;  %v15364_v37 = vrot.slane %v4401_v46, 5 }
 0x300   : > { %v11624_v2 = vpop.f32.mrb[19].mxu0  ;;  %6058 = vmatprep.subr.bf16.mxu0 %v12698_v34  ;;  %v4390_v34 = vsel %vm14367_vm10, %v4385_v44, %v4389_v53  ;;  %v4405_v39 = vshrl.u32 %v10956_v50, 16  ;;  %v12773_v52 = vld [vmem:[#allocation5 + $0x148] sm:$0xff]  ;;  %v12699_v61 = vld [vmem:[%s17526_s3 + $0x370] ss:$8 sps:$4 sm:$0xff]   ;;  %v11011_v54 = vrot.slane %v10995_v57, 9 }
 0x301   : > { %v11625_v3 = vadd.f32 %v11624_v2, %v11623_v10  ;;  %v2763_v27 = vadd.f32 %v11622_v35, %v15145_v32  ;;  %v12704_v53 = vld [vmem:[%s17526_s3 + $0x384] ss:$8 sps:$4 sm:$0xff]   ;;  %v15377_v50 = vcombine.low %v4380_v31, %v4390_v34  ;;  %v4411_v35 = vshll.u32 %v10957_v55, 16  ;;  %v10958_v2 = vld [vmem:[%s14340_s15 + $0x78] sm:$0xf]  ;;  %6266 = vmatmul.mubr.bf16.gmra.mrb[36].mxu1 %v11020_v4 }
 0x302   : > { %5978 = vmatmul.mubr.bf16.gmra.mrb[44].mxu0 %v12772_v22  ;;  %v4407_v10 = vrot.slane %v4405_v39, 4  ;;  %v4624_v6 = vrot.slane %v10996_v33, 5  ;;  %v12702_v46 = vld [vmem:[%s17526_s3 + $0x380] ss:$8 sps:$4 sm:$0xff]   ;;  %v10959_v55 = vld [vmem:[%s14340_s15 + $0x7c] sm:$0xf]  ;;  %6275 = vmatprep.mubr.bf16.mxu1 %v17537_v12 }
 0x303   : > { %v15368_v41 = vadd.f32 %v15257_v36, %v2763_v27  ;;  %v2766_v62 = vadd.f32 %v11625_v3, %v15145_v32  ;;  %5987 = vmatprep.mubr.bf16.mxu0 %v12773_v52  ;;  %6059 = vmatpush1.bf16.msra.mxu0 %v12696_v13  ;;  %v4398_v36 = vor.u32 %v4397_v40, %v4394_v63  ;;  %v4413_v31 = vrot.slane %v4411_v35, 5  ;;  %v12707_v40 = vld [vmem:[%s17526_s3 + $0x394] ss:$8 sps:$4 sm:$0xff]   ;;  %v10960_v27 = vld [vmem:[%s14340_s15 + $0x80] sm:$0x1] }
 0x304   : > { %6060 = vmatprep.subr.bf16.mxu0 %v12701_v48  ;;  %v4627_v3 = vrot.slane %v10997_v26, 5  ;;  %v4408_v57 = vor.u32 %v4407_v10, %v15364_v37  ;;  %v4626_v33 = vrot.slane %v4624_v6, 4  ;;  %v4416_v26 = vshrl.u32 %v10958_v2, 16  ;;  %v10999_v22 = vld [vmem:[%s14340_s15 + $0x7c] sm:$0xf] }
 0x305   : > { %17586 = vst [vmem:[#allocation22_spill] sm:$0xff] %v15368_v41  ;;  %v15382_v44 = vadd.f32 %v15275_v8, %v2766_v62  ;;  %v11626_v0 = vpop.f32.mrb[20].mxu0  ;;  %v4399_v63 = vrot.slane %v4398_v36, 4  ;;  %v4625_v8 = vsel %vm14555_vm13, %v11011_v54, %v4624_v6  ;;  %v4419_v62 = vshll.u32 %v10958_v2, 16  ;;  %v12774_v2 = vld [vmem:[#allocation5 + $0x140] sm:$0xff] }
 0x306   : > { %v11627_v48 = vpop.f32.mrb[21].mxu0  ;;  %v4409_v35 = vrot.slane %v4408_v57, 4  ;;  %v4628_v36 = vsel %vm14555_vm13, %v4626_v33, %v4627_v3  ;;  %v4425_v10 = vshll.u32 %v10959_v55, 16  ;;  %v11000_v57 = vld [vmem:[%s14340_s15 + $0x80] sm:$0x1] }
 0x307   : > { %17587 = vst [vmem:[#allocation23_spill] sm:$0xff] %v15382_v44  ;;  %v11628_v34 = vadd.f32 %v11627_v48, %v11626_v0  ;;  %v11629_v39 = vpop.f32.mrb[22].mxu0  ;;  %6061 = vmatpush1.bf16.msra.mxu0 %v12699_v61  ;;  %v4404_v52 = vsel %vm14367_vm10, %v4399_v63, %v15364_v37  ;;  %v11021_v61 = vcombine.low %v4625_v8, %v4628_v36  ;;  %v4418_v0 = vrot.slane %v4416_v26, 4  ;;  %v10998_v48 = vld [vmem:[%s14340_s15 + $0x78] sm:$0xe]  ;;  %v12775_v8 = vld [vmem:[#allocation5 + $0x190] sm:$0xff] }
 0x308   : > { %v11630_v4 = vpop.f32.mrb[23].mxu0  ;;  %6062 = vmatprep.subr.bf16.mxu0 %v12704_v53  ;;  %v4414_v53 = vsel %vm14367_vm10, %v4409_v35, %v4413_v31  ;;  %v4421_v13 = vrot.slane %v4419_v62, 5  ;;  %v15407_v37 = vrot.slane %v4425_v10, 5  ;;  %v4429_v63 = vshrl.u32 %v10959_v55, 16  ;;  %v12710_v31 = vld [vmem:[%s17526_s3 + $0x3a4] ss:$8 sps:$4 sm:$0xff]  }
 0x309   : > { %v2771_v54 = vadd.f32 %v11628_v34, %v15145_v32  ;;  %v11631_v6 = vadd.f32 %v11630_v4, %v11629_v39  ;;  %v12705_v34 = vld [vmem:[%s17526_s3 + $0x390] ss:$8 sps:$4 sm:$0xff]   ;;  %v15420_v55 = vcombine.low %v4404_v52, %v4414_v53  ;;  %v4435_v39 = vshll.u32 %v10960_v27, 16  ;;  %v10961_v35 = vld [vmem:[%s14340_s15 + $0x84] sm:$0xf]  ;;  %6276 = vmatmul.mubr.bf16.gmra.mrb[40].mxu1 %v11021_v61 }
 0x30a   : > { %5988 = vmatmul.mubr.bf16.gmra.mrb[48].mxu0 %v12774_v2  ;;  %v4431_v26 = vrot.slane %v4429_v63, 4  ;;  %v11012_v62 = vrot.slane %v10998_v48, 9  ;;  %v4631_v4 = vrot.slane %v10999_v22, 5  ;;  %v10962_v2 = vld [vmem:[%s14340_s15 + $0x88] sm:$0xf]  ;;  %6285 = vmatprep.mubr.bf16.mxu1 %v17537_v12  ;;  %v4440_v61 = vshrl.u32 %v10961_v35, 16 }
 0x30b   : > { %v15411_v3 = vadd.f32 %v15245_v18, %v2771_v54  ;;  %v2774_v33 = vadd.f32 %v11631_v6, %v15145_v32  ;;  %5997 = vmatprep.mubr.bf16.mxu0 %v12775_v8  ;;  %6063 = vmatpush1.bf16.msra.mxu0 %v12702_v46  ;;  %v4422_v18 = vor.u32 %v4421_v13, %v4418_v0  ;;  %v4437_v54 = vrot.slane %v4435_v39, 5  ;;  %v12708_v27 = vld [vmem:[%s17526_s3 + $0x3a0] ss:$8 sps:$4 sm:$0xff]   ;;  %v12713_v53 = vld [vmem:[%s17526_s3 + $0x3b4] ss:$8 sps:$4 sm:$0xff]  }
 0x30c   : > { %6064 = vmatprep.subr.bf16.mxu0 %v12707_v40  ;;  %v4634_v6 = vrot.slane %v11000_v57, 5  ;;  %v4432_v40 = vor.u32 %v4431_v26, %v15407_v37  ;;  %v4632_v22 = vsel %vm14555_vm13, %v11012_v62, %v4631_v4  ;;  %v4633_v52 = vrot.slane %v4631_v4, 4 }
 0x30d   : > { %17588 = vst [vmem:[#allocation24_spill] sm:$0xff] %v15411_v3  ;;  %v15425_v36 = vadd.f32 %v15264_v24, %v2774_v33  ;;  %v11632_v10 = vpop.f32.mrb[24].mxu0  ;;  %v4423_v13 = vrot.slane %v4422_v18, 4  ;;  %v4443_v63 = vshll.u32 %v10961_v35, 16  ;;  %v10963_v18 = vld [vmem:[%s14340_s15 + $0x8c] sm:$0x1] }
 0x30e   : > { %v11633_v8 = vpop.f32.mrb[25].mxu0  ;;  %v4433_v39 = vrot.slane %v4432_v40, 4  ;;  %v4449_v26 = vshll.u32 %v10962_v2, 16  ;;  %v12711_v35 = vld [vmem:[%s17526_s3 + $0x3b0] ss:$8 sps:$4 sm:$0xff]  }
 0x30f   : > { %17589 = vst [vmem:[#allocation25_spill] sm:$0xff] %v15425_v36  ;;  %v11634_v0 = vadd.f32 %v11633_v8, %v11632_v10  ;;  %v11635_v48 = vpop.f32.mrb[26].mxu0  ;;  %6065 = vmatpush1.bf16.msra.mxu0 %v12705_v34  ;;  %v4428_v33 = vsel %vm14367_vm10, %v4423_v13, %v15407_v37  ;;  %v4635_v34 = vsel %vm14555_vm13, %v4633_v52, %v4634_v6  ;;  %v11001_v8 = vld [vmem:[%s14340_s15 + $0x84] sm:$0xe]  ;;  %v11002_v24 = vld [vmem:[%s14340_s15 + $0x88] sm:$0xf] }
 0x310   : > { %v11636_v57 = vpop.f32.mrb[27].mxu0  ;;  %6066 = vmatprep.subr.bf16.mxu0 %v12710_v31  ;;  %v11022_v10 = vcombine.low %v4632_v22, %v4635_v34  ;;  %v4442_v31 = vrot.slane %v4440_v61, 4  ;;  %v12776_v37 = vld [vmem:[#allocation5 + $0x188] sm:$0xff]  ;;  %v4438_v6 = vsel %vm14367_vm10, %v4433_v39, %v4437_v54  ;;  %v4445_v13 = vrot.slane %v4443_v63, 5  ;;  %v12777_v22 = vld [vmem:[#allocation5 + $0x1d8] sm:$0xff] }
 0x311   : > { %v11637_v62 = vadd.f32 %v11636_v57, %v11635_v48  ;;  %v2779_v4 = vadd.f32 %v11634_v0, %v15145_v32  ;;  %v4451_v40 = vrot.slane %v4449_v26, 5  ;;  %v4453_v52 = vshrl.u32 %v10962_v2, 16  ;;  %v11003_v48 = vld [vmem:[%s14340_s15 + $0x8c] sm:$0x1]  ;;  %v10974_v63 = vld [vmem:[%s14340_s15 + $0x18] sm:$0xe] }
 0x312   : > { %5998 = vmatmul.mubr.bf16.gmra.mrb[52].mxu0 %v12776_v37  ;;  %v12719_v61 = vld [vmem:[%s17526_s3 + $0x3c4] ss:$8 sps:$4 sm:$0xff]   ;;  %v15461_v34 = vcombine.low %v4428_v33, %v4438_v6  ;;  %v4459_v54 = vshll.u32 %v10963_v18, 16  ;;  %v4446_v2 = vor.u32 %v4445_v13, %v4442_v31  ;;  %v11013_v26 = vrot.slane %v11001_v8, 9  ;;  %6286 = vmatmul.mubr.bf16.gmra.mrb[44].mxu1 %v11022_v10 }
 0x313   : > { %v15455_v0 = vadd.f32 %v15312_v30, %v2779_v4  ;;  %v2782_v57 = vadd.f32 %v11637_v62, %v15145_v32  ;;  %6007 = vmatprep.mubr.bf16.mxu0 %v12777_v22  ;;  %6067 = vmatpush1.bf16.msra.mxu0 %v12708_v27  ;;  %v4455_v39 = vrot.slane %v4453_v52, 4  ;;  %v4638_v30 = vrot.slane %v11002_v24, 5  ;;  %v10975_v4 = vld [vmem:[%s14340_s15 + $0x1c] sm:$0xf] }
 0x314   : > { %6068 = vmatprep.subr.bf16.mxu0 %v12713_v53  ;;  %v4461_v22 = vrot.slane %v4459_v54, 5  ;;  %v4641_v46 = vrot.slane %v11003_v48, 5  ;;  %v4447_v33 = vrot.slane %v4446_v2, 4  ;;  %6295 = vmatprep.mubr.bf16.mxu1 %v17537_v12  ;;  %v11004_v13 = vrot.slane %v10974_v63, 9  ;;  %v12725_v48 = vld [vmem:[%s17526_s3 + $0x3d4] ss:$8 sps:$4 sm:$0xff]  }
 0x315   : > { %17590 = vst [vmem:[#allocation26_spill] sm:$0xff] %v15455_v0  ;;  %v15467_v37 = vadd.f32 %v15329_v1, %v2782_v57  ;;  %v11638_v27 = vpop.f32.mrb[28].mxu0  ;;  %v4456_v18 = vor.u32 %v4455_v39, %v4451_v40  ;;  %v4639_v53 = vsel %vm14555_vm13, %v11013_v26, %v4638_v30  ;;  %v4640_v31 = vrot.slane %v4638_v30, 4  ;;  %v12717_v1 = vld [vmem:[%s17526_s3 + $0x3c0] ss:$8 sps:$4 sm:$0xff]   ;;  %v12778_v63 = vld [vmem:[#allocation5 + $0x1d0] sm:$0xff] }
 0x316   : > { %v11639_v19 = vpop.f32.mrb[29].mxu0  ;;  %v4575_v52 = vrot.slane %v10975_v4, 5  ;;  %v4452_v57 = vsel %vm14367_vm10, %v4447_v33, %v4451_v40  ;;  %v4578_v54 = vrot.slane %v10976_v5, 5  ;;  %v12779_v5 = vld [vmem:[#allocation5 + $0x220] sm:$0xff] }
 0x317   : > { %17591 = vst [vmem:[#allocation27_spill] sm:$0xff] %v15467_v37  ;;  %v11640_v8 = vadd.f32 %v11639_v19, %v11638_v27  ;;  %v11641_v6 = vpop.f32.mrb[30].mxu0  ;;  %6069 = vmatpush1.bf16.msra.mxu0 %v12711_v35  ;;  %v4457_v19 = vrot.slane %v4456_v18, 4  ;;  %v4642_v35 = vsel %vm14555_vm13, %v4640_v31, %v4641_v46  ;;  %v12723_v27 = vld [vmem:[%s17526_s3 + $0x3d0] ss:$8 sps:$4 sm:$0xff]  }
 0x318   : > { %v11642_v10 = vpop.f32.mrb[31].mxu0  ;;  %6070 = vmatprep.subr.bf16.mxu0 %v12719_v61  ;;  %v11023_v26 = vcombine.low %v4639_v53, %v4642_v35  ;;  %v15489_v30 = vsel %vm14555_vm13, %v11004_v13, %v4575_v52  ;;  %v4577_v4 = vrot.slane %v4575_v52, 4  ;;  %v12738_v13 = vld [vmem:[%s17526_s3 + $0x3f0] ss:$8 sps:$4 sm:$0xff]   ;;  %v12782_v52 = vld [vmem:[%s17526_s3 + $0x404] ss:$8 sps:$4 sm:$0xff]  }
 0x319   : > { %v2787_v2 = vadd.f32 %v11640_v8, %v15145_v32  ;;  %v11643_v39 = vadd.f32 %v11642_v10, %v11641_v6  ;;  %v4462_v61 = vsel %vm14367_vm10, %v4457_v19, %v4461_v22  ;;  %v12731_v22 = vld [vmem:[%s17526_s3 + $0x3e4] ss:$8 sps:$4 sm:$0xff]   ;;  %v12729_v8 = vld [vmem:[%s17526_s3 + $0x3e0] ss:$8 sps:$4 sm:$0xff]   ;;  %v12740_v6 = vld [vmem:[%s17526_s3 + $0x3f4] ss:$8 sps:$4 sm:$0xff]  }
 0x31a   : > { %6008 = vmatmul.mubr.bf16.gmra.mrb[56].mxu0 %v12778_v63  ;;  %v15498_v33 = vcombine.low %v4452_v57, %v4462_v61  ;;  %6296 = vmatmul.mubr.bf16.gmra.mrb[48].mxu1 %v11023_v26  ;;  %v12783_v10 = vld [vmem:[#allocation5 + $0x260] sm:$0xff]  ;;  %v12785_v57 = vld [vmem:[#allocation5 + $0x2a8] sm:$0xff]  ;;  %v12786_v19 = vld [vmem:[#allocation5 + $0x38] sm:$0xff] }
 0x31b   : > { %v15492_v40 = vadd.f32 %v15300_v29, %v2787_v2  ;;  %v2790_v46 = vadd.f32 %v11643_v39, %v15145_v32  ;;  %6017 = vmatprep.mubr.bf16.mxu0 %v12779_v5  ;;  %6071 = vmatpush1.bf16.msra.mxu0 %v12717_v1  ;;  %v15505_v29 = vsel %vm14555_vm13, %v4577_v4, %v4578_v54  ;;  %v12780_v1 = vld [vmem:[#allocation5 + $0x218] sm:$0xff]  ;;  %v12787_v35 = vld [vmem:[#allocation5 + $0x30] sm:$0xff]  ;;  %v12788_v54 = vld [vmem:[%s17526_s3 + $0x400] ss:$8 sps:$4 sm:$0xff]  }
 0x31c   : > { %6072 = vmatprep.subr.bf16.mxu0 %v12725_v48  ;;  %v11014_v53 = vcombine.low %v15489_v30, %v15505_v29  ;;  %v12784_v48 = vld [vmem:[#allocation5 + $0x2b0] sm:$0xff]  ;;  %v12791_v26 = vld [vmem:[%s17526_s3 + $0x424] ss:$8 sps:$4 sm:$0xff]   ;;  %v12792_v63 = vld [vmem:[#allocation5 + $0x78] sm:$0xff] }
 0x31d   : > { %17592 = vst [vmem:[#allocation28_spill] sm:$0xff] %v15492_v40  ;;  %v15509_v18 = vadd.f32 %v15316_v14, %v2790_v46  ;;  %v12781_v14 = vld [vmem:[#allocation5 + $0x268] sm:$0xff]  ;;  %v12789_v2 = vld [vmem:[%s17526_s3 + $0x414] ss:$8 sps:$4 sm:$0xff]   ;;  %v12790_v39 = vld [vmem:[%s17526_s3 + $0x410] ss:$8 sps:$4 sm:$0xff]  }
 0x31e   : > { %v12794_v61 = vld [vmem:[%s17526_s3 + $0x434] ss:$8 sps:$4 sm:$0xff]   ;;  %v12795_v4 = vld [vmem:[%s17526_s3 + $0x430] ss:$8 sps:$4 sm:$0xff]   ;;  %v12796_v46 = vld [vmem:[%s17526_s3 + $0x444] ss:$8 sps:$4 sm:$0xff]  }
 0x31f   : > { %17593 = vst [vmem:[#allocation29_spill] sm:$0xff] %v15509_v18  ;;  %6073 = vmatpush1.bf16.msra.mxu0 %v12723_v27  ;;  %v12798_v5 = vld [vmem:[%s17526_s3 + $0x440] ss:$8 sps:$4 sm:$0xff]   ;;  %v12799_v27 = vld [vmem:[%s17526_s3 + $0x454] ss:$8 sps:$4 sm:$0xff]  }
 0x320   : > { %6074 = vmatprep.subr.bf16.mxu0 %v12731_v22  ;;  %v12800_v22 = vld [vmem:[%s17526_s3 + $0x450] ss:$8 sps:$4 sm:$0xff]   ;;  %v4927_v31 = vld [vmem:[%s17527_s4] sm:$0x3] }
 0x322   : > { %6018 = vmatmul.mubr.bf16.gmra.mrb[60].mxu0 %v12780_v1  ;;  %v12804_v1 = vld [vmem:[%s17526_s3 + $0x474] ss:$8 sps:$4 sm:$0xff]  }
 0x323   : > { %6027 = vmatprep.mubr.bf16.mxu0 %v12781_v14  ;;  %6075 = vmatpush1.bf16.msra.mxu0 %v12729_v8  ;;  %v12801_v8 = vld [vmem:[%s17526_s3 + $0x464] ss:$8 sps:$4 sm:$0xff]   ;;  %v12805_v14 = vld [vmem:[%s17526_s3 + $0x470] ss:$8 sps:$4 sm:$0xff]  }
 0x324   : > { %6076 = vmatprep.subr.bf16.mxu0 %v12740_v6  ;;  %v12803_v6 = vld [vmem:[%s17526_s3 + $0x460] ss:$8 sps:$4 sm:$0xff]  }
 0x327   : > { %6077 = vmatpush1.bf16.msra.mxu0 %v12738_v13  ;;  %v12806_v13 = vld [vmem:[#allocation5 + $0x150] sm:$0xff] }
 0x328   : > { %6175 = vmatprep.subr.bf16.mxu0 %v12782_v52 }
 0x32a   : > { %6028 = vmatmul.mubr.bf16.gmra.mrb[64].mxu0 %v12783_v10 }
 0x32b   : > { %6037 = vmatprep.mubr.bf16.mxu0 %v12784_v48 }
 0x332   : > { %6038 = vmatmul.mubr.bf16.gmra.mrb[68].mxu0 %v12785_v57 }
 0x333   : > { %6078 = vmatprep.mubr.bf16.mxu0 %v12786_v19 }
 0x33a   : > { %6079 = vmatmul.mubr.bf16.vlgmr.msra.gmra.mrb[32].mxu0 %v12787_v35 }
 0x33b   : > { %6176 = vmatpush1.bf16.msra.mxu0 %v12788_v54  ;;  %6086 = vmatprep.mubr.bf16.mxu0 %v15139_v11  ;;  %v12793_v11 = vld [vmem:[%s17526_s3 + $0x420] ss:$8 sps:$4 sm:$0xff]  }
 0x33c   : > { %6177 = vmatprep.subr.bf16.mxu0 %v12789_v2 }
 0x33f   : > { %6178 = vmatpush1.bf16.msra.mxu0 %v12790_v39 }
 0x340   : > { %6179 = vmatprep.subr.bf16.mxu0 %v12791_v26 }
 0x342   : > { %6087 = vmatmul.mubr.bf16.gmra.mrb[36].mxu0 %v12792_v63 }
 0x343   : > { %6096 = vmatprep.mubr.bf16.mxu0 %v15169_v59  ;;  %6180 = vmatpush1.bf16.msra.mxu0 %v12793_v11  ;;  %v12797_v59 = vld [vmem:[#allocation5 + $0xc0] sm:$0xff] }
 0x344   : > { %6181 = vmatprep.subr.bf16.mxu0 %v12794_v61 }
 0x347   : > { %6182 = vmatpush1.bf16.msra.mxu0 %v12795_v4 }
 0x348   : > { %6183 = vmatprep.subr.bf16.mxu0 %v12796_v46 }
 0x34a   : > { %6097 = vmatmul.mubr.bf16.gmra.mrb[40].mxu0 %v12797_v59 }
 0x34b   : > { %6106 = vmatprep.mubr.bf16.mxu0 %v15223_v25  ;;  %6184 = vmatpush1.bf16.msra.mxu0 %v12798_v5  ;;  %v12802_v25 = vld [vmem:[#allocation5 + $0x108] sm:$0xff] }
 0x34c   : > { %6185 = vmatprep.subr.bf16.mxu0 %v12799_v27 }
 0x34f   : > { %6186 = vmatpush1.bf16.msra.mxu0 %v12800_v22 }
 0x350   : > { %6187 = vmatprep.subr.bf16.mxu0 %v12801_v8 }
 0x352   : > { %6107 = vmatmul.mubr.bf16.gmra.mrb[44].mxu0 %v12802_v25 }
 0x353   : > { %6116 = vmatprep.mubr.bf16.mxu0 %v15277_v28  ;;  %6188 = vmatpush1.bf16.msra.mxu0 %v12803_v6 }
 0x354   : > { %6189 = vmatprep.subr.bf16.mxu0 %v12804_v1  ;;  %v4929_v1 = vlaneseq }
 0x357   : > { %6190 = vmatpush1.bf16.msra.mxu0 %v12805_v14  ;;  %v4930_v14 = vshrl.u32 %v4929_v1, 7 }
 0x359   : > { %v4935_v32 = vsub.s32 1, %v4930_v14 }
 0x35a   : > { %6117 = vmatmul.mubr.bf16.gmra.mrb[48].mxu0 %v12806_v13  ;;  %v4931_v13 = vsub.s32 0, %v4930_v14 }
 0x35b   : > { %6126 = vmatprep.mubr.bf16.mxu0 %v15331_v49  ;;  %v15654_v62 = vrot.slane %v4927_v31, %v4935_v32 }
 0x35c   : > { %v15652_v24 = vrot.slane %v4927_v31, %v4931_v13 }
 0x362   : > { %6127 = vmatmul.mubr.bf16.gmra.mrb[52].mxu0 %v15137_v7 }
 0x363   : > { %6136 = vmatprep.mubr.bf16.mxu0 %v15377_v50 }
 0x36a   : > { %6137 = vmatmul.mubr.bf16.gmra.mrb[56].mxu0 %v15173_v56 }
 0x36b   : > { %6146 = vmatprep.mubr.bf16.mxu0 %v15420_v55 }
 0x372   : > { %6147 = vmatmul.mubr.bf16.gmra.mrb[60].mxu0 %v15228_v43 }
 0x373   : > { %6156 = vmatprep.mubr.bf16.mxu0 %v15461_v34 }
 0x37a   : > { %6157 = vmatmul.mubr.bf16.gmra.mrb[64].mxu0 %v15281_v23 }
 0x37b   : > { %6166 = vmatprep.mubr.bf16.mxu0 %v15498_v33 }
 0x382   : > { %6167 = vmatmul.mubr.bf16.gmra.mrb[68].mxu0 %v15335_v47 }
 0x383   : > { %6207 = vmatprep.mubr.bf16.mxu0 %v17537_v12 }
 0x38a   : > { %6208 = vmatmul.mubr.bf16.vlgmr.msra.gmra.mrb[32].mxu0 %v11014_v53 }
 0x3ac   : > { %v6217_v7 = vpop.f32.mrb[16].mxu1 }
 0x3ad   : > { %v6219_v56 = vpop.f32.mrb[17].mxu1 }
 0x3ae   : > { %v6221_v28 = vpop.f32.mrb[18].mxu1 }
 0x3af   : > { %v6223_v49 = vpop.f32.mrb[19].mxu1 }
 0x3b4   : > { %v15589_v50 = vpop.f32.mrb[20].mxu1 }
 0x3b5   : > { %v15591_v43 = vpop.f32.mrb[21].mxu1 }
 0x3b6   : > { %v15593_v55 = vpop.f32.mrb[22].mxu1 }
 0x3b7   : > { %v15595_v23 = vpop.f32.mrb[23].mxu1 }
 0x3bc   : > { %v15597_v34 = vpop.f32.mrb[24].mxu1 }
 0x3bd   : > { %v15599_v47 = vpop.f32.mrb[25].mxu1 }
 0x3be   : > { %v15601_v33 = vpop.f32.mrb[26].mxu1 }
 0x3bf   : > { %v15603_v30 = vpop.f32.mrb[27].mxu1 }
 0x3c4   : > { %v15605_v29 = vpop.f32.mrb[28].mxu1 }
 0x3c5   : > { %v15607_v53 = vpop.f32.mrb[29].mxu1 }
 0x3c6   : > { %v15609_v52 = vpop.f32.mrb[30].mxu1 }
 0x3c7   : > { %v15611_v10 = vpop.f32.mrb[31].mxu1 }
 0x3cc   : > { %v15613_v48 = vpop.f32.mrb[32].mxu1 }
 0x3cd   : > { %v15615_v57 = vpop.f32.mrb[33].mxu1 }
 0x3ce   : > { %v15617_v19 = vpop.f32.mrb[34].mxu1 }
 0x3cf   : > { %v15619_v35 = vpop.f32.mrb[35].mxu1 }
 0x3d4   : > { %v15621_v54 = vpop.f32.mrb[36].mxu1 }
 0x3d5   : > { %v15623_v2 = vpop.f32.mrb[37].mxu1 }
 0x3d6   : > { %v15625_v39 = vpop.f32.mrb[38].mxu1 }
 0x3d7   : > { %v15627_v26 = vpop.f32.mrb[39].mxu1 }
 0x3dc   : > { %v15629_v63 = vpop.f32.mrb[40].mxu1 }
 0x3dd   : > { %v15631_v11 = vpop.f32.mrb[41].mxu1 }
 0x3de   : > { %v15633_v61 = vpop.f32.mrb[42].mxu1 }
 0x3df   : > { %v15635_v4 = vpop.f32.mrb[43].mxu1 }
 0x3e5   : > { %v15637_v46 = vpop.f32.mrb[44].mxu1 }
 0x3e6   : > { %v15639_v59 = vpop.f32.mrb[45].mxu1 }
 0x3e7   : > { %v15641_v5 = vpop.f32.mrb[46].mxu1 }
 0x3e8   : > { %v15643_v27 = vpop.f32.mrb[47].mxu1 }
 0x3ed   : > { %v6297_v22 = vpop.f32.mrb[48].mxu1 }
 0x3ee   : > { %v15645_v8 = vpop.f32.mrb[49].mxu1 }
 0x3ef   : > { %v6300_v25 = vpop.f32.mrb[50].mxu1 }
 0x3f0   : > { %v15647_v6 = vpop.f32.mrb[51].mxu1 }
 0x415   : > { %v6088_v58 = vpop.f32.mrb[36].mxu0 }
 0x416   : > { %v12142_v22 = vadd.f32 %v6088_v58, %v15652_v24  ;;  %v6090_v42 = vpop.f32.mrb[37].mxu0 }
 0x417   : > { %v12144_v25 = vadd.f32 %v6090_v42, %v15654_v62  ;;  %v6092_v12 = vpop.f32.mrb[38].mxu0 }
 0x418   : > { %v12146_v18 = vadd.f32 %v6092_v12, %v15652_v24  ;;  %v15659_v1 = vadd.f32 %v12142_v22, %v6217_v7  ;;  %v6094_v40 = vpop.f32.mrb[39].mxu0 }
 0x419   : > { %v12148_v37 = vadd.f32 %v6094_v40, %v15654_v62  ;;  %v12145_v0 = vadd.f32 %v12144_v25, %v6219_v56 }
 0x41a   : > { %v15663_v13 = vadd.f32 %v12146_v18, %v6221_v28 }
 0x41b   : > { %v6307_v32 = vmax.f32 %v12145_v0, 0.0  ;;  %v12149_v31 = vadd.f32 %v12148_v37, %v6223_v49 }
 0x41d   : > { %v11502_v36 = vpack.c.bf16 %v6307_v32, %v6307_v32  ;;  %v6309_v3 = vmax.f32 %v12149_v31, 0.0  ;;  %v6098_v42 = vpop.f32.mrb[40].mxu0  ;;  %v6615_v31 = vld [vmem:[#allocation4 + $0xc] sm:$0xf] }
 0x41e   : > { %v12150_v12 = vadd.f32 %v6098_v42, %v15652_v24  ;;  %v6100_v7 = vpop.f32.mrb[41].mxu0 }
 0x41f   : > { %v6421_v22 = vshrl.u32 %v11502_v36, 16  ;;  %v11503_v44 = vpack.c.bf16 %v6309_v3, %v6309_v3  ;;  %v12152_v40 = vadd.f32 %v6100_v7, %v15654_v62  ;;  %v6102_v56 = vpop.f32.mrb[42].mxu0  ;;  %v6424_v49 = vshll.u32 %v11502_v36, 16 }
 0x420   : > { %v12154_v0 = vadd.f32 %v6102_v56, %v15652_v24  ;;  %v15670_v37 = vadd.f32 %v12150_v12, %v15589_v50  ;;  %v6104_v18 = vpop.f32.mrb[43].mxu0 }
 0x421   : > { %v6423_v28 = vrot.slane %v6421_v22, 7  ;;  %v6429_v25 = vshrl.u32 %v11503_v44, 16  ;;  %v12156_v32 = vadd.f32 %v6104_v18, %v15654_v62  ;;  %v12153_v7 = vadd.f32 %v12152_v40, %v15591_v43  ;;  %v6619_v43 = vld [vmem:[#allocation4 + $0x14] sm:$0x1] }
 0x422   : > { %v15682_v50 = vadd.f32 %v12154_v0, %v15593_v55  ;;  %v6432_v56 = vshll.u32 %v11503_v44, 16 }
 0x423   : > { %v6426_v12 = vor.u32 %v6424_v49, %v6423_v28  ;;  %v6431_v22 = vrot.slane %v6429_v25, 7  ;;  %v12157_v18 = vadd.f32 %v12156_v32, %v15595_v23  ;;  %v6427_v58 = vrot.slane %v6423_v28, 4 }
 0x424   : > { %v6311_v55 = vmax.f32 %v12153_v7, 0.0 }
 0x425   : > { %v6616_v0 = vsel %vm15675_vm3, %v6426_v12, %v6615_v31  ;;  %v6434_v49 = vor.u32 %v6432_v56, %v6431_v22  ;;  %v6436_v14 = vrot.slane %v6431_v22, 4  ;;  %v6313_v25 = vmax.f32 %v12157_v18, 0.0  ;;  %v6108_v44 = vpop.f32.mrb[44].mxu0 }
 0x426   : > { %6617 = vst [vmem:[#allocation4 + $0xc] sm:$0xf] %v6616_v0  ;;  %v11504_v23 = vpack.c.bf16 %v6311_v55, %v6311_v55  ;;  %v12158_v28 = vadd.f32 %v6108_v44, %v15652_v24  ;;  %v6110_v32 = vpop.f32.mrb[45].mxu0 }
 0x427   : > { %v6435_v41 = vsel %vm15686_vm4, %v6427_v58, %v6434_v49  ;;  %v6620_v7 = vsel %vm15693_vm5, %v6436_v14, %v6619_v43  ;;  %v11505_v60 = vpack.c.bf16 %v6313_v25, %v6313_v25  ;;  %v12160_v40 = vadd.f32 %v6110_v32, %v15654_v62  ;;  %v6112_v15 = vpop.f32.mrb[46].mxu0 }
 0x428   : > { %6618 = vst [vmem:[#allocation4 + $0x10] sm:$0xf] %v6435_v41  ;;  %6621 = vst [vmem:[#allocation4 + $0x14] sm:$0x1] %v6620_v7  ;;  %v6438_v31 = vshrl.u32 %v11504_v23, 16  ;;  %v12162_v12 = vadd.f32 %v6112_v15, %v15652_v24  ;;  %v15708_v22 = vadd.f32 %v12158_v28, %v15597_v34  ;;  %v6114_v56 = vpop.f32.mrb[47].mxu0 }
 0x429   : > { %v6446_v18 = vshrl.u32 %v11505_v60, 16  ;;  %v12164_v55 = vadd.f32 %v6114_v56, %v15654_v62  ;;  %v12161_v58 = vadd.f32 %v12160_v40, %v15599_v47  ;;  %v6441_v14 = vshll.u32 %v11504_v23, 16  ;;  %v6622_v41 = vld [vmem:[#allocation4 + $0x18] sm:$0xf]  ;;  %v6626_v7 = vld [vmem:[#allocation4 + $0x20] sm:$0x1] }
 0x42a   : > { %v6440_v0 = vrot.slane %v6438_v31, 7  ;;  %v15714_v49 = vadd.f32 %v12162_v12, %v15601_v33  ;;  %v6449_v44 = vshll.u32 %v11505_v60, 16 }
 0x42b   : > { %v6448_v25 = vrot.slane %v6446_v18, 7  ;;  %v6315_v15 = vmax.f32 %v12161_v58, 0.0  ;;  %v12165_v34 = vadd.f32 %v12164_v55, %v15603_v30 }
 0x42c   : > { %v6443_v28 = vor.u32 %v6441_v14, %v6440_v0  ;;  %v6444_v32 = vrot.slane %v6440_v0, 4 }
 0x42d   : > { %v6451_v17 = vor.u32 %v6449_v44, %v6448_v25  ;;  %v6453_v47 = vrot.slane %v6448_v25, 4  ;;  %v11506_v40 = vpack.c.bf16 %v6315_v15, %v6315_v15  ;;  %v6317_v23 = vmax.f32 %v12165_v34, 0.0  ;;  %v6118_v31 = vpop.f32.mrb[48].mxu0 }
 0x42e   : > { %v6623_v33 = vsel %vm15675_vm3, %v6443_v28, %v6622_v41  ;;  %v12166_v12 = vadd.f32 %v6118_v31, %v15652_v24  ;;  %v6120_v18 = vpop.f32.mrb[49].mxu0  ;;  %v6629_v28 = vld [vmem:[#allocation4 + $0x24] sm:$0xf] }
 0x42f   : > { %6624 = vst [vmem:[#allocation4 + $0x18] sm:$0xf] %v6623_v33  ;;  %v6452_v60 = vsel %vm15686_vm4, %v6444_v32, %v6451_v17  ;;  %v6627_v30 = vsel %vm15693_vm5, %v6453_v47, %v6626_v7  ;;  %v6455_v55 = vshrl.u32 %v11506_v40, 16  ;;  %v6122_v58 = vpop.f32.mrb[50].mxu0  ;;  %v11507_v0 = vpack.c.bf16 %v6317_v23, %v6317_v23 }
 0x430   : > { %6625 = vst [vmem:[#allocation4 + $0x1c] sm:$0xf] %v6452_v60  ;;  %6628 = vst [vmem:[#allocation4 + $0x20] sm:$0x1] %v6627_v30  ;;  %v12168_v14 = vadd.f32 %v6120_v18, %v15654_v62  ;;  %v12170_v25 = vadd.f32 %v6122_v58, %v15652_v24  ;;  %v15728_v41 = vadd.f32 %v12166_v12, %v15605_v29  ;;  %v6124_v44 = vpop.f32.mrb[51].mxu0  ;;  %v6458_v34 = vshll.u32 %v11506_v40, 16 }
 0x431   : > { %v6457_v15 = vrot.slane %v6455_v55, 7  ;;  %v12172_v17 = vadd.f32 %v6124_v44, %v15654_v62  ;;  %v6463_v32 = vshrl.u32 %v11507_v0, 16  ;;  %v6466_v29 = vshll.u32 %v11507_v0, 16  ;;  %v6633_v30 = vld [vmem:[#allocation4 + $0x2c] sm:$0x1] }
 0x432   : > { %v12169_v47 = vadd.f32 %v12168_v14, %v15607_v53  ;;  %v15734_v23 = vadd.f32 %v12170_v25, %v15609_v52 }
 0x433   : > { %v6460_v31 = vor.u32 %v6458_v34, %v6457_v15  ;;  %v12173_v33 = vadd.f32 %v12172_v17, %v15611_v10  ;;  %v6465_v18 = vrot.slane %v6463_v32, 7  ;;  %v6461_v60 = vrot.slane %v6457_v15, 4 }
 0x434   : > { %v6319_v12 = vmax.f32 %v12169_v47, 0.0 }
 0x435   : > { %v6630_v40 = vsel %vm15675_vm3, %v6460_v31, %v6629_v28  ;;  %v6321_v58 = vmax.f32 %v12173_v33, 0.0  ;;  %v6128_v44 = vpop.f32.mrb[52].mxu0  ;;  %v6468_v53 = vor.u32 %v6466_v29, %v6465_v18  ;;  %v6470_v14 = vrot.slane %v6465_v18, 4 }
 0x436   : > { %6631 = vst [vmem:[#allocation4 + $0x24] sm:$0xf] %v6630_v40  ;;  %v11508_v34 = vpack.c.bf16 %v6319_v12, %v6319_v12  ;;  %v12174_v52 = vadd.f32 %v6128_v44, %v15652_v24  ;;  %v6130_v25 = vpop.f32.mrb[53].mxu0 }
 0x437   : > { %v11509_v10 = vpack.c.bf16 %v6321_v58, %v6321_v58  ;;  %v12176_v0 = vadd.f32 %v6130_v25, %v15654_v62  ;;  %v6132_v17 = vpop.f32.mrb[54].mxu0  ;;  %v6469_v15 = vsel %vm15686_vm4, %v6461_v60, %v6468_v53  ;;  %v6634_v28 = vsel %vm15693_vm5, %v6470_v14, %v6633_v30  ;;  %v6636_v60 = vld [vmem:[#allocation4 + $0x30] sm:$0xf] }
 0x438   : > { %v6472_v32 = vshrl.u32 %v11508_v34, 16  ;;  %v6134_v47 = vpop.f32.mrb[55].mxu0  ;;  %6632 = vst [vmem:[#allocation4 + $0x28] sm:$0xf] %v6469_v15  ;;  %6635 = vst [vmem:[#allocation4 + $0x2c] sm:$0x1] %v6634_v28  ;;  %v12178_v33 = vadd.f32 %v6132_v17, %v15652_v24  ;;  %v15748_v18 = vadd.f32 %v12174_v52, %v15613_v48 }
 0x439   : > { %v6480_v31 = vshrl.u32 %v11509_v10, 16  ;;  %v6475_v12 = vshll.u32 %v11508_v34, 16  ;;  %v12180_v40 = vadd.f32 %v6134_v47, %v15654_v62  ;;  %v12177_v58 = vadd.f32 %v12176_v0, %v15615_v57  ;;  %v6640_v15 = vld [vmem:[#allocation4 + $0x38] sm:$0x1] }
 0x43a   : > { %v6474_v29 = vrot.slane %v6472_v32, 7  ;;  %v6483_v53 = vshll.u32 %v11509_v10, 16  ;;  %v15754_v14 = vadd.f32 %v12178_v33, %v15617_v19 }
 0x43b   : > { %v6482_v44 = vrot.slane %v6480_v31, 7  ;;  %v6323_v17 = vmax.f32 %v12177_v58, 0.0  ;;  %v12181_v48 = vadd.f32 %v12180_v40, %v15619_v35 }
 0x43c   : > { %v6477_v25 = vor.u32 %v6475_v12, %v6474_v29  ;;  %v6478_v52 = vrot.slane %v6474_v29, 4 }
 0x43d   : > { %v6485_v28 = vor.u32 %v6483_v53, %v6482_v44  ;;  %v6487_v34 = vrot.slane %v6482_v44, 4  ;;  %v6138_v47 = vpop.f32.mrb[56].mxu0  ;;  %v11510_v10 = vpack.c.bf16 %v6323_v17, %v6323_v17  ;;  %v6325_v0 = vmax.f32 %v12181_v48, 0.0 }
 0x43e   : > { %v6637_v57 = vsel %vm15675_vm3, %v6477_v25, %v6636_v60  ;;  %v12182_v31 = vadd.f32 %v6138_v47, %v15652_v24  ;;  %v6140_v19 = vpop.f32.mrb[57].mxu0 }
 0x43f   : > { %6638 = vst [vmem:[#allocation4 + $0x30] sm:$0xf] %v6637_v57  ;;  %v6486_v33 = vsel %vm15686_vm4, %v6478_v52, %v6485_v28  ;;  %v6641_v35 = vsel %vm15693_vm5, %v6487_v34, %v6640_v15  ;;  %v12184_v29 = vadd.f32 %v6140_v19, %v15654_v62  ;;  %v6142_v12 = vpop.f32.mrb[58].mxu0  ;;  %v6489_v40 = vshrl.u32 %v11510_v10, 16  ;;  %v6643_v34 = vld [vmem:[#allocation4 + $0x3c] sm:$0xf] }
 0x440   : > { %6639 = vst [vmem:[#allocation4 + $0x34] sm:$0xf] %v6486_v33  ;;  %6642 = vst [vmem:[#allocation4 + $0x38] sm:$0x1] %v6641_v35  ;;  %v11511_v58 = vpack.c.bf16 %v6325_v0, %v6325_v0  ;;  %v12186_v60 = vadd.f32 %v6142_v12, %v15652_v24  ;;  %v6144_v44 = vpop.f32.mrb[59].mxu0  ;;  %v15768_v53 = vadd.f32 %v12182_v31, %v15621_v54  ;;  %v6492_v52 = vshll.u32 %v11510_v10, 16 }
 0x441   : > { %v12188_v25 = vadd.f32 %v6144_v44, %v15654_v62  ;;  %v12185_v17 = vadd.f32 %v12184_v29, %v15623_v2  ;;  %v6491_v48 = vrot.slane %v6489_v40, 7  ;;  %v6647_v12 = vld [vmem:[#allocation4 + $0x44] sm:$0x1] }
 0x442   : > { %v6497_v15 = vshrl.u32 %v11511_v58, 16  ;;  %v15773_v28 = vadd.f32 %v12186_v60, %v15625_v39  ;;  %v6500_v54 = vshll.u32 %v11511_v58, 16 }
 0x443   : > { %v6327_v57 = vmax.f32 %v12185_v17, 0.0  ;;  %v12189_v0 = vadd.f32 %v12188_v25, %v15627_v26  ;;  %v6494_v19 = vor.u32 %v6492_v52, %v6491_v48  ;;  %v6495_v35 = vrot.slane %v6491_v48, 4 }
 0x444   : > { %17600 = vst [vmem:[#allocation30_spill] sm:$0xff] %v15773_v28  ;;  %v6499_v33 = vrot.slane %v6497_v15, 7 }
 0x445   : > { %v11512_v2 = vpack.c.bf16 %v6327_v57, %v6327_v57  ;;  %v6329_v29 = vmax.f32 %v12189_v0, 0.0  ;;  %v6148_v10 = vpop.f32.mrb[60].mxu0  ;;  %v6644_v39 = vsel %vm15675_vm3, %v6494_v19, %v6643_v34 }
 0x446   : > { %v6502_v40 = vor.u32 %v6500_v54, %v6499_v33  ;;  %v6504_v60 = vrot.slane %v6499_v33, 4  ;;  %v12190_v44 = vadd.f32 %v6148_v10, %v15652_v24  ;;  %v6150_v17 = vpop.f32.mrb[61].mxu0  ;;  %6645 = vst [vmem:[#allocation4 + $0x3c] sm:$0xf] %v6644_v39  ;;  %v6650_v10 = vld [vmem:[#allocation4 + $0x48] sm:$0xf] }
 0x447   : > { %v6506_v26 = vshrl.u32 %v11512_v2, 16  ;;  %v11513_v25 = vpack.c.bf16 %v6329_v29, %v6329_v29  ;;  %v12192_v58 = vadd.f32 %v6150_v17, %v15654_v62  ;;  %v6152_v52 = vpop.f32.mrb[62].mxu0  ;;  %v6509_v33 = vshll.u32 %v11512_v2, 16 }
 0x448   : > { %v6503_v48 = vsel %vm15686_vm4, %v6495_v35, %v6502_v40  ;;  %v6648_v15 = vsel %vm15693_vm5, %v6504_v60, %v6647_v12  ;;  %v12194_v57 = vadd.f32 %v6152_v52, %v15652_v24  ;;  %v15788_v34 = vadd.f32 %v12190_v44, %v15629_v63  ;;  %v6154_v0 = vpop.f32.mrb[63].mxu0  ;;  %v6654_v52 = vld [vmem:[#allocation4 + $0x50] sm:$0x1] }
 0x449   : > { %6646 = vst [vmem:[#allocation4 + $0x40] sm:$0xf] %v6503_v48  ;;  %6649 = vst [vmem:[#allocation4 + $0x44] sm:$0x1] %v6648_v15  ;;  %v6508_v19 = vrot.slane %v6506_v26, 7  ;;  %v6514_v54 = vshrl.u32 %v11513_v25, 16  ;;  %v12196_v29 = vadd.f32 %v6154_v0, %v15654_v62  ;;  %v12193_v35 = vadd.f32 %v12192_v58, %v15631_v11 }
 0x44a   : > { %17601 = vst [vmem:[#allocation31_spill] sm:$0xff] %v15788_v34  ;;  %v15794_v12 = vadd.f32 %v12194_v57, %v15633_v61  ;;  %v6517_v63 = vshll.u32 %v11513_v25, 16 }
 0x44b   : > { %v6511_v40 = vor.u32 %v6509_v33, %v6508_v19  ;;  %v6516_v60 = vrot.slane %v6514_v54, 7  ;;  %v12197_v44 = vadd.f32 %v12196_v29, %v15635_v4  ;;  %v6512_v17 = vrot.slane %v6508_v19, 4 }
 0x44c   : > { %17602 = vst [vmem:[#allocation32_spill] sm:$0xff] %v15794_v12  ;;  %v6331_v26 = vmax.f32 %v12193_v35, 0.0 }
 0x44d   : > { %v6651_v48 = vsel %vm15675_vm3, %v6511_v40, %v6650_v10  ;;  %v6519_v15 = vor.u32 %v6517_v63, %v6516_v60  ;;  %v6521_v0 = vrot.slane %v6516_v60, 4  ;;  %v6333_v39 = vmax.f32 %v12197_v44, 0.0  ;;  %v6158_v11 = vpop.f32.mrb[64].mxu0 }
 0x44e   : > { %6652 = vst [vmem:[#allocation4 + $0x48] sm:$0xf] %v6651_v48  ;;  %v11514_v61 = vpack.c.bf16 %v6331_v26, %v6331_v26  ;;  %v12198_v58 = vadd.f32 %v6158_v11, %v15652_v24  ;;  %v6160_v57 = vpop.f32.mrb[65].mxu0  ;;  %v6657_v48 = vld [vmem:[#allocation4 + $0x54] sm:$0xf] }
 0x44f   : > { %v6520_v4 = vsel %vm15686_vm4, %v6512_v17, %v6519_v15  ;;  %v6655_v25 = vsel %vm15693_vm5, %v6521_v0, %v6654_v52  ;;  %v11515_v19 = vpack.c.bf16 %v6333_v39, %v6333_v39  ;;  %v12200_v33 = vadd.f32 %v6160_v57, %v15654_v62  ;;  %v6162_v54 = vpop.f32.mrb[66].mxu0  ;;  %v6661_v57 = vld [vmem:[#allocation4 + $0x5c] sm:$0x1] }
 0x450   : > { %6653 = vst [vmem:[#allocation4 + $0x4c] sm:$0xf] %v6520_v4  ;;  %6656 = vst [vmem:[#allocation4 + $0x50] sm:$0x1] %v6655_v25  ;;  %v6523_v29 = vshrl.u32 %v11514_v61, 16  ;;  %v12202_v10 = vadd.f32 %v6162_v54, %v15652_v24  ;;  %v15808_v35 = vadd.f32 %v12198_v58, %v15637_v46  ;;  %v6164_v40 = vpop.f32.mrb[67].mxu0 }
 0x451   : > { %v6531_v60 = vshrl.u32 %v11515_v19, 16  ;;  %v12204_v63 = vadd.f32 %v6164_v40, %v15654_v62  ;;  %v12201_v44 = vadd.f32 %v12200_v33, %v15639_v59  ;;  %v6526_v52 = vshll.u32 %v11514_v61, 16 }
 0x452   : > { %17603 = vst [vmem:[#allocation33_spill] sm:$0xff] %v15808_v35  ;;  %v6525_v17 = vrot.slane %v6523_v29, 7  ;;  %v15814_v26 = vadd.f32 %v12202_v10, %v15641_v5  ;;  %v6534_v0 = vshll.u32 %v11515_v19, 16 }
 0x453   : > { %v6533_v15 = vrot.slane %v6531_v60, 7  ;;  %v6335_v24 = vmax.f32 %v12201_v44, 0.0  ;;  %v12205_v46 = vadd.f32 %v12204_v63, %v15643_v27 }
 0x454   : > { %17604 = vst [vmem:[#allocation34_spill] sm:$0xff] %v15814_v26  ;;  %v6528_v11 = vor.u32 %v6526_v52, %v6525_v17  ;;  %v6529_v58 = vrot.slane %v6525_v17, 4 }
 0x455   : > { %v6536_v25 = vor.u32 %v6534_v0, %v6533_v15  ;;  %v6538_v59 = vrot.slane %v6533_v15, 4  ;;  %v11516_v33 = vpack.c.bf16 %v6335_v24, %v6335_v24  ;;  %v6337_v61 = vmax.f32 %v12205_v46, 0.0  ;;  %v6168_v54 = vpop.f32.mrb[68].mxu0  ;;  %v6664_v15 = vld [vmem:[#allocation4 + $0x60] sm:$0xf] }
 0x456   : > { %v6658_v5 = vsel %vm15675_vm3, %v6528_v11, %v6657_v48  ;;  %v6169_v29 = vpop.f32.mrb[69].mxu0 }
 0x457   : > { %6659 = vst [vmem:[#allocation4 + $0x54] sm:$0xf] %v6658_v5  ;;  %v6537_v19 = vsel %vm15686_vm4, %v6529_v58, %v6536_v25  ;;  %v6662_v27 = vsel %vm15693_vm5, %v6538_v59, %v6661_v57  ;;  %v6540_v10 = vshrl.u32 %v11516_v33, 16  ;;  %v6171_v40 = vpop.f32.mrb[70].mxu0  ;;  %v11517_v60 = vpack.c.bf16 %v6337_v61, %v6337_v61  ;;  %v6668_v61 = vld [vmem:[#allocation4 + $0x68] sm:$0x1] }
 0x458   : > { %6660 = vst [vmem:[#allocation4 + $0x58] sm:$0xf] %v6537_v19  ;;  %6663 = vst [vmem:[#allocation4 + $0x5c] sm:$0x1] %v6662_v27  ;;  %v12206_v63 = vadd.f32 %v6169_v29, %v15654_v62  ;;  %v6172_v44 = vpop.f32.mrb[71].mxu0  ;;  %v6543_v52 = vshll.u32 %v11516_v33, 16 }
 0x459   : > { %v6542_v17 = vrot.slane %v6540_v10, 7  ;;  %v12208_v48 = vadd.f32 %v6172_v44, %v15654_v62  ;;  %v6548_v0 = vshrl.u32 %v11517_v60, 16  ;;  %v6551_v57 = vshll.u32 %v11517_v60, 16 }
 0x45a   : > { %v12207_v24 = vadd.f32 %v12206_v63, %v15645_v8 }
 0x45b   : > { %v6545_v46 = vor.u32 %v6543_v52, %v6542_v17  ;;  %v12209_v11 = vadd.f32 %v12208_v48, %v15647_v6  ;;  %v6550_v58 = vrot.slane %v6548_v0, 7  ;;  %v6546_v29 = vrot.slane %v6542_v17, 4 }
 0x45c   : > { %v6338_v25 = vmax.f32 %v12207_v24, 0.0 }
 0x45d   : > { %v6665_v59 = vsel %vm15675_vm3, %v6545_v46, %v6664_v15  ;;  %v6339_v54 = vmax.f32 %v12209_v11, 0.0  ;;  %v6209_v5 = vpop.f32.mrb[32].mxu0  ;;  %v6553_v33 = vor.u32 %v6551_v57, %v6550_v58  ;;  %v6555_v19 = vrot.slane %v6550_v58, 4  ;;  %v6671_v46 = vld [vmem:[#allocation4 + $0x6c] sm:$0xf] }
 0x45e   : > { %6666 = vst [vmem:[#allocation4 + $0x60] sm:$0xf] %v6665_v59  ;;  %v11518_v27 = vpack.c.bf16 %v6338_v25, %v6338_v25  ;;  %v6210_v10 = vpop.f32.mrb[33].mxu0 }
 0x45f   : > { %v11519_v40 = vpack.c.bf16 %v6339_v54, %v6339_v54  ;;  %v12140_v8 = vadd.f32 %v6210_v10, %v15654_v62  ;;  %v6212_v63 = vpop.f32.mrb[34].mxu0  ;;  %v6554_v6 = vsel %vm15686_vm4, %v6546_v29, %v6553_v33  ;;  %v6669_v60 = vsel %vm15693_vm5, %v6555_v19, %v6668_v61  ;;  %v6675_v54 = vld [vmem:[#allocation4 + $0x74] sm:$0x1] }
 0x460   : > { %v6557_v44 = vshrl.u32 %v11518_v27, 16  ;;  %v6213_v52 = vpop.f32.mrb[35].mxu0  ;;  %6667 = vst [vmem:[#allocation4 + $0x64] sm:$0xf] %v6554_v6  ;;  %6670 = vst [vmem:[#allocation4 + $0x68] sm:$0x1] %v6669_v60 }
 0x461   : > { %v6565_v17 = vshrl.u32 %v11519_v40, 16  ;;  %v6304_v48 = vmax.f32 %v12140_v8, 0.0  ;;  %v12141_v15 = vadd.f32 %v6213_v52, %v15654_v62  ;;  %v6560_v24 = vshll.u32 %v11518_v27, 16  ;;  %v6606_v63 = vld [vmem:[#allocation4] sm:$0xf] }
 0x462   : > { %v6559_v0 = vrot.slane %v6557_v44, 7  ;;  %v6568_v58 = vshll.u32 %v11519_v40, 16 }
 0x463   : > { %v6567_v11 = vrot.slane %v6565_v17, 7  ;;  %v11500_v57 = vpack.c.bf16 %v6304_v48, %v6304_v48  ;;  %v6305_v25 = vmax.f32 %v12141_v15, 0.0  ;;  %v6612_v48 = vld [vmem:[#allocation4 + $0x8] sm:$0x1] }
 0x464   : > { %v6562_v59 = vor.u32 %v6560_v24, %v6559_v0  ;;  %v6563_v5 = vrot.slane %v6559_v0, 4 }
 0x465   : > { %v6570_v29 = vor.u32 %v6568_v58, %v6567_v11  ;;  %v6572_v61 = vrot.slane %v6567_v11, 4  ;;  %v6404_v33 = vshrl.u32 %v11500_v57, 16  ;;  %v11501_v10 = vpack.c.bf16 %v6305_v25, %v6305_v25 }
 0x466   : > { %v6672_v19 = vsel %vm15675_vm3, %v6562_v59, %v6671_v46  ;;  %v6407_v8 = vshll.u32 %v11500_v57, 16  ;;  %v13003_v58 = vmov (!%p10598_p0), 0  }
 0x467   : > { %6673 = vst [vmem:[#allocation4 + $0x6c] sm:$0xf] %v6672_v19  ;;  %v6571_v62 = vsel %vm15686_vm4, %v6563_v5, %v6570_v29  ;;  %v6676_v27 = vsel %vm15693_vm5, %v6572_v61, %v6675_v54  ;;  %v6406_v40 = vrot.slane %v6404_v33, 7  ;;  %v6412_v6 = vshrl.u32 %v11501_v10, 16 }
 0x468   : > { %6674 = vst [vmem:[#allocation4 + $0x70] sm:$0xf] %v6571_v62  ;;  %6677 = vst [vmem:[#allocation4 + $0x74] sm:$0x1] %v6676_v27  ;;  %v6415_v52 = vshll.u32 %v11501_v10, 16  ;;  %6680 = sbr.rel (%p10598_p0) target bundleno = 1136 (0x470), region = 60 }
 0x469   : > { %v6409_v60 = vor.u32 %v6407_v8, %v6406_v40  ;;  %v6414_v44 = vrot.slane %v6412_v6, 7  ;;  %v6410_v15 = vrot.slane %v6406_v40, 4 }
 0x46b   : > { %v6607_v17 = vsel %vm15675_vm3, %v6409_v60, %v6606_v63  ;;  %v6417_v0 = vor.u32 %v6415_v52, %v6414_v44  ;;  %v6419_v24 = vrot.slane %v6414_v44, 4 }
 0x46c   : > { %6608 = vst [vmem:[#allocation4] sm:$0xf] %v6607_v17 }
 0x46d   : > { %v6418_v46 = vsel %vm15686_vm4, %v6410_v15, %v6417_v0  ;;  %v6613_v11 = vsel %vm15693_vm5, %v6419_v24, %v6612_v48  ;;  %6681 = vst [vmem:[#allocation4] sm:$0xf] (!%p10598_p0), %v13003_v58 }
 0x46e   : > { %6609 = vst [vmem:[#allocation4 + $0x4] sm:$0xf] %v6418_v46  ;;  %6614 = vst [vmem:[#allocation4 + $0x8] sm:$0x1] %v6613_v11 }
 0x46f   : > { %6682 = vst [vmem:[#allocation4 + $0x4] sm:$0xf] %v13003_v58  ;;  %6683 = vst [vmem:[#allocation4 + $0x8] sm:$0x1] %v13003_v58 }
 0x470 PF: > { %p11189_p1 = scmp.ne.s32.totalorder %s12983_s30, 1 }
 0x471   : > { %v13004_v3 = vmov (!%p11189_p1), 0  }
 0x472   : > { %6687 = sbr.rel (%p11189_p1) target bundleno = 1145 (0x479), region = 64  ;;  %6689 = vst [vmem:[#allocation4 + $0x6c] sm:$0xf] (!%p11189_p1), %v13004_v3  ;;  %6690 = vst [vmem:[#allocation4 + $0x70] sm:$0xf] (!%p11189_p1), %v13004_v3 }
 0x473   : > { %6691 = vst [vmem:[#allocation4 + $0x74] sm:$0x1] (!%p11189_p1), %v13004_v3 }
 0x479 PF: > { %v12809_v42 = vld [vmem:[%s17528_s5 + $0x40] sm:$0xff]   ;;  %v17605_v36 = vmov 0   ;;  %v12811_v25 = vld [vmem:[%s17528_s5 + $0x48] sm:$0xff]   ;;  %v12813_v54 = vld [vmem:[%s17528_s5 + $0x50] sm:$0xff]   ;;  %s13005_s25 = smov 96   ;;  %s16604_s21 = scalar_lea.vmem [#allocation3], %s11499_s24 }
 0x47a   : > { %12807 = vset.pattern.permute.xlu0 %v17605_v36  ;;  %12808 = vset.pattern.permute.xlu1 %v17605_v36  ;;  %v12810_v57 = vld [vmem:[%s17528_s5] sm:$0xff]   ;;  %v12812_v59 = vld [vmem:[%s17528_s5 + $0x8] sm:$0xff]   ;;  %v12814_v5 = vld [vmem:[%s17528_s5 + $0x10] sm:$0xff]   ;;  %vm9356_vm6 = vcmask 1046528   ;;  %vm9453_vm7 = vcmask 1045504   ;;  %s13006_s24 = smov 32  }
 0x47b   : > { %11660 = vmatprep.subr.bf16.mxu1 %v12809_v42  ;;  %v12815_v29 = vld [vmem:[%s17528_s5 + $0x58] sm:$0xff]   ;;  %v12817_v33 = vld [vmem:[%s17528_s5 + $0x60] sm:$0xff]   ;;  %v12819_v10 = vld [vmem:[%s17528_s5 + $0x68] sm:$0xff]   ;;  %vm10362_vm8 = vcmask 785408   ;;  %s13007_s26 = smov 64   ;;  %vm10379_vm9 = vcmask 523264  }
 0x47c   : > { %11661 = vmatpush3.bf16.msra.mxu1 %v12810_v57  ;;  %v12816_v61 = vld [vmem:[%s17528_s5 + $0x18] sm:$0xff]   ;;  %v12818_v19 = vld [vmem:[%s17528_s5 + $0x20] sm:$0xff]   ;;  %v6764_v62 = vld [vmem:[#allocation4] sm:$0xf]  ;;  %s12336_s20 = smul.u32 48, %s12983_s30  ;;  %s10478_s13 = sshll.u32 %s13143_s10, 4  ;;  %s17464_s13 = int_to_ptr.vmem [resolvable:$true] %s10478_s13 }
 0x47d   : > { %11662 = vmatprep.subr.bf16.mxu1 %v12811_v25  ;;  %v6765_v27 = vld [vmem:[#allocation4 + $0x4] sm:$0xf]  ;;  %v6766_v40 = vld [vmem:[#allocation4 + $0x8] sm:$0x1]  ;;  %v6789_v63 = vshrl.u32 %v6764_v62, 16  ;;  %v6792_v6 = vshll.u32 %v6764_v62, 16 }
 0x47e   : > { %v12820_v8 = vld [vmem:[%s17528_s5 + $0x28] sm:$0xff]   ;;  %v6798_v60 = vshll.u32 %v6765_v27, 16  ;;  %v6802_v44 = vshrl.u32 %v6765_v27, 16  ;;  %v6808_v52 = vshll.u32 %v6766_v40, 16  ;;  %v12821_v46 = vld [vmem:[%s17528_s5 + $0x70] sm:$0xff]   ;;  %v12823_v25 = vld [vmem:[%s17528_s5 + $0x78] sm:$0xff]  }
 0x47f   : > { %v15889_v17 = vld [vmem:[#allocation4] sm:$0xff]   ;;  %v6791_v48 = vrot.slane %v6789_v63, 4  ;;  %v6794_v15 = vrot.slane %v6792_v6, 5  ;;  %v12822_v11 = vld [vmem:[%s17528_s5 + $0x30] sm:$0xff]   ;;  %v6768_v57 = vld [vmem:[#allocation4 + $0x10] sm:$0xf] }
 0x480   : > { %11663 = vmatpush3.bf16.msra.mxu1 %v12812_v59  ;;  %v6800_v0 = vrot.slane %v6798_v60, 5  ;;  %v6804_v24 = vrot.slane %v6802_v44, 4  ;;  %v6810_v42 = vrot.slane %v6808_v52, 5  ;;  %v6767_v36 = vld [vmem:[#allocation4 + $0xc] sm:$0xf]  ;;  %v12824_v60 = vld [vmem:[%s17528_s5 + $0x38] sm:$0xff]  }
 0x481   : > { %11664 = vmatprep.subr.bf16.mxu1 %v12813_v54  ;;  %v6795_v58 = vor.u32 %v6794_v15, %v6791_v48  ;;  %v6769_v59 = vld [vmem:[#allocation4 + $0x14] sm:$0x1]  ;;  %v6813_v54 = vshrl.u32 %v6767_v36, 16  ;;  %v15900_v62 = vld [vmem:[#allocation4 + $0xc] sm:$0xff]   ;;  %v12826_v48 = vld [vmem:[%s17528_s5 + $0xc0] sm:$0xff]   ;;  %s12337_s22 = smul.u32 96, %s12987_s9 }
 0x482   : > { %v6805_v3 = vor.u32 %v6804_v24, %v6800_v0  ;;  %v16061_v4 = vld [vmem:[#allocation4 + $0x48] sm:$0xff]   ;;  %v7035_v39 = vld [vmem:[#allocation4 + $0x3c] sm:$0xe]  ;;  %v7040_v32 = vld [vmem:[#allocation4 + $0x50] sm:$0x1] }
 0x483   : > { %v6815_v27 = vrot.slane %v6813_v54, 4  ;;  %v7038_v31 = vld [vmem:[#allocation4 + $0x48] sm:$0xe]  ;;  %v7039_v47 = vld [vmem:[#allocation4 + $0x4c] sm:$0xf]  ;;  %v7115_v30 = vrot.slane %v7040_v32, 5  ;;  %s10475_s30 = sadd.s32 %s12337_s22, %s12336_s20 }
 0x484   : > { %11665 = vmatpush3.bf16.msra.mxu1 %v12814_v5  ;;  %v6816_v5 = vshll.u32 %v6767_v36, 16  ;;  %v6772_v36 = vld [vmem:[#allocation4 + $0x20] sm:$0x1]  ;;  %v7041_v55 = vld [vmem:[#allocation4 + $0x54] sm:$0xe]  ;;  %s11430_s9 = sshll.u32 %s10475_s30, 7 }
 0x485   : > { %11666 = vmatprep.subr.bf16.mxu1 %v12815_v29  ;;  %v6822_v29 = vshll.u32 %v6768_v57, 16  ;;  %v7043_v32 = vld [vmem:[#allocation4 + $0x5c] sm:$0x1]  ;;  %v7493_v56 = vld [vmem:[#allocation4 + $0xc] sm:$0xe]  ;;  %v12875_v26 = vld [vmem:[%s17528_s5 + $0x1c8] sm:$0xff]   ;;  %s17462_s17 = scalar_lea.hbm %s17531_s8, %s11430_s9 }
 0x486   : > { %v6818_v40 = vrot.slane %v6816_v5, 5  ;;  %v7240_v38 = vld [vmem:[#allocation4 + $0x18] sm:$0xf]  ;;  %v7715_v20 = vld [vmem:[#allocation4 + $0x2c] sm:$0x1]  ;;  %v10051_v9 = vld [vmem:[%s13141_s11 + $0x48] sm:$0xff] }
 0x487   : > { %v6824_v63 = vrot.slane %v6822_v29, 5  ;;  %v6856_v29 = vshll.u32 %v6772_v36, 16  ;;  %v7980_v51 = vld [vmem:[#allocation4 + $0x50] sm:$0x1] }
 0x488   : > { %11667 = vmatpush3.bf16.msra.mxu1 %v12816_v61  ;;  %v6826_v61 = vshrl.u32 %v6768_v57, 16  ;;  %v6819_v15 = vor.u32 %v6818_v40, %v6815_v27 }
 0x489   : > { %11668 = vmatprep.subr.bf16.mxu1 %v12817_v33  ;;  %v6796_v33 = vrot.slane %v6795_v58, 4  ;;  %v6770_v58 = vld [vmem:[#allocation4 + $0x18] sm:$0xf] }
 0x48a   : > { %v6828_v6 = vrot.slane %v6826_v61, 4  ;;  %v6820_v57 = vrot.slane %v6819_v15, 4  ;;  %v6840_v54 = vshll.u32 %v6770_v58, 16  ;;  %v15912_v61 = vld [vmem:[#allocation4 + $0x18] sm:$0xff]   ;;  %v12830_v15 = vld [vmem:[%s17528_s5 + $0x88] sm:$0xff]  }
 0x48b   : > { %v6801_v44 = vsel %vm14367_vm10, %v6796_v33, %v6800_v0  ;;  %v6837_v0 = vshrl.u32 %v6770_v58, 16 }
 0x48c   : > { %11669 = vmatpush3.bf16.msra.mxu1 %v12818_v19  ;;  %v6806_v19 = vrot.slane %v6805_v3, 4  ;;  %v6829_v24 = vor.u32 %v6828_v6, %v6824_v63  ;;  %v6771_v3 = vld [vmem:[#allocation4 + $0x1c] sm:$0xf]  ;;  %v6825_v33 = vsel %vm14367_vm10, %v6820_v57, %v6824_v63  ;;  %v6858_v63 = vrot.slane %v6856_v29, 5 }
 0x48d   : > { %11670 = vmatprep.subr.bf16.mxu1 %v12819_v10  ;;  %v6832_v10 = vshll.u32 %v6769_v59, 16  ;;  %v6846_v5 = vshll.u32 %v6771_v3, 16 }
 0x48e   : > { %v6830_v59 = vrot.slane %v6829_v24, 4  ;;  %v6774_v24 = vld [vmem:[#allocation4 + $0x28] sm:$0xf] }
 0x48f   : > { %v6848_v40 = vrot.slane %v6846_v5, 5  ;;  %v6874_v57 = vshrl.u32 %v6774_v24, 16 }
 0x490   : > { %11671 = vmatpush3.bf16.msra.mxu1 %v12820_v8  ;;  %v6811_v8 = vsel %vm14367_vm10, %v6806_v19, %v6810_v42  ;;  %v6850_v42 = vshrl.u32 %v6771_v3, 16  ;;  %v6839_v19 = vrot.slane %v6837_v0, 4 }
 0x491   : > { %11672 = vmatprep.subr.bf16.mxu1 %v12821_v46  ;;  %v11198_v52 = vcombine.low %v6801_v44, %v6811_v8  ;;  %v6834_v46 = vrot.slane %v6832_v10, 5  ;;  %v6842_v10 = vrot.slane %v6840_v54, 5  ;;  %v12829_v44 = vld [vmem:[%s17528_s5 + $0xc8] sm:$0xff]  }
 0x492   : > { %v6852_v6 = vrot.slane %v6850_v42, 4  ;;  %v15928_v42 = vld [vmem:[#allocation4 + $0x24] sm:$0xff]  }
 0x493   : > { %8797 = vmatprep.mubr.bf16.mxu1 %v11198_v52  ;;  %v6843_v8 = vor.u32 %v6842_v10, %v6839_v19  ;;  %v6773_v52 = vld [vmem:[#allocation4 + $0x24] sm:$0xf]  ;;  %v12833_v10 = vld [vmem:[%s17528_s5 + $0x90] sm:$0xff]  }
 0x494   : > { %11673 = vmatpush3.bf16.msra.mxu1 %v12822_v11  ;;  %v6835_v11 = vsel %vm14367_vm10, %v6830_v59, %v6834_v46  ;;  %v6775_v46 = vld [vmem:[#allocation4 + $0x2c] sm:$0x1]  ;;  %v6861_v58 = vshrl.u32 %v6773_v52, 16  ;;  %v6864_v3 = vshll.u32 %v6773_v52, 16  ;;  %v6777_v52 = vld [vmem:[#allocation4 + $0x34] sm:$0xf] }
 0x495   : > { %11674 = vmatprep.subr.bf16.mxu1 %v12823_v25  ;;  %v12827_v25 = vld [vmem:[%s17528_s5 + $0x80] sm:$0xff]   ;;  %v11199_v27 = vcombine.low %v6825_v33, %v6835_v11  ;;  %v6844_v36 = vrot.slane %v6843_v8, 4  ;;  %v6880_v59 = vshll.u32 %v6775_v46, 16  ;;  %v12832_v33 = vld [vmem:[%s17528_s5 + $0xd0] sm:$0xff]   ;;  %v6876_v11 = vrot.slane %v6874_v57, 4  ;;  %v15943_v57 = vld [vmem:[#allocation4 + $0x30] sm:$0xff]  }
 0x496   : > { %v6863_v54 = vrot.slane %v6861_v58, 4  ;;  %v6866_v5 = vrot.slane %v6864_v3, 5  ;;  %v6776_v8 = vld [vmem:[#allocation4 + $0x30] sm:$0xf] }
 0x497   : > { %v6849_v29 = vsel %vm14367_vm10, %v6844_v36, %v6848_v40  ;;  %v6885_v46 = vshrl.u32 %v6776_v8, 16  ;;  %v6888_v58 = vshll.u32 %v6776_v8, 16  ;;  %v6898_v36 = vshrl.u32 %v6777_v52, 16  ;;  %v6780_v8 = vld [vmem:[#allocation4 + $0x40] sm:$0xf] }
 0x498   : > { %11675 = vmatpush3.bf16.msra.mxu1 %v12824_v60  ;;  %v6853_v60 = vor.u32 %v6852_v6, %v6848_v40  ;;  %v12835_v40 = vld [vmem:[%s17528_s5 + $0xd8] sm:$0xff]  }
 0x499   : > { %11724 = vmatprep.subr.bf16.mxu1 %v12826_v48  ;;  %v6870_v48 = vshll.u32 %v6774_v24, 16  ;;  %v6778_v24 = vld [vmem:[#allocation4 + $0x38] sm:$0x1] }
 0x49a   : > { %v6854_v0 = vrot.slane %v6853_v60, 4 }
 0x49b   : > { %8798 = vmatmul.mubr.bf16.vlgmr.msra.gmra.mrb[52].mxu1 %v15889_v17  ;;  %v6872_v17 = vrot.slane %v6870_v48, 5  ;;  %v6904_v48 = vshll.u32 %v6778_v24, 16 }
 0x49c   : > { %11725 = vmatpush3.bf16.msra.mxu1 %v12827_v25  ;;  %8805 = vmatprep.mubr.bf16.mxu1 %v11199_v27  ;;  %v6859_v19 = vsel %vm14367_vm10, %v6854_v0, %v6858_v63  ;;  %v6867_v25 = vor.u32 %v6866_v5, %v6863_v54  ;;  %v6894_v63 = vshll.u32 %v6777_v52, 16  ;;  %v6887_v0 = vrot.slane %v6885_v46, 4  ;;  %v6781_v52 = vld [vmem:[#allocation4 + $0x44] sm:$0x1] }
 0x49d   : > { %11726 = vmatprep.subr.bf16.mxu1 %v12829_v44  ;;  %v11200_v27 = vcombine.low %v6849_v29, %v6859_v19  ;;  %v6877_v6 = vor.u32 %v6876_v11, %v6872_v17  ;;  %v6882_v44 = vrot.slane %v6880_v59, 5  ;;  %v6890_v54 = vrot.slane %v6888_v58, 5  ;;  %v12836_v29 = vld [vmem:[%s17528_s5 + $0x98] sm:$0xff]  }
 0x49e   : > { %v6868_v60 = vrot.slane %v6867_v25, 4  ;;  %v6896_v5 = vrot.slane %v6894_v63, 5  ;;  %v6906_v25 = vrot.slane %v6904_v48, 5  ;;  %v6918_v46 = vshll.u32 %v6780_v8, 16 }
 0x49f   : > { %v6878_v3 = vrot.slane %v6877_v6, 4  ;;  %v6891_v19 = vor.u32 %v6890_v54, %v6887_v0  ;;  %v6922_v63 = vshrl.u32 %v6780_v8, 16  ;;  %v6783_v8 = vld [vmem:[#allocation4 + $0x4c] sm:$0xf] }
 0x4a0   : > { %11727 = vmatpush3.bf16.msra.mxu1 %v12830_v15  ;;  %v6873_v59 = vsel %vm14367_vm10, %v6868_v60, %v6872_v17  ;;  %v12838_v17 = vld [vmem:[%s17528_s5 + $0xe0] sm:$0xff]  }
 0x4a1   : > { %11728 = vmatprep.subr.bf16.mxu1 %v12832_v33  ;;  %v6883_v15 = vsel %vm14367_vm10, %v6878_v3, %v6882_v44  ;;  %v6900_v33 = vrot.slane %v6898_v36, 4  ;;  %v6892_v44 = vrot.slane %v6891_v19, 4  ;;  %v6924_v54 = vrot.slane %v6922_v63, 4 }
 0x4a2   : > { %v11201_v11 = vcombine.low %v6873_v59, %v6883_v15  ;;  %v6920_v59 = vrot.slane %v6918_v46, 5  ;;  %v12841_v15 = vld [vmem:[%s17528_s5 + $0xe8] sm:$0xff]  }
 0x4a3   : > { %8806 = vmatmul.mubr.bf16.gmra.mrb[56].mxu1 %v15900_v62  ;;  %v6901_v6 = vor.u32 %v6900_v33, %v6896_v5  ;;  %v6779_v62 = vld [vmem:[#allocation4 + $0x3c] sm:$0xf]  ;;  %v6897_v3 = vsel %vm14367_vm10, %v6892_v44, %v6896_v5  ;;  %v12842_v5 = vld [vmem:[%s17528_s5 + $0xa8] sm:$0xff]  }
 0x4a4   : > { %8813 = vmatprep.mubr.bf16.mxu1 %v11200_v27  ;;  %11729 = vmatpush3.bf16.msra.mxu1 %v12833_v10  ;;  %v6909_v60 = vshrl.u32 %v6779_v62, 16  ;;  %v6912_v24 = vshll.u32 %v6779_v62, 16  ;;  %v6928_v27 = vshll.u32 %v6781_v52, 16  ;;  %v15956_v10 = vld [vmem:[#allocation4 + $0x3c] sm:$0xff]   ;;  %v6925_v62 = vor.u32 %v6924_v54, %v6920_v59  ;;  %v6784_v52 = vld [vmem:[#allocation4 + $0x50] sm:$0x1] }
 0x4a5   : > { %11730 = vmatprep.subr.bf16.mxu1 %v12835_v40  ;;  %v6902_v58 = vrot.slane %v6901_v6, 4  ;;  %v12839_v40 = vld [vmem:[%s17528_s5 + $0xa0] sm:$0xff]   ;;  %v6782_v6 = vld [vmem:[#allocation4 + $0x48] sm:$0xf]  ;;  %v6952_v46 = vshll.u32 %v6784_v52, 16 }
 0x4a6   : > { %v6911_v36 = vrot.slane %v6909_v60, 4  ;;  %v6914_v48 = vrot.slane %v6912_v24, 5  ;;  %v6930_v19 = vrot.slane %v6928_v27, 5  ;;  %v6942_v60 = vshll.u32 %v6783_v8, 16  ;;  %v6787_v52 = vld [vmem:[#allocation4 + $0x5c] sm:$0x1] }
 0x4a7   : > { %v6907_v0 = vsel %vm14367_vm10, %v6902_v58, %v6906_v25  ;;  %v6933_v25 = vshrl.u32 %v6782_v6, 16  ;;  %v6946_v24 = vshrl.u32 %v6783_v8, 16  ;;  %v6926_v58 = vrot.slane %v6925_v62, 4  ;;  %v6785_v62 = vld [vmem:[#allocation4 + $0x54] sm:$0xf] }
 0x4a8   : > { %11731 = vmatpush3.bf16.msra.mxu1 %v12836_v29  ;;  %v11202_v29 = vcombine.low %v6897_v3, %v6907_v0  ;;  %v6915_v33 = vor.u32 %v6914_v48, %v6911_v36  ;;  %v15972_v3 = vld [vmem:[#allocation4 + $0x48] sm:$0xff]   ;;  %v6944_v36 = vrot.slane %v6942_v60, 5 }
 0x4a9   : > { %11732 = vmatprep.subr.bf16.mxu1 %v12838_v17  ;;  %v6936_v17 = vshll.u32 %v6782_v6, 16  ;;  %v6935_v63 = vrot.slane %v6933_v25, 4  ;;  %v6948_v48 = vrot.slane %v6946_v24, 4  ;;  %v12845_v6 = vld [vmem:[%s17528_s5 + $0xb0] sm:$0xff]   ;;  %v6957_v25 = vshrl.u32 %v6785_v62, 16 }
 0x4aa   : > { %v6916_v44 = vrot.slane %v6915_v33, 4  ;;  %v6954_v33 = vrot.slane %v6952_v46, 5 }
 0x4ab   : > { %8814 = vmatmul.mubr.bf16.gmra.mrb[60].mxu1 %v15912_v61  ;;  %v6938_v27 = vrot.slane %v6936_v17, 5  ;;  %v6960_v17 = vshll.u32 %v6785_v62, 16  ;;  %v6959_v46 = vrot.slane %v6957_v25, 4  ;;  %v15997_v62 = vld [vmem:[#allocation4 + $0xc] sm:$0xff]  }
 0x4ac   : > { %8821 = vmatprep.mubr.bf16.mxu1 %v11201_v11  ;;  %11733 = vmatpush3.bf16.msra.mxu1 %v12839_v40  ;;  %v6921_v61 = vsel %vm14367_vm10, %v6916_v44, %v6920_v59  ;;  %v12844_v11 = vld [vmem:[%s17528_s5 + $0xf0] sm:$0xff]   ;;  %v6931_v40 = vsel %vm14367_vm10, %v6926_v58, %v6930_v19  ;;  %v6786_v59 = vld [vmem:[#allocation4 + $0x58] sm:$0xf]  ;;  %v6976_v19 = vshll.u32 %v6787_v52, 16  ;;  %v7021_v52 = vld [vmem:[#allocation4 + $0x4] sm:$0xf] }
 0x4ad   : > { %11734 = vmatprep.subr.bf16.mxu1 %v12841_v15  ;;  %v6939_v0 = vor.u32 %v6938_v27, %v6935_v63  ;;  %v11203_v54 = vcombine.low %v6921_v61, %v6931_v40  ;;  %v6949_v15 = vor.u32 %v6948_v48, %v6944_v36  ;;  %v6966_v44 = vshll.u32 %v6786_v59, 16  ;;  %v15984_v58 = vld [vmem:[#allocation4 + $0x54] sm:$0xff]  }
 0x4ae   : > { %v6970_v24 = vshrl.u32 %v6786_v59, 16  ;;  %v6962_v63 = vrot.slane %v6960_v17, 5  ;;  %v12847_v61 = vld [vmem:[%s17528_s5 + $0xf8] sm:$0xff]   ;;  %v7070_v17 = vrot.slane %v7021_v52, 5  ;;  %v7027_v52 = vld [vmem:[#allocation4 + $0x1c] sm:$0xf] }
 0x4af   : > { %v6940_v8 = vrot.slane %v6939_v0, 4  ;;  %v6950_v60 = vrot.slane %v6949_v15, 4  ;;  %v6968_v27 = vrot.slane %v6966_v44, 5  ;;  %v6978_v15 = vrot.slane %v6976_v19, 5 }
 0x4b0   : > { %11735 = vmatpush3.bf16.msra.mxu1 %v12842_v5  ;;  %v6963_v0 = vor.u32 %v6962_v63, %v6959_v46  ;;  %v7072_v46 = vrot.slane %v7070_v17, 4 }
 0x4b1   : > { %11736 = vmatprep.subr.bf16.mxu1 %v12844_v11  ;;  %v6945_v5 = vsel %vm14367_vm10, %v6940_v8, %v6944_v36  ;;  %v6955_v48 = vsel %vm14367_vm10, %v6950_v60, %v6954_v33  ;;  %v6972_v11 = vrot.slane %v6970_v24, 4  ;;  %v7020_v8 = vld [vmem:[#allocation4] sm:$0xe]  ;;  %v16004_v24 = vld [vmem:[#allocation4 + $0x18] sm:$0xff]  }
 0x4b2   : > { %v11204_v40 = vcombine.low %v6945_v5, %v6955_v48  ;;  %v6964_v59 = vrot.slane %v6963_v0, 4  ;;  %v11206_v25 = vrot.slane %v7020_v8, 9  ;;  %v7024_v48 = vld [vmem:[#allocation4 + $0x10] sm:$0xf]  ;;  %v16023_v8 = vld [vmem:[#allocation4 + $0x24] sm:$0xff]  }
 0x4b3   : > { %8822 = vmatmul.mubr.bf16.gmra.mrb[64].mxu1 %v15928_v42  ;;  %v12848_v42 = vld [vmem:[%s17528_s5 + $0xb8] sm:$0xff]   ;;  %v6973_v36 = vor.u32 %v6972_v11, %v6968_v27 }
 0x4b4   : > { %8829 = vmatprep.mubr.bf16.mxu1 %v11202_v29  ;;  %11737 = vmatpush3.bf16.msra.mxu1 %v12845_v6  ;;  %v12850_v29 = vld [vmem:[%s17528_s5 + $0x140] sm:$0xff]   ;;  %v7022_v6 = vld [vmem:[#allocation4 + $0x8] sm:$0x1]  ;;  %v6969_v44 = vsel %vm14367_vm10, %v6964_v59, %v6968_v27  ;;  %v16010_v5 = vsel %vm14555_vm13, %v11206_v25, %v7070_v17  ;;  %v7025_v11 = vld [vmem:[#allocation4 + $0x14] sm:$0x1]  ;;  %v7084_v25 = vrot.slane %v7027_v52, 5 }
 0x4b5   : > { %11738 = vmatprep.subr.bf16.mxu1 %v12847_v61  ;;  %v6974_v33 = vrot.slane %v6973_v36, 4  ;;  %v7073_v60 = vrot.slane %v7022_v6, 5  ;;  %v7023_v61 = vld [vmem:[#allocation4 + $0xc] sm:$0xe]  ;;  %v7077_v36 = vrot.slane %v7024_v48, 5 }
 0x4b6   : > { %v11207_v0 = vrot.slane %v7023_v61, 9  ;;  %v7029_v61 = vld [vmem:[#allocation4 + $0x24] sm:$0xe]  ;;  %v7030_v48 = vld [vmem:[#allocation4 + $0x28] sm:$0xf] }
 0x4b7   : > { %v6979_v19 = vsel %vm14367_vm10, %v6974_v33, %v6978_v15  ;;  %v16015_v27 = vsel %vm14555_vm13, %v7072_v46, %v7073_v60  ;;  %v7080_v15 = vrot.slane %v7025_v11, 5  ;;  %v16036_v46 = vld [vmem:[#allocation4 + $0x30] sm:$0xff]   ;;  %v7031_v11 = vld [vmem:[#allocation4 + $0x2c] sm:$0x1] }
 0x4b8   : > { %11739 = vmatpush3.bf16.msra.mxu1 %v12848_v42  ;;  %v11205_v63 = vcombine.low %v6969_v44, %v6979_v19  ;;  %v11214_v42 = vcombine.low %v16010_v5, %v16015_v27  ;;  %v16021_v59 = vsel %vm14555_vm13, %v11207_v0, %v7077_v36  ;;  %v7086_v19 = vrot.slane %v7084_v25, 4 }
 0x4b9   : > { %11788 = vmatprep.subr.bf16.mxu1 %v12850_v29  ;;  %v7028_v29 = vld [vmem:[#allocation4 + $0x20] sm:$0x1] }
 0x4ba   : > { %v7087_v17 = vrot.slane %v7028_v29, 5  ;;  %v16048_v29 = vld [vmem:[#allocation4 + $0x3c] sm:$0xff]  }
 0x4bb   : > { %8830 = vmatmul.mubr.bf16.gmra.mrb[68].mxu1 %v15943_v57  ;;  %v7079_v57 = vrot.slane %v7077_v36, 4  ;;  %v11209_v36 = vrot.slane %v7029_v61, 9 }
 0x4bc   : > { %8837 = vmatprep.mubr.bf16.mxu1 %v11203_v54  ;;  %v7026_v54 = vld [vmem:[#allocation4 + $0x18] sm:$0xe]  ;;  %v16040_v0 = vsel %vm14555_vm13, %v7086_v19, %v7087_v17  ;;  %v7034_v17 = vld [vmem:[#allocation4 + $0x38] sm:$0x1] }
 0x4bd   : > { %v11208_v33 = vrot.slane %v7026_v54, 9  ;;  %v16027_v6 = vsel %vm14555_vm13, %v7079_v57, %v7080_v15  ;;  %v7091_v15 = vrot.slane %v7030_v48, 5  ;;  %v7094_v57 = vrot.slane %v7031_v11, 5 }
 0x4be   : > { %v7101_v11 = vrot.slane %v7034_v17, 5  ;;  %v7238_v17 = vld [vmem:[#allocation4 + $0x10] sm:$0xf] }
 0x4bf   : > { %v16034_v60 = vsel %vm14555_vm13, %v11208_v33, %v7084_v25  ;;  %v16046_v54 = vsel %vm14555_vm13, %v11209_v36, %v7091_v15  ;;  %v7093_v52 = vrot.slane %v7091_v15, 4  ;;  %v7033_v33 = vld [vmem:[#allocation4 + $0x34] sm:$0xf]  ;;  %v7271_v44 = vshll.u32 %v7238_v17, 16 }
 0x4c0   : > { %v7098_v61 = vrot.slane %v7033_v33, 5  ;;  %v11211_v33 = vrot.slane %v7035_v39, 9  ;;  %v11212_v39 = vrot.slane %v7038_v31, 9  ;;  %v11213_v31 = vrot.slane %v7041_v55, 9  ;;  %v7495_v55 = vld [vmem:[#allocation4 + $0x14] sm:$0x1] }
 0x4c1   : > { %v16052_v25 = vsel %vm14555_vm13, %v7093_v52, %v7094_v57  ;;  %v7036_v52 = vld [vmem:[#allocation4 + $0x40] sm:$0xf] }
 0x4c2   : > { %v7100_v15 = vrot.slane %v7098_v61, 4 }
 0x4c3   : > { %8838 = vmatmul.mubr.bf16.gmra.mrb[72].mxu1 %v15956_v10 }
 0x4c4   : > { %8845 = vmatprep.mubr.bf16.mxu1 %v11204_v40  ;;  %v7032_v40 = vld [vmem:[#allocation4 + $0x30] sm:$0xe]  ;;  %v16065_v57 = vsel %vm14555_vm13, %v7100_v15, %v7101_v11  ;;  %v7112_v15 = vrot.slane %v7039_v47, 5 }
 0x4c5   : > { %v11210_v19 = vrot.slane %v7032_v40, 9  ;;  %v7037_v40 = vld [vmem:[#allocation4 + $0x44] sm:$0x1] }
 0x4c6   : > { %v7108_v2 = vrot.slane %v7037_v40, 5  ;;  %v16085_v40 = vsel %vm14555_vm13, %v11212_v39, %v7112_v15  ;;  %v12851_v39 = vld [vmem:[%s17528_s5 + $0x100] sm:$0xff]  }
 0x4c7   : > { %v16059_v36 = vsel %vm14555_vm13, %v11210_v19, %v7098_v61  ;;  %v16073_v61 = vld [vmem:[#allocation4 + $0x54] sm:$0xff]  }
 0x4cb   : > { %8846 = vmatmul.mubr.bf16.gmra.mrb[76].mxu1 %v15972_v3  ;;  %v7105_v3 = vrot.slane %v7036_v52, 5  ;;  %v7237_v52 = vld [vmem:[#allocation4 + $0xc] sm:$0xf] }
 0x4cc   : > { %8853 = vmatprep.mubr.bf16.mxu1 %v11205_v63  ;;  %v7262_v48 = vshrl.u32 %v7237_v52, 16  ;;  %v7265_v10 = vshll.u32 %v7237_v52, 16  ;;  %v12857_v52 = vld [vmem:[%s17528_s5 + $0x110] sm:$0xff]  }
 0x4cd   : > { %v16071_v19 = vsel %vm14555_vm13, %v11211_v33, %v7105_v3  ;;  %v7107_v63 = vrot.slane %v7105_v3, 4  ;;  %v7114_v33 = vrot.slane %v7112_v15, 4  ;;  %v16087_v3 = vld [vmem:[#allocation4 + $0x60] sm:$0xff]  }
 0x4ce   : > { %v7264_v27 = vrot.slane %v7262_v48, 4 }
 0x4cf   : > { %v16077_v11 = vsel %vm14555_vm13, %v7107_v63, %v7108_v2  ;;  %v7042_v2 = vld [vmem:[#allocation4 + $0x58] sm:$0xf]  ;;  %v16091_v47 = vsel %vm14555_vm13, %v7114_v33, %v7115_v30  ;;  %v12853_v30 = vld [vmem:[%s17528_s5 + $0x148] sm:$0xff]   ;;  %v7494_v33 = vld [vmem:[#allocation4 + $0x10] sm:$0xf]  ;;  %v7546_v63 = vrot.slane %v7495_v55, 5 }
 0x4d3   : > { %8854 = vmatmul.mubr.bf16.gmra.mrb[80].mxu1 %v15984_v58  ;;  %v7119_v58 = vrot.slane %v7042_v2, 5  ;;  %v11238_v2 = vrot.slane %v7493_v56, 9  ;;  %v12854_v56 = vld [vmem:[%s17528_s5 + $0x108] sm:$0xff]  }
 0x4d4   : > { %8894 = vmatprep.mubr.bf16.mxu1 %v15997_v62  ;;  %v7122_v62 = vrot.slane %v7043_v32, 5  ;;  %v7543_v32 = vrot.slane %v7494_v33, 5  ;;  %v7275_v33 = vshrl.u32 %v7238_v17, 16 }
 0x4d5   : > { %v7120_v15 = vsel %vm14555_vm13, %v11213_v31, %v7119_v58  ;;  %v7121_v7 = vrot.slane %v7119_v58, 4  ;;  %v7239_v58 = vld [vmem:[#allocation4 + $0x14] sm:$0x1] }
 0x4d6   : > { %v7281_v5 = vshll.u32 %v7239_v58, 16  ;;  %v7498_v58 = vld [vmem:[#allocation4 + $0x20] sm:$0x1] }
 0x4d7   : > { %v7123_v43 = vsel %vm14555_vm13, %v7121_v7, %v7122_v62  ;;  %v7544_v7 = vsel %vm14555_vm13, %v11238_v2, %v7543_v32  ;;  %v7545_v62 = vrot.slane %v7543_v32, 4  ;;  %v7496_v2 = vld [vmem:[#allocation4 + $0x18] sm:$0xe]  ;;  %v7497_v32 = vld [vmem:[#allocation4 + $0x1c] sm:$0xf]  ;;  %v7553_v21 = vrot.slane %v7498_v58, 5 }
 0x4d8   : > { %v16108_v31 = vcombine.low %v7120_v15, %v7123_v43  ;;  %v12856_v43 = vld [vmem:[%s17528_s5 + $0x150] sm:$0xff]   ;;  %v7277_v15 = vrot.slane %v7275_v33, 4  ;;  %v7283_v17 = vrot.slane %v7281_v5, 5  ;;  %v11239_v48 = vrot.slane %v7496_v2, 9 }
 0x4d9   : > { %v7550_v45 = vrot.slane %v7497_v32, 5  ;;  %v7286_v33 = vshrl.u32 %v7240_v38, 16 }
 0x4da   : > { %7163 = vst [vmem:[#allocation5 + $0x208] sm:$0xff] %v16108_v31 }
 0x4db   : > { %8895 = vmatmul.mubr.bf16.vlgmr.msra.gmra.mrb[84].mxu1 %v11214_v42  ;;  %v7267_v42 = vrot.slane %v7265_v10, 5  ;;  %v7288_v2 = vrot.slane %v7286_v33, 4  ;;  %v7499_v33 = vld [vmem:[#allocation4 + $0x24] sm:$0xe] }
 0x4dc   : > { %11789 = vmatpush3.bf16.msra.mxu1 %v12851_v39  ;;  %8902 = vmatprep.mubr.bf16.mxu1 %v16004_v24  ;;  %v7273_v24 = vrot.slane %v7271_v44, 5  ;;  %v7547_v39 = vsel %vm14555_vm13, %v7545_v62, %v7546_v63  ;;  %v12859_v44 = vld [vmem:[%s17528_s5 + $0x158] sm:$0xff]   ;;  %v7242_v62 = vld [vmem:[#allocation4 + $0x20] sm:$0x1] }
 0x4dd   : > { %11790 = vmatprep.subr.bf16.mxu1 %v12853_v30  ;;  %v16125_v55 = vcombine.low %v7544_v7, %v7547_v39  ;;  %v7268_v30 = vor.u32 %v7267_v42, %v7264_v27  ;;  %v7241_v7 = vld [vmem:[#allocation4 + $0x1c] sm:$0xf]  ;;  %v7551_v27 = vsel %vm14555_vm13, %v11239_v48, %v7550_v45  ;;  %v7552_v42 = vrot.slane %v7550_v45, 4 }
 0x4de   : > { %v7278_v10 = vor.u32 %v7277_v15, %v7273_v24  ;;  %v7289_v39 = vshll.u32 %v7240_v38, 16  ;;  %v17606_v15 = vcombine.low %v16021_v59, %v16027_v6  ;;  %v7295_v32 = vshll.u32 %v7241_v7, 16 }
 0x4df   : > { %7629 = vst [vmem:[#allocation5 + $0x28] sm:$0xff] %v16125_v55  ;;  %v7269_v63 = vrot.slane %v7268_v30, 4  ;;  %v7299_v58 = vshrl.u32 %v7241_v7, 16  ;;  %v7554_v45 = vsel %vm14555_vm13, %v7552_v42, %v7553_v21  ;;  %v7305_v6 = vshll.u32 %v7242_v62, 16  ;;  %v7500_v7 = vld [vmem:[#allocation4 + $0x28] sm:$0xf] }
 0x4e0   : > { %11791 = vmatpush3.bf16.msra.mxu1 %v12854_v56  ;;  %v12860_v56 = vld [vmem:[%s17528_s5 + $0x118] sm:$0xff]   ;;  %v7279_v5 = vrot.slane %v7278_v10, 4  ;;  %v7291_v59 = vrot.slane %v7289_v39, 5  ;;  %v16151_v48 = vcombine.low %v7551_v27, %v7554_v45  ;;  %v7243_v27 = vld [vmem:[#allocation4 + $0x24] sm:$0xf] }
 0x4e1   : > { %11792 = vmatprep.subr.bf16.mxu1 %v12856_v43  ;;  %v12862_v43 = vld [vmem:[%s17528_s5 + $0x160] sm:$0xff]   ;;  %v7274_v30 = vsel %vm14367_vm10, %v7269_v63, %v7273_v24  ;;  %v7297_v24 = vrot.slane %v7295_v32, 5  ;;  %v7301_v63 = vrot.slane %v7299_v58, 4  ;;  %v7244_v42 = vld [vmem:[#allocation4 + $0x28] sm:$0xf]  ;;  %v12865_v39 = vld [vmem:[%s17528_s5 + $0x168] sm:$0xff]  }
 0x4e2   : > { %v7284_v38 = vsel %vm14367_vm10, %v7279_v5, %v7283_v17  ;;  %v7501_v17 = vld [vmem:[#allocation4 + $0x2c] sm:$0x1]  ;;  %v11240_v5 = vrot.slane %v7499_v33, 9  ;;  %7630 = vst [vmem:[#allocation5 + $0x70] sm:$0xff] %v16151_v48 }
 0x4e3   : > { %8903 = vmatmul.mubr.bf16.gmra.mrb[88].mxu1 %v17606_v15  ;;  %v16149_v10 = vcombine.low %v7274_v30, %v7284_v38  ;;  %v7557_v15 = vrot.slane %v7500_v7, 5  ;;  %v7302_v21 = vor.u32 %v7301_v63, %v7297_v24  ;;  %v7560_v62 = vrot.slane %v7501_v17, 5  ;;  %v7245_v58 = vld [vmem:[#allocation4 + $0x2c] sm:$0x1] }
 0x4e4   : > { %8910 = vmatprep.mubr.bf16.mxu1 %v16023_v8  ;;  %11793 = vmatpush3.bf16.msra.mxu1 %v12857_v52  ;;  %v12863_v8 = vld [vmem:[%s17528_s5 + $0x120] sm:$0xff]   ;;  %v7292_v52 = vor.u32 %v7291_v59, %v7288_v2  ;;  %v7310_v38 = vshrl.u32 %v7243_v27, 16  ;;  %v7313_v59 = vshll.u32 %v7243_v27, 16  ;;  %v7319_v63 = vshll.u32 %v7244_v42, 16 }
 0x4e5   : > { %11794 = vmatprep.subr.bf16.mxu1 %v12859_v44  ;;  %7485 = vst [vmem:[#allocation5 + $0x20] sm:$0xff] %v16149_v10  ;;  %v7307_v44 = vrot.slane %v7305_v6, 5  ;;  %v7558_v2 = vsel %vm14555_vm13, %v11240_v5, %v7557_v15  ;;  %v7559_v32 = vrot.slane %v7557_v15, 4  ;;  %v7303_v45 = vrot.slane %v7302_v21, 4 }
 0x4e6   : > { %v7293_v30 = vrot.slane %v7292_v52, 4  ;;  %v7323_v6 = vshrl.u32 %v7244_v42, 16  ;;  %v7312_v52 = vrot.slane %v7310_v38, 4  ;;  %v7329_v17 = vshll.u32 %v7245_v58, 16  ;;  %v7502_v42 = vld [vmem:[#allocation4 + $0x30] sm:$0xe] }
 0x4e7   : > { %v7561_v7 = vsel %vm14555_vm13, %v7559_v32, %v7560_v62  ;;  %v17607_v5 = vcombine.low %v16034_v60, %v16040_v0  ;;  %v7315_v21 = vrot.slane %v7313_v59, 5  ;;  %v7321_v27 = vrot.slane %v7319_v63, 5  ;;  %v7503_v32 = vld [vmem:[#allocation4 + $0x34] sm:$0xf]  ;;  %v7504_v58 = vld [vmem:[#allocation4 + $0x38] sm:$0x1] }
 0x4e8   : > { %11795 = vmatpush3.bf16.msra.mxu1 %v12860_v56  ;;  %v12866_v56 = vld [vmem:[%s17528_s5 + $0x128] sm:$0xff]   ;;  %v7298_v33 = vsel %vm14367_vm10, %v7293_v30, %v7297_v24  ;;  %v16175_v15 = vcombine.low %v7558_v2, %v7561_v7  ;;  %v7325_v62 = vrot.slane %v7323_v6, 4  ;;  %v7331_v30 = vrot.slane %v7329_v17, 5  ;;  %v12868_v60 = vld [vmem:[%s17528_s5 + $0x170] sm:$0xff]   ;;  %v7247_v59 = vld [vmem:[#allocation4 + $0x34] sm:$0xf] }
 0x4e9   : > { %11796 = vmatprep.subr.bf16.mxu1 %v12862_v43  ;;  %v7308_v43 = vsel %vm14367_vm10, %v7303_v45, %v7307_v44  ;;  %v7316_v0 = vor.u32 %v7315_v21, %v7312_v52  ;;  %v11241_v44 = vrot.slane %v7502_v42, 9  ;;  %v7564_v2 = vrot.slane %v7503_v32, 5  ;;  %v7246_v45 = vld [vmem:[#allocation4 + $0x30] sm:$0xf] }
 0x4ea   : > { %v16178_v24 = vcombine.low %v7298_v33, %v7308_v43  ;;  %7631 = vst [vmem:[#allocation5 + $0xb8] sm:$0xff] %v16175_v15  ;;  %v7567_v38 = vrot.slane %v7504_v58, 5  ;;  %v7334_v63 = vshrl.u32 %v7246_v45, 16  ;;  %v7337_v6 = vshll.u32 %v7246_v45, 16  ;;  %v12871_v33 = vld [vmem:[%s17528_s5 + $0x178] sm:$0xff]  }
 0x4eb   : > { %8911 = vmatmul.mubr.bf16.gmra.mrb[92].mxu1 %v17607_v5  ;;  %v7317_v7 = vrot.slane %v7316_v0, 4  ;;  %v7565_v52 = vsel %vm14555_vm13, %v11241_v44, %v7564_v2  ;;  %v7566_v17 = vrot.slane %v7564_v2, 4  ;;  %v7343_v5 = vshll.u32 %v7247_v59, 16 }
 0x4ec   : > { %8918 = vmatprep.mubr.bf16.mxu1 %v16036_v46  ;;  %11797 = vmatpush3.bf16.msra.mxu1 %v12863_v8  ;;  %v12869_v46 = vld [vmem:[%s17528_s5 + $0x130] sm:$0xff]   ;;  %7486 = vst [vmem:[#allocation5 + $0x68] sm:$0xff] %v16178_v24  ;;  %v7326_v8 = vor.u32 %v7325_v62, %v7321_v27  ;;  %v7336_v21 = vrot.slane %v7334_v63, 4  ;;  %v7339_v42 = vrot.slane %v7337_v6, 5  ;;  %v7347_v32 = vshrl.u32 %v7247_v59, 16 }
 0x4ed   : > { %11798 = vmatprep.subr.bf16.mxu1 %v12865_v39  ;;  %v7248_v39 = vld [vmem:[#allocation4 + $0x38] sm:$0x1]  ;;  %v7322_v62 = vsel %vm14367_vm10, %v7317_v7, %v7321_v27  ;;  %v7568_v58 = vsel %vm14555_vm13, %v7566_v17, %v7567_v38  ;;  %v7345_v45 = vrot.slane %v7343_v5, 5  ;;  %v7506_v63 = vld [vmem:[#allocation4 + $0x40] sm:$0xf]  ;;  %v12872_v27 = vld [vmem:[%s17528_s5 + $0x138] sm:$0xff]  }
 0x4ee   : > { %v7327_v43 = vrot.slane %v7326_v8, 4  ;;  %v7353_v16 = vshll.u32 %v7248_v39, 16  ;;  %v16199_v44 = vcombine.low %v7565_v52, %v7568_v58  ;;  %v7340_v2 = vor.u32 %v7339_v42, %v7336_v21  ;;  %v7505_v8 = vld [vmem:[#allocation4 + $0x3c] sm:$0xe]  ;;  %v7507_v39 = vld [vmem:[#allocation4 + $0x44] sm:$0x1] }
 0x4ef   : > { %v11242_v6 = vrot.slane %v7505_v8, 9  ;;  %v7574_v17 = vrot.slane %v7507_v39, 5  ;;  %v12873_v5 = vld [vmem:[%s17528_s5 + $0x1c0] sm:$0xff]  }
 0x4f0   : > { %11799 = vmatpush3.bf16.msra.mxu1 %v12866_v56  ;;  %v7332_v0 = vsel %vm14367_vm10, %v7327_v43, %v7331_v30  ;;  %v7349_v56 = vrot.slane %v7347_v32, 4  ;;  %v7355_v59 = vrot.slane %v7353_v16, 5  ;;  %v7571_v30 = vrot.slane %v7506_v63, 5  ;;  %7632 = vst [vmem:[#allocation5 + $0x100] sm:$0xff] %v16199_v44  ;;  %v16221_v8 = vld [vmem:[#allocation4 + $0x18] sm:$0xff]  }
 0x4f1   : > { %11800 = vmatprep.subr.bf16.mxu1 %v12868_v60  ;;  %v17608_v60 = vcombine.low %v16046_v54, %v16052_v25  ;;  %v16207_v38 = vcombine.low %v7322_v62, %v7332_v0  ;;  %v7341_v7 = vrot.slane %v7340_v2, 4  ;;  %v7249_v54 = vld [vmem:[#allocation4 + $0x3c] sm:$0xf]  ;;  %v7250_v25 = vld [vmem:[#allocation4 + $0x40] sm:$0xf]  ;;  %7702 = vst [vmem:[#allocation5 + $0x30] sm:$0xff] %v16221_v8 }
 0x4f2   : > { %v7350_v52 = vor.u32 %v7349_v56, %v7345_v45  ;;  %v7572_v16 = vsel %vm14555_vm13, %v11242_v6, %v7571_v30  ;;  %v7573_v43 = vrot.slane %v7571_v30, 4  ;;  %v7361_v21 = vshll.u32 %v7249_v54, 16 }
 0x4f3   : > { %8919 = vmatmul.mubr.bf16.gmra.mrb[96].mxu1 %v17608_v60  ;;  %7487 = vst [vmem:[#allocation5 + $0xb0] sm:$0xff] %v16207_v38  ;;  %v7346_v42 = vsel %vm14367_vm10, %v7341_v7, %v7345_v45  ;;  %v7367_v62 = vshll.u32 %v7250_v25, 16  ;;  %v7371_v58 = vshrl.u32 %v7250_v25, 16 }
 0x4f4   : > { %8926 = vmatprep.mubr.bf16.mxu1 %v16048_v29  ;;  %11801 = vmatpush3.bf16.msra.mxu1 %v12869_v46  ;;  %v7251_v29 = vld [vmem:[#allocation4 + $0x44] sm:$0x1]  ;;  %v7358_v46 = vshrl.u32 %v7249_v54, 16  ;;  %v7351_v32 = vrot.slane %v7350_v52, 4  ;;  %v7363_v2 = vrot.slane %v7361_v21, 5 }
 0x4f5   : > { %11802 = vmatprep.subr.bf16.mxu1 %v12871_v33  ;;  %v7575_v33 = vsel %vm14555_vm13, %v7573_v43, %v7574_v17  ;;  %v7377_v56 = vshll.u32 %v7251_v29, 16  ;;  %v7369_v39 = vrot.slane %v7367_v62, 5  ;;  %v7373_v6 = vrot.slane %v7371_v58, 4  ;;  %v7508_v52 = vld [vmem:[#allocation4 + $0x48] sm:$0xe] }
 0x4f6   : > { %v7360_v0 = vrot.slane %v7358_v46, 4  ;;  %v7356_v63 = vsel %vm14367_vm10, %v7351_v32, %v7355_v59  ;;  %v16225_v60 = vcombine.low %v7572_v16, %v7575_v33  ;;  %v7509_v17 = vld [vmem:[#allocation4 + $0x4c] sm:$0xf]  ;;  %v11243_v25 = vrot.slane %v7508_v52, 9  ;;  %v7252_v59 = vld [vmem:[#allocation4 + $0x48] sm:$0xf] }
 0x4f7   : > { %v16227_v45 = vcombine.low %v7346_v42, %v7356_v63  ;;  %v7379_v7 = vrot.slane %v7377_v56, 5  ;;  %v7374_v54 = vor.u32 %v7373_v6, %v7369_v39  ;;  %v7578_v43 = vrot.slane %v7509_v17, 5  ;;  %v7253_v46 = vld [vmem:[#allocation4 + $0x4c] sm:$0xf]  ;;  %v7254_v21 = vld [vmem:[#allocation4 + $0x50] sm:$0x1] }
 0x4f8   : > { %11803 = vmatpush3.bf16.msra.mxu1 %v12872_v27  ;;  %v7364_v30 = vor.u32 %v7363_v2, %v7360_v0  ;;  %7633 = vst [vmem:[#allocation5 + $0x148] sm:$0xff] %v16225_v60  ;;  %v7510_v27 = vld [vmem:[#allocation4 + $0x50] sm:$0x1]  ;;  %v17609_v16 = vcombine.low %v16059_v36, %v16065_v57  ;;  %v7382_v58 = vshrl.u32 %v7252_v59, 16  ;;  %v16238_v33 = vld [vmem:[#allocation4 + $0x24] sm:$0xff]   ;;  %v7385_v57 = vshll.u32 %v7252_v59, 16 }
 0x4f9   : > { %11852 = vmatprep.subr.bf16.mxu1 %v12873_v5  ;;  %7488 = vst [vmem:[#allocation5 + $0xf8] sm:$0xff] %v16227_v45  ;;  %v7581_v29 = vrot.slane %v7510_v27, 5  ;;  %v7375_v42 = vrot.slane %v7374_v54, 4  ;;  %v7579_v32 = vsel %vm14555_vm13, %v11243_v25, %v7578_v43  ;;  %v7580_v62 = vrot.slane %v7578_v43, 4  ;;  %7703 = vst [vmem:[#allocation5 + $0x78] sm:$0xff] %v16238_v33 }
 0x4fa   : > { %v7365_v5 = vrot.slane %v7364_v30, 4  ;;  %v7391_v0 = vshll.u32 %v7253_v46, 16  ;;  %v7395_v2 = vshrl.u32 %v7253_v46, 16  ;;  %v7384_v63 = vrot.slane %v7382_v58, 4  ;;  %v7512_v27 = vld [vmem:[#allocation4 + $0x58] sm:$0xf] }
 0x4fb   : > { %8927 = vmatmul.mubr.bf16.gmra.mrb[100].mxu1 %v17609_v16  ;;  %v7380_v56 = vsel %vm14367_vm10, %v7375_v42, %v7379_v7  ;;  %v7401_v6 = vshll.u32 %v7254_v21, 16  ;;  %v7387_v17 = vrot.slane %v7385_v57, 5  ;;  %v7513_v59 = vld [vmem:[#allocation4 + $0x5c] sm:$0x1]  ;;  %v7585_v7 = vrot.slane %v7512_v27, 5  ;;  %v16253_v42 = vld [vmem:[#allocation4 + $0x30] sm:$0xff]  }
 0x4fc   : > { %8934 = vmatprep.mubr.bf16.mxu1 %v16061_v4  ;;  %v7370_v36 = vsel %vm14367_vm10, %v7365_v5, %v7369_v39  ;;  %v7582_v4 = vsel %vm14555_vm13, %v7580_v62, %v7581_v29  ;;  %v7393_v54 = vrot.slane %v7391_v0, 5  ;;  %v7511_v39 = vld [vmem:[#allocation4 + $0x54] sm:$0xe]  ;;  %v7397_v25 = vrot.slane %v7395_v2, 4  ;;  %v7256_v21 = vld [vmem:[#allocation4 + $0x58] sm:$0xf] }
 0x4fd   : > { %v16247_v30 = vcombine.low %v7370_v36, %v7380_v56  ;;  %v16249_v52 = vcombine.low %v7579_v32, %v7582_v4  ;;  %v7403_v43 = vrot.slane %v7401_v6, 5  ;;  %v11244_v16 = vrot.slane %v7511_v39, 9  ;;  %v7255_v46 = vld [vmem:[#allocation4 + $0x54] sm:$0xf]  ;;  %v7257_v36 = vld [vmem:[#allocation4 + $0x5c] sm:$0x1] }
 0x4fe   : > { %v7388_v5 = vor.u32 %v7387_v17, %v7384_v63  ;;  %v7588_v29 = vrot.slane %v7513_v59, 5  ;;  %v7398_v32 = vor.u32 %v7397_v25, %v7393_v54  ;;  %v7587_v58 = vrot.slane %v7585_v7, 4  ;;  %7704 = vst [vmem:[#allocation5 + $0xc0] sm:$0xff] %v16253_v42 }
 0x4ff   : > { %7489 = vst [vmem:[#allocation5 + $0x140] sm:$0xff] %v16247_v30  ;;  %7634 = vst [vmem:[#allocation5 + $0x190] sm:$0xff] %v16249_v52  ;;  %v7586_v62 = vsel %vm14555_vm13, %v11244_v16, %v7585_v7  ;;  %v7406_v57 = vshrl.u32 %v7255_v46, 16  ;;  %v17610_v0 = vcombine.low %v16071_v19, %v16077_v11  ;;  %v7409_v56 = vshll.u32 %v7255_v46, 16  ;;  %v7514_v16 = vld [vmem:[#allocation4 + $0x60] sm:$0xe] }
 0x500   : > { %v7389_v2 = vrot.slane %v7388_v5, 4  ;;  %v7415_v4 = vshll.u32 %v7256_v21, 16  ;;  %v7419_v63 = vshrl.u32 %v7256_v21, 16  ;;  %v7399_v6 = vrot.slane %v7398_v32, 4  ;;  %v7516_v21 = vld [vmem:[#allocation4 + $0x68] sm:$0x1] }
 0x501   : > { %v7589_v17 = vsel %vm14555_vm13, %v7587_v58, %v7588_v29  ;;  %v7408_v39 = vrot.slane %v7406_v57, 4  ;;  %v7425_v27 = vshll.u32 %v7257_v36, 16  ;;  %v7411_v19 = vrot.slane %v7409_v56, 5 }
 0x502   : > { %v7394_v25 = vsel %vm14367_vm10, %v7389_v2, %v7393_v54  ;;  %v16266_v59 = vcombine.low %v7586_v62, %v7589_v17  ;;  %v7417_v11 = vrot.slane %v7415_v4, 5  ;;  %v7404_v7 = vsel %vm14367_vm10, %v7399_v6, %v7403_v43  ;;  %v7258_v54 = vld [vmem:[#allocation4 + $0x60] sm:$0xf]  ;;  %v7259_v62 = vld [vmem:[#allocation4 + $0x64] sm:$0xf] }
 0x503   : > { %8935 = vmatmul.mubr.bf16.gmra.mrb[104].mxu1 %v17610_v0  ;;  %v7421_v5 = vrot.slane %v7419_v63, 4  ;;  %v7427_v46 = vrot.slane %v7425_v27, 5  ;;  %v16270_v32 = vcombine.low %v7394_v25, %v7404_v7  ;;  %v7412_v29 = vor.u32 %v7411_v19, %v7408_v39  ;;  %v7260_v2 = vld [vmem:[#allocation4 + $0x68] sm:$0x1]  ;;  %v16273_v17 = vld [vmem:[#allocation4 + $0x3c] sm:$0xff]  }
 0x504   : > { %8942 = vmatprep.mubr.bf16.mxu1 %v16073_v61  ;;  %v7515_v61 = vld [vmem:[#allocation4 + $0x64] sm:$0xf]  ;;  %7635 = vst [vmem:[#allocation5 + $0x1d8] sm:$0xff] %v16266_v59  ;;  %v11245_v58 = vrot.slane %v7514_v16, 9  ;;  %v7595_v0 = vrot.slane %v7516_v21, 5  ;;  %v7430_v56 = vshrl.u32 %v7258_v54, 16  ;;  %v17611_v7 = vcombine.low %v16085_v40, %v16091_v47 }
 0x505   : > { %v7592_v36 = vrot.slane %v7515_v61, 5  ;;  %v7422_v57 = vor.u32 %v7421_v5, %v7417_v11  ;;  %v7433_v4 = vshll.u32 %v7258_v54, 16  ;;  %7490 = vst [vmem:[#allocation5 + $0x188] sm:$0xff] %v16270_v32  ;;  %v7413_v43 = vrot.slane %v7412_v29, 4  ;;  %7705 = vst [vmem:[#allocation5 + $0x108] sm:$0xff] %v16273_v17  ;;  %v16291_v47 = vld [vmem:[#allocation4 + $0x48] sm:$0xff]  }
 0x506   : > { %v7439_v27 = vshll.u32 %v7259_v62, 16  ;;  %v7432_v25 = vrot.slane %v7430_v56, 4  ;;  %v7443_v16 = vshrl.u32 %v7259_v62, 16  ;;  %v7449_v29 = vshll.u32 %v7260_v2, 16  ;;  %v7711_v40 = vld [vmem:[#allocation4 + $0x1c] sm:$0xf] }
 0x507   : > { %v7593_v63 = vsel %vm14555_vm13, %v11245_v58, %v7592_v36  ;;  %v7594_v6 = vrot.slane %v7592_v36, 4  ;;  %v7423_v39 = vrot.slane %v7422_v57, 4  ;;  %v7435_v19 = vrot.slane %v7433_v4, 5  ;;  %v7710_v57 = vld [vmem:[#allocation4 + $0x18] sm:$0xf]  ;;  %7706 = vst [vmem:[#allocation5 + $0x150] sm:$0xff] %v16291_v47 }
 0x508   : > { %v7418_v5 = vsel %vm14367_vm10, %v7413_v43, %v7417_v11  ;;  %v7441_v21 = vrot.slane %v7439_v27, 5  ;;  %v7445_v62 = vrot.slane %v7443_v16, 4  ;;  %v7451_v11 = vrot.slane %v7449_v29, 5  ;;  %v7712_v4 = vld [vmem:[#allocation4 + $0x20] sm:$0x1] }
 0x509   : > { %v7596_v61 = vsel %vm14555_vm13, %v7594_v6, %v7595_v0  ;;  %v7428_v58 = vsel %vm14367_vm10, %v7423_v39, %v7427_v46  ;;  %v7436_v54 = vor.u32 %v7435_v19, %v7432_v25  ;;  %v7735_v0 = vshrl.u32 %v7710_v57, 16 }
 0x50a   : > { %v16289_v36 = vcombine.low %v7593_v63, %v7596_v61  ;;  %v16293_v56 = vcombine.low %v7418_v5, %v7428_v58  ;;  %v7738_v43 = vshll.u32 %v7710_v57, 16  ;;  %v7446_v2 = vor.u32 %v7445_v62, %v7441_v21  ;;  %v16297_v63 = vld [vmem:[#allocation4 + $0x54] sm:$0xff]   ;;  %v16302_v61 = vld [vmem:[#allocation4 + $0x60] sm:$0xff]  }
 0x50b   : > { %8943 = vmatmul.mubr.bf16.gmra.mrb[108].mxu1 %v17611_v7  ;;  %v7744_v6 = vshll.u32 %v7711_v40, 16  ;;  %v7748_v46 = vshrl.u32 %v7711_v40, 16  ;;  %v7737_v27 = vrot.slane %v7735_v0, 4  ;;  %v7754_v25 = vshll.u32 %v7712_v4, 16  ;;  %v7714_v40 = vld [vmem:[#allocation4 + $0x28] sm:$0xf] }
 0x50c   : > { %8950 = vmatprep.mubr.bf16.mxu1 %v16087_v3  ;;  %7636 = vst [vmem:[#allocation5 + $0x220] sm:$0xff] %v16289_v36  ;;  %v7437_v3 = vrot.slane %v7436_v54, 4  ;;  %7491 = vst [vmem:[#allocation5 + $0x1d0] sm:$0xff] %v16293_v56  ;;  %v7740_v39 = vrot.slane %v7738_v43, 5  ;;  %v7447_v16 = vrot.slane %v7446_v2, 4  ;;  %v7772_v2 = vshrl.u32 %v7714_v40, 16 }
 0x50d   : > { %v7746_v7 = vrot.slane %v7744_v6, 5  ;;  %v7750_v5 = vrot.slane %v7748_v46, 4  ;;  %v7756_v58 = vrot.slane %v7754_v25, 5  ;;  %v7713_v54 = vld [vmem:[#allocation4 + $0x24] sm:$0xf]  ;;  %v16309_v6 = vld [vmem:[#allocation4 + $0x6c] sm:$0xff]  }
 0x50e   : > { %v7442_v19 = vsel %vm14367_vm10, %v7437_v3, %v7441_v21  ;;  %v7741_v29 = vor.u32 %v7740_v39, %v7737_v27  ;;  %v7452_v62 = vsel %vm14367_vm10, %v7447_v16, %v7451_v11  ;;  %v7759_v0 = vshrl.u32 %v7713_v54, 16 }
 0x50f   : > { %v7751_v57 = vor.u32 %v7750_v5, %v7746_v7  ;;  %v7762_v43 = vshll.u32 %v7713_v54, 16  ;;  %v16307_v4 = vcombine.low %v7442_v19, %v7452_v62  ;;  %v7768_v3 = vshll.u32 %v7714_v40, 16  ;;  %v12874_v19 = vld [vmem:[%s17528_s5 + $0x180] sm:$0xff]   ;;  %v7716_v54 = vld [vmem:[#allocation4 + $0x30] sm:$0xf] }
 0x510   : > { %v7742_v21 = vrot.slane %v7741_v29, 4  ;;  %v7761_v27 = vrot.slane %v7759_v0, 4  ;;  %v7778_v11 = vshll.u32 %v7715_v20, 16  ;;  %v7717_v62 = vld [vmem:[#allocation4 + $0x34] sm:$0xf]  ;;  %v7783_v0 = vshrl.u32 %v7716_v54, 16 }
 0x511   : > { %v7752_v46 = vrot.slane %v7751_v57, 4  ;;  %v7764_v39 = vrot.slane %v7762_v43, 5  ;;  %7492 = vst [vmem:[#allocation5 + $0x218] sm:$0xff] %v16307_v4  ;;  %v7770_v16 = vrot.slane %v7768_v3, 5  ;;  %v7718_v40 = vld [vmem:[#allocation4 + $0x38] sm:$0x1] }
 0x512   : > { %v7747_v25 = vsel %vm14367_vm10, %v7742_v21, %v7746_v7  ;;  %v7786_v43 = vshll.u32 %v7716_v54, 16  ;;  %v7792_v21 = vshll.u32 %v7717_v62, 16  ;;  %v7796_v3 = vshrl.u32 %v7717_v62, 16 }
 0x513   : > { %8951 = vmatmul.mubr.bf16.gmra.mrb[112].mxu1 %v16108_v31  ;;  %v7774_v31 = vrot.slane %v7772_v2, 4  ;;  %v7757_v5 = vsel %vm14367_vm10, %v7752_v46, %v7756_v58  ;;  %v7765_v29 = vor.u32 %v7764_v39, %v7761_v27  ;;  %v7802_v2 = vshll.u32 %v7718_v40, 16  ;;  %v12876_v39 = vld [vmem:[%s17528_s5 + $0x188] sm:$0xff]  }
 0x514   : > { %8991 = vmatprep.mubr.bf16.mxu1 %v16125_v55  ;;  %v7780_v55 = vrot.slane %v7778_v11, 5  ;;  %v16320_v57 = vcombine.low %v7747_v25, %v7757_v5  ;;  %v7785_v46 = vrot.slane %v7783_v0, 4  ;;  %v7788_v27 = vrot.slane %v7786_v43, 5  ;;  %v12877_v5 = vld [vmem:[%s17528_s5 + $0x1d0] sm:$0xff]   ;;  %v7720_v40 = vld [vmem:[#allocation4 + $0x40] sm:$0xf] }
 0x515   : > { %v7775_v20 = vor.u32 %v7774_v31, %v7770_v16  ;;  %v7766_v7 = vrot.slane %v7765_v29, 4  ;;  %v7794_v25 = vrot.slane %v7792_v21, 5  ;;  %v7798_v31 = vrot.slane %v7796_v3, 4  ;;  %v7721_v43 = vld [vmem:[#allocation4 + $0x44] sm:$0x1] }
 0x516   : > { %7958 = vst [vmem:[#allocation5 + $0x38] sm:$0xff] %v16320_v57  ;;  %v7789_v54 = vor.u32 %v7788_v27, %v7785_v46  ;;  %v7804_v62 = vrot.slane %v7802_v2, 5  ;;  %v7816_v3 = vshll.u32 %v7720_v40, 16  ;;  %v7820_v35 = vshrl.u32 %v7720_v40, 16  ;;  %v7724_v40 = vld [vmem:[#allocation4 + $0x50] sm:$0x1] }
 0x517   : > { %v7776_v58 = vrot.slane %v7775_v20, 4  ;;  %v7771_v11 = vsel %vm14367_vm10, %v7766_v7, %v7770_v16  ;;  %v7719_v20 = vld [vmem:[#allocation4 + $0x3c] sm:$0xf]  ;;  %v7799_v16 = vor.u32 %v7798_v31, %v7794_v25  ;;  %v7826_v12 = vshll.u32 %v7721_v43, 16 }
 0x518   : > { %v7807_v7 = vshrl.u32 %v7719_v20, 16  ;;  %v7790_v21 = vrot.slane %v7789_v54, 4  ;;  %v7818_v27 = vrot.slane %v7816_v3, 5  ;;  %v7722_v54 = vld [vmem:[#allocation4 + $0x48] sm:$0xf] }
 0x519   : > { %v7781_v29 = vsel %vm14367_vm10, %v7776_v58, %v7780_v55  ;;  %v12878_v55 = vld [vmem:[%s17528_s5 + $0x190] sm:$0xff]   ;;  %v7800_v2 = vrot.slane %v7799_v16, 4 }
 0x51a   : > { %v16338_v0 = vcombine.low %v7771_v11, %v7781_v29  ;;  %v7809_v58 = vrot.slane %v7807_v7, 4  ;;  %v7795_v46 = vsel %vm14367_vm10, %v7790_v21, %v7794_v25  ;;  %v7828_v11 = vrot.slane %v7826_v12, 5  ;;  %v12880_v12 = vld [vmem:[%s17528_s5 + $0x198] sm:$0xff]  }
 0x51b   : > { %8992 = vmatmul.mubr.bf16.vlgmr.msra.gmra.mrb[116].mxu1 %v16149_v10  ;;  %v7810_v10 = vshll.u32 %v7719_v20, 16  ;;  %v7805_v31 = vsel %vm14367_vm10, %v7800_v2, %v7804_v62  ;;  %v7723_v20 = vld [vmem:[#allocation4 + $0x4c] sm:$0xf]  ;;  %v7831_v7 = vshrl.u32 %v7722_v54, 16  ;;  %v7850_v21 = vshll.u32 %v7724_v40, 16 }
 0x51c   : > { %11853 = vmatpush3.bf16.msra.mxu1 %v12874_v19  ;;  %8999 = vmatprep.mubr.bf16.mxu1 %v16151_v48  ;;  %v12879_v48 = vld [vmem:[%s17528_s5 + $0x1d8] sm:$0xff]   ;;  %v16350_v16 = vcombine.low %v7795_v46, %v7805_v31  ;;  %v7840_v28 = vshll.u32 %v7723_v20, 16  ;;  %v7844_v25 = vshrl.u32 %v7723_v20, 16  ;;  %v7726_v31 = vld [vmem:[#allocation4 + $0x58] sm:$0xf] }
 0x51d   : > { %11854 = vmatprep.subr.bf16.mxu1 %v12875_v26  ;;  %v7812_v19 = vrot.slane %v7810_v10, 5  ;;  %v7822_v26 = vrot.slane %v7820_v35, 4  ;;  %v7834_v10 = vshll.u32 %v7722_v54, 16  ;;  %v7864_v40 = vshll.u32 %v7726_v31, 16 }
 0x51e   : > { %v7842_v2 = vrot.slane %v7840_v28, 5 }
 0x51f   : > { %v7813_v29 = vor.u32 %v7812_v19, %v7809_v58  ;;  %v7823_v43 = vor.u32 %v7822_v26, %v7818_v27  ;;  %v7836_v62 = vrot.slane %v7834_v10, 5  ;;  %v7846_v58 = vrot.slane %v7844_v25, 4  ;;  %v7725_v19 = vld [vmem:[#allocation4 + $0x54] sm:$0xf] }
 0x520   : > { %11855 = vmatpush3.bf16.msra.mxu1 %v12876_v39  ;;  %v7833_v39 = vrot.slane %v7831_v7, 4  ;;  %v7866_v10 = vrot.slane %v7864_v40, 5 }
 0x521   : > { %11856 = vmatprep.subr.bf16.mxu1 %v12877_v5  ;;  %v7814_v34 = vrot.slane %v7813_v29, 4  ;;  %v7824_v35 = vrot.slane %v7823_v43, 4  ;;  %v12881_v5 = vld [vmem:[%s17528_s5 + $0x1e0] sm:$0xff]   ;;  %v7847_v20 = vor.u32 %v7846_v58, %v7842_v2  ;;  %v7868_v43 = vshrl.u32 %v7726_v31, 16  ;;  %v7729_v58 = vld [vmem:[#allocation4 + $0x64] sm:$0xf] }
 0x522   : > { %v7837_v26 = vor.u32 %v7836_v62, %v7833_v39  ;;  %v7727_v29 = vld [vmem:[#allocation4 + $0x5c] sm:$0x1] }
 0x523   : > { %9000 = vmatmul.mubr.bf16.gmra.mrb[120].mxu1 %v16178_v24  ;;  %v7819_v3 = vsel %vm14367_vm10, %v7814_v34, %v7818_v27  ;;  %v7852_v24 = vrot.slane %v7850_v21, 5  ;;  %v7829_v46 = vsel %vm14367_vm10, %v7824_v35, %v7828_v11  ;;  %v7874_v27 = vshll.u32 %v7727_v29, 16  ;;  %v12883_v21 = vld [vmem:[%s17528_s5 + $0x1e8] sm:$0xff]  }
 0x524   : > { %9007 = vmatprep.mubr.bf16.mxu1 %v16175_v15  ;;  %11857 = vmatpush3.bf16.msra.mxu1 %v12878_v55  ;;  %v7855_v15 = vshrl.u32 %v7725_v19, 16  ;;  %v7858_v55 = vshll.u32 %v7725_v19, 16  ;;  %v16364_v54 = vcombine.low %v7819_v3, %v7829_v46  ;;  %v7838_v7 = vrot.slane %v7837_v26, 4  ;;  %v7728_v3 = vld [vmem:[#allocation4 + $0x60] sm:$0xf] }
 0x525   : > { %11858 = vmatprep.subr.bf16.mxu1 %v12879_v48  ;;  %v12882_v48 = vld [vmem:[%s17528_s5 + $0x1a0] sm:$0xff]   ;;  %v7848_v11 = vrot.slane %v7847_v20, 4  ;;  %v7870_v25 = vrot.slane %v7868_v43, 4  ;;  %v7876_v62 = vrot.slane %v7874_v27, 5  ;;  %v7879_v26 = vshrl.u32 %v7728_v3, 16 }
 0x526   : > { %v7857_v34 = vrot.slane %v7855_v15, 4  ;;  %v7860_v28 = vrot.slane %v7858_v55, 5  ;;  %v7843_v35 = vsel %vm14367_vm10, %v7838_v7, %v7842_v2  ;;  %v7882_v31 = vshll.u32 %v7728_v3, 16  ;;  %v12885_v2 = vld [vmem:[%s17528_s5 + $0x1f0] sm:$0xff]  }
 0x527   : > { %v7853_v19 = vsel %vm14367_vm10, %v7848_v11, %v7852_v24  ;;  %v7871_v46 = vor.u32 %v7870_v25, %v7866_v10  ;;  %v7888_v55 = vshll.u32 %v7729_v58, 16  ;;  %v7892_v20 = vshrl.u32 %v7729_v58, 16  ;;  %v7731_v27 = vld [vmem:[#allocation4 + $0x6c] sm:$0xf] }
 0x528   : > { %11859 = vmatpush3.bf16.msra.mxu1 %v12880_v12  ;;  %v7861_v39 = vor.u32 %v7860_v28, %v7857_v34  ;;  %v12884_v12 = vld [vmem:[%s17528_s5 + $0x1a8] sm:$0xff]   ;;  %v16383_v29 = vcombine.low %v7843_v35, %v7853_v19  ;;  %v7881_v24 = vrot.slane %v7879_v26, 4  ;;  %v7884_v43 = vrot.slane %v7882_v31, 5  ;;  %v12886_v11 = vld [vmem:[%s17528_s5 + $0x1b0] sm:$0xff]   ;;  %v7732_v35 = vld [vmem:[#allocation4 + $0x70] sm:$0xf] }
 0x529   : > { %11860 = vmatprep.subr.bf16.mxu1 %v12881_v5  ;;  %v7730_v5 = vld [vmem:[#allocation4 + $0x68] sm:$0x1]  ;;  %v7872_v40 = vrot.slane %v7871_v46, 4  ;;  %v7890_v34 = vrot.slane %v7888_v55, 5  ;;  %v7894_v28 = vrot.slane %v7892_v20, 4  ;;  %v7903_v3 = vshrl.u32 %v7731_v27, 16 }
 0x52a   : > { %v7862_v15 = vrot.slane %v7861_v39, 4  ;;  %v7898_v7 = vshll.u32 %v7730_v5, 16  ;;  %v7733_v39 = vld [vmem:[#allocation4 + $0x74] sm:$0x1]  ;;  %v7906_v19 = vshll.u32 %v7731_v27, 16  ;;  %v7916_v26 = vshrl.u32 %v7732_v35, 16 }
 0x52b   : > { %9008 = vmatmul.mubr.bf16.gmra.mrb[124].mxu1 %v16207_v38  ;;  %v7877_v25 = vsel %vm14367_vm10, %v7872_v40, %v7876_v62  ;;  %v7905_v5 = vrot.slane %v7903_v3, 4  ;;  %v7922_v31 = vshll.u32 %v7733_v39, 16  ;;  %v12887_v62 = vld [vmem:[%s17528_s5 + $0x1f8] sm:$0xff]  }
 0x52c   : > { %9015 = vmatprep.mubr.bf16.mxu1 %v16199_v44  ;;  %11861 = vmatpush3.bf16.msra.mxu1 %v12882_v48  ;;  %v7867_v38 = vsel %vm14367_vm10, %v7862_v15, %v7866_v10  ;;  %v7885_v44 = vor.u32 %v7884_v43, %v7881_v24  ;;  %v7900_v48 = vrot.slane %v7898_v7, 5  ;;  %v7912_v10 = vshll.u32 %v7732_v35, 16  ;;  %v12888_v40 = vld [vmem:[%s17528_s5 + $0x1b8] sm:$0xff]   ;;  %v7966_v7 = vld [vmem:[#allocation4 + $0x18] sm:$0xe] }
 0x52d   : > { %11862 = vmatprep.subr.bf16.mxu1 %v12883_v21  ;;  %v16393_v58 = vcombine.low %v7867_v38, %v7877_v25  ;;  %v7895_v21 = vor.u32 %v7894_v28, %v7890_v34  ;;  %v7908_v55 = vrot.slane %v7906_v19, 5  ;;  %v7924_v43 = vrot.slane %v7922_v31, 5  ;;  %v7967_v38 = vld [vmem:[#allocation4 + $0x1c] sm:$0xf]  ;;  %v7968_v25 = vld [vmem:[#allocation4 + $0x20] sm:$0x1] }
 0x52e   : > { %v7886_v46 = vrot.slane %v7885_v44, 4  ;;  %v7914_v20 = vrot.slane %v7912_v10, 5  ;;  %v11270_v44 = vrot.slane %v7966_v7, 9  ;;  %v8016_v35 = vrot.slane %v7967_v38, 5  ;;  %v7971_v19 = vld [vmem:[#allocation4 + $0x2c] sm:$0x1] }
 0x52f   : > { %v7896_v15 = vrot.slane %v7895_v21, 4  ;;  %v7909_v27 = vor.u32 %v7908_v55, %v7905_v5  ;;  %v8019_v3 = vrot.slane %v7968_v25, 5  ;;  %v7970_v21 = vld [vmem:[#allocation4 + $0x28] sm:$0xf]  ;;  %v7972_v31 = vld [vmem:[#allocation4 + $0x30] sm:$0xe] }
 0x530   : > { %11863 = vmatpush3.bf16.msra.mxu1 %v12884_v12  ;;  %v7891_v24 = vsel %vm14367_vm10, %v7886_v46, %v7890_v34  ;;  %v7918_v12 = vrot.slane %v7916_v26, 4  ;;  %v7969_v34 = vld [vmem:[#allocation4 + $0x24] sm:$0xe]  ;;  %v8018_v5 = vrot.slane %v8016_v35, 4  ;;  %v8023_v26 = vrot.slane %v7970_v21, 5 }
 0x531   : > { %11864 = vmatprep.subr.bf16.mxu1 %v12885_v2  ;;  %v16407_v2 = vld [vmem:[%s17528_s5 + $0x200] sm:$0xff]   ;;  %v7901_v28 = vsel %vm14367_vm10, %v7896_v15, %v7900_v48  ;;  %v11271_v10 = vrot.slane %v7969_v34, 9  ;;  %v7910_v46 = vrot.slane %v7909_v27, 4  ;;  %v16416_v48 = vsel %vm14555_vm13, %v11270_v44, %v8016_v35  ;;  %v7976_v27 = vld [vmem:[#allocation4 + $0x40] sm:$0xf] }
 0x532   : > { %v16412_v39 = vcombine.low %v7891_v24, %v7901_v28  ;;  %v10042_v15 = vld [vmem:[%s13141_s11] sm:$0xff]  ;;  %v8025_v38 = vrot.slane %v8023_v26, 4  ;;  %v11272_v35 = vrot.slane %v7972_v31, 9  ;;  %v7977_v34 = vld [vmem:[#allocation4 + $0x44] sm:$0x1] }
 0x533   : > { %9016 = vmatmul.mubr.bf16.gmra.mrb[128].mxu1 %v16227_v45  ;;  %v7919_v45 = vor.u32 %v7918_v12, %v7914_v20  ;;  %v7974_v24 = vld [vmem:[#allocation4 + $0x38] sm:$0x1]  ;;  %10060 = vperm.xlu0 %12807, %v10042_v15   ;;  %v7915_v12 = vsel %vm14367_vm10, %v7910_v46, %v7914_v20  ;;  %v16427_v7 = vsel %vm14555_vm13, %v11271_v10, %v8023_v26  ;;  %v7975_v28 = vld [vmem:[#allocation4 + $0x3c] sm:$0xe]  ;;  %v7979_v10 = vld [vmem:[#allocation4 + $0x4c] sm:$0xf] }
 0x534   : > { %9023 = vmatprep.mubr.bf16.mxu1 %v16225_v60  ;;  %11865 = vmatpush3.bf16.msra.mxu1 %v12886_v11  ;;  %v8026_v60 = vrot.slane %v7971_v19, 5  ;;  %v7973_v11 = vld [vmem:[#allocation4 + $0x34] sm:$0xf]  ;;  %v8033_v19 = vrot.slane %v7974_v24, 5  ;;  %v8037_v26 = vrot.slane %v7976_v27, 5  ;;  %v8047_v24 = vrot.slane %v7980_v51, 5 }
 0x535   : > { %11866 = vmatprep.subr.bf16.mxu1 %v12887_v62  ;;  %v7920_v55 = vrot.slane %v7919_v45, 4  ;;  %v16423_v62 = vsel %vm14555_vm13, %v8018_v5, %v8019_v3  ;;  %v8030_v20 = vrot.slane %v7973_v11, 5  ;;  %v7978_v45 = vld [vmem:[#allocation4 + $0x48] sm:$0xe]  ;;  %v7981_v31 = vld [vmem:[#allocation4 + $0x54] sm:$0xe] }
 0x536   : > { %v16438_v21 = vsel %vm14555_vm13, %v8025_v38, %v8026_v60  ;;  %v7982_v15 = vld [vmem:[#allocation4 + $0x58] sm:$0xf]  ;;  %v11274_v60 = vrot.slane %v7978_v45, 9  ;;  %v8044_v11 = vrot.slane %v7979_v10, 5  ;;  %v8039_v27 = vrot.slane %v8037_v26, 4 }
 0x537   : > { %v7925_v25 = vsel %vm14367_vm10, %v7920_v55, %v7924_v43  ;;  %v16444_v46 = vsel %vm14555_vm13, %v11272_v35, %v8030_v20  ;;  %v8032_v5 = vrot.slane %v8030_v20, 4  ;;  %v8040_v55 = vrot.slane %v7977_v34, 5  ;;  %v7984_v35 = vld [vmem:[#allocation4 + $0x60] sm:$0xe]  ;;  %v7987_v10 = vld [vmem:[#allocation4 + $0x6c] sm:$0xe] }
 0x538   : > { %11867 = vmatpush3.bf16.msra.mxu1 %v12888_v40  ;;  %v16434_v3 = vcombine.low %v7915_v12, %v7925_v25  ;;  %v11273_v40 = vrot.slane %v7975_v28, 9  ;;  %v7983_v12 = vld [vmem:[#allocation4 + $0x5c] sm:$0x1]  ;;  %v11275_v25 = vrot.slane %v7981_v31, 9  ;;  %v16460_v34 = vsel %vm14555_vm13, %v11274_v60, %v8044_v11  ;;  %v7988_v31 = vld [vmem:[#allocation4 + $0x70] sm:$0xf] }
 0x539   : > { %11964 = vmatprep.subr.bf16.mxu1 %v16407_v2  ;;  %v16450_v38 = vsel %vm14555_vm13, %v8032_v5, %v8033_v19  ;;  %v8051_v45 = vrot.slane %v7982_v15, 5  ;;  %v7986_v19 = vld [vmem:[#allocation4 + $0x68] sm:$0x1]  ;;  %v8054_v51 = vrot.slane %v7983_v12, 5  ;;  %v11276_v5 = vrot.slane %v7984_v35, 9  ;;  %v10043_v12 = vld [vmem:[%s13141_s11 + $0x8] sm:$0xff] }
 0x53a   : > { %v16454_v28 = vsel %vm14555_vm13, %v11273_v40, %v8037_v26  ;;  %v16464_v40 = vsel %vm14555_vm13, %v8039_v27, %v8040_v55  ;;  %v10044_v43 = vld [vmem:[%s13141_s11 + $0x10] sm:$0xff]  ;;  %v8061_v20 = vrot.slane %v7986_v19, 5  ;;  %10065 = vperm.xlu0 %12807, %v10043_v12   ;;  %v10046_v44 = vld [vmem:[%s13141_s11 + $0x20] sm:$0xff]  ;;  %vm10396_vm10 = vcmask 261120  }
 0x53b   : > { %9024 = vmatmul.mubr.bf16.gmra.mrb[132].mxu1 %v16247_v30  ;;  %v7985_v30 = vld [vmem:[#allocation4 + $0x64] sm:$0xf]  ;;  %v16475_v15 = vsel %vm14555_vm13, %v11275_v25, %v8051_v45  ;;  %v8053_v55 = vrot.slane %v8051_v45, 4  ;;  %10070 = vperm.xlu1 %12808, %v10044_v43   ;;  %v8065_v43 = vrot.slane %v7988_v31, 5  ;;  %v10054_v12 = vld [vmem:[%s13141_s11 + $0x60] sm:$0xff] }
 0x53c   : > { %9031 = vmatprep.mubr.bf16.mxu1 %v16249_v52  ;;  %v8046_v52 = vrot.slane %v8044_v11, 4  ;;  %v8058_v26 = vrot.slane %v7985_v30, 5  ;;  %v7989_v11 = vld [vmem:[#allocation4 + $0x74] sm:$0x1] }
 0x53d   : > { %v16487_v25 = vsel %vm14555_vm13, %v8053_v55, %v8054_v51  ;;  %v8068_v45 = vrot.slane %v7989_v11, 5  ;;  %v10049_v55 = vld [vmem:[%s13141_s11 + $0x38] sm:$0xff]  ;;  %v10050_v11 = vld [vmem:[%s13141_s11 + $0x40] sm:$0xff] }
 0x53e   : > { %v16471_v60 = vsel %vm14555_vm13, %v8046_v52, %v8047_v24  ;;  %v16482_v35 = vsel %vm14555_vm13, %v11276_v5, %v8058_v26  ;;  %v8060_v30 = vrot.slane %v8058_v26, 4  ;;  %v10045_v24 = vld [vmem:[%s13141_s11 + $0x18] sm:$0xff]  ;;  %v11277_v52 = vrot.slane %v7987_v10, 9  ;;  %10080 = vperm.xlu0 %12807, %v10046_v44   ;;  %v10047_v26 = vld [vmem:[%s13141_s11 + $0x28] sm:$0xff] }
 0x53f   : > { %v11283_v27 = vcombine.low %v16475_v15, %v16487_v25  ;;  %v8067_v5 = vrot.slane %v8065_v43, 4  ;;  %10075 = vperm.xlu1 %12808, %v10045_v24   ;;  %v10053_v44 = vld [vmem:[%s13141_s11 + $0x58] sm:$0xff]  ;;  %v10056_v24 = vld [vmem:[%s13141_s11 + $0x70] sm:$0xff]  ;;  %v9430_v15 = vld [vmem:[%s16604_s21 + $0xc] sm:$0xe]  ;;  %v17626_v25 = vmax.f32 %v15754_v14, 0.0 }
 0x540   : > { %v16494_v19 = vsel %vm14555_vm13, %v8060_v30, %v8061_v20  ;;  %v16501_v10 = vsel %vm14555_vm13, %v11277_v52, %v8065_v43  ;;  %v10055_v30 = vld [vmem:[%s13141_s11 + $0x68] sm:$0xff] }
 0x541   : > { %v11284_v51 = vcombine.low %v16482_v35, %v16494_v19  ;;  %v16507_v20 = vsel %vm14555_vm13, %v8067_v5, %v8068_v45  ;;  %v9316_v14 = vld [vmem:[%s16604_s21 + $0x8] sm:$0x1] }
 0x542   : > { %v11285_v31 = vcombine.low %v16501_v10, %v16507_v20 }
 0x543   : > { %9032 = vmatmul.mubr.bf16.gmra.mrb[136].mxu1 %v16270_v32  ;;  %v10048_v32 = vld [vmem:[%s13141_s11 + $0x30] sm:$0xff]  ;;  %10085 = vperm.xlu1 %12808, %v10047_v26  }
 0x544   : > { %9039 = vmatprep.mubr.bf16.mxu1 %v16266_v59  ;;  %10090 = vperm.xlu0 %12807, %v10048_v32   ;;  %v10052_v59 = vld [vmem:[%s13141_s11 + $0x50] sm:$0xff] }
 0x547   : > { %10095 = vperm.xlu1 %12808, %v10049_v55  }
 0x548   : > { %10100 = vperm.xlu0 %12807, %v10050_v11  }
 0x54b   : > { %9040 = vmatmul.mubr.bf16.gmra.mrb[140].mxu1 %v16293_v56  ;;  %10105 = vperm.xlu1 %12808, %v10051_v9   ;;  %v10057_v56 = vld [vmem:[%s13141_s11 + $0x78] sm:$0xff]  ;;  %s12905_s11 = scalar_lea.vmem %s17464_s13, 6144 }
 0x54c   : > { %9047 = vmatprep.mubr.bf16.mxu1 %v16289_v36  ;;  %10110 = vperm.xlu0 %12807, %v10052_v59   ;;  %v12892_v36 = vld [vmem:[%s17528_s5 + $0x208] sm:$0xff]   ;;  %p12906_p2 = scmp.ne.s32.totalorder %s17464_s13, %s12905_s11 }
 0x54e   : > { %p12907_p4 = pnand %p12906_p2, %p13107_p3 }
 0x54f   : > { %10115 = vperm.xlu1 %12808, %v10053_v44  }
 0x550   : > { %10120 = vperm.xlu0 %12807, %v10054_v12   ;;  %p12908_p5 = pneg %p12907_p4 }
 0x553   : > { %9048 = vmatmul.mubr.bf16.gmra.mrb[144].mxu1 %v16307_v4  ;;  %10125 = vperm.xlu1 %12808, %v10055_v30   ;;  %v12894_v4 = vld [vmem:[%s17528_s5 + $0x210] sm:$0xff]  }
 0x554   : > { %9088 = vmatprep.mubr.bf16.mxu1 %v16320_v57  ;;  %10130 = vperm.xlu0 %12807, %v10056_v24   ;;  %v12896_v57 = vld [vmem:[%s17528_s5 + $0x218] sm:$0xff]  }
 0x557   : > { %10135 = vperm.xlu1 %12808, %v10057_v56  }
 0x55b   : > { %9089 = vmatmul.mubr.bf16.vlgmr.msra.gmra.mrb[148].mxu1 %v16221_v8  ;;  %v12898_v8 = vld [vmem:[%s17528_s5 + $0x220] sm:$0xff]  }
 0x55c   : > { %11965 = vmatpush3.bf16.msra.mxu1 %v16407_v2  ;;  %9096 = vmatprep.mubr.bf16.mxu1 %v16338_v0  ;;  %v12900_v0 = vld [vmem:[%s17528_s5 + $0x228] sm:$0xff]  }
 0x55d   : > { %11966 = vmatprep.subr.bf16.mxu1 %v12892_v36 }
 0x560   : > { %11967 = vmatpush3.bf16.msra.mxu1 %v12892_v36 }
 0x561   : > { %11968 = vmatprep.subr.bf16.mxu1 %v12894_v4 }
 0x563   : > { %9097 = vmatmul.mubr.bf16.gmra.mrb[152].mxu1 %v16238_v33  ;;  %v12902_v33 = vld [vmem:[%s17528_s5 + $0x230] sm:$0xff]  }
 0x564   : > { %9104 = vmatprep.mubr.bf16.mxu1 %v16350_v16  ;;  %11969 = vmatpush3.bf16.msra.mxu1 %v12894_v4 }
 0x565   : > { %11970 = vmatprep.subr.bf16.mxu1 %v12896_v57 }
 0x568   : > { %11971 = vmatpush3.bf16.msra.mxu1 %v12896_v57 }
 0x569   : > { %11972 = vmatprep.subr.bf16.mxu1 %v12898_v8 }
 0x56b   : > { %9105 = vmatmul.mubr.bf16.gmra.mrb[156].mxu1 %v16253_v42  ;;  %v12904_v42 = vld [vmem:[%s17528_s5 + $0x238] sm:$0xff]  }
 0x56c   : > { %9112 = vmatprep.mubr.bf16.mxu1 %v16364_v54  ;;  %11973 = vmatpush3.bf16.msra.mxu1 %v12898_v8 }
 0x56d   : > { %11974 = vmatprep.subr.bf16.mxu1 %v12900_v0 }
 0x56e   : > { %v11676_v16 = vpop.f32.mrb[52].mxu1 }
 0x56f   : > { %v11677_v2 = vpop.f32.mrb[53].mxu1 }
 0x570   : > { %v16550_v52 = vadd.f32 %v11677_v2, %v11676_v16  ;;  %v11679_v43 = vpop.f32.mrb[54].mxu1  ;;  %11975 = vmatpush3.bf16.msra.mxu1 %v12900_v0 }
 0x571   : > { %v11680_v45 = vpop.f32.mrb[55].mxu1  ;;  %11976 = vmatprep.subr.bf16.mxu1 %v12902_v33 }
 0x572   : > { %v11681_v5 = vadd.f32 %v11680_v45, %v11679_v43 }
 0x573   : > { %9113 = vmatmul.mubr.bf16.gmra.mrb[160].mxu1 %v16273_v17 }
 0x574   : > { %9120 = vmatprep.mubr.bf16.mxu1 %v16383_v29  ;;  %11977 = vmatpush3.bf16.msra.mxu1 %v12902_v33 }
 0x575   : > { %11978 = vmatprep.subr.bf16.mxu1 %v12904_v42 }
 0x576   : > { %v11682_v54 = vpop.f32.mrb[56].mxu1 }
 0x577   : > { %v11683_v26 = vpop.f32.mrb[57].mxu1 }
 0x578   : > { %v11684_v32 = vadd.f32 %v11683_v26, %v11682_v54  ;;  %v11685_v55 = vpop.f32.mrb[58].mxu1  ;;  %11979 = vmatpush3.bf16.msra.mxu1 %v12904_v42  ;;  %v17614_v26 = vcombine.low %v16444_v46, %v16450_v38  ;;  %v17617_v38 = vmax.f32 %v15670_v37, 0.0  ;;  %v17619_v37 = vcombine.low %v16454_v28, %v16464_v40 }
 0x579   : > { %v11686_v11 = vpop.f32.mrb[59].mxu1 }
 0x57a   : > { %v11687_v9 = vadd.f32 %v11686_v11, %v11685_v55 }
 0x57b   : > { %9121 = vmatmul.mubr.bf16.gmra.mrb[164].mxu1 %v16291_v47 }
 0x57c   : > { %9128 = vmatprep.mubr.bf16.mxu1 %v16393_v58 }
 0x57e   : > { %v11688_v59 = vpop.f32.mrb[60].mxu1 }
 0x57f   : > { %v11689_v44 = vpop.f32.mrb[61].mxu1 }
 0x580   : > { %v11690_v12 = vadd.f32 %v11689_v44, %v11688_v59  ;;  %v11691_v30 = vpop.f32.mrb[62].mxu1 }
 0x581   : > { %v11692_v17 = vpop.f32.mrb[63].mxu1 }
 0x582   : > { %v11693_v24 = vadd.f32 %v11692_v17, %v11691_v30 }
 0x583   : > { %9129 = vmatmul.mubr.bf16.gmra.mrb[168].mxu1 %v16297_v63  ;;  %v17612_v63 = vcombine.low %v16416_v48, %v16423_v62  ;;  %v17616_v48 = vmax.f32 %v15663_v13, 0.0 }
 0x584   : > { %9136 = vmatprep.mubr.bf16.mxu1 %v16412_v39 }
 0x585   : > { %10188 = vrot.lane.b32.xlu1 %v17616_v48, %s13005_s25 }
 0x586   : > { %v11694_v29 = vpop.f32.mrb[64].mxu1 }
 0x587   : > { %v11695_v56 = vpop.f32.mrb[65].mxu1 }
 0x588   : > { %v11696_v36 = vadd.f32 %v11695_v56, %v11694_v29  ;;  %v11697_v4 = vpop.f32.mrb[66].mxu1 }
 0x589   : > { %v11698_v57 = vpop.f32.mrb[67].mxu1 }
 0x58a   : > { %v11699_v8 = vadd.f32 %v11698_v57, %v11697_v4 }
 0x58b   : > { %9137 = vmatmul.mubr.bf16.gmra.mrb[172].mxu1 %v16302_v61 }
 0x58c   : > { %9144 = vmatprep.mubr.bf16.mxu1 %v16434_v3  ;;  %v17613_v3 = vcombine.low %v16427_v7, %v16438_v21  ;;  %v11286_v7 = vld [vmem:[%s17529_s6] ss:$0 sm:$0xff] }
 0x58d   : > { %v16589_v13 = vadd.f32 %v16550_v52, %v11286_v7  ;;  %v16591_v44 = vadd.f32 %v11681_v5, %v11286_v7  ;;  %v16593_v30 = vadd.f32 %v11684_v32, %v11286_v7  ;;  %v16595_v17 = vadd.f32 %v11687_v9, %v11286_v7 }
 0x58e   : > { %v11700_v47 = vpop.f32.mrb[68].mxu1  ;;  %v16597_v29 = vadd.f32 %v11690_v12, %v11286_v7  ;;  %v16607_v52 = vadd.f32 %v11693_v24, %v11286_v7  ;;  %v16609_v5 = vadd.f32 %v11696_v36, %v11286_v7  ;;  %v17620_v32 = vcombine.low %v16460_v34, %v16471_v60  ;;  %v9429_v34 = vld [vmem:[%s16604_s21] sm:$0xe] }
 0x58f   : > { %v11701_v58 = vpop.f32.mrb[69].mxu1  ;;  %v16616_v56 = vadd.f32 %v11699_v8, %v11286_v7  ;;  %v17621_v24 = vmax.f32 %v15708_v22, 0.0  ;;  %v17622_v36 = vmax.f32 %v15714_v49, 0.0 }
 0x590   : > { %v11702_v0 = vadd.f32 %v11701_v58, %v11700_v47  ;;  %v11703_v33 = vpop.f32.mrb[70].mxu1  ;;  %v9437_v47 = vunpack.c.l.bf16 %v9429_v34 }
 0x591   : > { %v11704_v16 = vpop.f32.mrb[71].mxu1 }
 0x592   : > { %v11705_v2 = vadd.f32 %v11704_v16, %v11703_v33  ;;  %v16618_v28 = vadd.f32 %v11702_v0, %v11286_v7  ;;  %v9270_v16 = vld [vmem:[%s16604_s21 + $0xc] sm:$0xff]  }
 0x593   : > { %9145 = vmatmul.mubr.bf16.gmra.mrb[176].mxu1 %v16309_v6  ;;  %v17615_v6 = vmax.f32 %v15659_v1, 0.0  ;;  %v17618_v1 = vmax.f32 %v15682_v50, 0.0  ;;  %v11522_v50 = vld [vmem:[%s16604_s21] sm:$0xff]  }
 0x594   : > { %11980 = vmatprep.mubr.bf16.mxu1 %v17612_v63  ;;  %v11523_v9 = vunpack.c.l.bf16 %v11522_v50  ;;  %v16614_v12 = vunpack.c.h.bf16 %v11522_v50  ;;  %v16620_v40 = vadd.f32 %v11705_v2, %v11286_v7 }
 0x595   : > { %10186 = vrot.lane.b32.xlu0 %v17615_v6, %s13005_s25  ;;  %10192 = vrot.lane.b32.xlu1 %v17618_v1, %s13005_s25  ;;  %v16650_v6 = vunpack.c.h.bf16 %v9270_v16 }
 0x596   : > { %v11706_v39 = vpop.f32.mrb[72].mxu1  ;;  %v9357_v57 = vrot.slane %v11523_v9, 1  ;;  %v9358_v8 = vrot.slane %v16614_v12, 1 }
 0x597   : > { %v11707_v43 = vpop.f32.mrb[73].mxu1  ;;  %v9363_v1 = vrot.slane %v16650_v6, 1 }
 0x598   : > { %v11708_v45 = vadd.f32 %v11707_v43, %v11706_v39  ;;  %v11709_v42 = vpop.f32.mrb[74].mxu1  ;;  %v9359_v63 = vsel %vm9356_vm6, %v9357_v57, %v9358_v8  ;;  %v9454_v39 = vrot.slane %v9437_v47, 2  ;;  %v9455_v43 = vrot.slane %v16614_v12, 2 }
 0x599   : > { %v11710_v54 = vpop.f32.mrb[75].mxu1  ;;  %10190 = vrot.lane.b32.xlu0 %v17617_v38, %s13005_s25  ;;  %10196 = vrot.lane.b32.xlu1 %v17622_v36, %s13005_s25 }
 0x59a   : > { %v11711_v61 = vadd.f32 %v11710_v54, %v11709_v42  ;;  %v16629_v60 = vadd.f32 %v11708_v45, %v11286_v7  ;;  %v17623_v42 = vmax.f32 %v15728_v41, 0.0  ;;  %v17624_v54 = vmax.f32 %v15734_v23, 0.0 }
 0x59b   : > { %11981 = vmatmul.mubr.bf16.vlgmr.msra.gmra.mrb[180].mxu1 %v17613_v3  ;;  %v11362_v3 = vld [vmem:[%s16604_s21 + $0xc] sm:$0xff]   ;;  %v9456_v41 = vsel %vm9453_vm7, %v9454_v39, %v9455_v43 }
 0x59c   : > { %11984 = vmatprep.mubr.bf16.mxu1 %v17614_v26  ;;  %v16632_v58 = vadd.f32 %v11711_v61, %v11286_v7  ;;  %v9413_v61 = vadd.f32 %v11523_v9, %v9359_v63  ;;  %v9286_v26 = vunpack.c.l.bf16 %v9270_v16  ;;  %v9460_v16 = vrot.slane %v16650_v6, 2 }
 0x59d   : > { %10194 = vrot.lane.b32.xlu0 %v17621_v24, %s13005_s25  ;;  %10200 = vrot.lane.b32.xlu1 %v17624_v54, %s13005_s25 }
 0x59e   : > { %v11712_v62 = vpop.f32.mrb[76].mxu1  ;;  %v9510_v23 = vadd.f32 %v9456_v41, %v9413_v61  ;;  %v9362_v38 = vrot.slane %v9286_v26, 1  ;;  %v17627_v61 = vmax.f32 %v15768_v53, 0.0 }
 0x59f   : > { %v11713_v21 = vpop.f32.mrb[77].mxu1 }
 0x5a0   : > { %v11714_v55 = vadd.f32 %v11713_v21, %v11712_v62  ;;  %v11715_v11 = vpop.f32.mrb[78].mxu1  ;;  %v9544_v21 = vunpack.c.l.bf16 %v11362_v3  ;;  %v9364_v19 = vsel %vm9356_vm6, %v9362_v38, %v9363_v1 }
 0x5a1   : > { %v11716_v46 = vpop.f32.mrb[79].mxu1  ;;  %10198 = vrot.lane.b32.xlu0 %v17623_v42, %s13005_s25  ;;  %10204 = vrot.lane.b32.xlu1 %v17626_v25, %s13005_s25  ;;  %v9415_v34 = vadd.f32 %v9364_v19, %v9286_v26  ;;  %v11420_v26 = vld [vmem:[%s16604_s21 + $0x18] sm:$0xe] }
 0x5a2   : > { %v11717_v59 = vadd.f32 %v11716_v46, %v11715_v11  ;;  %v16634_v0 = vadd.f32 %v11714_v55, %v11286_v7  ;;  %v16660_v55 = vunpack.c.h.bf16 %v11362_v3  ;;  %v11386_v11 = vld [vmem:[%s16604_s21 + $0xc] sm:$0xe]  ;;  %v11576_v46 = vld [vmem:[%s16604_s21 + $0x18] sm:$0xff]   ;;  %v9954_v53 = vunpack.c.l.bf16 %v11420_v26 }
 0x5a3   : > { %11985 = vmatmul.mubr.bf16.gmra.mrb[184].mxu1 %v17619_v37  ;;  %v9616_v37 = vrot.slane %v9544_v21, 1  ;;  %v9696_v50 = vunpack.c.l.bf16 %v11386_v11  ;;  %v16680_v35 = vunpack.c.h.bf16 %v11576_v46  ;;  %v9324_v11 = vunpack.c.l.bf16 %v9316_v14 }
 0x5a4   : > { %11988 = vmatprep.mubr.bf16.mxu1 %v17620_v32  ;;  %v16636_v33 = vadd.f32 %v11717_v59, %v11286_v7  ;;  %v16670_v32 = vunpack.c.l.bf16 %v11576_v46  ;;  %v9617_v9 = vrot.slane %v16660_v55, 1  ;;  %v9713_v36 = vrot.slane %v16660_v55, 2 }
 0x5a5   : > { %v9712_v24 = vrot.slane %v9696_v50, 2  ;;  %v16692_v47 = vrot.slane %v16680_v35, 1  ;;  %v16700_v42 = vrot.slane %v16680_v35, 2  ;;  %v9360_v25 = vrot.slane %v9324_v11, 1 }
 0x5a6   : > { %v11718_v4 = vpop.f32.mrb[80].mxu1  ;;  %v9618_v57 = vsel %vm9356_vm6, %v9616_v37, %v9617_v9 }
 0x5a7   : > { %v11719_v22 = vpop.f32.mrb[81].mxu1 }
 0x5a8   : > { %v11720_v49 = vadd.f32 %v11719_v22, %v11718_v4  ;;  %v11721_v2 = vpop.f32.mrb[82].mxu1  ;;  %v9438_v22 = vunpack.c.l.bf16 %v9430_v15 }
 0x5a9   : > { %v11722_v45 = vpop.f32.mrb[83].mxu1 }
 0x5aa   : > { %v16652_v48 = vadd.f32 %v11720_v49, %v11286_v7  ;;  %v11723_v62 = vadd.f32 %v11722_v45, %v11721_v2  ;;  %v11387_v49 = vld [vmem:[%s16604_s21 + $0x18] sm:$0xe]  ;;  %v9714_v45 = vsel %vm9453_vm7, %v9712_v24, %v9713_v36 }
 0x5ab   : > { %11989 = vmatmul.mubr.bf16.gmra.mrb[188].mxu1 %v11283_v27  ;;  %v17625_v27 = vmax.f32 %v15748_v18, 0.0  ;;  %v9874_v18 = vrot.slane %v16670_v32, 1 }
 0x5ac   : > { %v16665_v59 = vadd.f32 %v11723_v62, %v11286_v7  ;;  %11992 = vmatprep.mubr.bf16.mxu1 %v11284_v51  ;;  %v9560_v7 = vadd.f32 %v9544_v21, %v9510_v23  ;;  %v17628_v62 = vld [vmem:[#allocation30_spill] sm:$0xff]  ;;  %v9459_v21 = vrot.slane %v9438_v22, 2  ;;  %v9697_v23 = vunpack.c.l.bf16 %v11387_v49 }
 0x5ad   : > { %10202 = vrot.lane.b32.xlu0 %v17625_v27, %s13005_s25  ;;  %v16707_v3 = vsel %vm9356_vm6, %v9874_v18, %v16692_v47  ;;  %v17629_v41 = vmax.f32 %v17628_v62, 0.0  ;;  %v11398_v27 = vld [vmem:[%s16604_s21 + $0x24] sm:$0xff]   ;;  %v17630_v18 = vld [vmem:[#allocation31_spill] sm:$0xff] }
 0x5ae   : > { %v11740_v51 = vpop.f32.mrb[84].mxu1  ;;  %v9672_v39 = vadd.f32 %v9618_v57, %v9560_v7  ;;  %v9461_v50 = vsel %vm9453_vm7, %v9459_v21, %v9460_v16  ;;  %v9717_v15 = vrot.slane %v9697_v23, 2  ;;  %v9457_v7 = vrot.slane %v9324_v11, 2  ;;  %v17632_v57 = vld [vmem:[#allocation32_spill] sm:$0xff] }
 0x5af   : > { %v11741_v4 = vpop.f32.mrb[85].mxu1  ;;  %10208 = vrot.lane.b32.xlu1 %v17629_v41, %s13005_s25  ;;  %v9512_v24 = vadd.f32 %v9461_v50, %v9415_v34  ;;  %v17631_v10 = vmax.f32 %v17630_v18, 0.0  ;;  %v16732_v14 = vunpack.c.h.bf16 %v11398_v27  ;;  %v17633_v22 = vmax.f32 %v17632_v57, 0.0  ;;  %v11379_v57 = vld [vmem:[%s16604_s21 + $0x20] sm:$0x1] }
 0x5b0   : > { %v11742_v2 = vadd.f32 %v11741_v4, %v11740_v51  ;;  %v11743_v63 = vpop.f32.mrb[86].mxu1  ;;  %v9768_v37 = vadd.f32 %v9714_v45, %v9672_v39  ;;  %v9970_v51 = vrot.slane %v9954_v53, 2  ;;  %v9719_v20 = vsel %vm9453_vm7, %v9717_v15, %v16700_v42  ;;  %v11421_v4 = vld [vmem:[%s16604_s21 + $0x24] sm:$0xe]  ;;  %v11378_v45 = vld [vmem:[%s16604_s21 + $0x14] sm:$0x1] }
 0x5b1   : > { %v11744_v54 = vpop.f32.mrb[87].mxu1  ;;  %10206 = vrot.lane.b32.xlu0 %v17627_v61, %s13005_s25  ;;  %v9955_v39 = vunpack.c.l.bf16 %v11421_v4  ;;  %v9880_v26 = vrot.slane %v16732_v14, 1  ;;  %v9458_v62 = vsel %vm9453_vm7, %v9455_v43, %v9457_v7  ;;  %v9976_v15 = vrot.slane %v16732_v14, 2  ;;  %v17634_v43 = vld [vmem:[#allocation33_spill] sm:$0xff] }
 0x5b2   : > { %v16714_v46 = vadd.f32 %v11742_v2, %v16589_v13  ;;  %v11745_v38 = vadd.f32 %v11744_v54, %v11743_v63  ;;  %v9818_v13 = vadd.f32 %v16670_v32, %v9768_v37  ;;  %v9972_v2 = vsel %vm9453_vm7, %v9970_v51, %v16700_v42  ;;  %v10061_v53 = vpop.permute.xlu0 %10060 }
 0x5b3   : > { %11993 = vmatmul.mubr.bf16.gmra.mrb[192].mxu1 %v11285_v31  ;;  %v9804_v31 = vunpack.c.l.bf16 %v11398_v27  ;;  %10212 = vrot.lane.b32.xlu1 %v17633_v22, %s13005_s25  ;;  %v9562_v63 = vadd.f32 %v16670_v32, %v9512_v24  ;;  %v17635_v7 = vmax.f32 %v17634_v43, 0.0 }
 0x5b4   : > { %v16724_v19 = vadd.f32 %v11745_v38, %v16591_v44  ;;  %v9361_v44 = vsel %vm9356_vm6, %v9358_v8, %v9360_v25  ;;  %v9930_v49 = vadd.f32 %v16707_v3, %v9818_v13  ;;  %v9975_v38 = vrot.slane %v9955_v39, 2  ;;  %v11412_v25 = vld [vmem:[%s16604_s21 + $0x20] sm:$0x1]  ;;  %v17636_v13 = vld [vmem:[#allocation34_spill] sm:$0xff] }
 0x5b5   : > { %10210 = vrot.lane.b32.xlu0 %v17631_v10, %s13005_s25  ;;  %v9879_v61 = vrot.slane %v9804_v31, 1  ;;  %v9414_v8 = vadd.f32 %v16614_v12, %v9361_v44  ;;  %v9674_v11 = vadd.f32 %v16707_v3, %v9562_v63  ;;  %v9584_v12 = vunpack.c.l.bf16 %v11378_v45  ;;  %v9317_v44 = vld [vmem:[%s16604_s21 + $0x14] sm:$0x1] }
 0x5b6   : > { %v11746_v34 = vpop.f32.mrb[88].mxu1  ;;  %v10026_v23 = vadd.f32 %v9972_v2, %v9930_v49  ;;  %v17637_v51 = vmax.f32 %v17636_v13, 0.0  ;;  %v9977_v22 = vsel %vm9453_vm7, %v9975_v38, %v9976_v15 }
 0x5b7   : > { %v11747_v54 = vpop.f32.mrb[89].mxu1  ;;  %v9881_v50 = vsel %vm9356_vm6, %v9879_v61, %v9880_v26  ;;  %v9511_v27 = vadd.f32 %v9458_v62, %v9414_v8  ;;  %v9770_v4 = vadd.f32 %v9719_v20, %v9674_v11  ;;  %v9619_v49 = vrot.slane %v9584_v12, 1 }
 0x5b8   : > { %v11748_v41 = vadd.f32 %v11747_v54, %v11746_v34  ;;  %v11749_v21 = vpop.f32.mrb[90].mxu1  ;;  %10216 = vrot.lane.b32.xlu1 %v17637_v51, %s13005_s25  ;;  %v10138_v10 = vmul.f32 %v10061_v53, %v10026_v23  ;;  %v9715_v2 = vrot.slane %v9584_v12, 2  ;;  %v9325_v61 = vunpack.c.l.bf16 %v9317_v44  ;;  %v11413_v12 = vld [vmem:[%s16604_s21 + $0x2c] sm:$0x1] }
 0x5b9   : > { %v11750_v37 = vpop.f32.mrb[91].mxu1  ;;  %10214 = vrot.lane.b32.xlu0 %v17635_v7, %s13005_s25  ;;  %v9561_v34 = vadd.f32 %v16660_v55, %v9511_v27  ;;  %v9820_v45 = vadd.f32 %v9804_v31, %v9770_v4  ;;  %v9620_v20 = vsel %vm9356_vm6, %v9617_v9, %v9619_v49  ;;  %v9585_v8 = vunpack.c.l.bf16 %v11379_v57  ;;  %s17670_s25 = sand.u32 1, %s12975_s28  }
 0x5ba   : > { %v16764_v24 = vadd.f32 %v11748_v41, %v16593_v30  ;;  %v11751_v18 = vadd.f32 %v11750_v37, %v11749_v21  ;;  %v10154_v39 = vmax.f32 %v10138_v10, 0.0  ;;  %v9842_v30 = vunpack.c.l.bf16 %v11412_v25  ;;  %v10071_v43 = vpop.permute.xlu1 %10070  ;;  %v9431_v10 = vld [vmem:[%s16604_s21 + $0x18] sm:$0xe]  ;;  %s17471_s15 = scalar_lea.sflag [#allocation7], %s17670_s25 }
 0x5bb   : > { %v9716_v54 = vsel %vm9453_vm7, %v9713_v36, %v9715_v2  ;;  %v9932_v41 = vadd.f32 %v9881_v50, %v9820_v45  ;;  %v9673_v21 = vadd.f32 %v9620_v20, %v9561_v34  ;;  %v9365_v11 = vrot.slane %v9325_v61, 1  ;;  %v11366_v34 = vld [vmem:[%s16604_s21 + $0x24] sm:$0xff]  }
 0x5bc   : > { %v16773_v63 = vadd.f32 %v11751_v18, %v16595_v17  ;;  %v9877_v23 = vrot.slane %v9842_v30, 1  ;;  %v9973_v17 = vrot.slane %v9842_v30, 2  ;;  %v9462_v38 = vrot.slane %v9325_v61, 2 }
 0x5bd   : > { %10314 = vrot.lane.b32.xlu0 %v10154_v39, %s13006_s24  ;;  %v9624_v9 = vrot.slane %v9585_v8, 1  ;;  %v9720_v37 = vrot.slane %v9585_v8, 2  ;;  %v10028_v36 = vadd.f32 %v9977_v22, %v9932_v41  ;;  %v9769_v27 = vadd.f32 %v9716_v54, %v9673_v21  ;;  %v11388_v39 = vld [vmem:[%s16604_s21 + $0x24] sm:$0xe] }
 0x5be   : > { %v11752_v62 = vpop.f32.mrb[92].mxu1  ;;  %v9878_v50 = vsel %vm9356_vm6, %v16692_v47, %v9877_v23  ;;  %v9974_v7 = vsel %vm9453_vm7, %v16700_v42, %v9973_v17  ;;  %v9366_v13 = vsel %vm9356_vm6, %v9363_v1, %v9365_v11  ;;  %v9463_v51 = vsel %vm9453_vm7, %v9460_v16, %v9462_v38 }
 0x5bf   : > { %v11753_v31 = vpop.f32.mrb[93].mxu1  ;;  %v9625_v18 = vsel %vm9356_vm6, %v16692_v47, %v9624_v9  ;;  %v10140_v57 = vmul.f32 %v10071_v43, %v10028_v36  ;;  %v9819_v22 = vadd.f32 %v16680_v35, %v9769_v27  ;;  %v9416_v49 = vadd.f32 %v9366_v13, %v16650_v6  ;;  %v11577_v27 = vld [vmem:[%s16604_s21 + $0x30] sm:$0xff]  }
 0x5c0   : > { %v11754_v55 = vadd.f32 %v11753_v31, %v11752_v62  ;;  %v11755_v53 = vpop.f32.mrb[94].mxu1  ;;  %v9721_v1 = vsel %vm9453_vm7, %v16700_v42, %v9720_v37  ;;  %v9843_v2 = vunpack.c.l.bf16 %v11413_v12  ;;  %v9417_v16 = vadd.f32 %v16670_v32, %v16707_v3  ;;  %v11422_v13 = vld [vmem:[%s16604_s21 + $0x30] sm:$0xe] }
 0x5c1   : > { %v11756_v25 = vpop.f32.mrb[95].mxu1  ;;  %v9931_v30 = vadd.f32 %v9878_v50, %v9819_v22  ;;  %v9439_v20 = vunpack.c.l.bf16 %v9431_v10  ;;  %v9513_v54 = vadd.f32 %v9463_v51, %v9416_v49  ;;  %v9548_v62 = vunpack.c.l.bf16 %v11366_v34  ;;  %v9318_v50 = vld [vmem:[%s16604_s21 + $0x20] sm:$0x1] }
 0x5c2   : > { %v16797_v4 = vadd.f32 %v11754_v55, %v16597_v29  ;;  %v11757_v44 = vadd.f32 %v11756_v25, %v11755_v53  ;;  %v10156_v29 = vmax.f32 %v10140_v57, 0.0  ;;  %v9882_v61 = vrot.slane %v9843_v2, 1  ;;  %v11380_v57 = vld [vmem:[%s16604_s21 + $0x2c] sm:$0x1] }
 0x5c3   : > { %v9978_v8 = vrot.slane %v9843_v2, 2  ;;  %v10027_v6 = vadd.f32 %v9974_v7, %v9931_v30  ;;  %v9464_v21 = vrot.slane %v9439_v20, 2  ;;  %v16810_v23 = vunpack.c.h.bf16 %v11366_v34 }
 0x5c4   : > { %v16808_v45 = vadd.f32 %v11757_v44, %v16607_v52  ;;  %v9698_v17 = vunpack.c.l.bf16 %v11388_v39  ;;  %10318 = vrot.lane.b32.xlu0 %v10156_v29, %s13006_s24  ;;  %v10066_v52 = vpop.permute.xlu0 %10065  ;;  %v9563_v3 = vadd.f32 %v16680_v35, %v9513_v54  ;;  %v9883_v31 = vsel %vm9356_vm6, %v9880_v26, %v9882_v61 }
 0x5c5   : > { %v9979_v11 = vsel %vm9453_vm7, %v9976_v15, %v9978_v8  ;;  %v9626_v38 = vrot.slane %v9548_v62, 1  ;;  %v10139_v55 = vmul.f32 %v10066_v52, %v10027_v6  ;;  %v9466_v53 = vsel %vm9453_vm7, %v9464_v21, %v16700_v42 }
 0x5c6   : > { %v11758_v41 = vpop.f32.mrb[96].mxu1  ;;  %v9627_v36 = vrot.slane %v16810_v23, 1  ;;  %v9675_v25 = vadd.f32 %v9625_v18, %v9563_v3  ;;  %v9514_v43 = vadd.f32 %v9466_v53, %v9417_v16  ;;  %v9722_v26 = vrot.slane %v9698_v17, 2 }
 0x5c7   : > { %v11759_v32 = vpop.f32.mrb[97].mxu1  ;;  %v9723_v7 = vrot.slane %v16810_v23, 2  ;;  %v10155_v10 = vmax.f32 %v10139_v55, 0.0  ;;  %v16833_v2 = vunpack.c.l.bf16 %v11577_v27  ;;  %v16838_v16 = vunpack.c.h.bf16 %v11577_v27 }
 0x5c8   : > { %v11760_v9 = vadd.f32 %v11759_v32, %v11758_v41  ;;  %v11761_v37 = vpop.f32.mrb[98].mxu1  ;;  %v9628_v44 = vsel %vm9356_vm6, %v9626_v38, %v9627_v36  ;;  %v9771_v22 = vadd.f32 %v9721_v1, %v9675_v25  ;;  %v9564_v34 = vadd.f32 %v9548_v62, %v9514_v43 }
 0x5c9   : > { %v11762_v12 = vpop.f32.mrb[99].mxu1  ;;  %v9724_v49 = vsel %vm9453_vm7, %v9722_v26, %v9723_v7  ;;  %v9956_v39 = vunpack.c.l.bf16 %v11422_v13  ;;  %v9326_v29 = vunpack.c.l.bf16 %v9318_v50  ;;  %10316 = vrot.lane.b32.xlu1 %v10155_v10, %s13006_s24  ;;  %v9884_v20 = vrot.slane %v16833_v2, 1  ;;  %v10076_v26 = vpop.permute.xlu1 %10075 }
 0x5ca   : > { %v16828_v15 = vadd.f32 %v11760_v9, %v16609_v5  ;;  %v11763_v51 = vadd.f32 %v11762_v12, %v11761_v37  ;;  %v9821_v5 = vadd.f32 %v16732_v14, %v9771_v22  ;;  %v9676_v30 = vadd.f32 %v9628_v44, %v9564_v34  ;;  %v11414_v37 = vld [vmem:[%s16604_s21 + $0x38] sm:$0x1]  ;;  %v9274_v12 = vld [vmem:[%s16604_s21 + $0x24] sm:$0xff]  }
 0x5cb   : > { %v9586_v1 = vunpack.c.l.bf16 %v11380_v57  ;;  %v16844_v61 = vrot.slane %v16838_v16, 1  ;;  %v9980_v8 = vrot.slane %v9956_v39, 2  ;;  %v9370_v62 = vrot.slane %v9326_v29, 1  ;;  %v9432_v57 = vld [vmem:[%s16604_s21 + $0x24] sm:$0xe] }
 0x5cc   : > { %v16836_v18 = vadd.f32 %v11763_v51, %v16616_v56  ;;  %v16847_v56 = vrot.slane %v16838_v16, 2  ;;  %v9933_v6 = vadd.f32 %v9883_v31, %v9821_v5  ;;  %v9772_v21 = vadd.f32 %v9724_v49, %v9676_v30  ;;  %v10081_v5 = vpop.permute.xlu0 %10080 }
 0x5cd   : > { %v9467_v17 = vrot.slane %v9326_v29, 2  ;;  %v9629_v14 = vrot.slane %v9586_v1, 1  ;;  %v16851_v3 = vsel %vm9356_vm6, %v9884_v20, %v16844_v61  ;;  %v9371_v9 = vsel %vm9356_vm6, %v16692_v47, %v9370_v62 }
 0x5ce   : > { %v11764_v54 = vpop.f32.mrb[100].mxu1  ;;  %v9982_v38 = vsel %vm9453_vm7, %v9980_v8, %v16847_v56  ;;  %v10029_v53 = vadd.f32 %v9979_v11, %v9933_v6  ;;  %v9822_v31 = vadd.f32 %v16833_v2, %v9772_v21  ;;  %v9418_v27 = vadd.f32 %v16680_v35, %v9371_v9 }
 0x5cf   : > { %v11765_v41 = vpop.f32.mrb[101].mxu1  ;;  %v9468_v50 = vsel %vm9453_vm7, %v16700_v42, %v9467_v17  ;;  %v9630_v13 = vsel %vm9356_vm6, %v9627_v36, %v9629_v14  ;;  %v9725_v47 = vrot.slane %v9586_v1, 2  ;;  %v9844_v44 = vunpack.c.l.bf16 %v11414_v37 }
 0x5d0   : > { %v11766_v32 = vadd.f32 %v11765_v41, %v11764_v54  ;;  %v11767_v52 = vpop.f32.mrb[102].mxu1  ;;  %v10141_v51 = vmul.f32 %v10076_v26, %v10029_v53  ;;  %v9934_v10 = vadd.f32 %v16851_v3, %v9822_v31  ;;  %v9515_v11 = vadd.f32 %v9468_v50, %v9418_v27  ;;  %v11423_v31 = vld [vmem:[%s16604_s21 + $0x3c] sm:$0xe]  ;;  %v9319_v27 = vld [vmem:[%s16604_s21 + $0x2c] sm:$0x1] }
 0x5d1   : > { %v11768_v55 = vpop.f32.mrb[103].mxu1  ;;  %v9726_v42 = vsel %vm9453_vm7, %v9723_v7, %v9725_v47  ;;  %v9290_v22 = vunpack.c.l.bf16 %v9274_v12  ;;  %v9887_v39 = vrot.slane %v9844_v44, 1  ;;  %v9983_v30 = vrot.slane %v9844_v44, 2 }
 0x5d2   : > { %v16864_v25 = vadd.f32 %v11766_v32, %v16618_v28  ;;  %v11769_v43 = vadd.f32 %v11768_v55, %v11767_v52  ;;  %v16873_v28 = vunpack.c.h.bf16 %v9274_v12  ;;  %v10157_v34 = vmax.f32 %v10141_v51, 0.0 }
 0x5d3   : > { %v10030_v49 = vadd.f32 %v9982_v38, %v9934_v10  ;;  %v9565_v36 = vadd.f32 %v16810_v23, %v9515_v11  ;;  %v9372_v20 = vrot.slane %v9290_v22, 1  ;;  %v9440_v54 = vunpack.c.l.bf16 %v9432_v57  ;;  %v11402_v23 = vld [vmem:[%s16604_s21 + $0x3c] sm:$0xff]  }
 0x5d4   : > { %v16870_v35 = vadd.f32 %v11769_v43, %v16620_v40  ;;  %v9373_v1 = vrot.slane %v16873_v28, 1  ;;  %v11389_v40 = vld [vmem:[%s16604_s21 + $0x30] sm:$0xe]  ;;  %v9888_v41 = vsel %vm9356_vm6, %v16844_v61, %v9887_v39  ;;  %v9470_v6 = vrot.slane %v16873_v28, 2  ;;  %10320 = vrot.lane.b32.xlu1 %v10157_v34, %s13006_s24 }
 0x5d5   : > { %v10142_v62 = vmul.f32 %v10081_v5, %v10030_v49  ;;  %v9677_v7 = vadd.f32 %v9630_v13, %v9565_v36  ;;  %v9984_v14 = vsel %vm9453_vm7, %v16847_v56, %v9983_v30  ;;  %v9469_v52 = vrot.slane %v9440_v54, 2 }
 0x5d6   : > { %v11770_v29 = vpop.f32.mrb[104].mxu1  ;;  %v9374_v32 = vsel %vm9356_vm6, %v9372_v20, %v9373_v1  ;;  %v9699_v53 = vunpack.c.l.bf16 %v11389_v40  ;;  %v9808_v26 = vunpack.c.l.bf16 %v11402_v23  ;;  %v16893_v10 = vunpack.c.h.bf16 %v11402_v23 }
 0x5d7   : > { %v11771_v8 = vpop.f32.mrb[105].mxu1  ;;  %v10158_v9 = vmax.f32 %v10142_v62, 0.0  ;;  %v9773_v37 = vadd.f32 %v9726_v42, %v9677_v7  ;;  %v9419_v55 = vadd.f32 %v9374_v32, %v9290_v22  ;;  %v9471_v43 = vsel %vm9453_vm7, %v9469_v52, %v9470_v6  ;;  %v11415_v7 = vld [vmem:[%s16604_s21 + $0x44] sm:$0x1] }
 0x5d8   : > { %v11772_v21 = vadd.f32 %v11771_v8, %v11770_v29  ;;  %v11773_v17 = vpop.f32.mrb[106].mxu1  ;;  %v9727_v51 = vrot.slane %v9699_v53, 2  ;;  %v9889_v44 = vrot.slane %v9808_v26, 1  ;;  %v9957_v57 = vunpack.c.l.bf16 %v11423_v31 }
 0x5d9   : > { %v11774_v38 = vpop.f32.mrb[107].mxu1  ;;  %v9823_v13 = vadd.f32 %v16838_v16, %v9773_v37  ;;  %v9516_v47 = vadd.f32 %v9471_v43, %v9419_v55  ;;  %10322 = vrot.lane.b32.xlu0 %v10158_v9, %s13006_s24  ;;  %v9327_v42 = vunpack.c.l.bf16 %v9319_v27  ;;  %v9890_v36 = vrot.slane %v16893_v10, 1  ;;  %v9433_v43 = vld [vmem:[%s16604_s21 + $0x30] sm:$0xe] }
 0x5da   : > { %v16889_v50 = vadd.f32 %v11772_v21, %v16629_v60  ;;  %v11775_v12 = vadd.f32 %v11774_v38, %v11773_v17  ;;  %v11381_v60 = vld [vmem:[%s16604_s21 + $0x38] sm:$0x1]  ;;  %v9729_v49 = vsel %vm9453_vm7, %v9727_v51, %v16847_v56  ;;  %v9985_v29 = vrot.slane %v9957_v57, 2  ;;  %v10086_v21 = vpop.permute.xlu1 %10085  ;;  %v11370_v51 = vld [vmem:[%s16604_s21 + $0x3c] sm:$0xff]  }
 0x5db   : > { %v9935_v22 = vadd.f32 %v9888_v41, %v9823_v13  ;;  %v9566_v34 = vadd.f32 %v16833_v2, %v9516_v47  ;;  %v9986_v5 = vrot.slane %v16893_v10, 2  ;;  %v9375_v30 = vrot.slane %v9327_v42, 1 }
 0x5dc   : > { %v16897_v11 = vadd.f32 %v11775_v12, %v16632_v58  ;;  %v9472_v58 = vrot.slane %v9327_v42, 2  ;;  %v9891_v8 = vsel %vm9356_vm6, %v9889_v44, %v9890_v36  ;;  %v9587_v62 = vunpack.c.l.bf16 %v11381_v60  ;;  %v11390_v42 = vld [vmem:[%s16604_s21 + $0x3c] sm:$0xe] }
 0x5dd   : > { %v10031_v54 = vadd.f32 %v9984_v14, %v9935_v22  ;;  %v9678_v40 = vadd.f32 %v16851_v3, %v9566_v34  ;;  %v9987_v17 = vsel %vm9453_vm7, %v9985_v29, %v9986_v5  ;;  %v9376_v32 = vsel %vm9356_vm6, %v9373_v1, %v9375_v30 }
 0x5de   : > { %v11776_v39 = vpop.f32.mrb[108].mxu1  ;;  %v9473_v52 = vsel %vm9453_vm7, %v9470_v6, %v9472_v58  ;;  %v9420_v37 = vadd.f32 %v9376_v32, %v16873_v28  ;;  %v9634_v55 = vrot.slane %v9587_v62, 1  ;;  %v9730_v27 = vrot.slane %v9587_v62, 2 }
 0x5df   : > { %v11777_v20 = vpop.f32.mrb[109].mxu1  ;;  %v10143_v9 = vmul.f32 %v10086_v21, %v10031_v54  ;;  %v9774_v14 = vadd.f32 %v9729_v49, %v9678_v40  ;;  %v9845_v12 = vunpack.c.l.bf16 %v11415_v7  ;;  %v9441_v34 = vunpack.c.l.bf16 %v9433_v43 }
 0x5e0   : > { %v11778_v41 = vadd.f32 %v11777_v20, %v11776_v39  ;;  %v11779_v23 = vpop.f32.mrb[110].mxu1  ;;  %v9517_v1 = vadd.f32 %v9473_v52, %v9420_v37  ;;  %v9635_v6 = vsel %vm9356_vm6, %v16844_v61, %v9634_v55  ;;  %v9731_v28 = vsel %vm9453_vm7, %v16847_v56, %v9730_v27  ;;  %v11382_v27 = vld [vmem:[%s16604_s21 + $0x44] sm:$0x1] }
 0x5e1   : > { %v11780_v38 = vpop.f32.mrb[111].mxu1  ;;  %v10159_v13 = vmax.f32 %v10143_v9, 0.0  ;;  %v9824_v47 = vadd.f32 %v9808_v26, %v9774_v14  ;;  %v9892_v57 = vrot.slane %v9845_v12, 1  ;;  %v9421_v26 = vadd.f32 %v16833_v2, %v16851_v3  ;;  %v10091_v3 = vpop.permute.xlu0 %10090 }
 0x5e2   : > { %v16913_v53 = vadd.f32 %v11778_v41, %v16634_v0  ;;  %v11781_v31 = vadd.f32 %v11780_v38, %v11779_v23  ;;  %v9988_v0 = vrot.slane %v9845_v12, 2  ;;  %v9567_v22 = vadd.f32 %v16838_v16, %v9517_v1  ;;  %v11424_v38 = vld [vmem:[%s16604_s21 + $0x48] sm:$0xe] }
 0x5e3   : > { %v9936_v60 = vadd.f32 %v9891_v8, %v9824_v47  ;;  %10324 = vrot.lane.b32.xlu1 %v10159_v13, %s13006_s24  ;;  %v9552_v29 = vunpack.c.l.bf16 %v11370_v51  ;;  %v16931_v30 = vunpack.c.h.bf16 %v11370_v51  ;;  %v9474_v40 = vrot.slane %v9441_v34, 2 }
 0x5e4   : > { %v16920_v44 = vadd.f32 %v11781_v31, %v16636_v33  ;;  %v9893_v33 = vsel %vm9356_vm6, %v9890_v36, %v9892_v57  ;;  %v9989_v39 = vsel %vm9453_vm7, %v9986_v5, %v9988_v0  ;;  %v9679_v54 = vadd.f32 %v9635_v6, %v9567_v22  ;;  %v11578_v5 = vld [vmem:[%s16604_s21 + $0x48] sm:$0xff]   ;;  %v9320_v31 = vld [vmem:[%s16604_s21 + $0x38] sm:$0x1] }
 0x5e5   : > { %v10032_v20 = vadd.f32 %v9987_v17, %v9936_v60  ;;  %v9700_v8 = vunpack.c.l.bf16 %v11390_v42  ;;  %v9636_v7 = vrot.slane %v9552_v29, 1  ;;  %v9637_v41 = vrot.slane %v16931_v30, 1 }
 0x5e6   : > { %v11782_v49 = vpop.f32.mrb[112].mxu1  ;;  %v9733_v36 = vrot.slane %v16931_v30, 2  ;;  %v9775_v32 = vadd.f32 %v9731_v28, %v9679_v54  ;;  %v9476_v17 = vsel %vm9453_vm7, %v9474_v40, %v16847_v56  ;;  %v16951_v47 = vunpack.c.l.bf16 %v11578_v5  ;;  %v10096_v54 = vpop.permute.xlu1 %10095 }
 0x5e7   : > { %v11783_v58 = vpop.f32.mrb[113].mxu1  ;;  %v10144_v21 = vmul.f32 %v10091_v3, %v10032_v20  ;;  %v9732_v52 = vrot.slane %v9700_v8, 2  ;;  %v9518_v37 = vadd.f32 %v9476_v17, %v9421_v26  ;;  %v9638_v55 = vsel %vm9356_vm6, %v9636_v7, %v9637_v41  ;;  %v9278_v3 = vld [vmem:[%s16604_s21 + $0x3c] sm:$0xff]  }
 0x5e8   : > { %v11784_v62 = vadd.f32 %v11783_v58, %v11782_v49  ;;  %v11785_v2 = vpop.f32.mrb[114].mxu1  ;;  %v9825_v43 = vadd.f32 %v16893_v10, %v9775_v32  ;;  %v16956_v6 = vunpack.c.h.bf16 %v11578_v5  ;;  %v9958_v51 = vunpack.c.l.bf16 %v11424_v38 }
 0x5e9   : > { %v11786_v23 = vpop.f32.mrb[115].mxu1  ;;  %v10160_v12 = vmax.f32 %v10144_v21, 0.0  ;;  %v9734_v13 = vsel %vm9453_vm7, %v9732_v52, %v9733_v36  ;;  %v9568_v1 = vadd.f32 %v9552_v29, %v9518_v37  ;;  %v9894_v57 = vrot.slane %v16951_v47, 1 }
 0x5ea   : > { %v16940_v9 = vadd.f32 %v11784_v62, %v16652_v48  ;;  %v11787_v14 = vadd.f32 %v11786_v23, %v11785_v2  ;;  %v9937_v28 = vadd.f32 %v9893_v33, %v9825_v43  ;;  %v9328_v0 = vunpack.c.l.bf16 %v9320_v31  ;;  %v11416_v2 = vld [vmem:[%s16604_s21 + $0x50] sm:$0x1] }
 0x5eb   : > { %v9588_v42 = vunpack.c.l.bf16 %v11382_v27  ;;  %10326 = vrot.lane.b32.xlu0 %v10160_v12, %s13006_s24  ;;  %v9680_v60 = vadd.f32 %v9638_v55, %v9568_v1  ;;  %v16961_v22 = vrot.slane %v16956_v6, 1  ;;  %v16964_v49 = vrot.slane %v16956_v6, 2  ;;  %v9434_v27 = vld [vmem:[%s16604_s21 + $0x3c] sm:$0xe] }
 0x5ec   : > { %v16954_v48 = vadd.f32 %v11787_v14, %v16665_v59  ;;  %v9990_v59 = vrot.slane %v9958_v51, 2  ;;  %v10033_v34 = vadd.f32 %v9989_v39, %v9937_v28  ;;  %v9380_v33 = vrot.slane %v9328_v0, 1 }
 0x5ed   : > { %v9477_v29 = vrot.slane %v9328_v0, 2  ;;  %v9776_v40 = vadd.f32 %v9734_v13, %v9680_v60  ;;  %v16968_v8 = vsel %vm9356_vm6, %v9894_v57, %v16961_v22  ;;  %v9639_v62 = vrot.slane %v9588_v42, 1  ;;  %v10101_v60 = vpop.permute.xlu0 %10100 }
 0x5ee   : > { %v11804_v10 = vpop.f32.mrb[116].mxu1  ;;  %v10145_v5 = vmul.f32 %v10096_v54, %v10033_v34  ;;  %v9992_v39 = vsel %vm9453_vm7, %v9990_v59, %v16964_v49  ;;  %v9381_v23 = vsel %vm9356_vm6, %v16844_v61, %v9380_v33  ;;  %v9735_v37 = vrot.slane %v9588_v42, 2  ;;  %v17001_v42 = vld [vmem:[%s16604_s21 + $0x54] sm:$0xff]  }
 0x5ef   : > { %v11805_v26 = vpop.f32.mrb[117].mxu1  ;;  %v9478_v21 = vsel %vm9453_vm7, %v16847_v56, %v9477_v29  ;;  %v9826_v52 = vadd.f32 %v16951_v47, %v9776_v40  ;;  %v9422_v38 = vadd.f32 %v16838_v16, %v9381_v23  ;;  %v9846_v55 = vunpack.c.l.bf16 %v11416_v2 }
 0x5f0   : > { %v11806_v58 = vadd.f32 %v11805_v26, %v11804_v10  ;;  %v11807_v20 = vpop.f32.mrb[118].mxu1  ;;  %v10161_v14 = vmax.f32 %v10145_v5, 0.0  ;;  %v9294_v31 = vunpack.c.l.bf16 %v9278_v3  ;;  %v16988_v43 = vunpack.c.h.bf16 %v9278_v3  ;;  %v11425_v3 = vld [vmem:[%s16604_s21 + $0x54] sm:$0xe] }
 0x5f1   : > { %v11808_v7 = vpop.f32.mrb[119].mxu1  ;;  %v9938_v61 = vadd.f32 %v16968_v8, %v9826_v52  ;;  %v9519_v56 = vadd.f32 %v9478_v21, %v9422_v38  ;;  %v9640_v13 = vsel %vm9356_vm6, %v9637_v41, %v9639_v62  ;;  %v9736_v16 = vsel %vm9453_vm7, %v9733_v36, %v9735_v37  ;;  %v9321_v21 = vld [vmem:[%s16604_s21 + $0x44] sm:$0x1] }
 0x5f2   : > { %v16979_v32 = vadd.f32 %v11806_v58, %v16714_v46  ;;  %v11809_v17 = vadd.f32 %v11808_v7, %v11807_v20  ;;  %v11391_v46 = vld [vmem:[%s16604_s21 + $0x48] sm:$0xe]  ;;  %v9382_v1 = vrot.slane %v9294_v31, 1  ;;  %10328 = vrot.lane.b32.xlu1 %v10161_v14, %s13006_s24  ;;  %v9383_v57 = vrot.slane %v16988_v43, 1 }
 0x5f3   : > { %v9569_v28 = vadd.f32 %v16931_v30, %v9519_v56  ;;  %v9442_v0 = vunpack.c.l.bf16 %v9434_v27  ;;  %v9897_v41 = vrot.slane %v9846_v55, 1  ;;  %v9993_v59 = vrot.slane %v9846_v55, 2  ;;  %v10106_v55 = vpop.permute.xlu1 %10105 }
 0x5f4   : > { %v16985_v12 = vadd.f32 %v11809_v17, %v16724_v19  ;;  %v10034_v19 = vadd.f32 %v9992_v39, %v9938_v61  ;;  %v9480_v26 = vrot.slane %v16988_v43, 2  ;;  %v9701_v36 = vunpack.c.l.bf16 %v11391_v46  ;;  %v11383_v17 = vld [vmem:[%s16604_s21 + $0x50] sm:$0x1] }
 0x5f5   : > { %v9681_v58 = vadd.f32 %v9640_v13, %v9569_v28  ;;  %v9384_v30 = vsel %vm9356_vm6, %v9382_v1, %v9383_v57  ;;  %v9479_v40 = vrot.slane %v9442_v0, 2  ;;  %v9812_v2 = vunpack.c.l.bf16 %v17001_v42  ;;  %v11417_v1 = vld [vmem:[%s16604_s21 + $0x5c] sm:$0x1] }
 0x5f6   : > { %v11810_v51 = vpop.f32.mrb[120].mxu1  ;;  %v10146_v29 = vmul.f32 %v10101_v60, %v10034_v19  ;;  %v9423_v54 = vadd.f32 %v9384_v30, %v9294_v31  ;;  %v9737_v62 = vrot.slane %v9701_v36, 2  ;;  %v9898_v52 = vsel %vm9356_vm6, %v16961_v22, %v9897_v41 }
 0x5f7   : > { %v11811_v10 = vpop.f32.mrb[121].mxu1  ;;  %v9777_v23 = vadd.f32 %v9736_v16, %v9681_v58  ;;  %v9994_v38 = vsel %vm9453_vm7, %v16964_v49, %v9993_v59  ;;  %v9481_v14 = vsel %vm9453_vm7, %v9479_v40, %v9480_v26  ;;  %v17018_v37 = vunpack.c.h.bf16 %v17001_v42 }
 0x5f8   : > { %v11812_v34 = vadd.f32 %v11811_v10, %v11810_v51  ;;  %v11813_v33 = vpop.f32.mrb[122].mxu1  ;;  %v10162_v39 = vmax.f32 %v10146_v29, 0.0  ;;  %v9520_v27 = vadd.f32 %v9481_v14, %v9423_v54  ;;  %v9959_v61 = vunpack.c.l.bf16 %v11425_v3  ;;  %v10111_v10 = vpop.permute.xlu0 %10110 }
 0x5f9   : > { %v11814_v20 = vpop.f32.mrb[123].mxu1  ;;  %v9827_v31 = vadd.f32 %v16956_v6, %v9777_v23  ;;  %v9899_v56 = vrot.slane %v9812_v2, 1  ;;  %v9900_v46 = vrot.slane %v17018_v37, 1  ;;  %v9329_v13 = vunpack.c.l.bf16 %v9321_v21 }
 0x5fa   : > { %v17008_v7 = vadd.f32 %v11812_v34, %v16764_v24  ;;  %v11815_v5 = vadd.f32 %v11814_v20, %v11813_v33  ;;  %10330 = vrot.lane.b32.xlu0 %v10162_v39, %s13006_s24  ;;  %v9589_v16 = vunpack.c.l.bf16 %v11383_v17  ;;  %v9570_v28 = vadd.f32 %v16951_v47, %v9520_v27  ;;  %v17040_v17 = vpop.permute.xlu1 %10115 }
 0x5fb   : > { %v9939_v19 = vadd.f32 %v9898_v52, %v9827_v31  ;;  %v9996_v0 = vrot.slane %v17018_v37, 2  ;;  %v9995_v60 = vrot.slane %v9959_v61, 2  ;;  %v9385_v41 = vrot.slane %v9329_v13, 1  ;;  %v9435_v52 = vld [vmem:[%s16604_s21 + $0x48] sm:$0xe] }
 0x5fc   : > { %v17021_v24 = vadd.f32 %v11815_v5, %v16773_v63  ;;  %v9739_v63 = vsel %vm9453_vm7, %v9737_v62, %v16964_v49  ;;  %v9482_v59 = vrot.slane %v9329_v13, 2  ;;  %v9644_v36 = vrot.slane %v9589_v16, 1  ;;  %v11392_v31 = vld [vmem:[%s16604_s21 + $0x54] sm:$0xe]  ;;  %v11579_v13 = vld [vmem:[%s16604_s21 + $0x60] sm:$0xff]  }
 0x5fd   : > { %v10035_v29 = vadd.f32 %v9994_v38, %v9939_v19  ;;  %v9682_v58 = vadd.f32 %v16968_v8, %v9570_v28  ;;  %v9847_v30 = vunpack.c.l.bf16 %v11417_v1  ;;  %v9901_v54 = vsel %vm9356_vm6, %v9899_v56, %v9900_v46 }
 0x5fe   : > { %v11816_v51 = vpop.f32.mrb[124].mxu1  ;;  %v9386_v40 = vsel %vm9356_vm6, %v9383_v57, %v9385_v41  ;;  %v9483_v62 = vsel %vm9453_vm7, %v9480_v26, %v9482_v59  ;;  %v9740_v3 = vrot.slane %v9589_v16, 2  ;;  %v9997_v38 = vsel %vm9453_vm7, %v9995_v60, %v9996_v0  ;;  %v11374_v26 = vld [vmem:[%s16604_s21 + $0x54] sm:$0xff]  }
 0x5ff   : > { %v11817_v42 = vpop.f32.mrb[125].mxu1  ;;  %v10147_v23 = vmul.f32 %v10106_v55, %v10035_v29  ;;  %v9778_v21 = vadd.f32 %v9739_v63, %v9682_v58  ;;  %v9424_v14 = vadd.f32 %v9386_v40, %v16988_v43  ;;  %v9645_v57 = vsel %vm9356_vm6, %v16961_v22, %v9644_v36 }
 0x600   : > { %v11818_v34 = vadd.f32 %v11817_v42, %v11816_v51  ;;  %v11819_v33 = vpop.f32.mrb[126].mxu1  ;;  %v9902_v56 = vrot.slane %v9847_v30, 1  ;;  %v9998_v1 = vrot.slane %v9847_v30, 2  ;;  %v17057_v51 = vpop.permute.xlu0 %10120  ;;  %v9425_v43 = vadd.f32 %v16951_v47, %v16968_v8 }
 0x601   : > { %v11820_v20 = vpop.f32.mrb[127].mxu1  ;;  %v10163_v27 = vmax.f32 %v10147_v23, 0.0  ;;  %v9828_v61 = vadd.f32 %v9812_v2, %v9778_v21  ;;  %v9521_v16 = vadd.f32 %v9483_v62, %v9424_v14  ;;  %v9443_v19 = vunpack.c.l.bf16 %v9435_v52  ;;  %v17070_v30 = vpop.permute.xlu1 %10125  ;;  %v9322_v14 = vld [vmem:[%s16604_s21 + $0x50] sm:$0x1] }
 0x602   : > { %v17038_v5 = vadd.f32 %v11818_v34, %v16797_v4  ;;  %v11821_v39 = vadd.f32 %v11820_v20, %v11819_v33  ;;  %v9741_v4 = vsel %vm9453_vm7, %v16964_v49, %v9740_v3  ;;  %v9556_v42 = vunpack.c.l.bf16 %v11374_v26 }
 0x603   : > { %v9940_v63 = vadd.f32 %v9901_v54, %v9828_v61  ;;  %v17061_v60 = vunpack.c.h.bf16 %v11374_v26  ;;  %v9702_v41 = vunpack.c.l.bf16 %v11392_v31  ;;  %10332 = vrot.lane.b32.xlu1 %v10163_v27, %s13006_s24  ;;  %v9571_v2 = vadd.f32 %v16956_v6, %v9521_v16  ;;  %v11384_v61 = vld [vmem:[%s16604_s21 + $0x5c] sm:$0x1] }
 0x604   : > { %v17054_v55 = vadd.f32 %v11821_v39, %v16808_v45  ;;  %v9484_v59 = vrot.slane %v9443_v19, 2  ;;  %v17065_v36 = vunpack.c.l.bf16 %v11579_v13  ;;  %v17067_v34 = vunpack.c.h.bf16 %v11579_v13 }
 0x605   : > { %v10036_v8 = vadd.f32 %v9997_v38, %v9940_v63  ;;  %v9646_v29 = vrot.slane %v9556_v42, 1  ;;  %v9647_v58 = vrot.slane %v17061_v60, 1  ;;  %v9683_v54 = vadd.f32 %v9645_v57, %v9571_v2  ;;  %v11426_v38 = vld [vmem:[%s16604_s21 + $0x60] sm:$0xe] }
 0x606   : > { %v11822_v28 = vpop.f32.mrb[128].mxu1  ;;  %v9486_v40 = vsel %vm9453_vm7, %v9484_v59, %v16964_v49  ;;  %v9742_v62 = vrot.slane %v9702_v41, 2  ;;  %v9743_v3 = vrot.slane %v17061_v60, 2  ;;  %v9903_v31 = vsel %vm9356_vm6, %v9900_v46, %v9902_v56  ;;  %v11418_v41 = vld [vmem:[%s16604_s21 + $0x68] sm:$0x1] }
 0x607   : > { %v11823_v45 = vpop.f32.mrb[129].mxu1  ;;  %v10148_v21 = vmul.f32 %v10111_v10, %v10036_v8  ;;  %v9522_v52 = vadd.f32 %v9486_v40, %v9425_v43  ;;  %v9779_v26 = vadd.f32 %v9741_v4, %v9683_v54  ;;  %v9999_v57 = vsel %vm9453_vm7, %v9996_v0, %v9998_v1 }
 0x608   : > { %v11824_v33 = vadd.f32 %v11823_v45, %v11822_v28  ;;  %v11825_v47 = vpop.f32.mrb[130].mxu1  ;;  %v9648_v27 = vsel %vm9356_vm6, %v9646_v29, %v9647_v58  ;;  %v9744_v4 = vsel %vm9453_vm7, %v9742_v62, %v9743_v3  ;;  %v9904_v46 = vrot.slane %v17065_v36, 1 }
 0x609   : > { %v11826_v20 = vpop.f32.mrb[131].mxu1  ;;  %v10164_v13 = vmax.f32 %v10148_v21, 0.0  ;;  %v9572_v16 = vadd.f32 %v9556_v42, %v9522_v52  ;;  %v9829_v43 = vadd.f32 %v17018_v37, %v9779_v26  ;;  %v9960_v56 = vunpack.c.l.bf16 %v11426_v38  ;;  %v17104_v42 = vpop.permute.xlu1 %10135 }
 0x60a   : > { %v17076_v39 = vadd.f32 %v11824_v33, %v16828_v15  ;;  %v11827_v23 = vadd.f32 %v11826_v20, %v11825_v47  ;;  %v17088_v15 = vpop.permute.xlu0 %10130  ;;  %v9330_v19 = vunpack.c.l.bf16 %v9322_v14  ;;  %v17097_v28 = vrot.slane %v17067_v34, 1 }
 0x60b   : > { %v9684_v1 = vadd.f32 %v9648_v27, %v9572_v16  ;;  %v17100_v63 = vrot.slane %v17067_v34, 2  ;;  %10334 = vrot.lane.b32.xlu0 %v10164_v13, %s13006_s24  ;;  %v9941_v37 = vadd.f32 %v9903_v31, %v9829_v43  ;;  %v10000_v2 = vrot.slane %v9960_v56, 2  ;;  %v11393_v56 = vld [vmem:[%s16604_s21 + $0x60] sm:$0xe] }
 0x60c   : > { %v17091_v10 = vadd.f32 %v11827_v23, %v16836_v18  ;;  %v9590_v18 = vunpack.c.l.bf16 %v11384_v61  ;;  %v9390_v59 = vrot.slane %v9330_v19, 1  ;;  %v9487_v33 = vrot.slane %v9330_v19, 2  ;;  %v9282_v61 = vld [vmem:[%s16604_s21 + $0x54] sm:$0xff]  }
 0x60d   : > { %v9780_v20 = vadd.f32 %v9744_v4, %v9684_v1  ;;  %v10037_v23 = vadd.f32 %v9999_v57, %v9941_v37  ;;  %v9848_v38 = vunpack.c.l.bf16 %v11418_v41  ;;  %v17121_v57 = vsel %vm9356_vm6, %v9904_v46, %v17097_v28  ;;  %v17127_v16 = vpop.permute.xlu1 %10188 }
 0x60e   : > { %v11828_v0 = vpop.f32.mrb[132].mxu1  ;;  %v17106_v47 = vpop.permute.xlu0 %10186  ;;  %v9649_v54 = vrot.slane %v9590_v18, 1  ;;  %v9745_v40 = vrot.slane %v9590_v18, 2  ;;  %v9391_v21 = vsel %vm9356_vm6, %v16961_v22, %v9390_v59  ;;  %v9488_v52 = vsel %vm9453_vm7, %v16964_v49, %v9487_v33  ;;  %v17141_v59 = vld [vmem:[%s16604_s21 + $0x6c] sm:$0xff]  }
 0x60f   : > { %v11829_v45 = vpop.f32.mrb[133].mxu1  ;;  %v9830_v31 = vadd.f32 %v17065_v36, %v9780_v20  ;;  %v9426_v27 = vadd.f32 %v16956_v6, %v9391_v21  ;;  %v10149_v13 = vmul.f32 %v17040_v17, %v10037_v23  ;;  %v10002_v22 = vsel %vm9453_vm7, %v10000_v2, %v17100_v63 }
 0x610   : > { %v11830_v8 = vadd.f32 %v11829_v45, %v11828_v0  ;;  %v11831_v29 = vpop.f32.mrb[134].mxu1  ;;  %v9650_v49 = vsel %vm9356_vm6, %v9647_v58, %v9649_v54  ;;  %v9746_v46 = vsel %vm9453_vm7, %v9743_v3, %v9745_v40  ;;  %v9907_v0 = vrot.slane %v9848_v38, 1 }
 0x611   : > { %v11832_v62 = vpop.f32.mrb[135].mxu1  ;;  %v9942_v17 = vadd.f32 %v17121_v57, %v9830_v31  ;;  %v9523_v43 = vadd.f32 %v9488_v52, %v9426_v27  ;;  %v10165_v19 = vmax.f32 %v10149_v13, 0.0  ;;  %v9298_v1 = vunpack.c.l.bf16 %v9282_v61  ;;  %v17146_v20 = vpop.permute.xlu1 %10192 }
 0x612   : > { %v17113_v14 = vadd.f32 %v11830_v8, %v16864_v25  ;;  %v11833_v26 = vadd.f32 %v11832_v62, %v11831_v29  ;;  %v9436_v25 = vld [vmem:[%s16604_s21 + $0x54] sm:$0xe]  ;;  %v17129_v4 = vpop.permute.xlu0 %10190  ;;  %v17137_v18 = vunpack.c.h.bf16 %v9282_v61  ;;  %v10003_v37 = vrot.slane %v9848_v38, 2  ;;  %v11427_v61 = vld [vmem:[%s16604_s21 + $0x6c] sm:$0xe] }
 0x613   : > { %v10038_v41 = vadd.f32 %v10002_v22, %v9942_v17  ;;  %v9573_v45 = vadd.f32 %v17061_v60, %v9523_v43  ;;  %v9444_v2 = vunpack.c.l.bf16 %v9436_v25  ;;  %v9392_v33 = vrot.slane %v9298_v1, 1  ;;  %10336 = vrot.lane.b32.xlu1 %v10165_v19, %s13006_s24  ;;  %v11385_v17 = vld [vmem:[%s16604_s21 + $0x68] sm:$0x1] }
 0x614   : > { %v17132_v6 = vadd.f32 %v11833_v26, %v16870_v35  ;;  %v9393_v8 = vrot.slane %v17137_v18, 1  ;;  %v9490_v3 = vrot.slane %v17137_v18, 2  ;;  %v9703_v29 = vunpack.c.l.bf16 %v11393_v56 }
 0x615   : > { %v10150_v60 = vmul.f32 %v17057_v51, %v10038_v41  ;;  %v9685_v62 = vadd.f32 %v9650_v49, %v9573_v45  ;;  %v9489_v23 = vrot.slane %v9444_v2, 2  ;;  %v9816_v31 = vunpack.c.l.bf16 %v17141_v59  ;;  %v9323_v49 = vld [vmem:[%s16604_s21 + $0x5c] sm:$0x1]  ;;  %v17167_v41 = vpop.permute.xlu1 %10196 }
 0x616   : > { %v11834_v58 = vpop.f32.mrb[136].mxu1  ;;  %v17149_v21 = vpop.permute.xlu0 %10194  ;;  %v9394_v38 = vsel %vm9356_vm6, %v9392_v33, %v9393_v8  ;;  %v9747_v26 = vrot.slane %v9703_v29, 2  ;;  %v17154_v27 = vunpack.c.h.bf16 %v17141_v59  ;;  %v9908_v43 = vsel %vm9356_vm6, %v17097_v28, %v9907_v0  ;;  %v11419_v29 = vld [vmem:[%s16604_s21 + $0x74] sm:$0x1]  ;;  %s13008_s21 = smov [#allocation6]  }
 0x617   : > { %v11835_v35 = vpop.f32.mrb[137].mxu1  ;;  %v10166_v25 = vmax.f32 %v10150_v60, 0.0  ;;  %v9781_v51 = vadd.f32 %v9746_v46, %v9685_v62  ;;  %v9427_v56 = vadd.f32 %v9394_v38, %v9298_v1  ;;  %v9491_v19 = vsel %vm9453_vm7, %v9489_v23, %v9490_v3 }
 0x618   : > { %v11836_v54 = vadd.f32 %v11835_v35, %v11834_v58  ;;  %v11837_v40 = vpop.f32.mrb[138].mxu1  ;;  %v9749_v58 = vsel %vm9453_vm7, %v9747_v26, %v17100_v63  ;;  %v10004_v46 = vsel %vm9453_vm7, %v17100_v63, %v10003_v37  ;;  %v9961_v2 = vunpack.c.l.bf16 %v11427_v61 }
 0x619   : > { %v11838_v52 = vpop.f32.mrb[139].mxu1  ;;  %v9831_v45 = vadd.f32 %v17067_v34, %v9781_v51  ;;  %10338 = vrot.lane.b32.xlu0 %v10166_v25, %s13006_s24  ;;  %v9524_v1 = vadd.f32 %v9491_v19, %v9427_v56  ;;  %v9909_v59 = vrot.slane %v9816_v31, 1  ;;  %v9331_v35 = vunpack.c.l.bf16 %v9323_v49  ;;  %v17182_v61 = vpop.permute.xlu1 %10200 }
 0x61a   : > { %v17158_v13 = vadd.f32 %v11836_v54, %v16889_v50  ;;  %v11839_v22 = vadd.f32 %v11838_v52, %v11837_v40  ;;  %v17176_v0 = vpop.permute.xlu0 %10198  ;;  %v9591_v33 = vunpack.c.l.bf16 %v11385_v17  ;;  %v10005_v60 = vrot.slane %v9961_v2, 2 }
 0x61b   : > { %v9943_v40 = vadd.f32 %v9908_v43, %v9831_v45  ;;  %v10006_v62 = vrot.slane %v17154_v27, 2  ;;  %v9574_v37 = vadd.f32 %v17065_v36, %v9524_v1  ;;  %v9395_v52 = vrot.slane %v9331_v35, 1 }
 0x61c   : > { %v17170_v50 = vadd.f32 %v11839_v22, %v16897_v11  ;;  %v9910_v11 = vrot.slane %v17154_v27, 1  ;;  %v9492_v38 = vrot.slane %v9331_v35, 2  ;;  %v9654_v26 = vrot.slane %v9591_v33, 1 }
 0x61d   : > { %v10039_v51 = vadd.f32 %v10004_v46, %v9943_v40  ;;  %v9750_v49 = vrot.slane %v9591_v33, 2  ;;  %v9849_v17 = vunpack.c.l.bf16 %v11419_v29  ;;  %v9686_v19 = vadd.f32 %v17121_v57, %v9574_v37 }
 0x61e   : > { %v11840_v54 = vpop.f32.mrb[140].mxu1  ;;  %v9396_v45 = vsel %vm9356_vm6, %v9393_v8, %v9395_v52  ;;  %v9493_v2 = vsel %vm9453_vm7, %v9490_v3, %v9492_v38  ;;  %v9655_v36 = vsel %vm9356_vm6, %v17097_v28, %v9654_v26  ;;  %v9911_v57 = vsel %vm9356_vm6, %v9909_v59, %v9910_v11  ;;  %v17640_v52 = vld [vmem:[#allocation15_spill] sm:$0xff] }
 0x61f   : > { %v11841_v23 = vpop.f32.mrb[141].mxu1  ;;  %v17184_v56 = vpop.permute.xlu0 %10202  ;;  %v10151_v46 = vmul.f32 %v17070_v30, %v10039_v51  ;;  %v9428_v33 = vadd.f32 %v9396_v45, %v17137_v18  ;;  %v9782_v29 = vadd.f32 %v9749_v58, %v9686_v19  ;;  %v10007_v8 = vsel %vm9453_vm7, %v10005_v60, %v10006_v62  ;;  %v17638_v60 = vld [vmem:[#allocation14_spill] sm:$0xff]  ;;  %v17644_v51 = vld [vmem:[#allocation17_spill] sm:$0xff] }
 0x620   : > { %v11842_v22 = vadd.f32 %v11841_v23, %v11840_v54  ;;  %v11843_v25 = vpop.f32.mrb[142].mxu1  ;;  %v9751_v28 = vsel %vm9453_vm7, %v17100_v63, %v9750_v49  ;;  %v9912_v54 = vrot.slane %v9849_v17, 1  ;;  %v10008_v40 = vrot.slane %v9849_v17, 2  ;;  %v17646_v19 = vld [vmem:[#allocation18_spill] sm:$0xff] }
 0x621   : > { %v11844_v43 = vpop.f32.mrb[143].mxu1  ;;  %v10167_v30 = vmax.f32 %v10151_v46, 0.0  ;;  %v9525_v18 = vadd.f32 %v9493_v2, %v9428_v33  ;;  %v9832_v59 = vadd.f32 %v9816_v31, %v9782_v29  ;;  %v17639_v23 = vmax.f32 %v17638_v60, 0.0  ;;  %v17642_v31 = vld [vmem:[#allocation16_spill] sm:$0xff] }
 0x622   : > { %v17192_v1 = vadd.f32 %v11842_v22, %v16913_v53  ;;  %v11845_v35 = vadd.f32 %v11844_v43, %v11843_v25  ;;  %v17204_v53 = vpop.permute.xlu1 %10204  ;;  %v17641_v38 = vmax.f32 %v17640_v52, 0.0  ;;  %v17643_v22 = vmax.f32 %v17642_v31, 0.0  ;;  %v17650_v29 = vld [vmem:[#allocation20_spill] sm:$0xff] }
 0x623   : > { %v17209_v58 = vpop.permute.xlu0 %10206  ;;  %v10363_v63 = vsel %vm10362_vm8, %v17639_v23, %v17106_v47  ;;  %10340 = vrot.lane.b32.xlu1 %v10167_v30, %s13006_s24  ;;  %v17645_v49 = vmax.f32 %v17644_v51, 0.0  ;;  %v9944_v43 = vadd.f32 %v9911_v57, %v9832_v59  ;;  %v17647_v45 = vmax.f32 %v17646_v19, 0.0 }
 0x624   : > { %v17207_v3 = vadd.f32 %v11845_v35, %v16920_v44  ;;  %v9575_v44 = vadd.f32 %v17067_v34, %v9525_v18  ;;  %10413 = vst [vmem:[%s13143_s10] sm:$0xff] %v10363_v63  ;;  %v10364_v26 = vsel %vm10362_vm8, %v17641_v38, %v17127_v16  ;;  %v10365_v25 = vsel %vm10362_vm8, %v17643_v22, %v17129_v4  ;;  %v17648_v35 = vld [vmem:[#allocation19_spill] sm:$0xff]  ;;  %v17652_v63 = vld [vmem:[#allocation21_spill] sm:$0xff] }
 0x625   : > { %v10366_v34 = vsel %vm10362_vm8, %v17645_v49, %v17146_v20  ;;  %10416 = vst [vmem:[%s13143_s10 + $0x18] sm:$0xff] %v10364_v26  ;;  %10419 = vst [vmem:[%s13143_s10 + $0x30] sm:$0xff] %v10365_v25  ;;  %v10367_v2 = vsel %vm10362_vm8, %v17647_v45, %v17149_v21  ;;  %v17649_v46 = vmax.f32 %v17648_v35, 0.0  ;;  %v17651_v30 = vmax.f32 %v17650_v29, 0.0  ;;  %v17654_v26 = vld [vmem:[#allocation22_spill] sm:$0xff]  ;;  %v17660_v45 = vld [vmem:[#allocation25_spill] sm:$0xff] }
 0x626   : > { %v11846_v37 = vpop.f32.mrb[144].mxu1  ;;  %10422 = vst [vmem:[%s13143_s10 + $0x48] sm:$0xff] %v10366_v34  ;;  %v17245_v18 = vpop.permute.xlu1 %10208  ;;  %v9687_v23 = vadd.f32 %v9655_v36, %v9575_v44  ;;  %10425 = vst [vmem:[%s13143_s10 + $0x60] sm:$0xff] %v10367_v2  ;;  %v17653_v52 = vmax.f32 %v17652_v63, 0.0  ;;  %v17655_v31 = vmax.f32 %v17654_v26, 0.0  ;;  %v10040_v36 = vadd.f32 %v10007_v8, %v9944_v43  ;;  %v17656_v44 = vld [vmem:[#allocation23_spill] sm:$0xff] }
 0x627   : > { %v11847_v17 = vpop.f32.mrb[145].mxu1  ;;  %v10368_v33 = vsel %vm10362_vm8, %v17649_v46, %v17167_v41  ;;  %v10369_v57 = vsel %vm10362_vm8, %v17651_v30, %v17176_v0  ;;  %v17258_v25 = vpop.permute.xlu0 %10210  ;;  %v17657_v51 = vmax.f32 %v17656_v44, 0.0  ;;  %v17658_v34 = vld [vmem:[#allocation24_spill] sm:$0xff]  ;;  %v17661_v2 = vmax.f32 %v17660_v45, 0.0 }
 0x628   : > { %v11848_v59 = vadd.f32 %v11847_v17, %v11846_v37  ;;  %v11849_v60 = vpop.f32.mrb[146].mxu1  ;;  %10428 = vst [vmem:[%s13143_s10 + $0x78] sm:$0xff] %v10368_v33  ;;  %10431 = vst [vmem:[%s13143_s10 + $0x90] sm:$0xff] %v10369_v57  ;;  %v10370_v38 = vsel %vm10362_vm8, %v17653_v52, %v17182_v61  ;;  %v10371_v22 = vsel %vm10362_vm8, %v17655_v31, %v17184_v56  ;;  %v17659_v17 = vmax.f32 %v17658_v34, 0.0  ;;  %v17662_v33 = vld [vmem:[#allocation26_spill] sm:$0xff] }
 0x629   : > { %v11850_v37 = vpop.f32.mrb[147].mxu1  ;;  %10434 = vst [vmem:[%s13143_s10 + $0xa8] sm:$0xff] %v10370_v38  ;;  %10437 = vst [vmem:[%s13143_s10 + $0xc0] sm:$0xff] %v10371_v22  ;;  %v10372_v49 = vsel %vm10362_vm8, %v17657_v51, %v17204_v53  ;;  %v10374_v35 = vsel %vm10362_vm8, %v17661_v2, %v17245_v18  ;;  %v9783_v43 = vadd.f32 %v9751_v28, %v9687_v23  ;;  %v17663_v29 = vmax.f32 %v17662_v33, 0.0  ;;  %v17664_v23 = vld [vmem:[#allocation27_spill] sm:$0xff] }
 0x62a   : > { %v10373_v19 = vsel %vm10362_vm8, %v17659_v17, %v17209_v58  ;;  %v17275_v46 = vadd.f32 %v11848_v59, %v16940_v9  ;;  %v11851_v8 = vadd.f32 %v11850_v37, %v11849_v60  ;;  %10440 = vst [vmem:[%s13143_s10 + $0xd8] sm:$0xff] %v10372_v49  ;;  %10446 = vst [vmem:[%s13143_s10 + $0x108] sm:$0xff] %v10374_v35  ;;  %v17291_v59 = vpop.permute.xlu1 %10212  ;;  %v17665_v63 = vmax.f32 %v17664_v23, 0.0  ;;  %v17668_v49 = vld [vmem:[#allocation29_spill] sm:$0xff] }
 0x62b   : > { %10443 = vst [vmem:[%s13143_s10 + $0xf0] sm:$0xff] %v10373_v19  ;;  %v10375_v30 = vsel %vm10362_vm8, %v17663_v29, %v17258_v25  ;;  %v17285_v57 = vmul.f32 %v17088_v15, %v10040_v36  ;;  %v9913_v9 = vsel %vm9356_vm6, %v9910_v11, %v9912_v54  ;;  %v9833_v60 = vadd.f32 %v17154_v27, %v9783_v43  ;;  %v17301_v15 = vpop.permute.xlu0 %10214  ;;  %v17666_v54 = vld [vmem:[#allocation28_spill] sm:$0xff] }
 0x62c   : > { %10449 = vst [vmem:[%s13143_s10 + $0x120] sm:$0xff] %v10375_v30  ;;  %v17294_v28 = vadd.f32 %v11851_v8, %v16954_v48  ;;  %v10376_v52 = vsel %vm10362_vm8, %v17665_v63, %v17291_v59  ;;  %v10009_v11 = vsel %vm9453_vm7, %v10006_v62, %v10008_v40  ;;  %v17667_v38 = vmax.f32 %v17666_v54, 0.0 }
 0x62d   : > { %10452 = vst [vmem:[%s13143_s10 + $0x138] sm:$0xff] %v10376_v52  ;;  %v9945_v31 = vadd.f32 %v9913_v9, %v9833_v60  ;;  %v17669_v27 = vmax.f32 %v17668_v49, 0.0 }
 0x62e   : > { %v10377_v48 = vsel %vm10362_vm8, %v17667_v38, %v17301_v15  ;;  %v11868_v26 = vpop.f32.mrb[148].mxu1  ;;  %v17312_v37 = vpop.permute.xlu1 %10216 }
 0x62f   : > { %10455 = vst [vmem:[%s13143_s10 + $0x150] sm:$0xff] %v10377_v48  ;;  %v11869_v22 = vpop.f32.mrb[149].mxu1  ;;  %v10041_v51 = vadd.f32 %v10009_v11, %v9945_v31  ;;  %v10378_v62 = vsel %vm10362_vm8, %v17669_v27, %v17312_v37 }
 0x630   : > { %v11870_v36 = vadd.f32 %v11869_v22, %v11868_v26  ;;  %v11871_v44 = vpop.f32.mrb[150].mxu1  ;;  %10458 = vst [vmem:[%s13143_s10 + $0x168] sm:$0xff] %v10378_v62 }
 0x631   : > { %v11872_v40 = vpop.f32.mrb[151].mxu1  ;;  %v17320_v17 = vmul.f32 %v17104_v42, %v10041_v51 }
 0x632   : > { %v11873_v34 = vadd.f32 %v11872_v40, %v11871_v44  ;;  %v9091_v19 = vadd.f32 %v11870_v36, %v16979_v32 }
 0x634   : > { %v17324_v45 = vadd.f32 %v11873_v34, %v16985_v12 }
 0x636   : > { %v11874_v2 = vpop.f32.mrb[152].mxu1 }
 0x637   : > { %v11875_v35 = vpop.f32.mrb[153].mxu1 }
 0x638   : > { %v11876_v8 = vadd.f32 %v11875_v35, %v11874_v2  ;;  %v11877_v43 = vpop.f32.mrb[154].mxu1 }
 0x639   : > { %v11878_v33 = vpop.f32.mrb[155].mxu1 }
 0x63a   : > { %v11879_v29 = vadd.f32 %v11878_v33, %v11877_v43  ;;  %v9099_v30 = vadd.f32 %v11876_v8, %v17008_v7 }
 0x63c   : > { %v9102_v9 = vadd.f32 %v11879_v29, %v17021_v24 }
 0x63e   : > { %v11880_v60 = vpop.f32.mrb[156].mxu1 }
 0x63f   : > { %v11881_v23 = vpop.f32.mrb[157].mxu1 }
 0x640   : > { %v11882_v63 = vadd.f32 %v11881_v23, %v11880_v60  ;;  %v11883_v42 = vpop.f32.mrb[158].mxu1 }
 0x641   : > { %v11884_v52 = vpop.f32.mrb[159].mxu1 }
 0x642   : > { %v11885_v11 = vadd.f32 %v11884_v52, %v11883_v42  ;;  %v9107_v32 = vadd.f32 %v11882_v63, %v17038_v5 }
 0x644   : > { %v17330_v12 = vadd.f32 %v11885_v11, %v17054_v55 }
 0x646   : > { %v11886_v54 = vpop.f32.mrb[160].mxu1 }
 0x647   : > { %v11887_v38 = vpop.f32.mrb[161].mxu1 }
 0x648   : > { %v11888_v48 = vadd.f32 %v11887_v38, %v11886_v54  ;;  %v11889_v26 = vpop.f32.mrb[162].mxu1 }
 0x649   : > { %v11890_v31 = vpop.f32.mrb[163].mxu1 }
 0x64a   : > { %v11891_v22 = vadd.f32 %v11890_v31, %v11889_v26  ;;  %v9115_v7 = vadd.f32 %v11888_v48, %v17076_v39 }
 0x64c   : > { %v9118_v24 = vadd.f32 %v11891_v22, %v17091_v10 }
 0x64e   : > { %v11892_v36 = vpop.f32.mrb[164].mxu1 }
 0x64f   : > { %v11893_v44 = vpop.f32.mrb[165].mxu1 }
 0x650   : > { %v11894_v51 = vadd.f32 %v11893_v44, %v11892_v36  ;;  %v11895_v49 = vpop.f32.mrb[166].mxu1 }
 0x651   : > { %v11896_v27 = vpop.f32.mrb[167].mxu1 }
 0x652   : > { %v11897_v62 = vadd.f32 %v11896_v27, %v11895_v49  ;;  %v9123_v5 = vadd.f32 %v11894_v51, %v17113_v14 }
 0x654   : > { %v17336_v55 = vadd.f32 %v11897_v62, %v17132_v6 }
 0x656   : > { %v11898_v40 = vpop.f32.mrb[168].mxu1 }
 0x657   : > { %v11899_v34 = vpop.f32.mrb[169].mxu1 }
 0x658   : > { %v11900_v2 = vadd.f32 %v11899_v34, %v11898_v40  ;;  %v11901_v35 = vpop.f32.mrb[170].mxu1 }
 0x659   : > { %v11902_v8 = vpop.f32.mrb[171].mxu1 }
 0x65a   : > { %v11903_v43 = vadd.f32 %v11902_v8, %v11901_v35  ;;  %v9131_v39 = vadd.f32 %v11900_v2, %v17158_v13 }
 0x65c   : > { %v9134_v10 = vadd.f32 %v11903_v43, %v17170_v50 }
 0x65e   : > { %v11904_v33 = vpop.f32.mrb[172].mxu1 }
 0x65f   : > { %v11905_v29 = vpop.f32.mrb[173].mxu1 }
 0x660   : > { %v11906_v60 = vadd.f32 %v11905_v29, %v11904_v33  ;;  %v11907_v23 = vpop.f32.mrb[174].mxu1 }
 0x661   : > { %v11908_v63 = vpop.f32.mrb[175].mxu1 }
 0x662   : > { %v11909_v42 = vadd.f32 %v11908_v63, %v11907_v23  ;;  %v9139_v14 = vadd.f32 %v11906_v60, %v17192_v1 }
 0x664   : > { %v17342_v6 = vadd.f32 %v11909_v42, %v17207_v3 }
 0x666   : > { %v11910_v52 = vpop.f32.mrb[176].mxu1 }
 0x667   : > { %v11911_v11 = vpop.f32.mrb[177].mxu1 }
 0x668   : > { %v11912_v54 = vadd.f32 %v11911_v11, %v11910_v52  ;;  %v11913_v38 = vpop.f32.mrb[178].mxu1 }
 0x669   : > { %v11914_v48 = vpop.f32.mrb[179].mxu1 }
 0x66a   : > { %v11915_v26 = vadd.f32 %v11914_v48, %v11913_v38  ;;  %v9147_v13 = vadd.f32 %v11912_v54, %v17275_v46 }
 0x66c   : > { %v9150_v50 = vadd.f32 %v11915_v26, %v17294_v28 }
 0x66e   : > { %v11982_v31 = vpop.f32.mrb[180].mxu1 }
 0x66f   : > { %v9196_v22 = vadd.f32 %v11982_v31, %v9099_v30  ;;  %v9187_v36 = vpop.f32.mrb[181].mxu1 }
 0x670   : > { %v9188_v44 = vadd.f32 %v9187_v36, %v9091_v19  ;;  %v11983_v51 = vpop.f32.mrb[182].mxu1 }
 0x671   : > { %v9252_v49 = vmax.f32 %v9196_v22, 0.0  ;;  %v9199_v1 = vadd.f32 %v11983_v51, %v9102_v9  ;;  %v9190_v27 = vpop.f32.mrb[183].mxu1 }
 0x672   : > { %v9191_v3 = vadd.f32 %v9190_v27, %v17324_v45  ;;  %v9250_v40 = vmax.f32 %v9188_v44, 0.0 }
 0x673   : > { %v9253_v62 = vmax.f32 %v9199_v1, 0.0  ;;  %10254 = vrot.lane.b32.xlu0 %v9252_v49, %s13007_s26 }
 0x674   : > { %v9251_v34 = vmax.f32 %v9191_v3, 0.0 }
 0x675   : > { %10256 = vrot.lane.b32.xlu1 %v9253_v62, %s13007_s26 }
 0x676   : > { %v11986_v46 = vpop.f32.mrb[184].mxu1 }
 0x677   : > { %v9212_v28 = vadd.f32 %v11986_v46, %v9115_v7  ;;  %v9203_v2 = vpop.f32.mrb[185].mxu1  ;;  %10250 = vrot.lane.b32.xlu0 %v9250_v40, %s13007_s26 }
 0x678   : > { %v9204_v19 = vadd.f32 %v9203_v2, %v9107_v32  ;;  %v11987_v30 = vpop.f32.mrb[186].mxu1 }
 0x679   : > { %v9256_v35 = vmax.f32 %v9212_v28, 0.0  ;;  %v9215_v9 = vadd.f32 %v11987_v30, %v9118_v24  ;;  %v9206_v8 = vpop.f32.mrb[187].mxu1  ;;  %10252 = vrot.lane.b32.xlu1 %v9251_v34, %s13007_s26 }
 0x67a   : > { %v9207_v45 = vadd.f32 %v9206_v8, %v17330_v12  ;;  %v9254_v33 = vmax.f32 %v9204_v19, 0.0 }
 0x67b   : > { %v9257_v43 = vmax.f32 %v9215_v9, 0.0  ;;  %10262 = vrot.lane.b32.xlu0 %v9256_v35, %s13007_s26 }
 0x67c   : > { %v9255_v7 = vmax.f32 %v9207_v45, 0.0 }
 0x67d   : > { %10264 = vrot.lane.b32.xlu1 %v9257_v43, %s13007_s26 }
 0x67e   : > { %v11990_v29 = vpop.f32.mrb[188].mxu1 }
 0x67f   : > { %v9228_v60 = vadd.f32 %v11990_v29, %v9131_v39  ;;  %v9219_v23 = vpop.f32.mrb[189].mxu1  ;;  %10258 = vrot.lane.b32.xlu0 %v9254_v33, %s13007_s26 }
 0x680   : > { %v9220_v32 = vadd.f32 %v9219_v23, %v9123_v5  ;;  %v11991_v63 = vpop.f32.mrb[190].mxu1 }
 0x681   : > { %v9260_v24 = vmax.f32 %v9228_v60, 0.0  ;;  %v9231_v42 = vadd.f32 %v11991_v63, %v9134_v10  ;;  %v9222_v52 = vpop.f32.mrb[191].mxu1  ;;  %10260 = vrot.lane.b32.xlu1 %v9255_v7, %s13007_s26 }
 0x682   : > { %v9223_v12 = vadd.f32 %v9222_v52, %v17336_v55  ;;  %v9258_v54 = vmax.f32 %v9220_v32, 0.0 }
 0x683   : > { %v9261_v11 = vmax.f32 %v9231_v42, 0.0  ;;  %10270 = vrot.lane.b32.xlu0 %v9260_v24, %s13007_s26 }
 0x684   : > { %v9259_v39 = vmax.f32 %v9223_v12, 0.0 }
 0x685   : > { %10272 = vrot.lane.b32.xlu1 %v9261_v11, %s13007_s26 }
 0x686   : > { %v11994_v38 = vpop.f32.mrb[192].mxu1 }
 0x687   : > { %v9244_v48 = vadd.f32 %v11994_v38, %v9147_v13  ;;  %v9235_v26 = vpop.f32.mrb[193].mxu1  ;;  %10266 = vrot.lane.b32.xlu0 %v9258_v54, %s13007_s26  ;;  %v10168_v13 = vmax.f32 %v17285_v57, 0.0 }
 0x688   : > { %v9236_v5 = vadd.f32 %v9235_v26, %v9139_v14  ;;  %v11995_v31 = vpop.f32.mrb[194].mxu1  ;;  %v10169_v14 = vmax.f32 %v17320_v17, 0.0 }
 0x689   : > { %v9264_v10 = vmax.f32 %v9244_v48, 0.0  ;;  %v9247_v22 = vadd.f32 %v11995_v31, %v9150_v50  ;;  %v9238_v36 = vpop.f32.mrb[195].mxu1  ;;  %10268 = vrot.lane.b32.xlu1 %v9259_v39, %s13007_s26  ;;  %v10317_v50 = vpop.permute.xlu1 %10316 }
 0x68a   : > { %v9239_v55 = vadd.f32 %v9238_v36, %v17342_v6  ;;  %v9262_v51 = vmax.f32 %v9236_v5, 0.0  ;;  %v10315_v6 = vpop.permute.xlu0 %10314 }
 0x68b   : > { %v9265_v44 = vmax.f32 %v9247_v22, 0.0  ;;  %10278 = vrot.lane.b32.xlu0 %v9264_v10, %s13007_s26 }
 0x68c   : > { %v9263_v49 = vmax.f32 %v9239_v55, 0.0 }
 0x68d   : > { %10280 = vrot.lane.b32.xlu1 %v9265_v44, %s13007_s26  ;;  %v10321_v27 = vpop.permute.xlu1 %10320 }
 0x68e   : > { %v10319_v1 = vpop.permute.xlu0 %10318 }
 0x68f   : > { %10274 = vrot.lane.b32.xlu0 %v9262_v51, %s13007_s26 }
 0x691   : > { %10276 = vrot.lane.b32.xlu1 %v9263_v49, %s13007_s26  ;;  %v10325_v62 = vpop.permute.xlu1 %10324 }
 0x692   : > { %v10323_v3 = vpop.permute.xlu0 %10322 }
 0x693   : > { %10342 = vrot.lane.b32.xlu0 %v10168_v13, %s13006_s24 }
 0x695   : > { %10344 = vrot.lane.b32.xlu1 %v10169_v14, %s13006_s24  ;;  %v10329_v46 = vpop.permute.xlu1 %10328  ;;  %s12909_s24 = sshll.u32 %s13008_s21, 4  ;;  %s12910_s24 = int_to_ptr.vmem [resolvable:$false] %s12909_s24 }
 0x696   : > { %v10327_v40 = vpop.permute.xlu0 %10326  ;;  %s12911_s26 = scalar_lea.vmem %s12910_s24, 12288  ;;  %p12912_p6 = scmp.lt.s32.totalorder %s17464_s13, %s12910_s24 }
 0x697   : > { %p12913_p7 = scmp.lt.s32.totalorder %s12911_s26, %s12905_s11 }
 0x699   : > { %v17370_v57 = vpop.permute.xlu1 %10332  ;;  %p12914_p9 = por %p12913_p7, %p12912_p6 }
 0x69a   : > { %v10331_v34 = vpop.permute.xlu0 %10330 }
 0x69b   : > { %p12915_p10 = pnand %p12914_p9, %p12908_p5 }
 0x69d   : > { %v10337_v28 = vpop.permute.xlu1 %10336 }
 0x69e   : > { %v10335_v17 = vpop.permute.xlu0 %10334 }
 0x6a1   : > { %v17374_v19 = vpop.permute.xlu1 %10340 }
 0x6a2   : > { %v17372_v2 = vpop.permute.xlu0 %10338 }
 0x6e5   : > { %v10255_v30 = vpop.permute.xlu0 %10254 }
 0x6e6   : > { %v10382_v35 = vsel %vm10379_vm9, %v17129_v4, %v10255_v30  ;;  %v10399_v9 = vsel %vm10396_vm10, %v10255_v30, %v10319_v1 }
 0x6e7   : > { %10420 = vst [vmem:[%s13143_s10 + $0x38] sm:$0xff] %v10382_v35  ;;  %10421 = vst [vmem:[%s13143_s10 + $0x40] sm:$0xff] %v10399_v9  ;;  %v10257_v8 = vpop.permute.xlu1 %10256 }
 0x6e8   : > { %v10383_v45 = vsel %vm10379_vm9, %v17146_v20, %v10257_v8  ;;  %v10400_v43 = vsel %vm10396_vm10, %v10257_v8, %v10321_v27 }
 0x6e9   : > { %10423 = vst [vmem:[%s13143_s10 + $0x50] sm:$0xff] %v10383_v45  ;;  %10424 = vst [vmem:[%s13143_s10 + $0x58] sm:$0xff] %v10400_v43  ;;  %v10251_v33 = vpop.permute.xlu0 %10250 }
 0x6ea   : > { %v10380_v4 = vsel %vm10379_vm9, %v17106_v47, %v10251_v33  ;;  %v10397_v29 = vsel %vm10396_vm10, %v10251_v33, %v10315_v6 }
 0x6eb   : > { %10414 = vst [vmem:[%s13143_s10 + $0x8] sm:$0xff] %v10380_v4  ;;  %10415 = vst [vmem:[%s13143_s10 + $0x10] sm:$0xff] %v10397_v29  ;;  %v10253_v7 = vpop.permute.xlu1 %10252 }
 0x6ec   : > { %v10381_v20 = vsel %vm10379_vm9, %v17127_v16, %v10253_v7  ;;  %v10398_v60 = vsel %vm10396_vm10, %v10253_v7, %v10317_v50 }
 0x6ed   : > { %10417 = vst [vmem:[%s13143_s10 + $0x20] sm:$0xff] %v10381_v20  ;;  %10418 = vst [vmem:[%s13143_s10 + $0x28] sm:$0xff] %v10398_v60  ;;  %v10263_v23 = vpop.permute.xlu0 %10262 }
 0x6ee   : > { %v10386_v47 = vsel %vm10379_vm9, %v17176_v0, %v10263_v23  ;;  %v10403_v32 = vsel %vm10396_vm10, %v10263_v23, %v10327_v40 }
 0x6ef   : > { %10432 = vst [vmem:[%s13143_s10 + $0x98] sm:$0xff] %v10386_v47  ;;  %10433 = vst [vmem:[%s13143_s10 + $0xa0] sm:$0xff] %v10403_v32  ;;  %v10265_v63 = vpop.permute.xlu1 %10264 }
 0x6f0   : > { %v10387_v16 = vsel %vm10379_vm9, %v17182_v61, %v10265_v63  ;;  %v10404_v24 = vsel %vm10396_vm10, %v10265_v63, %v10329_v46 }
 0x6f1   : > { %10435 = vst [vmem:[%s13143_s10 + $0xb0] sm:$0xff] %v10387_v16  ;;  %10436 = vst [vmem:[%s13143_s10 + $0xb8] sm:$0xff] %v10404_v24  ;;  %v10259_v42 = vpop.permute.xlu0 %10258 }
 0x6f2   : > { %v10384_v0 = vsel %vm10379_vm9, %v17149_v21, %v10259_v42  ;;  %v10401_v52 = vsel %vm10396_vm10, %v10259_v42, %v10323_v3 }
 0x6f3   : > { %10426 = vst [vmem:[%s13143_s10 + $0x68] sm:$0xff] %v10384_v0  ;;  %10427 = vst [vmem:[%s13143_s10 + $0x70] sm:$0xff] %v10401_v52  ;;  %v10261_v12 = vpop.permute.xlu1 %10260 }
 0x6f4   : > { %v10385_v61 = vsel %vm10379_vm9, %v17167_v41, %v10261_v12  ;;  %v10402_v11 = vsel %vm10396_vm10, %v10261_v12, %v10325_v62 }
 0x6f5   : > { %10429 = vst [vmem:[%s13143_s10 + $0x80] sm:$0xff] %v10385_v61  ;;  %10430 = vst [vmem:[%s13143_s10 + $0x88] sm:$0xff] %v10402_v11  ;;  %v10271_v54 = vpop.permute.xlu0 %10270 }
 0x6f6   : > { %v10390_v21 = vsel %vm10379_vm9, %v17209_v58, %v10271_v54  ;;  %v10407_v38 = vsel %vm10396_vm10, %v10271_v54, %v10335_v17 }
 0x6f7   : > { %10444 = vst [vmem:[%s13143_s10 + $0xf8] sm:$0xff] %v10390_v21  ;;  %10445 = vst [vmem:[%s13143_s10 + $0x100] sm:$0xff] %v10407_v38  ;;  %v10273_v39 = vpop.permute.xlu1 %10272 }
 0x6f8   : > { %v10391_v41 = vsel %vm10379_vm9, %v17245_v18, %v10273_v39  ;;  %v10408_v48 = vsel %vm10396_vm10, %v10273_v39, %v10337_v28 }
 0x6f9   : > { %10447 = vst [vmem:[%s13143_s10 + $0x110] sm:$0xff] %v10391_v41  ;;  %10448 = vst [vmem:[%s13143_s10 + $0x118] sm:$0xff] %v10408_v48  ;;  %v10267_v26 = vpop.permute.xlu0 %10266 }
 0x6fa   : > { %v10388_v58 = vsel %vm10379_vm9, %v17184_v56, %v10267_v26  ;;  %v10405_v5 = vsel %vm10396_vm10, %v10267_v26, %v10331_v34 }
 0x6fb   : > { %10438 = vst [vmem:[%s13143_s10 + $0xc8] sm:$0xff] %v10388_v58  ;;  %10439 = vst [vmem:[%s13143_s10 + $0xd0] sm:$0xff] %v10405_v5  ;;  %v10269_v31 = vpop.permute.xlu1 %10268 }
 0x6fc   : > { %v10389_v18 = vsel %vm10379_vm9, %v17204_v53, %v10269_v31  ;;  %v10406_v10 = vsel %vm10396_vm10, %v10269_v31, %v17370_v57 }
 0x6fd   : > { %10441 = vst [vmem:[%s13143_s10 + $0xe0] sm:$0xff] %v10389_v18  ;;  %10442 = vst [vmem:[%s13143_s10 + $0xe8] sm:$0xff] %v10406_v10  ;;  %v10279_v56 = vpop.permute.xlu0 %10278 }
 0x6fe   : > { %v10394_v22 = vsel %vm10379_vm9, %v17301_v15, %v10279_v56 }
 0x6ff   : > { %10456 = vst [vmem:[%s13143_s10 + $0x158] sm:$0xff] %v10394_v22  ;;  %v10281_v36 = vpop.permute.xlu1 %10280 }
 0x700   : > { %v10395_v55 = vsel %vm10379_vm9, %v17312_v37, %v10281_v36 }
 0x701   : > { %10459 = vst [vmem:[%s13143_s10 + $0x170] sm:$0xff] %v10395_v55  ;;  %v10275_v53 = vpop.permute.xlu0 %10274 }
 0x702   : > { %v10392_v44 = vsel %vm10379_vm9, %v17258_v25, %v10275_v53  ;;  %v10409_v51 = vsel %vm10396_vm10, %v10275_v53, %v17372_v2 }
 0x703   : > { %10450 = vst [vmem:[%s13143_s10 + $0x128] sm:$0xff] %v10392_v44  ;;  %10451 = vst [vmem:[%s13143_s10 + $0x130] sm:$0xff] %v10409_v51  ;;  %v10277_v15 = vpop.permute.xlu1 %10276 }
 0x704   : > { %v10393_v37 = vsel %vm10379_vm9, %v17291_v59, %v10277_v15  ;;  %v10410_v49 = vsel %vm10396_vm10, %v10277_v15, %v17374_v19 }
 0x705   : > { %10453 = vst [vmem:[%s13143_s10 + $0x140] sm:$0xff] %v10393_v37  ;;  %10454 = vst [vmem:[%s13143_s10 + $0x148] sm:$0xff] %v10410_v49  ;;  %v10343_v25 = vpop.permute.xlu0 %10342 }
 0x706   : > { %v10411_v13 = vsel %vm10396_vm10, %v10279_v56, %v10343_v25 }
 0x707   : > { %10457 = vst [vmem:[%s13143_s10 + $0x160] sm:$0xff] %v10411_v13  ;;  %v10345_v59 = vpop.permute.xlu1 %10344 }
 0x708   : > { %v10412_v14 = vsel %vm10396_vm10, %v10281_v36, %v10345_v59 }
 0x709   : > { %10460 = vst [vmem:[%s13143_s10 + $0x178] sm:$0xff] %v10412_v14 }
 0x70a   : > { %12918 = shalt.err (!%p12915_p10)
}
 0x70b   : > { %s12919_s10 = scalar_lea.hbm %s17462_s17, 6144  ;;  %s12923_s30 = scalar_lea.hbm %s17531_s8, 24576 }
 0x70c   : > { %p12920_p11 = scmp.ne.s32.totalorder %s17462_s17, %s12919_s10  ;;  %p12924_p0 = scmp.lt.u32.totalorder %s17462_s17, %s17531_s8 }
 0x70d   : > { %p12925_p1 = scmp.lt.u32.totalorder %s12923_s30, %s12919_s10  ;;  %p12927_p4 = scmp.lt.u32.totalorder %s12919_s10, %s17462_s17 }
 0x70e   : > { %p12921_p12 = pnand %p12920_p11, %p13107_p3 }
 0x70f   : > { %p12926_p2 = por %p12925_p1, %p12924_p0 }
 0x710   : > { %p12922_p13 = pneg %p12921_p12 }
 0x711   : > { %p12928_p5 = por %p12927_p4, %p12926_p2 }
 0x713   : > { %p12929_p6 = pnand %p12928_p5, %p12922_p13 }
 0x715   : > { %12932 = shalt.err (!%p12929_p6)
}
 0x716   : > { %s13009_s14 = smov 384   ;;  %s13010_s25 = smov 24  }
 0x717   : > { %12338 = dma.vmem_to_hbm [thread:$0]  (%p13107_p3), %s17464_s13, 6144, %s17462_s17, %s17471_s15, %s13009_s14, %s13009_s14, %s13010_s25  }
 0x718 PF: > { %p12344_p7 = scmp.ge.s32.totalorder %s12999_s12, 2  ;;  %s10493_s11 = sand.u32 1, %s12971_s27  }
 0x719   : > { %s10494_s21 = scalar_lea.sflag [#allocation7], %s10493_s11 }
 0x71a   : > { %p12341_p9 = pnand %p12344_p7, %p13116_p8 }
 0x71c   : > { %12966 = dma.done.wait (!%p12341_p9), %s10494_s21, 6144  }
 0x71d   : > { %12968 = vsyncadd (!%p12341_p9), %s10494_s21, 4294961152  ;;  %s21_s12 = sadd.s32 1, %s12999_s12   ;;  %s17671_s30 = sld [smem:[#allocation9_spill]] }
 0x71e   : > { %p18_p10 = scmp.ge.s32.totalorder %s21_s12, 6   ;;  %s17672_s9 = sld [smem:[#allocation10_spill]] }
 0x71f   : > { %s17673_s10 = sld [smem:[#allocation11_spill]]  ;;  %s17674_s11 = sld [smem:[#allocation12_spill]] }
 0x720   : > { %s17675_s27 = smov %s12975_s28  ;;  %s17676_s28 = smov %s12979_s29 }
 0x721   : > { %s17677_s29 = smov %s13125_s23  ;;  %20 = sbr.rel (!%p18_p10) target bundleno = 5 (0x5), region = 114 }
 0x728   :  { %10499 = vsyncpa [#allocation7], 1 }
 0x729   :  { %10501 = vsyncpa [#allocation7 + $0x1], 1 }

</bundles_post_ra>
